<compile_context>
chip_gen: v7x
topology: tpu7x:2x2x1
jax: 0.10.0
libtpu: 0.0.40
codegen_flags: <defaults>
</compile_context>

<pallas_src>
import math
import functools

import jax
import jax.numpy as jnp
import numpy as np
from jax import lax
from jax.experimental import pallas as pl
from jax.experimental.pallas import tpu as pltpu


# Contract dim 0 of both operands: result == lhs.T @ rhs, with no materialized transpose.
_CONTRACT_DIM0 = (((0,), (0,)), ((), ()))


def _softmax_probs_bf16(logits, exp_dtype):
    """Row softmax over the lane dim.  f32 logits in, bf16 probabilities out.

    Max subtraction and the denominator stay f32; exp runs in `exp_dtype`
    (bf16 on v6e/v7x, f32 on v5e); reciprocal uses the EUP approx path.
    """
    m = jnp.max(logits, axis=-1, keepdims=True)
    e = jnp.exp((logits - m).astype(exp_dtype))
    s = jnp.sum(e.astype(jnp.float32), axis=-1, keepdims=True)
    inv = pl.reciprocal(s, approx=True)
    return (e * inv.astype(exp_dtype)).astype(jnp.bfloat16)


def _attn_pool_kernel(x_ref,
                      wq_ref, bq_ref, wk_ref, bk_ref, wv_ref, bv_ref,
                      wqg_ref, bqg_ref, wkg_ref, bkg_ref, wvg_ref, bvg_ref,
                      out_ref, *, num_chunks, chunk_size, batch_tile, exp_dtype):
    f32 = jnp.float32
    bf16 = jnp.bfloat16
    hw = x_ref.shape[-1]
    scale = 1.0 / math.sqrt(hw)

    # Small weights / biases: load once per grid step (hoisted out of the batch loop).
    wq = wq_ref[...]; wk = wk_ref[...]; wv = wv_ref[...]          # [C, C] bf16 block-diag
    wqg = wqg_ref[...]; wkg = wkg_ref[...]; wvg = wvg_ref[...]    # [C, C] bf16
    bq = bq_ref[...]; bk = bk_ref[...]; bv = bv_ref[...]          # [C, 1] f32
    bqg = bqg_ref[...]; bkg = bkg_ref[...]; bvg = bvg_ref[...]    # [C, 1] f32

    # scf.for over the batch tile: bounds the live range of the [HW, HW]
    # temporaries to a single batch (a static Python loop would not).
    @pl.loop(0, batch_tile)
    def _per_batch(b):
        xb = x_ref[b]                            # [C, HW] bf16

        # ---- channel-mixing projections (bf16 x bf16 -> f32 accumulation on the MXU) ----
        # 1/sqrt(HW) folded into q ([C, HW]) rather than the [HW, HW] scores;
        # results cast back to bf16 so the score matmuls also run at native bf16 rate.
        qg = ((jnp.dot(wqg, xb, preferred_element_type=f32) + bqg) * scale).astype(bf16)
        kg = (jnp.dot(wkg, xb, preferred_element_type=f32) + bkg).astype(bf16)
        vg = (jnp.dot(wvg, xb, preferred_element_type=f32) + bvg).astype(bf16)
        # Fused block-diagonal projection == num_chunks independent [cs, cs] 1x1 convs.
        qc = ((jnp.dot(wq, xb, preferred_element_type=f32) + bq) * scale).astype(bf16)
        kc = (jnp.dot(wk, xb, preferred_element_type=f32) + bk).astype(bf16)
        vc = (jnp.dot(wv, xb, preferred_element_type=f32) + bv).astype(bf16)

        # ---- global attention over all teacher channels ----
        sg = lax.dot_general(qg, kg, _CONTRACT_DIM0, preferred_element_type=f32)  # [HW, HW] f32
        ag = _softmax_probs_bf16(sg, exp_dtype)                                   # [HW, HW] bf16
        outg = jnp.dot(vg, ag, preferred_element_type=f32)                        # [C, HW] f32

        # ---- per-chunk attention + pooling ----
        rows = []
        for i in range(num_chunks):              # static; num_chunks is small
            sl = slice(i * chunk_size, (i + 1) * chunk_size)
            sc = lax.dot_general(qc[sl], kc[sl], _CONTRACT_DIM0,
                                 preferred_element_type=f32)                      # [HW, HW] f32
            ac = _softmax_probs_bf16(sc, exp_dtype)                               # [HW, HW] bf16
            out_c = jnp.dot(vc[sl], ac, preferred_element_type=f32)               # [cs, HW] f32
            combined = out_c + outg[sl]
            rows.append(jnp.sum(xb[sl].astype(f32) * combined, axis=0, keepdims=True))
        # One sublane+lane-dense store per batch instead of num_chunks row stores.
        out_ref[b] = jnp.concatenate(rows, axis=0)                                # [nc, HW] f32


def _block_diag(w):
    """[num_chunks, cs, cs] -> block-diagonal [num_chunks*cs, num_chunks*cs]."""
    nc, cs, _ = w.shape
    eye = jnp.eye(nc, dtype=w.dtype)
    return jnp.einsum("ij,iab->iajb", eye, w).reshape(nc * cs, nc * cs)


def learned_channel_self_attention_pooling_v4(x, params, *, batch_tile=None,
                                              compute_dtype=jnp.bfloat16):
    """x: [B, C, H, W] float32 (NCHW, as in PyTorch).  Returns [B, num_chunks, H, W]."""
    B, C, H, W = x.shape
    num_chunks, chunk_size, _ = params["wq"].shape
    assert C == num_chunks * chunk_size
    HW = H * W
    itemsize = jnp.dtype(compute_dtype).itemsize

    # ---- generation-aware VMEM budget (v5e/v6e: 128 MiB physical, v7x: 64 MiB) ----
    try:
        vmem_cap = int(pltpu.get_tpu_info().vmem_capacity_bytes)
    except Exception:
        vmem_cap = 64 * 2**20                    # conservative fallback, valid everywhere
    vmem_budget = int(0.85 * vmem_cap)           # leave 15% headroom

    def vmem_estimate(bt):
        x_blk = 2 * bt * C * HW * itemsize                  # double-buffered input block
        out_blk = 2 * bt * num_chunks * HW * 4              # double-buffered output block
        weights = 2 * (6 * C * C * itemsize + 6 * C * 4)    # weight / bias blocks
        temps = (6 * C * HW * itemsize                      # bf16 q/k/v (global + chunks)
                 + 2 * C * HW * 4                           # f32 projection temporaries / outg
                 + HW * HW * 4 + HW * HW * itemsize         # one score (f32) + probs (bf16)
                 + num_chunks * HW * 4)                     # pooled rows
        return x_blk + out_blk + weights + 2 * temps        # 2x margin on live temporaries

    if batch_tile is None:
        # At least min(B, 4) grid steps: enables double-buffered prefetch of the next
        # x tile and lets the "parallel" grid axis feed both v7x TensorCores.
        target_steps = min(B, 4)
        cands = [d for d in range(1, B + 1)
                 if B % d == 0 and B // d >= target_steps and vmem_estimate(d) <= vmem_budget]
        batch_tile = max(cands) if cands else 1
    assert B % batch_tile == 0

    vmem_limit = int(min(vmem_budget,
                         max(32 * 2**20, int(1.5 * vmem_estimate(batch_tile)))))

    # bf16 exp on v6e/v7x (EUP bf16 path); f32 exp on v5e and earlier.
    try:
        kind = jax.devices()[0].device_kind.lower()
    except Exception:
        kind = ""
    use_bf16_exp = bool(kind) and not any(v in kind for v in ("v2", "v3", "v4", "v5"))
    exp_dtype = jnp.bfloat16 if use_bf16_exp else jnp.float32

    # Matmul operands go to the MXU in bf16 (halves HBM traffic, native bf16 rate);
    # biases stay f32 and are reshaped to [C, 1] so they broadcast along lanes for free.
    x_flat = x.reshape(B, C, HW).astype(compute_dtype)
    wq_bd = _block_diag(params["wq"]).astype(compute_dtype)
    wk_bd = _block_diag(params["wk"]).astype(compute_dtype)
    wv_bd = _block_diag(params["wv"]).astype(compute_dtype)
    bq = params["bq"].reshape(C, 1).astype(jnp.float32)
    bk = params["bk"].reshape(C, 1).astype(jnp.float32)
    bv = params["bv"].reshape(C, 1).astype(jnp.float32)
    wqg = params["wqg"].astype(compute_dtype)
    wkg = params["wkg"].astype(compute_dtype)
    wvg = params["wvg"].astype(compute_dtype)
    bqg = params["bqg"].reshape(C, 1).astype(jnp.float32)
    bkg = params["bkg"].reshape(C, 1).astype(jnp.float32)
    bvg = params["bvg"].reshape(C, 1).astype(jnp.float32)

    kernel = functools.partial(_attn_pool_kernel, num_chunks=num_chunks,
                               chunk_size=chunk_size, batch_tile=batch_tile,
                               exp_dtype=exp_dtype)

    def const(shape):   # weights/biases: same block every grid step (no re-DMA)
        n = len(shape)
        return pl.BlockSpec(shape, lambda g, n=n: (0,) * n)

    out = pl.pallas_call(
        kernel,
        out_shape=jax.ShapeDtypeStruct((B, num_chunks, HW), jnp.float32),
        grid=(B // batch_tile,),
        in_specs=[
            pl.BlockSpec((batch_tile, C, HW), lambda g: (g, 0, 0)),   # x (batch tile per step)
            const((C, C)), const((C, 1)),                             # wq (block-diag), bq
            const((C, C)), const((C, 1)),                             # wk (block-diag), bk
            const((C, C)), const((C, 1)),                             # wv (block-diag), bv
            const((C, C)), const((C, 1)),                             # wqg, bqg
            const((C, C)), const((C, 1)),                             # wkg, bkg
            const((C, C)), const((C, 1)),                             # wvg, bvg
        ],
        out_specs=pl.BlockSpec((batch_tile, num_chunks, HW), lambda g: (g, 0, 0)),
        compiler_params=pltpu.CompilerParams(
            dimension_semantics=("parallel",),          # batch tiles are independent
            vmem_limit_bytes=vmem_limit),
    )(x_flat,
      wq_bd, bq, wk_bd, bk, wv_bd, bv,
      wqg, bqg, wkg, bkg, wvg, bvg)

    return out.reshape(B, num_chunks, H, W)


def reference_forward(x, params):
    """Pure-JAX mirror of the PyTorch forward (f32, HIGHEST matmul precision)."""
    B, C, H, W = x.shape
    num_chunks, cs, _ = params["wq"].shape
    HW = H * W
    xf = x.reshape(B, C, HW)
    scale = 1.0 / math.sqrt(HW)
    hi = jax.lax.Precision.HIGHEST

    def conv1x1(xc, w, b):
        return jnp.einsum("oc,bcp->bop", w, xc, precision=hi) + b[None, :, None]

    qg = conv1x1(xf, params["wqg"], params["bqg"])
    kg = conv1x1(xf, params["wkg"], params["bkg"])
    vg = conv1x1(xf, params["wvg"], params["bvg"])
    ag = jax.nn.softmax(jnp.einsum("bcp,bcq->bpq", qg, kg, precision=hi) * scale, axis=-1)
    outg = jnp.einsum("bcp,bpq->bcq", vg, ag, precision=hi)            # [B, C, HW]

    pooled = []
    for i in range(num_chunks):
        chunk = xf[:, i * cs:(i + 1) * cs, :]
        q = conv1x1(chunk, params["wq"][i], params["bq"][i])
        k = conv1x1(chunk, params["wk"][i], params["bk"][i])
        v = conv1x1(chunk, params["wv"][i], params["bv"][i])
        a = jax.nn.softmax(jnp.einsum("bcp,bcq->bpq", q, k, precision=hi) * scale, axis=-1)
        out = jnp.einsum("bcp,bpq->bcq", v, a, precision=hi)
        combined = out + outg[:, i * cs:(i + 1) * cs, :]
        pooled.append(jnp.sum(chunk * combined, axis=1))
    return jnp.stack(pooled, axis=1).reshape(B, num_chunks, H, W)


def init_params(key, teacher_dim, student_dim):
    if teacher_dim % student_dim != 0:
        raise ValueError("teacher_dim should be divisible by student_dim")
    cs = teacher_dim // student_dim
    nc = teacher_dim // cs                       # == student_dim
    keys = jax.random.split(key, 12)
    s_small = 1.0 / math.sqrt(cs)
    s_big = 1.0 / math.sqrt(teacher_dim)
    return dict(
        wq=jax.random.normal(keys[0], (nc, cs, cs), jnp.float32) * s_small,
        bq=jax.random.normal(keys[1], (nc, cs), jnp.float32) * s_small,
        wk=jax.random.normal(keys[2], (nc, cs, cs), jnp.float32) * s_small,
        bk=jax.random.normal(keys[3], (nc, cs), jnp.float32) * s_small,
        wv=jax.random.normal(keys[4], (nc, cs, cs), jnp.float32) * s_small,
        bv=jax.random.normal(keys[5], (nc, cs), jnp.float32) * s_small,
        wqg=jax.random.normal(keys[6], (teacher_dim, teacher_dim), jnp.float32) * s_big,
        bqg=jax.random.normal(keys[7], (teacher_dim,), jnp.float32) * s_big,
        wkg=jax.random.normal(keys[8], (teacher_dim, teacher_dim), jnp.float32) * s_big,
        bkg=jax.random.normal(keys[9], (teacher_dim,), jnp.float32) * s_big,
        wvg=jax.random.normal(keys[10], (teacher_dim, teacher_dim), jnp.float32) * s_big,
        bvg=jax.random.normal(keys[11], (teacher_dim,), jnp.float32) * s_big,
    )


if __name__ == "__main__":
    key = jax.random.PRNGKey(0)
    k_param, k_x = jax.random.split(key)

    B, teacher_dim, student_dim, H, W = 2, 8, 4, 16, 16   # chunk_size = 2, num_chunks = 4
    params = init_params(k_param, teacher_dim, student_dim)
    x = jax.random.normal(k_x, (B, teacher_dim, H, W), jnp.float32)

    pooled = jax.block_until_ready(learned_channel_self_attention_pooling_v4(x, params))

    # The kernel feeds bf16 operands to every MXU matmul (f32 accumulation, f32
    # softmax logits/denominator).  Verify against the pure-JAX reference evaluated
    # on the SAME bf16-quantized x / weights, so the check isolates the kernel
    # algorithm; the tolerance covers bf16 probabilities / V in the PV matmuls,
    # the (optional) bf16 exp, and the EUP approximate reciprocal.
    def bf16_q(a):
        return a.astype(jnp.bfloat16).astype(jnp.float32)

    params_q = {k: (bf16_q(v) if k.startswith("w") else v) for k, v in params.items()}
    ref = jax.block_until_ready(reference_forward(bf16_q(x), params_q))
    np.testing.assert_allclose(np.asarray(pooled), np.asarray(ref), rtol=2e-2, atol=2e-2)

    assert pooled.shape == (B, student_dim, H, W)
    print("KERNEL_OK")
</pallas_src>

<mosaic_0001>
module attributes {stable_mosaic.version = 11 : i64} {
  func.func @_attn_pool_kernel(%arg0: i32, %arg1: memref<1x8x256xbf16, #tpu.memory_space<vmem>>, %arg2: memref<8x8xbf16, #tpu.memory_space<vmem>>, %arg3: memref<8x1xf32, #tpu.memory_space<vmem>>, %arg4: memref<8x8xbf16, #tpu.memory_space<vmem>>, %arg5: memref<8x1xf32, #tpu.memory_space<vmem>>, %arg6: memref<8x8xbf16, #tpu.memory_space<vmem>>, %arg7: memref<8x1xf32, #tpu.memory_space<vmem>>, %arg8: memref<8x8xbf16, #tpu.memory_space<vmem>>, %arg9: memref<8x1xf32, #tpu.memory_space<vmem>>, %arg10: memref<8x8xbf16, #tpu.memory_space<vmem>>, %arg11: memref<8x1xf32, #tpu.memory_space<vmem>>, %arg12: memref<8x8xbf16, #tpu.memory_space<vmem>>, %arg13: memref<8x1xf32, #tpu.memory_space<vmem>>, %arg14: memref<1x4x256xf32, #tpu.memory_space<vmem>>) attributes {dimension_semantics = [#tpu.dimension_semantics<parallel>], iteration_bounds = array<i64: 2>, scalar_prefetch = 0 : i64, scratch_operands = 0 : i64, tpu.core_type = #tpu.core_type<tc>, window_params = [{transform_indices = @transform_0, window_bounds = array<i64: 1, 8, 256>}, {pipeline_mode = #tpu.pipeline_mode<synchronous>, transform_indices = @transform_1, window_bounds = array<i64: 8, 8>}, {pipeline_mode = #tpu.pipeline_mode<synchronous>, transform_indices = @transform_2, window_bounds = array<i64: 8, 1>}, {pipeline_mode = #tpu.pipeline_mode<synchronous>, transform_indices = @transform_3, window_bounds = array<i64: 8, 8>}, {pipeline_mode = #tpu.pipeline_mode<synchronous>, transform_indices = @transform_4, window_bounds = array<i64: 8, 1>}, {pipeline_mode = #tpu.pipeline_mode<synchronous>, transform_indices = @transform_5, window_bounds = array<i64: 8, 8>}, {pipeline_mode = #tpu.pipeline_mode<synchronous>, transform_indices = @transform_6, window_bounds = array<i64: 8, 1>}, {pipeline_mode = #tpu.pipeline_mode<synchronous>, transform_indices = @transform_7, window_bounds = array<i64: 8, 8>}, {pipeline_mode = #tpu.pipeline_mode<synchronous>, transform_indices = @transform_8, window_bounds = array<i64: 8, 1>}, {pipeline_mode = #tpu.pipeline_mode<synchronous>, transform_indices = @transform_9, window_bounds = array<i64: 8, 8>}, {pipeline_mode = #tpu.pipeline_mode<synchronous>, transform_indices = @transform_10, window_bounds = array<i64: 8, 1>}, {pipeline_mode = #tpu.pipeline_mode<synchronous>, transform_indices = @transform_11, window_bounds = array<i64: 8, 8>}, {pipeline_mode = #tpu.pipeline_mode<synchronous>, transform_indices = @transform_12, window_bounds = array<i64: 8, 1>}, {transform_indices = @transform_13, window_bounds = array<i64: 1, 4, 256>}]} {
    %c0 = arith.constant 0 : index
    %c0_0 = arith.constant 0 : index
    %0 = vector.load %arg2[%c0, %c0_0] : memref<8x8xbf16, #tpu.memory_space<vmem>>, vector<8x8xbf16>
    %c0_1 = arith.constant 0 : index
    %c0_2 = arith.constant 0 : index
    %1 = vector.load %arg4[%c0_1, %c0_2] : memref<8x8xbf16, #tpu.memory_space<vmem>>, vector<8x8xbf16>
    %c0_3 = arith.constant 0 : index
    %c0_4 = arith.constant 0 : index
    %2 = vector.load %arg6[%c0_3, %c0_4] : memref<8x8xbf16, #tpu.memory_space<vmem>>, vector<8x8xbf16>
    %c0_5 = arith.constant 0 : index
    %c0_6 = arith.constant 0 : index
    %3 = vector.load %arg8[%c0_5, %c0_6] : memref<8x8xbf16, #tpu.memory_space<vmem>>, vector<8x8xbf16>
    %c0_7 = arith.constant 0 : index
    %c0_8 = arith.constant 0 : index
    %4 = vector.load %arg10[%c0_7, %c0_8] : memref<8x8xbf16, #tpu.memory_space<vmem>>, vector<8x8xbf16>
    %c0_9 = arith.constant 0 : index
    %c0_10 = arith.constant 0 : index
    %5 = vector.load %arg12[%c0_9, %c0_10] : memref<8x8xbf16, #tpu.memory_space<vmem>>, vector<8x8xbf16>
    %c0_11 = arith.constant 0 : index
    %c0_12 = arith.constant 0 : index
    %6 = vector.load %arg3[%c0_11, %c0_12] : memref<8x1xf32, #tpu.memory_space<vmem>>, vector<8x1xf32>
    %c0_13 = arith.constant 0 : index
    %c0_14 = arith.constant 0 : index
    %7 = vector.load %arg5[%c0_13, %c0_14] : memref<8x1xf32, #tpu.memory_space<vmem>>, vector<8x1xf32>
    %c0_15 = arith.constant 0 : index
    %c0_16 = arith.constant 0 : index
    %8 = vector.load %arg7[%c0_15, %c0_16] : memref<8x1xf32, #tpu.memory_space<vmem>>, vector<8x1xf32>
    %c0_17 = arith.constant 0 : index
    %c0_18 = arith.constant 0 : index
    %9 = vector.load %arg9[%c0_17, %c0_18] : memref<8x1xf32, #tpu.memory_space<vmem>>, vector<8x1xf32>
    %c0_19 = arith.constant 0 : index
    %c0_20 = arith.constant 0 : index
    %10 = vector.load %arg11[%c0_19, %c0_20] : memref<8x1xf32, #tpu.memory_space<vmem>>, vector<8x1xf32>
    %c0_21 = arith.constant 0 : index
    %c0_22 = arith.constant 0 : index
    %11 = vector.load %arg13[%c0_21, %c0_22] : memref<8x1xf32, #tpu.memory_space<vmem>>, vector<8x1xf32>
    %c0_i32 = arith.constant 0 : i32
    %c1_i32 = arith.constant 1 : i32
    %12 = arith.muli %c0_i32, %c1_i32 : i32
    %c0_i32_23 = arith.constant 0 : i32
    %13 = arith.addi %c0_i32_23, %12 : i32
    %14 = arith.index_cast %13 : i32 to index
    %c0_24 = arith.constant 0 : index
    %c0_25 = arith.constant 0 : index
    %15 = vector.load %arg1[%14, %c0_24, %c0_25] : memref<1x8x256xbf16, #tpu.memory_space<vmem>>, vector<1x8x256xbf16>
    %16 = vector.shape_cast %15 : vector<1x8x256xbf16> to vector<8x256xbf16>
    %cst = arith.constant dense<0.000000e+00> : vector<8x256xf32>
    %17 = tpu.matmul %3, %16, %cst {dimension_numbers = #tpu.dot_dimension_numbers<[1], [0], [0], [1], [0, 0, 1, 1], [], []>} : vector<8x8xbf16>, vector<8x256xbf16>, vector<8x256xf32> -> vector<8x256xf32>
    %18 = vector.broadcast %9 : vector<8x1xf32> to vector<8x256xf32>
    %19 = arith.addf %17, %18 : vector<8x256xf32>
    %cst_26 = arith.constant 6.250000e-02 : f32
    %20 = vector.broadcast %cst_26 : f32 to vector<8x256xf32>
    %21 = arith.mulf %19, %20 : vector<8x256xf32>
    %22 = arith.truncf %21 : vector<8x256xf32> to vector<8x256xbf16>
    %cst_27 = arith.constant dense<0.000000e+00> : vector<8x256xf32>
    %23 = tpu.matmul %4, %16, %cst_27 {dimension_numbers = #tpu.dot_dimension_numbers<[1], [0], [0], [1], [0, 0, 1, 1], [], []>} : vector<8x8xbf16>, vector<8x256xbf16>, vector<8x256xf32> -> vector<8x256xf32>
    %24 = vector.broadcast %10 : vector<8x1xf32> to vector<8x256xf32>
    %25 = arith.addf %23, %24 : vector<8x256xf32>
    %26 = arith.truncf %25 : vector<8x256xf32> to vector<8x256xbf16>
    %cst_28 = arith.constant dense<0.000000e+00> : vector<8x256xf32>
    %27 = tpu.matmul %5, %16, %cst_28 {dimension_numbers = #tpu.dot_dimension_numbers<[1], [0], [0], [1], [0, 0, 1, 1], [], []>} : vector<8x8xbf16>, vector<8x256xbf16>, vector<8x256xf32> -> vector<8x256xf32>
    %28 = vector.broadcast %11 : vector<8x1xf32> to vector<8x256xf32>
    %29 = arith.addf %27, %28 : vector<8x256xf32>
    %30 = arith.truncf %29 : vector<8x256xf32> to vector<8x256xbf16>
    %cst_29 = arith.constant dense<0.000000e+00> : vector<8x256xf32>
    %31 = tpu.matmul %0, %16, %cst_29 {dimension_numbers = #tpu.dot_dimension_numbers<[1], [0], [0], [1], [0, 0, 1, 1], [], []>} : vector<8x8xbf16>, vector<8x256xbf16>, vector<8x256xf32> -> vector<8x256xf32>
    %32 = vector.broadcast %6 : vector<8x1xf32> to vector<8x256xf32>
    %33 = arith.addf %31, %32 : vector<8x256xf32>
    %cst_30 = arith.constant 6.250000e-02 : f32
    %34 = vector.broadcast %cst_30 : f32 to vector<8x256xf32>
    %35 = arith.mulf %33, %34 : vector<8x256xf32>
    %36 = arith.truncf %35 : vector<8x256xf32> to vector<8x256xbf16>
    %cst_31 = arith.constant dense<0.000000e+00> : vector<8x256xf32>
    %37 = tpu.matmul %1, %16, %cst_31 {dimension_numbers = #tpu.dot_dimension_numbers<[1], [0], [0], [1], [0, 0, 1, 1], [], []>} : vector<8x8xbf16>, vector<8x256xbf16>, vector<8x256xf32> -> vector<8x256xf32>
    %38 = vector.broadcast %7 : vector<8x1xf32> to vector<8x256xf32>
    %39 = arith.addf %37, %38 : vector<8x256xf32>
    %40 = arith.truncf %39 : vector<8x256xf32> to vector<8x256xbf16>
    %cst_32 = arith.constant dense<0.000000e+00> : vector<8x256xf32>
    %41 = tpu.matmul %2, %16, %cst_32 {dimension_numbers = #tpu.dot_dimension_numbers<[1], [0], [0], [1], [0, 0, 1, 1], [], []>} : vector<8x8xbf16>, vector<8x256xbf16>, vector<8x256xf32> -> vector<8x256xf32>
    %42 = vector.broadcast %8 : vector<8x1xf32> to vector<8x256xf32>
    %43 = arith.addf %41, %42 : vector<8x256xf32>
    %44 = arith.truncf %43 : vector<8x256xf32> to vector<8x256xbf16>
    %cst_33 = arith.constant dense<0.000000e+00> : vector<256x256xf32>
    %45 = tpu.matmul %22, %26, %cst_33 {dimension_numbers = #tpu.dot_dimension_numbers<[0], [0], [1], [1], [0, 1, 1, 1], [], []>} : vector<8x256xbf16>, vector<8x256xbf16>, vector<256x256xf32> -> vector<256x256xf32>
    %cst_34 = arith.constant dense<0xFF800000> : vector<256xf32>
    %46 = vector.multi_reduction <maximumf>, %45, %cst_34 [1] : vector<256x256xf32> to vector<256xf32>
    %47 = vector.shape_cast %46 : vector<256xf32> to vector<256x1xf32>
    %48 = vector.broadcast %47 : vector<256x1xf32> to vector<256x256xf32>
    %49 = arith.subf %45, %48 : vector<256x256xf32>
    %50 = arith.truncf %49 : vector<256x256xf32> to vector<256x256xbf16>
    %51 = math.exp %50 : vector<256x256xbf16>
    %52 = arith.extf %51 : vector<256x256xbf16> to vector<256x256xf32>
    %cst_35 = arith.constant dense<0.000000e+00> : vector<256xf32>
    %53 = vector.multi_reduction <add>, %52, %cst_35 [1] : vector<256x256xf32> to vector<256xf32>
    %54 = vector.shape_cast %53 : vector<256xf32> to vector<256x1xf32>
    %55 = tpu.reciprocal %54 {approx = true} : vector<256x1xf32> -> vector<256x1xf32>
    %56 = arith.truncf %55 : vector<256x1xf32> to vector<256x1xbf16>
    %57 = vector.broadcast %56 : vector<256x1xbf16> to vector<256x256xbf16>
    %58 = arith.mulf %51, %57 : vector<256x256xbf16>
    %cst_36 = arith.constant dense<0.000000e+00> : vector<8x256xf32>
    %59 = tpu.matmul %30, %58, %cst_36 {dimension_numbers = #tpu.dot_dimension_numbers<[1], [0], [0], [1], [0, 0, 1, 1], [], []>} : vector<8x256xbf16>, vector<256x256xbf16>, vector<8x256xf32> -> vector<8x256xf32>
    %60 = vector.extract_strided_slice %36 {offsets = [0, 0], sizes = [2, 256], strides = [1, 1]} : vector<8x256xbf16> to vector<2x256xbf16>
    %61 = vector.extract_strided_slice %40 {offsets = [0, 0], sizes = [2, 256], strides = [1, 1]} : vector<8x256xbf16> to vector<2x256xbf16>
    %cst_37 = arith.constant dense<0.000000e+00> : vector<256x256xf32>
    %62 = tpu.matmul %60, %61, %cst_37 {dimension_numbers = #tpu.dot_dimension_numbers<[0], [0], [1], [1], [0, 1, 1, 1], [], []>} : vector<2x256xbf16>, vector<2x256xbf16>, vector<256x256xf32> -> vector<256x256xf32>
    %cst_38 = arith.constant dense<0xFF800000> : vector<256xf32>
    %63 = vector.multi_reduction <maximumf>, %62, %cst_38 [1] : vector<256x256xf32> to vector<256xf32>
    %64 = vector.shape_cast %63 : vector<256xf32> to vector<256x1xf32>
    %65 = vector.broadcast %64 : vector<256x1xf32> to vector<256x256xf32>
    %66 = arith.subf %62, %65 : vector<256x256xf32>
    %67 = arith.truncf %66 : vector<256x256xf32> to vector<256x256xbf16>
    %68 = math.exp %67 : vector<256x256xbf16>
    %69 = arith.extf %68 : vector<256x256xbf16> to vector<256x256xf32>
    %cst_39 = arith.constant dense<0.000000e+00> : vector<256xf32>
    %70 = vector.multi_reduction <add>, %69, %cst_39 [1] : vector<256x256xf32> to vector<256xf32>
    %71 = vector.shape_cast %70 : vector<256xf32> to vector<256x1xf32>
    %72 = tpu.reciprocal %71 {approx = true} : vector<256x1xf32> -> vector<256x1xf32>
    %73 = arith.truncf %72 : vector<256x1xf32> to vector<256x1xbf16>
    %74 = vector.broadcast %73 : vector<256x1xbf16> to vector<256x256xbf16>
    %75 = arith.mulf %68, %74 : vector<256x256xbf16>
    %76 = vector.extract_strided_slice %44 {offsets = [0, 0], sizes = [2, 256], strides = [1, 1]} : vector<8x256xbf16> to vector<2x256xbf16>
    %cst_40 = arith.constant dense<0.000000e+00> : vector<2x256xf32>
    %77 = tpu.matmul %76, %75, %cst_40 {dimension_numbers = #tpu.dot_dimension_numbers<[1], [0], [0], [1], [0, 0, 1, 1], [], []>} : vector<2x256xbf16>, vector<256x256xbf16>, vector<2x256xf32> -> vector<2x256xf32>
    %78 = vector.extract_strided_slice %59 {offsets = [0, 0], sizes = [2, 256], strides = [1, 1]} : vector<8x256xf32> to vector<2x256xf32>
    %79 = arith.addf %77, %78 : vector<2x256xf32>
    %80 = vector.extract_strided_slice %16 {offsets = [0, 0], sizes = [2, 256], strides = [1, 1]} : vector<8x256xbf16> to vector<2x256xbf16>
    %81 = arith.extf %80 : vector<2x256xbf16> to vector<2x256xf32>
    %82 = arith.mulf %81, %79 : vector<2x256xf32>
    %cst_41 = arith.constant dense<0.000000e+00> : vector<256xf32>
    %83 = vector.multi_reduction <add>, %82, %cst_41 [0] : vector<2x256xf32> to vector<256xf32>
    %84 = vector.shape_cast %83 : vector<256xf32> to vector<1x256xf32>
    %85 = vector.extract_strided_slice %36 {offsets = [2, 0], sizes = [2, 256], strides = [1, 1]} : vector<8x256xbf16> to vector<2x256xbf16>
    %86 = vector.extract_strided_slice %40 {offsets = [2, 0], sizes = [2, 256], strides = [1, 1]} : vector<8x256xbf16> to vector<2x256xbf16>
    %cst_42 = arith.constant dense<0.000000e+00> : vector<256x256xf32>
    %87 = tpu.matmul %85, %86, %cst_42 {dimension_numbers = #tpu.dot_dimension_numbers<[0], [0], [1], [1], [0, 1, 1, 1], [], []>} : vector<2x256xbf16>, vector<2x256xbf16>, vector<256x256xf32> -> vector<256x256xf32>
    %cst_43 = arith.constant dense<0xFF800000> : vector<256xf32>
    %88 = vector.multi_reduction <maximumf>, %87, %cst_43 [1] : vector<256x256xf32> to vector<256xf32>
    %89 = vector.shape_cast %88 : vector<256xf32> to vector<256x1xf32>
    %90 = vector.broadcast %89 : vector<256x1xf32> to vector<256x256xf32>
    %91 = arith.subf %87, %90 : vector<256x256xf32>
    %92 = arith.truncf %91 : vector<256x256xf32> to vector<256x256xbf16>
    %93 = math.exp %92 : vector<256x256xbf16>
    %94 = arith.extf %93 : vector<256x256xbf16> to vector<256x256xf32>
    %cst_44 = arith.constant dense<0.000000e+00> : vector<256xf32>
    %95 = vector.multi_reduction <add>, %94, %cst_44 [1] : vector<256x256xf32> to vector<256xf32>
    %96 = vector.shape_cast %95 : vector<256xf32> to vector<256x1xf32>
    %97 = tpu.reciprocal %96 {approx = true} : vector<256x1xf32> -> vector<256x1xf32>
    %98 = arith.truncf %97 : vector<256x1xf32> to vector<256x1xbf16>
    %99 = vector.broadcast %98 : vector<256x1xbf16> to vector<256x256xbf16>
    %100 = arith.mulf %93, %99 : vector<256x256xbf16>
    %101 = vector.extract_strided_slice %44 {offsets = [2, 0], sizes = [2, 256], strides = [1, 1]} : vector<8x256xbf16> to vector<2x256xbf16>
    %cst_45 = arith.constant dense<0.000000e+00> : vector<2x256xf32>
    %102 = tpu.matmul %101, %100, %cst_45 {dimension_numbers = #tpu.dot_dimension_numbers<[1], [0], [0], [1], [0, 0, 1, 1], [], []>} : vector<2x256xbf16>, vector<256x256xbf16>, vector<2x256xf32> -> vector<2x256xf32>
    %103 = vector.extract_strided_slice %59 {offsets = [2, 0], sizes = [2, 256], strides = [1, 1]} : vector<8x256xf32> to vector<2x256xf32>
    %104 = arith.addf %102, %103 : vector<2x256xf32>
    %105 = vector.extract_strided_slice %16 {offsets = [2, 0], sizes = [2, 256], strides = [1, 1]} : vector<8x256xbf16> to vector<2x256xbf16>
    %106 = arith.extf %105 : vector<2x256xbf16> to vector<2x256xf32>
    %107 = arith.mulf %106, %104 : vector<2x256xf32>
    %cst_46 = arith.constant dense<0.000000e+00> : vector<256xf32>
    %108 = vector.multi_reduction <add>, %107, %cst_46 [0] : vector<2x256xf32> to vector<256xf32>
    %109 = vector.shape_cast %108 : vector<256xf32> to vector<1x256xf32>
    %110 = vector.extract_strided_slice %36 {offsets = [4, 0], sizes = [2, 256], strides = [1, 1]} : vector<8x256xbf16> to vector<2x256xbf16>
    %111 = vector.extract_strided_slice %40 {offsets = [4, 0], sizes = [2, 256], strides = [1, 1]} : vector<8x256xbf16> to vector<2x256xbf16>
    %cst_47 = arith.constant dense<0.000000e+00> : vector<256x256xf32>
    %112 = tpu.matmul %110, %111, %cst_47 {dimension_numbers = #tpu.dot_dimension_numbers<[0], [0], [1], [1], [0, 1, 1, 1], [], []>} : vector<2x256xbf16>, vector<2x256xbf16>, vector<256x256xf32> -> vector<256x256xf32>
    %cst_48 = arith.constant dense<0xFF800000> : vector<256xf32>
    %113 = vector.multi_reduction <maximumf>, %112, %cst_48 [1] : vector<256x256xf32> to vector<256xf32>
    %114 = vector.shape_cast %113 : vector<256xf32> to vector<256x1xf32>
    %115 = vector.broadcast %114 : vector<256x1xf32> to vector<256x256xf32>
    %116 = arith.subf %112, %115 : vector<256x256xf32>
    %117 = arith.truncf %116 : vector<256x256xf32> to vector<256x256xbf16>
    %118 = math.exp %117 : vector<256x256xbf16>
    %119 = arith.extf %118 : vector<256x256xbf16> to vector<256x256xf32>
    %cst_49 = arith.constant dense<0.000000e+00> : vector<256xf32>
    %120 = vector.multi_reduction <add>, %119, %cst_49 [1] : vector<256x256xf32> to vector<256xf32>
    %121 = vector.shape_cast %120 : vector<256xf32> to vector<256x1xf32>
    %122 = tpu.reciprocal %121 {approx = true} : vector<256x1xf32> -> vector<256x1xf32>
    %123 = arith.truncf %122 : vector<256x1xf32> to vector<256x1xbf16>
    %124 = vector.broadcast %123 : vector<256x1xbf16> to vector<256x256xbf16>
    %125 = arith.mulf %118, %124 : vector<256x256xbf16>
    %126 = vector.extract_strided_slice %44 {offsets = [4, 0], sizes = [2, 256], strides = [1, 1]} : vector<8x256xbf16> to vector<2x256xbf16>
    %cst_50 = arith.constant dense<0.000000e+00> : vector<2x256xf32>
    %127 = tpu.matmul %126, %125, %cst_50 {dimension_numbers = #tpu.dot_dimension_numbers<[1], [0], [0], [1], [0, 0, 1, 1], [], []>} : vector<2x256xbf16>, vector<256x256xbf16>, vector<2x256xf32> -> vector<2x256xf32>
    %128 = vector.extract_strided_slice %59 {offsets = [4, 0], sizes = [2, 256], strides = [1, 1]} : vector<8x256xf32> to vector<2x256xf32>
    %129 = arith.addf %127, %128 : vector<2x256xf32>
    %130 = vector.extract_strided_slice %16 {offsets = [4, 0], sizes = [2, 256], strides = [1, 1]} : vector<8x256xbf16> to vector<2x256xbf16>
    %131 = arith.extf %130 : vector<2x256xbf16> to vector<2x256xf32>
    %132 = arith.mulf %131, %129 : vector<2x256xf32>
    %cst_51 = arith.constant dense<0.000000e+00> : vector<256xf32>
    %133 = vector.multi_reduction <add>, %132, %cst_51 [0] : vector<2x256xf32> to vector<256xf32>
    %134 = vector.shape_cast %133 : vector<256xf32> to vector<1x256xf32>
    %135 = vector.extract_strided_slice %36 {offsets = [6, 0], sizes = [2, 256], strides = [1, 1]} : vector<8x256xbf16> to vector<2x256xbf16>
    %136 = vector.extract_strided_slice %40 {offsets = [6, 0], sizes = [2, 256], strides = [1, 1]} : vector<8x256xbf16> to vector<2x256xbf16>
    %cst_52 = arith.constant dense<0.000000e+00> : vector<256x256xf32>
    %137 = tpu.matmul %135, %136, %cst_52 {dimension_numbers = #tpu.dot_dimension_numbers<[0], [0], [1], [1], [0, 1, 1, 1], [], []>} : vector<2x256xbf16>, vector<2x256xbf16>, vector<256x256xf32> -> vector<256x256xf32>
    %cst_53 = arith.constant dense<0xFF800000> : vector<256xf32>
    %138 = vector.multi_reduction <maximumf>, %137, %cst_53 [1] : vector<256x256xf32> to vector<256xf32>
    %139 = vector.shape_cast %138 : vector<256xf32> to vector<256x1xf32>
    %140 = vector.broadcast %139 : vector<256x1xf32> to vector<256x256xf32>
    %141 = arith.subf %137, %140 : vector<256x256xf32>
    %142 = arith.truncf %141 : vector<256x256xf32> to vector<256x256xbf16>
    %143 = math.exp %142 : vector<256x256xbf16>
    %144 = arith.extf %143 : vector<256x256xbf16> to vector<256x256xf32>
    %cst_54 = arith.constant dense<0.000000e+00> : vector<256xf32>
    %145 = vector.multi_reduction <add>, %144, %cst_54 [1] : vector<256x256xf32> to vector<256xf32>
    %146 = vector.shape_cast %145 : vector<256xf32> to vector<256x1xf32>
    %147 = tpu.reciprocal %146 {approx = true} : vector<256x1xf32> -> vector<256x1xf32>
    %148 = arith.truncf %147 : vector<256x1xf32> to vector<256x1xbf16>
    %149 = vector.broadcast %148 : vector<256x1xbf16> to vector<256x256xbf16>
    %150 = arith.mulf %143, %149 : vector<256x256xbf16>
    %151 = vector.extract_strided_slice %44 {offsets = [6, 0], sizes = [2, 256], strides = [1, 1]} : vector<8x256xbf16> to vector<2x256xbf16>
    %cst_55 = arith.constant dense<0.000000e+00> : vector<2x256xf32>
    %152 = tpu.matmul %151, %150, %cst_55 {dimension_numbers = #tpu.dot_dimension_numbers<[1], [0], [0], [1], [0, 0, 1, 1], [], []>} : vector<2x256xbf16>, vector<256x256xbf16>, vector<2x256xf32> -> vector<2x256xf32>
    %153 = vector.extract_strided_slice %59 {offsets = [6, 0], sizes = [2, 256], strides = [1, 1]} : vector<8x256xf32> to vector<2x256xf32>
    %154 = arith.addf %152, %153 : vector<2x256xf32>
    %155 = vector.extract_strided_slice %16 {offsets = [6, 0], sizes = [2, 256], strides = [1, 1]} : vector<8x256xbf16> to vector<2x256xbf16>
    %156 = arith.extf %155 : vector<2x256xbf16> to vector<2x256xf32>
    %157 = arith.mulf %156, %154 : vector<2x256xf32>
    %cst_56 = arith.constant dense<0.000000e+00> : vector<256xf32>
    %158 = vector.multi_reduction <add>, %157, %cst_56 [0] : vector<2x256xf32> to vector<256xf32>
    %159 = vector.shape_cast %158 : vector<256xf32> to vector<1x256xf32>
    %160 = tpu.concatenate %84, %109, %134, %159 in 0 : vector<1x256xf32>, vector<1x256xf32>, vector<1x256xf32>, vector<1x256xf32> -> vector<4x256xf32>
    %161 = arith.index_cast %13 : i32 to index
    %c0_57 = arith.constant 0 : index
    %c0_58 = arith.constant 0 : index
    %162 = vector.load %arg14[%161, %c0_57, %c0_58] : memref<1x4x256xf32, #tpu.memory_space<vmem>>, vector<1x4x256xf32>
    %163 = vector.shape_cast %162 : vector<1x4x256xf32> to vector<4x256xf32>
    %164 = vector.shape_cast %160 : vector<4x256xf32> to vector<1x4x256xf32>
    tpu.vector_store %arg14[%161, %c0_57, %c0_58], %164 {strides = array<i32>} : memref<1x4x256xf32, #tpu.memory_space<vmem>>, vector<1x4x256xf32>,
    %c1_i32_59 = arith.constant 1 : i32
    return
  }
  func.func @transform_0(%arg0: i32) -> (i32, i32, i32) {
    %c0_i32 = arith.constant 0 : i32
    %c0_i32_0 = arith.constant 0 : i32
    %c0_i32_1 = arith.constant 0 : i32
    return %arg0, %c0_i32, %c0_i32_0 : i32, i32, i32
  }
  func.func @transform_1(%arg0: i32) -> (i32, i32) {
    %c0_i32 = arith.constant 0 : i32
    %c0_i32_0 = arith.constant 0 : i32
    %c0_i32_1 = arith.constant 0 : i32
    return %c0_i32, %c0_i32_0 : i32, i32
  }
  func.func @transform_2(%arg0: i32) -> (i32, i32) {
    %c0_i32 = arith.constant 0 : i32
    %c0_i32_0 = arith.constant 0 : i32
    %c0_i32_1 = arith.constant 0 : i32
    return %c0_i32, %c0_i32_0 : i32, i32
  }
  func.func @transform_3(%arg0: i32) -> (i32, i32) {
    %c0_i32 = arith.constant 0 : i32
    %c0_i32_0 = arith.constant 0 : i32
    %c0_i32_1 = arith.constant 0 : i32
    return %c0_i32, %c0_i32_0 : i32, i32
  }
  func.func @transform_4(%arg0: i32) -> (i32, i32) {
    %c0_i32 = arith.constant 0 : i32
    %c0_i32_0 = arith.constant 0 : i32
    %c0_i32_1 = arith.constant 0 : i32
    return %c0_i32, %c0_i32_0 : i32, i32
  }
  func.func @transform_5(%arg0: i32) -> (i32, i32) {
    %c0_i32 = arith.constant 0 : i32
    %c0_i32_0 = arith.constant 0 : i32
    %c0_i32_1 = arith.constant 0 : i32
    return %c0_i32, %c0_i32_0 : i32, i32
  }
  func.func @transform_6(%arg0: i32) -> (i32, i32) {
    %c0_i32 = arith.constant 0 : i32
    %c0_i32_0 = arith.constant 0 : i32
    %c0_i32_1 = arith.constant 0 : i32
    return %c0_i32, %c0_i32_0 : i32, i32
  }
  func.func @transform_7(%arg0: i32) -> (i32, i32) {
    %c0_i32 = arith.constant 0 : i32
    %c0_i32_0 = arith.constant 0 : i32
    %c0_i32_1 = arith.constant 0 : i32
    return %c0_i32, %c0_i32_0 : i32, i32
  }
  func.func @transform_8(%arg0: i32) -> (i32, i32) {
    %c0_i32 = arith.constant 0 : i32
    %c0_i32_0 = arith.constant 0 : i32
    %c0_i32_1 = arith.constant 0 : i32
    return %c0_i32, %c0_i32_0 : i32, i32
  }
  func.func @transform_9(%arg0: i32) -> (i32, i32) {
    %c0_i32 = arith.constant 0 : i32
    %c0_i32_0 = arith.constant 0 : i32
    %c0_i32_1 = arith.constant 0 : i32
    return %c0_i32, %c0_i32_0 : i32, i32
  }
  func.func @transform_10(%arg0: i32) -> (i32, i32) {
    %c0_i32 = arith.constant 0 : i32
    %c0_i32_0 = arith.constant 0 : i32
    %c0_i32_1 = arith.constant 0 : i32
    return %c0_i32, %c0_i32_0 : i32, i32
  }
  func.func @transform_11(%arg0: i32) -> (i32, i32) {
    %c0_i32 = arith.constant 0 : i32
    %c0_i32_0 = arith.constant 0 : i32
    %c0_i32_1 = arith.constant 0 : i32
    return %c0_i32, %c0_i32_0 : i32, i32
  }
  func.func @transform_12(%arg0: i32) -> (i32, i32) {
    %c0_i32 = arith.constant 0 : i32
    %c0_i32_0 = arith.constant 0 : i32
    %c0_i32_1 = arith.constant 0 : i32
    return %c0_i32, %c0_i32_0 : i32, i32
  }
  func.func @transform_13(%arg0: i32) -> (i32, i32, i32) {
    %c0_i32 = arith.constant 0 : i32
    %c0_i32_0 = arith.constant 0 : i32
    %c0_i32_1 = arith.constant 0 : i32
    return %arg0, %c0_i32, %c0_i32_0 : i32, i32, i32
  }
}

</mosaic_0001>

<bundles_post_ra>
// kernel: tpu_custom_call.1
= control target key start
LH: loop header
LB: loop body
LE: loop exit
PB: predicated region body
PF: predicated region fallthrough
CT: control target
= control target key end

     0   :  { %s8782_s0 = inlined_call_operand.vmem [shape: bf16[2,8,256], index: 0, kind: input, shape index: {}]   ;;  %s8783_s1 = inlined_call_operand.vmem [shape: bf16[8,8], index: 1, kind: input, shape index: {}]   ;;  %s8784_s2 = inlined_call_operand.vmem [shape: f32[8,1], index: 2, kind: input, shape index: {}]   ;;  %s8785_s3 = inlined_call_operand.vmem [shape: bf16[8,8], index: 3, kind: input, shape index: {}]   ;;  %s8786_s4 = inlined_call_operand.vmem [shape: f32[8,1], index: 4, kind: input, shape index: {}]   ;;  %s8787_s5 = inlined_call_operand.vmem [shape: bf16[8,8], index: 5, kind: input, shape index: {}]   ;;  %s8788_s6 = inlined_call_operand.vmem [shape: f32[8,1], index: 6, kind: input, shape index: {}]   ;;  %s8789_s7 = inlined_call_operand.vmem [shape: bf16[8,8], index: 7, kind: input, shape index: {}]   ;;  %s8790_s8 = inlined_call_operand.vmem [shape: f32[8,1], index: 8, kind: input, shape index: {}]   ;;  %s8791_s9 = inlined_call_operand.vmem [shape: bf16[8,8], index: 9, kind: input, shape index: {}]   ;;  %s8792_s10 = inlined_call_operand.vmem [shape: f32[8,1], index: 10, kind: input, shape index: {}]   ;;  %s8793_s11 = inlined_call_operand.vmem [shape: bf16[8,8], index: 11, kind: input, shape index: {}]   ;;  %s8794_s12 = inlined_call_operand.vmem [shape: f32[8,1], index: 12, kind: input, shape index: {}]   ;;  %s8795_s13 = inlined_call_operand.hbm [shape: f32[2,4,256], index: 13, kind: output, shape index: {}]  }
   0x1   :  { %8893 = sst [smem:[#allocation32_spill]] %s8782_s0 }
   0x2   :  { %8894 = sst [smem:[#allocation33_spill]] %s8783_s1 }
   0x3   :  { %18 = vsyncpa [#allocation3], 0 }
   0x4   :  { %20 = vsyncpa [#allocation3 + $0x1], 0  ;;  %s6193_s25 = smov 0   ;;  %s6195_s26 = smov 0  }
   0x5   :  { %s6197_s27 = smov 0   ;;  %s6199_s28 = smov 0  }
   0x6 LB: > { %s6214_s29 = sadd.s32 4294967295, %s6119_s28   ;;  %s5257_s30 = sadd.s32 4294967294, %s6119_s28   ;;  %s6119_s28 = sphi %s6199_s28, %s9125_s28   ;;  %s6115_s27 = sphi %s6197_s27, %s9124_s27   ;;  %s6111_s26 = sphi %s6195_s26, %s9123_s26   ;;  %s6107_s25 = sphi %s6193_s25, %s9122_s25  }
   0x7   : > { %s6218_s14 = sadd.s32 1, %s6119_s28   ;;  %s311_s15 = sadd.s32 1, %s6115_s27 }
   0x8   : > { %s308_s16 = ssub.s32 %s6119_s28, %s6218_s14  ;;  %p321_p0 = scmp.ne.s32.totalorder %s6115_s27, %s6111_s26 }
   0x9   : > { %p309_p1 = scmp.eq.s32.totalorder %s308_s16, 0  ;;  %p322_p2 = scmp.eq.s32.totalorder %s6214_s29, 1 }
   0xa   : > { %p327_p3 = scmp.ne.s32.totalorder %s6111_s26, %s6107_s25  ;;  %p328_p4 = scmp.eq.s32.totalorder %s5257_s30, 1 }
   0xb   : > { %s6229_s17 = scalar_select %p309_p1, %s6115_s27, %s311_s15  }
   0xc   : > { %p6231_p5 = por %p322_p2, %p321_p0  ;;  %p6235_p6 = por %p328_p4, %p327_p3 }
   0xd   : > { %8895 = sst [smem:[#allocation5_spill]] %s6229_s17  ;;  %p5260_p7 = scmp.ge.s32.totalorder %s6119_s28, 1 }
   0xe   : > { %p390_p8 = scmp.lt.s32.totalorder %s6119_s28, 3 }
  0x10   : > { %p391_p9 = pnand %p5260_p7, %p390_p8 }
  0x12   : > { %394 = sbr.rel (%p391_p9) target bundleno = 4047 (0xfcf), region = 72 }
  0x19   : > { %p434_p10 = scmp.lt.s32.totalorder %s6214_s29, 1  ;;  %v8796_v0 = vmov 0   ;;  %v449_v1 = vld [vmem:[%s8790_s8] sm:$0xff]  ;;  %s8898_s0 = sld [smem:[#allocation32_spill]]  ;;  %vm467_vm0 = vcmask 1043456   ;;  %vm463_vm1 = vcmask 64512  }
  0x1a   : > { %506 = vmatprep.mubr.bf16.mxu0 %v8796_v0  ;;  %559 = vmatprep.mubr.bf16.mxu1 %v8796_v0  ;;  %v450_v2 = vld [vmem:[%s8792_s10] sm:$0xff]  ;;  %s8899_s1 = sld [smem:[#allocation33_spill]]  ;;  %vm1705_vm2 = vcmask 1040384   ;;  %vm1656_vm3 = vcmask 15360   ;;  %vm2478_vm4 = vcmask 1041408   ;;  %vm5175_vm5 = vcmask 1042432  }
  0x1b   : > { %s435_s22 = scalar_select %p434_p10, %s6214_s29, 1  ;;  %5412 = vset.pattern.permute.xlu0 %v8796_v0  ;;  %v443_v7 = vld [vmem:[%s8789_s7] sm:$0xf] }
  0x1c   : > { %455 = vperm.xlu0 %5412, %v449_v1   ;;  %v444_v8 = vld [vmem:[%s8791_s9] sm:$0xf]  ;;  %s5369_s30 = sshll.u32 %s6214_s29, 7 }
  0x1d   : > { %s5368_s23 = sshll.u32 %s435_s22, 3  ;;  %v445_v9 = vld [vmem:[%s8793_s11] sm:$0xf]  ;;  %s8740_s22 = scalar_lea.hbm %s8795_s13, %s5369_s30 }
  0x1e   : > { %v441_v11 = vld [vmem:[%s8785_s3] sm:$0xf] }
  0x1f   : > { %s6255_s17 = scalar_lea.vmem %s8898_s0, %s5368_s23  ;;  %v442_v12 = vld [vmem:[%s8787_s5] sm:$0xf] }
  0x20   : > { %v452_v3 = vld [vmem:[%s6255_s17] sm:$0xff]  ;;  %521 = vperm.xlu0 %5412, %v450_v2  }
  0x21   : > { %v5265_v4 = vcombine.high %v452_v3, %v452_v3  ;;  %v5264_v5 = vcombine.low %v452_v3, %v452_v3  ;;  %v440_v10 = vld [vmem:[%s8899_s1] sm:$0xf] }
  0x23   : > { %5266 = vmatprep.subr.msk.bf16.mxu0 %vm467_vm0, %v5265_v4  ;;  %5268 = vmatprep.subr.msk.bf16.mxu1 %vm467_vm0, %v5265_v4  ;;  %v469_v6 = vsel %vm467_vm0, %v5264_v5, 0 }
  0x24   : > { %475 = vmatpush1.bf16.msra.mxu0 %v469_v6  ;;  %528 = vmatpush1.bf16.msra.mxu1 %v469_v6 }
  0x25   : > { %5270 = vmatprep.subr.msk.bf16.mxu0 %vm467_vm0, %v5265_v4  ;;  %5272 = vmatprep.subr.msk.bf16.mxu1 %vm467_vm0, %v5265_v4 }
  0x27   : > { %5267 = vmatmul.mubr.msk.bf16.vlgmr.msra.gmra.mrb[0].mxu0 %vm463_vm1, %v443_v7  ;;  %5269 = vmatmul.mubr.msk.bf16.vlgmr.msra.gmra.mrb[0].mxu1 %vm463_vm1, %v444_v8 }
  0x28   : > { %579 = vmatpush1.bf16.msra.mxu0 %v469_v6  ;;  %630 = vmatpush1.bf16.msra.mxu1 %v469_v6 }
  0x29   : > { %610 = vmatprep.mubr.bf16.mxu0 %v8796_v0  ;;  %661 = vmatprep.mubr.bf16.mxu1 %v8796_v0 }
  0x2a   : > { %5274 = vmatprep.subr.msk.bf16.mxu0 %vm467_vm0, %v5265_v4  ;;  %5276 = vmatprep.subr.msk.bf16.mxu1 %vm467_vm0, %v5265_v4 }
  0x2f   : > { %5271 = vmatmul.mubr.msk.bf16.vlgmr.msra.gmra.mrb[4].mxu0 %vm463_vm1, %v445_v9  ;;  %5273 = vmatmul.mubr.msk.bf16.vlgmr.msra.gmra.mrb[4].mxu1 %vm463_vm1, %v440_v10 }
  0x30   : > { %683 = vmatpush1.bf16.msra.mxu0 %v469_v6  ;;  %734 = vmatpush1.bf16.msra.mxu1 %v469_v6 }
  0x31   : > { %714 = vmatprep.mubr.bf16.mxu0 %v8796_v0  ;;  %765 = vmatprep.mubr.bf16.mxu1 %v8796_v0 }
  0x37   : > { %5275 = vmatmul.mubr.msk.bf16.vlgmr.msra.gmra.mrb[8].mxu0 %vm463_vm1, %v441_v11  ;;  %5277 = vmatmul.mubr.msk.bf16.vlgmr.msra.gmra.mrb[8].mxu1 %vm463_vm1, %v442_v12 }
  0x38   : > { %894 = vmatprep.mubr.bf16.mxu0 %v8796_v0  ;;  %974 = vmatprep.mubr.bf16.mxu1 %v8796_v0 }
  0x9b   : > { %v456_v13 = vpop.permute.xlu0 %455 }
  0x9f   : > { %v522_v14 = vpop.permute.xlu0 %521 }
  0xfa   : > { %v508_v15 = vpop.f32.mrb[0].mxu0  ;;  %v561_v16 = vpop.f32.mrb[0].mxu1 }
  0xfb   : > { %v509_v17 = vadd.f32 %v508_v15, %v456_v13  ;;  %v562_v18 = vadd.f32 %v561_v16, %v522_v14  ;;  %v510_v19 = vpop.f32.mrb[1].mxu0  ;;  %v563_v20 = vpop.f32.mrb[1].mxu1 }
  0xfc   : > { %v564_v21 = vadd.f32 %v563_v20, %v522_v14  ;;  %v512_v22 = vpop.f32.mrb[2].mxu0  ;;  %v565_v23 = vpop.f32.mrb[2].mxu1  ;;  %v511_v31 = vadd.f32 %v510_v19, %v456_v13 }
  0xfd   : > { %v568_v24 = vpack.c.bf16 %v562_v18, %v562_v18  ;;  %v513_v25 = vpop.f32.mrb[3].mxu0  ;;  %v515_v26 = vmul.f32 0.0625, %v509_v17  ;;  %v566_v27 = vpop.f32.mrb[3].mxu1 }
  0xfe   : > { %v569_v28 = vpack.c.bf16 %v564_v21, %v564_v21  ;;  %v516_v32 = vmul.f32 0.0625, %v511_v31 }
  0xff   : > { %v857_v29 = vsel %vm467_vm0, %v568_v24, 0  ;;  %v517_v30 = vpack.c.bf16 %v515_v26, %v515_v26 }
 0x100   : > { %5278 = vmatprep.subr.msk.bf16.mxu0 %vm467_vm0, %v569_v28  ;;  %5370 = vmatprep.subr.msk.bf16.mxu1 %vm467_vm0, %v569_v28  ;;  %v518_v33 = vpack.c.bf16 %v516_v32, %v516_v32 }
 0x101   : > { %863 = vmatpush1.bf16.msra.mxu0 %v857_v29  ;;  %5371 = vmatpush1.bf16.msra.mxu1 %v857_v29 }
 0x102   : > { %776 = vxpose.xlu1.c.b16.start.end [1/1] (short) %v517_v30, 128  ;;  %v6299_v34 = vpop.f32.mrb[4].mxu0  ;;  %v6337_v58 = vpop.f32.mrb[4].mxu1 }
 0x103   : > { %8900 = vst [vmem:[#allocation6_spill] sm:$0xff] %v6299_v34  ;;  %v6301_v35 = vpop.f32.mrb[5].mxu0  ;;  %8904 = vst [vmem:[#allocation10_spill] sm:$0xff] %v6337_v58  ;;  %v6339_v59 = vpop.f32.mrb[5].mxu1 }
 0x104   : > { %8901 = vst [vmem:[#allocation7_spill] sm:$0xff] %v6301_v35  ;;  %v616_v36 = vpop.f32.mrb[6].mxu0  ;;  %8905 = vst [vmem:[#allocation11_spill] sm:$0xff] %v6339_v59  ;;  %v667_v60 = vpop.f32.mrb[6].mxu1 }
 0x105   : > { %v617_v37 = vpop.f32.mrb[7].mxu0  ;;  %v668_v61 = vpop.f32.mrb[7].mxu1 }
 0x10a   : > { %v6303_v38 = vpop.f32.mrb[8].mxu0  ;;  %v6341_v62 = vpop.f32.mrb[8].mxu1 }
 0x10b   : > { %8902 = vst [vmem:[#allocation8_spill] sm:$0xff] %v6303_v38  ;;  %v6305_v39 = vpop.f32.mrb[9].mxu0  ;;  %8906 = vst [vmem:[#allocation12_spill] sm:$0xff] %v6341_v62  ;;  %v6343_v63 = vpop.f32.mrb[9].mxu1 }
 0x10c   : > { %8903 = vst [vmem:[#allocation9_spill] sm:$0xff] %v6305_v39  ;;  %v720_v40 = vpop.f32.mrb[10].mxu0  ;;  %8907 = vst [vmem:[#allocation13_spill] sm:$0xff] %v6343_v63  ;;  %v771_v1 = vpop.f32.mrb[10].mxu1 }
 0x10d   : > { %v721_v41 = vpop.f32.mrb[11].mxu0  ;;  %v772_v2 = vpop.f32.mrb[11].mxu1 }
 0x11f   : > { %792 = vxpose.xlu1.c.b16.start.end [1/1] (short) %v518_v33, 128 }
 0x123   : > { %5413 = vset.pattern.permute.xlu1 %v8796_v0 }
 0x168   : > { %v784_v42 = vpop.trf.xlu1 }
 0x169   : > { %5279 = vmatmul.mubr.msk.bf16.vlgmr.msra.gmra.mrb[12].mxu0 %vm463_vm1, %v784_v42 }
 0x16a   : > { %904 = vmatprep.mubr.bf16.mxu0 %v8796_v0 }
 0x16c   : > { %v785_v43 = vpop.trf.xlu1 }
 0x170   : > { %v786_v44 = vpop.trf.xlu1 }
 0x171   : > { %5280 = vmatmul.mubr.msk.bf16.gmra.mrb[16].mxu0 %vm463_vm1, %v785_v43 }
 0x172   : > { %914 = vmatprep.mubr.bf16.mxu0 %v8796_v0 }
 0x174   : > { %v787_v45 = vpop.trf.xlu1 }
 0x178   : > { %v788_v46 = vpop.trf.xlu1 }
 0x179   : > { %5281 = vmatmul.mubr.msk.bf16.gmra.mrb[20].mxu0 %vm463_vm1, %v786_v44 }
 0x17a   : > { %924 = vmatprep.mubr.bf16.mxu0 %v8796_v0 }
 0x17c   : > { %v789_v47 = vpop.trf.xlu1 }
 0x180   : > { %v790_v48 = vpop.trf.xlu1 }
 0x181   : > { %5282 = vmatmul.mubr.msk.bf16.gmra.mrb[24].mxu0 %vm463_vm1, %v787_v45 }
 0x182   : > { %934 = vmatprep.mubr.bf16.mxu0 %v8796_v0 }
 0x184   : > { %v791_v49 = vpop.trf.xlu1 }
 0x188   : > { %v800_v50 = vpop.trf.xlu1 }
 0x189   : > { %5283 = vmatmul.mubr.msk.bf16.gmra.mrb[28].mxu0 %vm463_vm1, %v788_v46  ;;  %5287 = vmatmul.mubr.msk.bf16.vlgmr.msra.gmra.mrb[12].mxu1 %vm463_vm1, %v800_v50 }
 0x18a   : > { %944 = vmatprep.mubr.bf16.mxu0 %v8796_v0  ;;  %984 = vmatprep.mubr.bf16.mxu1 %v8796_v0 }
 0x18c   : > { %v801_v51 = vpop.trf.xlu1 }
 0x190   : > { %v802_v52 = vpop.trf.xlu1 }
 0x191   : > { %5284 = vmatmul.mubr.msk.bf16.gmra.mrb[32].mxu0 %vm463_vm1, %v789_v47  ;;  %5288 = vmatmul.mubr.msk.bf16.gmra.mrb[16].mxu1 %vm463_vm1, %v801_v51 }
 0x192   : > { %954 = vmatprep.mubr.bf16.mxu0 %v8796_v0  ;;  %994 = vmatprep.mubr.bf16.mxu1 %v8796_v0 }
 0x194   : > { %v803_v53 = vpop.trf.xlu1 }
 0x198   : > { %v804_v54 = vpop.trf.xlu1 }
 0x199   : > { %5285 = vmatmul.mubr.msk.bf16.gmra.mrb[36].mxu0 %vm463_vm1, %v790_v48  ;;  %5289 = vmatmul.mubr.msk.bf16.gmra.mrb[20].mxu1 %vm463_vm1, %v802_v52 }
 0x19a   : > { %964 = vmatprep.mubr.bf16.mxu0 %v8796_v0  ;;  %1004 = vmatprep.mubr.bf16.mxu1 %v8796_v0 }
 0x19c   : > { %v805_v55 = vpop.trf.xlu1 }
 0x1a0   : > { %v806_v56 = vpop.trf.xlu1 }
 0x1a1   : > { %5286 = vmatmul.mubr.msk.bf16.gmra.mrb[40].mxu0 %vm463_vm1, %v791_v49  ;;  %5290 = vmatmul.mubr.msk.bf16.gmra.mrb[24].mxu1 %vm463_vm1, %v803_v53 }
 0x1a2   : > { %1014 = vmatprep.mubr.bf16.mxu1 %v8796_v0 }
 0x1a4   : > { %v807_v57 = vpop.trf.xlu1 }
 0x1a9   : > { %5291 = vmatmul.mubr.msk.bf16.gmra.mrb[28].mxu1 %vm463_vm1, %v804_v54 }
 0x1aa   : > { %1024 = vmatprep.mubr.bf16.mxu1 %v8796_v0 }
 0x1b1   : > { %5292 = vmatmul.mubr.msk.bf16.gmra.mrb[32].mxu1 %vm463_vm1, %v805_v55 }
 0x1b2   : > { %1034 = vmatprep.mubr.bf16.mxu1 %v8796_v0 }
 0x1b9   : > { %5293 = vmatmul.mubr.msk.bf16.gmra.mrb[36].mxu1 %vm463_vm1, %v806_v56 }
 0x1ba   : > { %1044 = vmatprep.mubr.bf16.mxu1 %v8796_v0 }
 0x1c1   : > { %5294 = vmatmul.mubr.msk.bf16.gmra.mrb[40].mxu1 %vm463_vm1, %v807_v57 }
 0x23c   : > { %v6345_v3 = vpop.f32.mrb[12].mxu0 }
 0x23d   : > { %v6347_v4 = vpop.f32.mrb[13].mxu0 }
 0x23e   : > { %v6349_v5 = vpop.f32.mrb[14].mxu0  ;;  %v1055_v6 = vmax.f32 %v6345_v3, %v6347_v4 }
 0x23f   : > { %v6353_v7 = vpop.f32.mrb[15].mxu0 }
 0x240   : > { %1056 = vmax.xlane.f32.xlu0 %v1055_v6  ;;  %v1058_v8 = vmax.f32 %v6349_v5, %v6353_v7 }
 0x242   : > { %1059 = vmax.xlane.f32.xlu1 %v1058_v8 }
 0x244   : > { %v6357_v9 = vpop.f32.mrb[16].mxu0 }
 0x245   : > { %v6359_v10 = vpop.f32.mrb[17].mxu0 }
 0x246   : > { %v6361_v11 = vpop.f32.mrb[18].mxu0  ;;  %v1061_v12 = vmax.f32 %v6357_v9, %v6359_v10 }
 0x247   : > { %v6365_v13 = vpop.f32.mrb[19].mxu0 }
 0x248   : > { %v1064_v14 = vmax.f32 %v6361_v11, %v6365_v13 }
 0x24c   : > { %v6369_v15 = vpop.f32.mrb[20].mxu0 }
 0x24d   : > { %v6371_v16 = vpop.f32.mrb[21].mxu0 }
 0x24e   : > { %v6373_v17 = vpop.f32.mrb[22].mxu0  ;;  %v1067_v18 = vmax.f32 %v6369_v15, %v6371_v16 }
 0x24f   : > { %v6377_v19 = vpop.f32.mrb[23].mxu0 }
 0x250   : > { %v1070_v20 = vmax.f32 %v6373_v17, %v6377_v19 }
 0x254   : > { %v6381_v21 = vpop.f32.mrb[24].mxu0 }
 0x255   : > { %v6383_v22 = vpop.f32.mrb[25].mxu0 }
 0x256   : > { %v6385_v23 = vpop.f32.mrb[26].mxu0  ;;  %v1073_v24 = vmax.f32 %v6381_v21, %v6383_v22 }
 0x257   : > { %v6389_v25 = vpop.f32.mrb[27].mxu0 }
 0x258   : > { %v1076_v26 = vmax.f32 %v6385_v23, %v6389_v25 }
 0x25c   : > { %v6393_v27 = vpop.f32.mrb[28].mxu0  ;;  %v6395_v28 = vpop.f32.mrb[12].mxu1 }
 0x25d   : > { %v6397_v29 = vpop.f32.mrb[29].mxu0  ;;  %v6399_v30 = vpop.f32.mrb[13].mxu1 }
 0x25e   : > { %v6401_v31 = vpop.f32.mrb[30].mxu0  ;;  %v6403_v32 = vpop.f32.mrb[14].mxu1  ;;  %v1103_v33 = vmax.f32 %v6395_v28, %v6399_v30  ;;  %v1079_v36 = vmax.f32 %v6393_v27, %v6397_v29 }
 0x25f   : > { %v6409_v37 = vpop.f32.mrb[31].mxu0  ;;  %v6411_v40 = vpop.f32.mrb[15].mxu1 }
 0x260   : > { %1104 = vmax.xlane.f32.xlu0 %v1103_v33  ;;  %v1106_v41 = vmax.f32 %v6403_v32, %v6411_v40  ;;  %v1082_v42 = vmax.f32 %v6401_v31, %v6409_v37 }
 0x264   : > { %v6417_v43 = vpop.f32.mrb[32].mxu0  ;;  %1062 = vmax.xlane.f32.xlu0 %v1061_v12  ;;  %v6419_v44 = vpop.f32.mrb[16].mxu1 }
 0x265   : > { %v6421_v45 = vpop.f32.mrb[33].mxu0  ;;  %v6423_v46 = vpop.f32.mrb[17].mxu1 }
 0x266   : > { %v6425_v47 = vpop.f32.mrb[34].mxu0  ;;  %v6427_v48 = vpop.f32.mrb[18].mxu1  ;;  %v1085_v49 = vmax.f32 %v6417_v43, %v6421_v45 }
 0x267   : > { %v6433_v51 = vpop.f32.mrb[35].mxu0  ;;  %v6435_v52 = vpop.f32.mrb[19].mxu1 }
 0x268   : > { %1065 = vmax.xlane.f32.xlu0 %v1064_v14  ;;  %v1088_v53 = vmax.f32 %v6425_v47, %v6433_v51  ;;  %v1112_v54 = vmax.f32 %v6427_v48, %v6435_v52 }
 0x26a   : > { %1089 = vmax.xlane.f32.xlu1 %v1088_v53 }
 0x26c   : > { %v6441_v55 = vpop.f32.mrb[36].mxu0  ;;  %1068 = vmax.xlane.f32.xlu0 %v1067_v18  ;;  %v6443_v56 = vpop.f32.mrb[20].mxu1 }
 0x26d   : > { %v6445_v57 = vpop.f32.mrb[37].mxu0  ;;  %v6447_v60 = vpop.f32.mrb[21].mxu1 }
 0x26e   : > { %v6449_v61 = vpop.f32.mrb[38].mxu0  ;;  %v6451_v1 = vpop.f32.mrb[22].mxu1  ;;  %v1091_v2 = vmax.f32 %v6441_v55, %v6445_v57  ;;  %v1115_v6 = vmax.f32 %v6443_v56, %v6447_v60 }
 0x26f   : > { %v6457_v8 = vpop.f32.mrb[39].mxu0  ;;  %v6459_v12 = vpop.f32.mrb[23].mxu1 }
 0x270   : > { %1071 = vmax.xlane.f32.xlu0 %v1070_v20  ;;  %v1094_v14 = vmax.f32 %v6449_v61, %v6457_v8  ;;  %v1118_v18 = vmax.f32 %v6451_v1, %v6459_v12 }
 0x272   : > { %1095 = vmax.xlane.f32.xlu1 %v1094_v14 }
 0x274   : > { %v6465_v33 = vpop.f32.mrb[40].mxu0  ;;  %1074 = vmax.xlane.f32.xlu0 %v1073_v24  ;;  %v6467_v53 = vpop.f32.mrb[24].mxu1 }
 0x275   : > { %8908 = vst [vmem:[#allocation14_spill] sm:$0xff] %v6467_v53  ;;  %v6469_v0 = vpop.f32.mrb[41].mxu0  ;;  %v6471_v50 = vpop.f32.mrb[25].mxu1 }
 0x276   : > { %8909 = vst [vmem:[#allocation15_spill] sm:$0xff] %v6471_v50  ;;  %v6473_v62 = vpop.f32.mrb[42].mxu0  ;;  %v6475_v63 = vpop.f32.mrb[26].mxu1  ;;  %v1097_v20 = vmax.f32 %v6465_v33, %v6469_v0  ;;  %v1121_v34 = vmax.f32 %v6467_v53, %v6471_v50 }
 0x277   : > { %8910 = vst [vmem:[#allocation16_spill] sm:$0xff] %v6475_v63  ;;  %v6481_v14 = vpop.f32.mrb[43].mxu0  ;;  %v6483_v39 = vpop.f32.mrb[27].mxu1 }
 0x278   : > { %8911 = vst [vmem:[#allocation17_spill] sm:$0xff] %v6483_v39  ;;  %1077 = vmax.xlane.f32.xlu0 %v1076_v26  ;;  %v1100_v24 = vmax.f32 %v6473_v62, %v6481_v14  ;;  %v1124_v38 = vmax.f32 %v6475_v63, %v6483_v39 }
 0x27a   : > { %1101 = vmax.xlane.f32.xlu1 %v1100_v24 }
 0x27c   : > { %1080 = vmax.xlane.f32.xlu0 %v1079_v36  ;;  %v6489_v35 = vpop.f32.mrb[28].mxu1 }
 0x27d   : > { %8912 = vst [vmem:[#allocation18_spill] sm:$0xff] %v6489_v35  ;;  %v6491_v59 = vpop.f32.mrb[29].mxu1 }
 0x27e   : > { %8913 = vst [vmem:[#allocation19_spill] sm:$0xff] %v6491_v59  ;;  %1107 = vmax.xlane.f32.xlu1 %v1106_v41  ;;  %v6493_v58 = vpop.f32.mrb[30].mxu1  ;;  %v1127_v50 = vmax.f32 %v6489_v35, %v6491_v59 }
 0x27f   : > { %v6497_v53 = vpop.f32.mrb[31].mxu1 }
 0x280   : > { %1083 = vmax.xlane.f32.xlu0 %v1082_v42  ;;  %v1130_v26 = vmax.f32 %v6493_v58, %v6497_v53 }
 0x282   : > { %1113 = vmax.xlane.f32.xlu1 %v1112_v54 }
 0x284   : > { %1086 = vmax.xlane.f32.xlu0 %v1085_v49  ;;  %v6501_v24 = vpop.f32.mrb[32].mxu1 }
 0x285   : > { %8914 = vst [vmem:[#allocation20_spill] sm:$0xff] %v6501_v24  ;;  %v6503_v36 = vpop.f32.mrb[33].mxu1 }
 0x286   : > { %8915 = vst [vmem:[#allocation21_spill] sm:$0xff] %v6503_v36  ;;  %1119 = vmax.xlane.f32.xlu1 %v1118_v18  ;;  %v6505_v39 = vpop.f32.mrb[34].mxu1  ;;  %v1133_v41 = vmax.f32 %v6501_v24, %v6503_v36 }
 0x287   : > { %v6509_v63 = vpop.f32.mrb[35].mxu1 }
 0x288   : > { %8916 = vst [vmem:[#allocation22_spill] sm:$0xff] %v6509_v63  ;;  %1092 = vmax.xlane.f32.xlu0 %v1091_v2  ;;  %v1136_v42 = vmax.f32 %v6505_v39, %v6509_v63  ;;  %v8921_v2 = vmax.f32 %v6419_v44, %v6423_v46 }
 0x28a   : > { %1125 = vmax.xlane.f32.xlu1 %v1124_v38 }
 0x28c   : > { %1098 = vmax.xlane.f32.xlu0 %v1097_v20  ;;  %v6513_v54 = vpop.f32.mrb[36].mxu1 }
 0x28d   : > { %8917 = vst [vmem:[#allocation23_spill] sm:$0xff] %v6513_v54  ;;  %v6515_v49 = vpop.f32.mrb[37].mxu1 }
 0x28e   : > { %8918 = vst [vmem:[#allocation24_spill] sm:$0xff] %v6515_v49  ;;  %1131 = vmax.xlane.f32.xlu1 %v1130_v26  ;;  %v6517_v59 = vpop.f32.mrb[38].mxu1  ;;  %v1139_v18 = vmax.f32 %v6513_v54, %v6515_v49 }
 0x28f   : > { %8919 = vst [vmem:[#allocation25_spill] sm:$0xff] %v6517_v59  ;;  %v6521_v35 = vpop.f32.mrb[39].mxu1 }
 0x290   : > { %8920 = vst [vmem:[#allocation26_spill] sm:$0xff] %v6521_v35  ;;  %1110 = vmax.xlane.f32.xlu0 %v8921_v2  ;;  %v1142_v38 = vmax.f32 %v6517_v59, %v6521_v35 }
 0x292   : > { %1137 = vmax.xlane.f32.xlu1 %v1136_v42 }
 0x294   : > { %1116 = vmax.xlane.f32.xlu0 %v1115_v6  ;;  %v6528_v20 = vpop.f32.mrb[40].mxu1 }
 0x295   : > { %8922 = vst [vmem:[#allocation27_spill] sm:$0xff] %v6528_v20  ;;  %v6530_v36 = vpop.f32.mrb[41].mxu1 }
 0x296   : > { %8923 = vst [vmem:[#allocation28_spill] sm:$0xff] %v6530_v36  ;;  %1143 = vmax.xlane.f32.xlu1 %v1142_v38  ;;  %v6532_v26 = vpop.f32.mrb[42].mxu1  ;;  %v1145_v49 = vmax.f32 %v6528_v20, %v6530_v36 }
 0x297   : > { %v6536_v54 = vpop.f32.mrb[43].mxu1 }
 0x298   : > { %1122 = vmax.xlane.f32.xlu0 %v1121_v34  ;;  %v1148_v2 = vmax.f32 %v6532_v26, %v6536_v54 }
 0x29a   : > { %1149 = vmax.xlane.f32.xlu1 %v1148_v2 }
 0x29c   : > { %1128 = vmax.xlane.f32.xlu0 %v1127_v50 }
 0x2a0   : > { %1134 = vmax.xlane.f32.xlu0 %v1133_v41 }
 0x2a4   : > { %1140 = vmax.xlane.f32.xlu0 %v1139_v18 }
 0x2a8   : > { %1146 = vmax.xlane.f32.xlu0 %v1145_v49 }
 0x2cd   : > { %v1057_v6 = vpop.xlane.xlu0 %1056 }
 0x2ce   : > { %v1151_v38 = vsub.f32 %v6345_v3, %v1057_v6  ;;  %v1152_v35 = vsub.f32 %v6347_v4, %v1057_v6 }
 0x2cf   : > { %v1060_v42 = vpop.xlane.xlu1 %1059 }
 0x2d0   : > { %v1153_v59 = vsub.f32 %v6349_v5, %v1060_v42  ;;  %v1154_v36 = vsub.f32 %v6353_v7, %v1060_v42 }
 0x2d2   : > { %v1215_v20 = vpack.c.bf16 %v1153_v59, %v1151_v38  ;;  %v1216_v34 = vpack.c.bf16 %v1154_v36, %v1152_v35 }
 0x2d4   : > { %v1248_v24 = vmul.bf16 1069105081, %v1215_v20  ;;  %v1251_v63 = vmul.bf16 1069105081, %v1216_v34 }
 0x2d6   : > { %5416 = vpow.bf16 %v1248_v24 }
 0x2d7   : > { %5418 = vpow.bf16 %v1251_v63 }
 0x2e1   : > { %v6544_v50 = vpop.eup %5416 }
 0x2e2   : > { %v6546_v41 = vpop.eup %5418  ;;  %v1345_v49 = vunpack.c.h.bf16 %v6544_v50  ;;  %v1343_v3 = vunpack.c.l.bf16 %v6544_v50 }
 0x2e3   : > { %v1346_v4 = vunpack.c.h.bf16 %v6546_v41  ;;  %v1344_v5 = vunpack.c.l.bf16 %v6546_v41 }
 0x2e5   : > { %v1410_v18 = vadd.f32 %v1346_v4, %v1345_v49  ;;  %v1407_v7 = vadd.f32 %v1344_v5, %v1343_v3 }
 0x2e7   : > { %1411 = vadd.xlane.f32.xlu1 %v1410_v18  ;;  %1408 = vadd.xlane.f32.xlu0 %v1407_v7 }
 0x2ed   : > { %v1105_v35 = vpop.xlane.xlu0 %1104 }
 0x2f1   : > { %v1063_v59 = vpop.xlane.xlu0 %1062 }
 0x2f2   : > { %v1155_v63 = vsub.f32 %v6357_v9, %v1063_v59  ;;  %v1156_v36 = vsub.f32 %v6359_v10, %v1063_v59 }
 0x2f5   : > { %v1066_v24 = vpop.xlane.xlu0 %1065 }
 0x2f6   : > { %v1157_v20 = vsub.f32 %v6361_v11, %v1066_v24  ;;  %v1158_v2 = vsub.f32 %v6365_v13, %v1066_v24 }
 0x2f7   : > { %v1090_v18 = vpop.xlane.xlu1 %1089 }
 0x2f8   : > { %v1217_v6 = vpack.c.bf16 %v1157_v20, %v1155_v63  ;;  %v1218_v42 = vpack.c.bf16 %v1158_v2, %v1156_v36 }
 0x2f9   : > { %v1069_v38 = vpop.xlane.xlu0 %1068 }
 0x2fa   : > { %v1159_v49 = vsub.f32 %v6369_v15, %v1069_v38  ;;  %v1160_v3 = vsub.f32 %v6371_v16, %v1069_v38  ;;  %v1257_v2 = vmul.bf16 1069105081, %v1218_v42 }
 0x2fd   : > { %v1072_v34 = vpop.xlane.xlu0 %1071 }
 0x2fe   : > { %v1161_v4 = vsub.f32 %v6373_v17, %v1072_v34  ;;  %v1162_v5 = vsub.f32 %v6377_v19, %v1072_v34  ;;  %v1254_v19 = vmul.bf16 1069105081, %v1217_v6  ;;  %v1183_v34 = vsub.f32 %v6395_v28, %v1105_v35 }
 0x2ff   : > { %v1096_v11 = vpop.xlane.xlu1 %1095 }
 0x300   : > { %v1219_v9 = vpack.c.bf16 %v1161_v4, %v1159_v49  ;;  %v6560_v7 = vpack.c.bf16 %v1162_v5, %v1160_v3  ;;  %v1184_v49 = vsub.f32 %v6399_v30, %v1105_v35  ;;  %5420 = vpow.bf16 %v1254_v19 }
 0x301   : > { %v1075_v10 = vpop.xlane.xlu0 %1074  ;;  %5422 = vpow.bf16 %v1257_v2  ;;  %v1178_v19 = vsub.f32 %v6457_v8, %v1096_v11 }
 0x302   : > { %v1163_v13 = vsub.f32 %v6381_v21, %v1075_v10  ;;  %v1164_v24 = vsub.f32 %v6383_v22, %v1075_v10  ;;  %v1263_v2 = vmul.bf16 1069105081, %v6560_v7 }
 0x305   : > { %v1078_v59 = vpop.xlane.xlu0 %1077 }
 0x306   : > { %v1165_v63 = vsub.f32 %v6385_v23, %v1078_v59  ;;  %v1166_v15 = vsub.f32 %v6389_v25, %v1078_v59  ;;  %v1174_v59 = vsub.f32 %v6433_v51, %v1090_v18  ;;  %v1260_v51 = vmul.bf16 1069105081, %v1219_v9 }
 0x307   : > { %v1102_v16 = vpop.xlane.xlu1 %1101 }
 0x308   : > { %v6566_v36 = vpack.c.bf16 %v1165_v63, %v1163_v13  ;;  %v6568_v17 = vpack.c.bf16 %v1166_v15, %v1164_v24  ;;  %v1177_v15 = vsub.f32 %v6449_v61, %v1096_v11  ;;  %v1181_v61 = vsub.f32 %v6473_v62, %v1102_v16 }
 0x309   : > { %v1081_v20 = vpop.xlane.xlu0 %1080  ;;  %v1182_v8 = vsub.f32 %v6481_v14, %v1102_v16 }
 0x30a   : > { %v1167_v23 = vsub.f32 %v6393_v27, %v1081_v20  ;;  %v1168_v25 = vsub.f32 %v6397_v29, %v1081_v20  ;;  %v1173_v27 = vsub.f32 %v6425_v47, %v1090_v18 }
 0x30b   : > { %v1108_v38 = vpop.xlane.xlu1 %1107 }
 0x30c   : > { %v1185_v21 = vsub.f32 %v6403_v32, %v1108_v38  ;;  %v1186_v22 = vsub.f32 %v6411_v40, %v1108_v38 }
 0x30d   : > { %v1084_v3 = vpop.xlane.xlu0 %1083 }
 0x30e   : > { %v1231_v4 = vpack.c.bf16 %v1185_v21, %v1183_v34  ;;  %v1232_v5 = vpack.c.bf16 %v1186_v22, %v1184_v49  ;;  %v1169_v6 = vsub.f32 %v6401_v31, %v1084_v3  ;;  %v1170_v42 = vsub.f32 %v6409_v37, %v1084_v3 }
 0x30f   : > { %v1114_v28 = vpop.xlane.xlu1 %1113 }
 0x310   : > { %v1296_v10 = vmul.bf16 1069105081, %v1231_v4  ;;  %v1299_v30 = vmul.bf16 1069105081, %v1232_v5  ;;  %v6578_v35 = vpack.c.bf16 %v1169_v6, %v1167_v23  ;;  %v6580_v32 = vpack.c.bf16 %v1170_v42, %v1168_v25 }
 0x311   : > { %v1087_v40 = vpop.xlane.xlu0 %1086 }
 0x312   : > { %5424 = vpow.bf16 %v1296_v10  ;;  %v1171_v29 = vsub.f32 %v6417_v43, %v1087_v40  ;;  %v1172_v31 = vsub.f32 %v6421_v45, %v1087_v40  ;;  %v6594_v43 = vpop.eup %5420 }
 0x313   : > { %5426 = vpow.bf16 %v1299_v30  ;;  %v1120_v24 = vpop.xlane.xlu1 %1119  ;;  %v6601_v34 = vpop.eup %5422  ;;  %v1349_v22 = vunpack.c.h.bf16 %v6594_v43  ;;  %v1347_v10 = vunpack.c.l.bf16 %v6594_v43 }
 0x314   : > { %v6586_v37 = vpack.c.bf16 %v1173_v27, %v1171_v29  ;;  %v6588_v13 = vpack.c.bf16 %v1174_v59, %v1172_v31  ;;  %5428 = vpow.bf16 %v1260_v51  ;;  %v1350_v62 = vunpack.c.h.bf16 %v6601_v34 }
 0x315   : > { %v1093_v63 = vpop.xlane.xlu0 %1092  ;;  %5430 = vpow.bf16 %v1263_v2 }
 0x316   : > { %v1175_v47 = vsub.f32 %v6441_v55, %v1093_v63  ;;  %v1176_v20 = vsub.f32 %v6445_v57, %v1093_v63 }
 0x317   : > { %v1126_v11 = vpop.xlane.xlu1 %1125 }
 0x318   : > { %v6596_v18 = vpack.c.bf16 %v1177_v15, %v1175_v47  ;;  %v6598_v45 = vpack.c.bf16 %v1178_v19, %v1176_v20  ;;  %v1416_v19 = vadd.f32 %v1350_v62, %v1349_v22  ;;  %v8924_v47 = vld [vmem:[#allocation16_spill] sm:$0xff]  ;;  %v8925_v20 = vld [vmem:[#allocation17_spill] sm:$0xff] }
 0x319   : > { %v1099_v38 = vpop.xlane.xlu0 %1098 }
 0x31a   : > { %v1179_v55 = vsub.f32 %v6465_v33, %v1099_v38  ;;  %v1180_v57 = vsub.f32 %v6469_v0, %v1099_v38  ;;  %v1189_v33 = vsub.f32 %v6427_v48, %v1114_v28  ;;  %v1190_v0 = vsub.f32 %v6435_v52, %v1114_v28 }
 0x31b   : > { %v1348_v48 = vunpack.c.l.bf16 %v6601_v34  ;;  %v1193_v52 = vsub.f32 %v6451_v1, %v1120_v24  ;;  %v1132_v28 = vpop.xlane.xlu1 %1131  ;;  %v1197_v1 = vsub.f32 %v8924_v47, %v1126_v11 }
 0x31c   : > { %v6607_v9 = vpack.c.bf16 %v1181_v61, %v1179_v55  ;;  %v6609_v49 = vpack.c.bf16 %v1182_v8, %v1180_v57  ;;  %v8926_v61 = vld [vmem:[#allocation14_spill] sm:$0xff]  ;;  %v1266_v57 = vmul.bf16 1069105081, %v6566_v36 }
 0x31d   : > { %v6611_v21 = vpop.eup %5424  ;;  %v1111_v7 = vpop.xlane.xlu0 %1110  ;;  %v1413_v51 = vadd.f32 %v1348_v48, %v1347_v10 }
 0x31e   : > { %v6615_v23 = vpop.eup %5426  ;;  %v1187_v14 = vsub.f32 %v6419_v44, %v1111_v7  ;;  %v1188_v16 = vsub.f32 %v6423_v46, %v1111_v7  ;;  %v1377_v25 = vunpack.c.h.bf16 %v6611_v21  ;;  %v1375_v4 = vunpack.c.l.bf16 %v6611_v21 }
 0x31f   : > { %v1378_v3 = vunpack.c.h.bf16 %v6615_v23  ;;  %v1376_v5 = vunpack.c.l.bf16 %v6615_v23  ;;  %v1194_v44 = vsub.f32 %v6459_v12, %v1120_v24  ;;  %v1198_v12 = vsub.f32 %v8925_v20, %v1126_v11  ;;  %v1138_v7 = vpop.xlane.xlu1 %1137 }
 0x320   : > { %v1233_v6 = vpack.c.bf16 %v1189_v33, %v1187_v14  ;;  %v1234_v42 = vpack.c.bf16 %v1190_v0, %v1188_v16  ;;  %v1269_v11 = vmul.bf16 1069105081, %v6568_v17  ;;  %v1201_v14 = vsub.f32 %v6493_v58, %v1132_v28 }
 0x321   : > { %v1117_v46 = vpop.xlane.xlu0 %1116  ;;  %v1458_v30 = vadd.f32 %v1378_v3, %v1377_v25  ;;  %v1455_v40 = vadd.f32 %v1376_v5, %v1375_v4  ;;  %v1202_v16 = vsub.f32 %v6497_v53, %v1132_v28  ;;  %v8928_v25 = vld [vmem:[#allocation18_spill] sm:$0xff]  ;;  %v8929_v4 = vld [vmem:[#allocation19_spill] sm:$0xff]  ;;  %v1205_v58 = vsub.f32 %v6505_v39, %v1138_v7  ;;  %v8931_v28 = vld [vmem:[#allocation20_spill] sm:$0xff] }
 0x322   : > { %v1302_v27 = vmul.bf16 1069105081, %v1233_v6  ;;  %v1305_v29 = vmul.bf16 1069105081, %v1234_v42  ;;  %v1191_v59 = vsub.f32 %v6443_v56, %v1117_v46  ;;  %v1192_v31 = vsub.f32 %v6447_v60, %v1117_v46  ;;  %v8927_v56 = vld [vmem:[#allocation15_spill] sm:$0xff]  ;;  %v6635_v60 = vpop.eup %5428  ;;  %v8930_v46 = vld [vmem:[#allocation22_spill] sm:$0xff] }
 0x323   : > { %1459 = vadd.xlane.f32.xlu1 %v1458_v30  ;;  %1456 = vadd.xlane.f32.xlu0 %v1455_v40  ;;  %v6638_v22 = vpop.eup %5430  ;;  %v1144_v10 = vpop.xlane.xlu1 %1143  ;;  %v1206_v53 = vsub.f32 %v8930_v46, %v1138_v7  ;;  %v8932_v40 = vld [vmem:[#allocation21_spill] sm:$0xff]  ;;  %v8938_v46 = vld [vmem:[#allocation28_spill] sm:$0xff] }
 0x324   : > { %5432 = vpow.bf16 %v1302_v27  ;;  %v1235_v63 = vpack.c.bf16 %v1193_v52, %v1191_v59  ;;  %v1236_v15 = vpack.c.bf16 %v1194_v44, %v1192_v31  ;;  %v1353_v52 = vunpack.c.h.bf16 %v6635_v60 }
 0x325   : > { %5434 = vpow.bf16 %v1305_v29  ;;  %v1123_v24 = vpop.xlane.xlu0 %1122  ;;  %v1354_v44 = vunpack.c.h.bf16 %v6638_v22  ;;  %v1272_v59 = vmul.bf16 1069105081, %v6578_v35  ;;  %v1275_v31 = vmul.bf16 1069105081, %v6580_v32 }
 0x326   : > { %v1308_v2 = vmul.bf16 1069105081, %v1235_v63  ;;  %v1311_v38 = vmul.bf16 1069105081, %v1236_v15  ;;  %v1195_v8 = vsub.f32 %v8926_v61, %v1123_v24  ;;  %v1196_v55 = vsub.f32 %v8927_v56, %v1123_v24  ;;  %v8933_v24 = vld [vmem:[#allocation25_spill] sm:$0xff]  ;;  %v8935_v61 = vld [vmem:[#allocation23_spill] sm:$0xff] }
 0x327   : > { %1417 = vadd.xlane.f32.xlu1 %v1416_v19  ;;  %1414 = vadd.xlane.f32.xlu0 %v1413_v51  ;;  %v1351_v63 = vunpack.c.l.bf16 %v6635_v60  ;;  %v1352_v15 = vunpack.c.l.bf16 %v6638_v22  ;;  %v1209_v51 = vsub.f32 %v8933_v24, %v1144_v10  ;;  %v8936_v56 = vld [vmem:[#allocation24_spill] sm:$0xff]  ;;  %v1150_v7 = vpop.xlane.xlu1 %1149 }
 0x328   : > { %5436 = vpow.bf16 %v1308_v2  ;;  %v1237_v62 = vpack.c.bf16 %v1197_v1, %v1195_v8  ;;  %v1238_v33 = vpack.c.bf16 %v1198_v12, %v1196_v55  ;;  %v8934_v2 = vld [vmem:[#allocation26_spill] sm:$0xff] }
 0x329   : > { %5438 = vpow.bf16 %v1311_v38  ;;  %v1129_v0 = vpop.xlane.xlu0 %1128  ;;  %v1210_v38 = vsub.f32 %v8934_v2, %v1144_v10 }
 0x32a   : > { %v1199_v3 = vsub.f32 %v8928_v25, %v1129_v0  ;;  %v1200_v36 = vsub.f32 %v8929_v4, %v1129_v0  ;;  %5440 = vpow.bf16 %v1266_v57  ;;  %v1314_v5 = vmul.bf16 1069105081, %v1237_v62 }
 0x32b   : > { %5442 = vpow.bf16 %v1269_v11  ;;  %v1317_v17 = vmul.bf16 1069105081, %v1238_v33  ;;  %v1278_v25 = vmul.bf16 1069105081, %v6586_v37 }
 0x32c   : > { %v1239_v6 = vpack.c.bf16 %v1201_v14, %v1199_v3  ;;  %v1240_v42 = vpack.c.bf16 %v1202_v16, %v1200_v36  ;;  %5444 = vpow.bf16 %v1314_v5  ;;  %v1422_v36 = vadd.f32 %v1354_v44, %v1353_v52 }
 0x32d   : > { %v1135_v48 = vpop.xlane.xlu0 %1134  ;;  %5446 = vpow.bf16 %v1317_v17  ;;  %v1419_v5 = vadd.f32 %v1352_v15, %v1351_v63  ;;  %v1213_v17 = vsub.f32 %v6532_v26, %v1150_v7  ;;  %v1281_v44 = vmul.bf16 1069105081, %v6588_v13 }
 0x32e   : > { %v1203_v30 = vsub.f32 %v8931_v28, %v1135_v48  ;;  %v1204_v27 = vsub.f32 %v8932_v40, %v1135_v48  ;;  %5448 = vpow.bf16 %v1272_v59  ;;  %v1320_v0 = vmul.bf16 1069105081, %v1239_v6 }
 0x32f   : > { %v6651_v29 = vpop.eup %5432  ;;  %5450 = vpow.bf16 %v1275_v31  ;;  %v1323_v3 = vmul.bf16 1069105081, %v1240_v42  ;;  %v1214_v48 = vsub.f32 %v6536_v54, %v1150_v7 }
 0x330   : > { %v6657_v19 = vpop.eup %5434  ;;  %v6659_v39 = vpack.c.bf16 %v1205_v58, %v1203_v30  ;;  %v6661_v47 = vpack.c.bf16 %v1206_v53, %v1204_v27  ;;  %v1381_v1 = vunpack.c.h.bf16 %v6651_v29  ;;  %v1379_v35 = vunpack.c.l.bf16 %v6651_v29  ;;  %v8937_v58 = vld [vmem:[#allocation27_spill] sm:$0xff] }
 0x331   : > { %v1141_v20 = vpop.xlane.xlu0 %1140  ;;  %v1382_v12 = vunpack.c.h.bf16 %v6657_v19  ;;  %v1380_v32 = vunpack.c.l.bf16 %v6657_v19  ;;  %5452 = vpow.bf16 %v1320_v0  ;;  %v1284_v27 = vmul.bf16 1069105081, %v6596_v18 }
 0x332   : > { %v1207_v8 = vsub.f32 %v8935_v61, %v1141_v20  ;;  %v1208_v55 = vsub.f32 %v8936_v56, %v1141_v20  ;;  %5454 = vpow.bf16 %v1323_v3 }
 0x333   : > { %v6671_v57 = vpop.eup %5436  ;;  %v1464_v11 = vadd.f32 %v1382_v12, %v1381_v1  ;;  %v1461_v62 = vadd.f32 %v1380_v32, %v1379_v35  ;;  %5456 = vpow.bf16 %v1278_v25  ;;  %v1287_v12 = vmul.bf16 1069105081, %v6598_v45 }
 0x334   : > { %v6673_v33 = vpop.eup %5438  ;;  %v6675_v14 = vpack.c.bf16 %v1209_v51, %v1207_v8  ;;  %v6677_v16 = vpack.c.bf16 %v1210_v38, %v1208_v55  ;;  %v1385_v37 = vunpack.c.h.bf16 %v6671_v57  ;;  %v1383_v30 = vunpack.c.l.bf16 %v6671_v57 }
 0x335   : > { %1465 = vadd.xlane.f32.xlu1 %v1464_v11  ;;  %1462 = vadd.xlane.f32.xlu0 %v1461_v62  ;;  %v1147_v4 = vpop.xlane.xlu0 %1146  ;;  %v6680_v10 = vpop.eup %5440  ;;  %v1386_v42 = vunpack.c.h.bf16 %v6673_v33  ;;  %v1384_v52 = vunpack.c.l.bf16 %v6673_v33  ;;  %5458 = vpow.bf16 %v1281_v44  ;;  %v1290_v45 = vmul.bf16 1069105081, %v6607_v9 }
 0x336   : > { %v1211_v6 = vsub.f32 %v8937_v58, %v1147_v4  ;;  %v1212_v53 = vsub.f32 %v8938_v46, %v1147_v4  ;;  %v6686_v28 = vpop.eup %5442  ;;  %v1357_v40 = vunpack.c.h.bf16 %v6680_v10  ;;  %v1355_v31 = vunpack.c.l.bf16 %v6680_v10 }
 0x337   : > { %v1358_v59 = vunpack.c.h.bf16 %v6686_v28  ;;  %v1356_v63 = vunpack.c.l.bf16 %v6686_v28  ;;  %v6702_v15 = vpop.eup %5444  ;;  %v1470_v13 = vadd.f32 %v1386_v42, %v1385_v37  ;;  %v1467_v1 = vadd.f32 %v1384_v52, %v1383_v30 }
 0x338   : > { %v6693_v26 = vpack.c.bf16 %v1213_v17, %v1211_v6  ;;  %v6695_v54 = vpack.c.bf16 %v1214_v48, %v1212_v53  ;;  %v6704_v20 = vpop.eup %5446  ;;  %5460 = vpow.bf16 %v1284_v27  ;;  %v1389_v51 = vunpack.c.h.bf16 %v6702_v15 }
 0x339   : > { %1423 = vadd.xlane.f32.xlu1 %v1422_v36  ;;  %1420 = vadd.xlane.f32.xlu0 %v1419_v5  ;;  %v6707_v35 = vpop.eup %5448  ;;  %v1428_v18 = vadd.f32 %v1358_v59, %v1357_v40  ;;  %v1425_v32 = vadd.f32 %v1356_v63, %v1355_v31  ;;  %v1390_v2 = vunpack.c.h.bf16 %v6704_v20  ;;  %v1387_v38 = vunpack.c.l.bf16 %v6702_v15 }
 0x33a   : > { %v6709_v24 = vpop.eup %5450  ;;  %v1388_v61 = vunpack.c.l.bf16 %v6704_v20  ;;  %5462 = vpow.bf16 %v1287_v12  ;;  %v1293_v8 = vmul.bf16 1069105081, %v6609_v49  ;;  %v1361_v56 = vunpack.c.h.bf16 %v6707_v35 }
 0x33b   : > { %v1362_v55 = vunpack.c.h.bf16 %v6709_v24  ;;  %v1359_v7 = vunpack.c.l.bf16 %v6707_v35  ;;  %v1360_v11 = vunpack.c.l.bf16 %v6709_v24  ;;  %v1476_v0 = vadd.f32 %v1390_v2, %v1389_v51 }
 0x33c   : > { %v6721_v62 = vpop.eup %5452  ;;  %v1473_v25 = vadd.f32 %v1388_v61, %v1387_v38  ;;  %5464 = vpow.bf16 %v1290_v45  ;;  %v1326_v9 = vmul.bf16 1069105081, %v6659_v39  ;;  %v1329_v49 = vmul.bf16 1069105081, %v6661_v47 }
 0x33d   : > { %1471 = vadd.xlane.f32.xlu1 %v1470_v13  ;;  %1468 = vadd.xlane.f32.xlu0 %v1467_v1  ;;  %v6723_v3 = vpop.eup %5454  ;;  %5466 = vpow.bf16 %v1293_v8  ;;  %v1434_v36 = vadd.f32 %v1362_v55, %v1361_v56  ;;  %v1431_v5 = vadd.f32 %v1360_v11, %v1359_v7  ;;  %v1393_v48 = vunpack.c.h.bf16 %v6721_v62 }
 0x33e   : > { %v6727_v4 = vpop.eup %5456  ;;  %v1394_v58 = vunpack.c.h.bf16 %v6723_v3  ;;  %v1391_v6 = vunpack.c.l.bf16 %v6721_v62  ;;  %v1392_v46 = vunpack.c.l.bf16 %v6723_v3  ;;  %5468 = vpow.bf16 %v1326_v9 }
 0x33f   : > { %5470 = vpow.bf16 %v1329_v49  ;;  %v1365_v47 = vunpack.c.h.bf16 %v6727_v4  ;;  %v1363_v52 = vunpack.c.l.bf16 %v6727_v4  ;;  %v1332_v40 = vmul.bf16 1069105081, %v6675_v14 }
 0x340   : > { %v6729_v17 = vpop.eup %5458  ;;  %v1482_v42 = vadd.f32 %v1394_v58, %v1393_v48  ;;  %v1479_v30 = vadd.f32 %v1392_v46, %v1391_v6  ;;  %v1335_v27 = vmul.bf16 1069105081, %v6677_v16  ;;  %v1338_v56 = vmul.bf16 1069105081, %v6693_v26 }
 0x341   : > { %1429 = vadd.xlane.f32.xlu1 %v1428_v18  ;;  %1426 = vadd.xlane.f32.xlu0 %v1425_v32  ;;  %v1366_v53 = vunpack.c.h.bf16 %v6729_v17  ;;  %v1364_v44 = vunpack.c.l.bf16 %v6729_v17  ;;  %5472 = vpow.bf16 %v1332_v40  ;;  %v1341_v55 = vmul.bf16 1069105081, %v6695_v54 }
 0x342   : > { %5474 = vpow.bf16 %v1335_v27  ;;  %v446_v27 = vld [vmem:[%s8784_s2] sm:$0xff] }
 0x343   : > { %v6735_v39 = vpop.eup %5460  ;;  %v1440_v13 = vadd.f32 %v1366_v53, %v1365_v47  ;;  %v1437_v1 = vadd.f32 %v1364_v44, %v1363_v52  ;;  %5476 = vpow.bf16 %v1338_v56 }
 0x344   : > { %v1369_v59 = vunpack.c.h.bf16 %v6735_v39  ;;  %v1367_v12 = vunpack.c.l.bf16 %v6735_v39  ;;  %5478 = vpow.bf16 %v1341_v55 }
 0x345   : > { %1477 = vadd.xlane.f32.xlu1 %v1476_v0  ;;  %1474 = vadd.xlane.f32.xlu0 %v1473_v25  ;;  %v6739_v37 = vpop.eup %5462 }
 0x346   : > { %v1370_v31 = vunpack.c.h.bf16 %v6739_v37  ;;  %v1368_v18 = vunpack.c.l.bf16 %v6739_v37 }
 0x347   : > { %v6747_v63 = vpop.eup %5464 }
 0x348   : > { %v6751_v32 = vpop.eup %5466  ;;  %v1446_v14 = vadd.f32 %v1370_v31, %v1369_v59  ;;  %v1373_v16 = vunpack.c.h.bf16 %v6747_v63  ;;  %v1443_v2 = vadd.f32 %v1368_v18, %v1367_v12  ;;  %v1371_v61 = vunpack.c.l.bf16 %v6747_v63  ;;  %v447_v12 = vld [vmem:[%s8786_s4] sm:$0xff] }
 0x349   : > { %1435 = vadd.xlane.f32.xlu1 %v1434_v36  ;;  %1432 = vadd.xlane.f32.xlu0 %v1431_v5  ;;  %v6754_v51 = vpop.eup %5468  ;;  %v1374_v38 = vunpack.c.h.bf16 %v6751_v32  ;;  %v1372_v45 = vunpack.c.l.bf16 %v6751_v32 }
 0x34a   : > { %v6759_v8 = vpop.eup %5470  ;;  %v1395_v0 = vunpack.c.l.bf16 %v6754_v51  ;;  %v1397_v36 = vunpack.c.h.bf16 %v6754_v51 }
 0x34b   : > { %v1452_v7 = vadd.f32 %v1374_v38, %v1373_v16  ;;  %v1449_v11 = vadd.f32 %v1372_v45, %v1371_v61  ;;  %v1396_v25 = vunpack.c.l.bf16 %v6759_v8  ;;  %v1398_v26 = vunpack.c.h.bf16 %v6759_v8 }
 0x34c   : > { %v6765_v9 = vpop.eup %5472 }
 0x34d   : > { %1483 = vadd.xlane.f32.xlu1 %v1482_v42  ;;  %1480 = vadd.xlane.f32.xlu0 %v1479_v30  ;;  %v1485_v49 = vadd.f32 %v1396_v25, %v1395_v0  ;;  %v6769_v54 = vpop.eup %5474  ;;  %v1488_v5 = vadd.f32 %v1398_v26, %v1397_v36  ;;  %v1399_v48 = vunpack.c.l.bf16 %v6765_v9  ;;  %v1401_v47 = vunpack.c.h.bf16 %v6765_v9 }
 0x34e   : > { %v1400_v58 = vunpack.c.l.bf16 %v6769_v54  ;;  %v6773_v6 = vpop.eup %5476  ;;  %v1402_v53 = vunpack.c.h.bf16 %v6769_v54 }
 0x34f   : > { %v6777_v42 = vpop.eup %5478  ;;  %v1403_v52 = vunpack.c.l.bf16 %v6773_v6  ;;  %v1405_v38 = vunpack.c.h.bf16 %v6773_v6 }
 0x350   : > { %v1491_v46 = vadd.f32 %v1400_v58, %v1399_v48  ;;  %v1494_v30 = vadd.f32 %v1402_v53, %v1401_v47  ;;  %v1404_v44 = vunpack.c.l.bf16 %v6777_v42  ;;  %v1406_v61 = vunpack.c.h.bf16 %v6777_v42 }
 0x351   : > { %1441 = vadd.xlane.f32.xlu1 %v1440_v13  ;;  %1438 = vadd.xlane.f32.xlu0 %v1437_v1  ;;  %v451_v13 = vld [vmem:[%s8794_s12] sm:$0xff] }
 0x352   : > { %v1497_v40 = vadd.f32 %v1404_v44, %v1403_v52  ;;  %v1500_v45 = vadd.f32 %v1406_v61, %v1405_v38 }
 0x355   : > { %1447 = vadd.xlane.f32.xlu1 %v1446_v14  ;;  %1444 = vadd.xlane.f32.xlu0 %v1443_v2 }
 0x359   : > { %1453 = vadd.xlane.f32.xlu1 %v1452_v7  ;;  %1450 = vadd.xlane.f32.xlu0 %v1449_v11 }
 0x35d   : > { %1486 = vadd.xlane.f32.xlu1 %v1485_v49 }
 0x361   : > { %1489 = vadd.xlane.f32.xlu1 %v1488_v5 }
 0x365   : > { %1492 = vadd.xlane.f32.xlu1 %v1491_v46 }
 0x369   : > { %1495 = vadd.xlane.f32.xlu1 %v1494_v30 }
 0x36d   : > { %1498 = vadd.xlane.f32.xlu1 %v1497_v40 }
 0x36f   : > { %623 = vperm.xlu0 %5412, %v446_v27  }
 0x374   : > { %v1409_v59 = vpop.xlane.xlu0 %1408  ;;  %v1412_v31 = vpop.xlane.xlu1 %1411 }
 0x375   : > { %5480 = vrcp.f32 %v1409_v59 }
 0x376   : > { %5482 = vrcp.f32 %v1412_v31 }
 0x37e   : > { %572 = vperm.xlu1 %5413, %v451_v13  }
 0x37f   : > { %v5481_v1 = vpop.eup %5480 }
 0x380   : > { %v5483_v18 = vpop.eup %5482 }
 0x381   : > { %v1535_v14 = vpack.c.bf16 %v5483_v18, %v5481_v1 }
 0x382   : > { %676 = vperm.xlu1 %5413, %v447_v12  }
 0x383   : > { %v1552_v16 = vmul.bf16 %v6546_v41, %v1535_v14  ;;  %v1551_v2 = vmul.bf16 %v6544_v50, %v1535_v14 }
 0x385   : > { %1583 = vmatprep.subr.bf16.mxu1 %v1552_v16 }
 0x386   : > { %1584 = vmatpush1.bf16.msra.mxu1 %v1551_v2 }
 0x38e   : > { %1501 = vadd.xlane.f32.xlu0 %v1500_v45 }
 0x3b0   : > { %v1457_v56 = vpop.xlane.xlu0 %1456  ;;  %v1460_v55 = vpop.xlane.xlu1 %1459 }
 0x3b4   : > { %v1415_v7 = vpop.xlane.xlu0 %1414  ;;  %v1418_v11 = vpop.xlane.xlu1 %1417 }
 0x3b5   : > { %5484 = vrcp.f32 %v1415_v7 }
 0x3b6   : > { %5486 = vrcp.f32 %v1418_v11 }
 0x3bf   : > { %v5485_v0 = vpop.eup %5484 }
 0x3c0   : > { %v5487_v25 = vpop.eup %5486 }
 0x3c1   : > { %v1536_v49 = vpack.c.bf16 %v5487_v25, %v5485_v0 }
 0x3c2   : > { %v1463_v41 = vpop.xlane.xlu0 %1462  ;;  %v1466_v36 = vpop.xlane.xlu1 %1465 }
 0x3c3   : > { %v1554_v50 = vmul.bf16 %v6601_v34, %v1536_v49  ;;  %v1553_v26 = vmul.bf16 %v6594_v43, %v1536_v49 }
 0x3c5   : > { %1585 = vmatprep.subr.bf16.mxu1 %v1554_v50 }
 0x3c6   : > { %1586 = vmatpush1.bf16.msra.mxu1 %v1553_v26  ;;  %v1421_v5 = vpop.xlane.xlu0 %1420  ;;  %v1424_v48 = vpop.xlane.xlu1 %1423 }
 0x3c7   : > { %5488 = vrcp.f32 %v1421_v5 }
 0x3c8   : > { %5490 = vrcp.f32 %v1424_v48 }
 0x3ca   : > { %v1469_v58 = vpop.xlane.xlu0 %1468  ;;  %v1472_v46 = vpop.xlane.xlu1 %1471 }
 0x3ce   : > { %v1427_v47 = vpop.xlane.xlu0 %1426  ;;  %v1430_v53 = vpop.xlane.xlu1 %1429 }
 0x3cf   : > { %5492 = vrcp.f32 %v1427_v47 }
 0x3d0   : > { %5494 = vrcp.f32 %v1430_v53 }
 0x3d1   : > { %v5489_v30 = vpop.eup %5488 }
 0x3d2   : > { %v5491_v52 = vpop.eup %5490  ;;  %v1475_v44 = vpop.xlane.xlu0 %1474 }
 0x3d3   : > { %v6796_v40 = vpop.xlane.xlu1 %1477  ;;  %v1537_v34 = vpack.c.bf16 %v5491_v52, %v5489_v30  ;;  %v8939_v30 = vld [vmem:[#allocation10_spill] sm:$0xff] }
 0x3d5   : > { %v1556_v43 = vmul.bf16 %v6638_v22, %v1537_v34  ;;  %v1555_v27 = vmul.bf16 %v6635_v60, %v1537_v34  ;;  %v8940_v34 = vld [vmem:[#allocation11_spill] sm:$0xff] }
 0x3d6   : > { %v1433_v59 = vpop.xlane.xlu0 %1432 }
 0x3d7   : > { %v1436_v31 = vpop.xlane.xlu1 %1435  ;;  %5496 = vrcp.f32 %v1433_v59  ;;  %1587 = vmatprep.subr.bf16.mxu1 %v1556_v43 }
 0x3d8   : > { %5498 = vrcp.f32 %v1436_v31  ;;  %1588 = vmatpush1.bf16.msra.mxu1 %v1555_v27 }
 0x3d9   : > { %v5493_v13 = vpop.eup %5492 }
 0x3da   : > { %v5495_v1 = vpop.eup %5494  ;;  %v6800_v12 = vpop.xlane.xlu0 %1480 }
 0x3db   : > { %v6802_v18 = vpop.xlane.xlu1 %1483  ;;  %v1538_v14 = vpack.c.bf16 %v5495_v1, %v5493_v13 }
 0x3dd   : > { %v1558_v16 = vmul.bf16 %v6686_v28, %v1538_v14  ;;  %v1557_v2 = vmul.bf16 %v6680_v10, %v1538_v14 }
 0x3de   : > { %v1439_v22 = vpop.xlane.xlu0 %1438 }
 0x3df   : > { %v1442_v38 = vpop.xlane.xlu1 %1441  ;;  %5500 = vrcp.f32 %v1439_v22  ;;  %1589 = vmatprep.subr.bf16.mxu1 %v1558_v16 }
 0x3e0   : > { %5502 = vrcp.f32 %v1442_v38  ;;  %1590 = vmatpush1.bf16.msra.mxu1 %v1557_v2 }
 0x3e1   : > { %v5497_v60 = vpop.eup %5496 }
 0x3e2   : > { %v5499_v61 = vpop.eup %5498  ;;  %v1445_v45 = vpop.xlane.xlu0 %1444 }
 0x3e3   : > { %v1448_v7 = vpop.xlane.xlu1 %1447  ;;  %5504 = vrcp.f32 %v1445_v45  ;;  %v1539_v11 = vpack.c.bf16 %v5499_v61, %v5497_v60 }
 0x3e4   : > { %5506 = vrcp.f32 %v1448_v7 }
 0x3e5   : > { %5508 = vrcp.f32 %v1457_v56  ;;  %v1560_v0 = vmul.bf16 %v6709_v24, %v1539_v11  ;;  %v1559_v28 = vmul.bf16 %v6707_v35, %v1539_v11 }
 0x3e6   : > { %5510 = vrcp.f32 %v1460_v55  ;;  %v1451_v10 = vpop.xlane.xlu0 %1450 }
 0x3e7   : > { %v1454_v25 = vpop.xlane.xlu1 %1453  ;;  %5512 = vrcp.f32 %v1451_v10  ;;  %1591 = vmatprep.subr.bf16.mxu1 %v1560_v0 }
 0x3e8   : > { %5514 = vrcp.f32 %v1454_v25  ;;  %1592 = vmatpush1.bf16.msra.mxu1 %v1559_v28  ;;  %v8943_v28 = vld [vmem:[#allocation7_spill] sm:$0xff] }
 0x3e9   : > { %v5501_v49 = vpop.eup %5500  ;;  %5516 = vrcp.f32 %v1463_v41 }
 0x3ea   : > { %v5503_v50 = vpop.eup %5502  ;;  %5518 = vrcp.f32 %v1466_v36 }
 0x3eb   : > { %v1487_v26 = vpop.xlane.xlu1 %1486  ;;  %v1540_v5 = vpack.c.bf16 %v5503_v50, %v5501_v49  ;;  %5520 = vrcp.f32 %v1469_v58 }
 0x3ec   : > { %5522 = vrcp.f32 %v1472_v46 }
 0x3ed   : > { %v5505_v48 = vpop.eup %5504  ;;  %v1562_v56 = vmul.bf16 %v6729_v17, %v1540_v5  ;;  %v1561_v24 = vmul.bf16 %v6727_v4, %v1540_v5  ;;  %5524 = vrcp.f32 %v1475_v44 }
 0x3ee   : > { %v5507_v35 = vpop.eup %5506  ;;  %v624_v55 = vpop.permute.xlu0 %623  ;;  %5526 = vrcp.f32 %v6796_v40 }
 0x3ef   : > { %v1490_v47 = vpop.xlane.xlu1 %1489  ;;  %v5509_v53 = vpop.eup %5508  ;;  %v664_v52 = vadd.f32 %v8939_v30, %v624_v55  ;;  %v666_v43 = vadd.f32 %v8940_v34, %v624_v55  ;;  %1593 = vmatprep.subr.bf16.mxu1 %v1562_v56  ;;  %v1541_v41 = vpack.c.bf16 %v5507_v35, %v5505_v48  ;;  %5528 = vrcp.f32 %v6800_v12 }
 0x3f0   : > { %v5511_v36 = vpop.eup %5510  ;;  %1594 = vmatpush1.bf16.msra.mxu1 %v1561_v24  ;;  %5530 = vrcp.f32 %v6802_v18 }
 0x3f1   : > { %v5513_v27 = vpop.eup %5512  ;;  %v670_v58 = vmul.f32 0.0625, %v664_v52  ;;  %v671_v59 = vmul.f32 0.0625, %v666_v43  ;;  %v1564_v17 = vmul.bf16 %v6739_v37, %v1541_v41  ;;  %v1563_v4 = vmul.bf16 %v6735_v39, %v1541_v41  ;;  %v8944_v43 = vld [vmem:[#allocation8_spill] sm:$0xff]  ;;  %v8945_v41 = vld [vmem:[#allocation9_spill] sm:$0xff] }
 0x3f2   : > { %v5515_v46 = vpop.eup %5514  ;;  %v1543_v44 = vpack.c.bf16 %v5511_v36, %v5509_v53  ;;  %5532 = vrcp.f32 %v1490_v47 }
 0x3f3   : > { %v1493_v31 = vpop.xlane.xlu1 %1492  ;;  %v5517_v13 = vpop.eup %5516  ;;  %v6815_v1 = vpack.c.bf16 %v670_v58, %v670_v58  ;;  %v6817_v14 = vpack.c.bf16 %v671_v59, %v671_v59  ;;  %1595 = vmatprep.subr.bf16.mxu1 %v1564_v17  ;;  %v1542_v16 = vpack.c.bf16 %v5515_v46, %v5513_v27  ;;  %5534 = vrcp.f32 %v1487_v26  ;;  %v8946_v58 = vld [vmem:[#allocation6_spill] sm:$0xff] }
 0x3f4   : > { %v5519_v2 = vpop.eup %5518  ;;  %1596 = vmatpush1.bf16.msra.mxu1 %v1563_v4  ;;  %v1568_v38 = vmul.bf16 %v6615_v23, %v1543_v44  ;;  %v1567_v7 = vmul.bf16 %v6611_v21, %v1543_v44 }
 0x3f5   : > { %8941 = vst [vmem:[#allocation16_spill] sm:$0xff] %v6815_v1  ;;  %8942 = vst [vmem:[#allocation17_spill] sm:$0xff] %v6817_v14  ;;  %1640 = vxpose.xlu0.c.b16.start.end [1/1] (short) %v6817_v14, 128  ;;  %1624 = vxpose.xlu1.c.b16.start.end [1/1] (short) %v6815_v1, 128  ;;  %v1566_v39 = vmul.bf16 %v6751_v32, %v1542_v16  ;;  %v1565_v37 = vmul.bf16 %v6747_v63, %v1542_v16  ;;  %v5521_v22 = vpop.eup %5520 }
 0x3f6   : > { %v1544_v60 = vpack.c.bf16 %v5519_v2, %v5517_v13  ;;  %v5523_v61 = vpop.eup %5522 }
 0x3f7   : > { %v1496_v40 = vpop.xlane.xlu1 %1495  ;;  %1597 = vmatprep.subr.bf16.mxu1 %v1566_v39  ;;  %v5525_v12 = vpop.eup %5524  ;;  %v1545_v11 = vpack.c.bf16 %v5523_v61, %v5521_v22 }
 0x3f8   : > { %1598 = vmatpush1.bf16.msra.mxu1 %v1565_v37  ;;  %v1570_v32 = vmul.bf16 %v6657_v19, %v1544_v60  ;;  %v5527_v63 = vpop.eup %5526  ;;  %5536 = vrcp.f32 %v1496_v40  ;;  %v1569_v23 = vmul.bf16 %v6651_v29, %v1544_v60 }
 0x3f9   : > { %1599 = vmatprep.subr.bf16.mxu1 %v1568_v38  ;;  %v5529_v0 = vpop.eup %5528  ;;  %v1572_v25 = vmul.bf16 %v6673_v33, %v1545_v11  ;;  %v1546_v49 = vpack.c.bf16 %v5527_v63, %v5525_v12  ;;  %5538 = vrcp.f32 %v1493_v31  ;;  %v1571_v19 = vmul.bf16 %v6671_v57, %v1545_v11 }
 0x3fa   : > { %v5531_v50 = vpop.eup %5530  ;;  %v8949_v31 = vmov 0  }
 0x3fb   : > { %v1499_v45 = vpop.xlane.xlu1 %1498  ;;  %v1574_v26 = vmul.bf16 %v6704_v20, %v1546_v49  ;;  %v1547_v5 = vpack.c.bf16 %v5531_v50, %v5529_v0  ;;  %v1573_v56 = vmul.bf16 %v6702_v15, %v1546_v49 }
 0x3fc   : > { %1600 = vmatpush1.bf16.msra.mxu1 %v1567_v7  ;;  %v5533_v48 = vpop.eup %5532  ;;  %5540 = vrcp.f32 %v1499_v45 }
 0x3fd   : > { %1601 = vmatprep.subr.bf16.mxu1 %v1570_v32  ;;  %v5535_v29 = vpop.eup %5534  ;;  %v1576_v33 = vmul.bf16 %v6723_v3, %v1547_v5  ;;  %v1575_v47 = vmul.bf16 %v6721_v62, %v1547_v5 }
 0x3fe   : > { %v1548_v24 = vpack.c.bf16 %v5533_v48, %v5535_v29 }
 0x3ff   : > { %v573_v18 = vpop.permute.xlu1 %572 }
 0x400   : > { %v615_v10 = vadd.f32 %v8943_v28, %v573_v18  ;;  %1602 = vmatpush1.bf16.msra.mxu1 %v1569_v23  ;;  %v1578_v57 = vmul.bf16 %v6759_v8, %v1548_v24  ;;  %v1577_v20 = vmul.bf16 %v6754_v51, %v1548_v24  ;;  %v613_v51 = vadd.f32 %v8946_v58, %v573_v18 }
 0x401   : > { %1603 = vmatprep.subr.bf16.mxu1 %v1572_v25 }
 0x402   : > { %v620_v21 = vpack.c.bf16 %v615_v10, %v615_v10  ;;  %v5537_v35 = vpop.eup %5536  ;;  %v619_v4 = vpack.c.bf16 %v613_v51, %v613_v51 }
 0x403   : > { %v5539_v55 = vpop.eup %5538  ;;  %v677_v52 = vpop.permute.xlu1 %676 }
 0x404   : > { %1615 = vmatprep.mubr.bf16.mxu1 %v620_v21  ;;  %1604 = vmatpush1.bf16.msra.mxu1 %v1571_v19  ;;  %v1549_v53 = vpack.c.bf16 %v5537_v35, %v5539_v55  ;;  %v717_v8 = vadd.f32 %v8944_v43, %v677_v52  ;;  %v719_v36 = vadd.f32 %v8945_v41, %v677_v52 }
 0x405   : > { %1605 = vmatprep.subr.bf16.mxu1 %v1574_v26 }
 0x406   : > { %v1580_v30 = vmul.bf16 %v6769_v54, %v1549_v53  ;;  %v1579_v15 = vmul.bf16 %v6765_v9, %v1549_v53  ;;  %v5541_v34 = vpop.eup %5540  ;;  %v6845_v17 = vpack.c.bf16 %v717_v8, %v717_v8  ;;  %v6847_v9 = vpack.c.bf16 %v719_v36, %v719_v36 }
 0x408   : > { %1606 = vmatpush1.bf16.msra.mxu1 %v1573_v56  ;;  %8947 = vst [vmem:[#allocation14_spill] sm:$0xff] %v6845_v17  ;;  %8948 = vst [vmem:[#allocation15_spill] sm:$0xff] %v6847_v9  ;;  %v1707_v46 = vsel %vm1705_vm2, %v6845_v17, 0 }
 0x409   : > { %1607 = vmatprep.subr.bf16.mxu1 %v1576_v33 }
 0x40c   : > { %1608 = vmatpush1.bf16.msra.mxu1 %v1575_v47 }
 0x40d   : > { %1609 = vmatprep.subr.bf16.mxu1 %v1578_v57 }
 0x410   : > { %1610 = vmatpush1.bf16.msra.mxu1 %v1577_v20 }
 0x411   : > { %1611 = vmatprep.subr.bf16.mxu1 %v1580_v30 }
 0x414   : > { %1612 = vmatpush1.bf16.msra.mxu1 %v1579_v15 }
 0x41b   : > { %v1502_v3 = vpop.xlane.xlu0 %1501 }
 0x41c   : > { %5542 = vrcp.f32 %v1502_v3 }
 0x426   : > { %v5543_v62 = vpop.eup %5542 }
 0x427   : > { %v1550_v27 = vpack.c.bf16 %v5543_v62, %v5541_v34 }
 0x429   : > { %v1582_v54 = vmul.bf16 %v6777_v42, %v1550_v27  ;;  %v1581_v59 = vmul.bf16 %v6773_v6, %v1550_v27 }
 0x42b   : > { %1613 = vmatprep.subr.bf16.mxu1 %v1582_v54 }
 0x42c   : > { %1614 = vmatpush1.bf16.msra.mxu1 %v1581_v59 }
 0x42d   : > { %5295 = vmatprep.subr.msk.bf16.mxu1 %vm1705_vm2, %v6847_v9 }
 0x42f   : > { %1616 = vmatmul.mubr.bf16.vlgmr.msra.gmra.mrb[44].mxu1 %v619_v4 }
 0x430   : > { %1713 = vmatpush1.bf16.msra.mxu1 %v1707_v46  ;;  %1744 = vmatprep.mubr.bf16.mxu1 %v8949_v31 }
 0x45b   : > { %v1632_v6 = vpop.trf.xlu1  ;;  %v1648_v40 = vpop.trf.xlu0 }
 0x45c   : > { %5296 = vmatmul.mubr.msk.bf16.vlgmr.msra.gmra.mrb[48].mxu1 %vm1656_vm3, %v1632_v6 }
 0x45d   : > { %1754 = vmatprep.mubr.bf16.mxu1 %v8949_v31 }
 0x45f   : > { %v1633_v42 = vpop.trf.xlu1  ;;  %v1649_v22 = vpop.trf.xlu0 }
 0x463   : > { %v1634_v13 = vpop.trf.xlu1  ;;  %v1650_v38 = vpop.trf.xlu0 }
 0x464   : > { %5297 = vmatmul.mubr.msk.bf16.gmra.mrb[52].mxu1 %vm1656_vm3, %v1633_v42 }
 0x465   : > { %1764 = vmatprep.mubr.bf16.mxu1 %v8949_v31 }
 0x467   : > { %v1635_v16 = vpop.trf.xlu1  ;;  %v1651_v60 = vpop.trf.xlu0 }
 0x46b   : > { %v1636_v44 = vpop.trf.xlu1  ;;  %v1652_v61 = vpop.trf.xlu0 }
 0x46c   : > { %5298 = vmatmul.mubr.msk.bf16.gmra.mrb[56].mxu1 %vm1656_vm3, %v1634_v13 }
 0x46d   : > { %1774 = vmatprep.mubr.bf16.mxu1 %v8949_v31 }
 0x46f   : > { %v1637_v2 = vpop.trf.xlu1  ;;  %v1653_v12 = vpop.trf.xlu0 }
 0x473   : > { %v1638_v39 = vpop.trf.xlu1  ;;  %v1654_v45 = vpop.trf.xlu0 }
 0x474   : > { %5299 = vmatmul.mubr.msk.bf16.gmra.mrb[60].mxu1 %vm1656_vm3, %v1635_v16 }
 0x475   : > { %1784 = vmatprep.mubr.bf16.mxu1 %v8949_v31 }
 0x477   : > { %v1639_v37 = vpop.trf.xlu1  ;;  %v1655_v7 = vpop.trf.xlu0 }
 0x47c   : > { %5300 = vmatmul.mubr.msk.bf16.gmra.mrb[64].mxu1 %vm1656_vm3, %v1636_v44 }
 0x47d   : > { %1794 = vmatprep.mubr.bf16.mxu1 %v8949_v31 }
 0x484   : > { %5301 = vmatmul.mubr.msk.bf16.gmra.mrb[68].mxu1 %vm1656_vm3, %v1637_v2 }
 0x485   : > { %1804 = vmatprep.mubr.bf16.mxu1 %v8949_v31 }
 0x48c   : > { %5302 = vmatmul.mubr.msk.bf16.gmra.mrb[72].mxu1 %vm1656_vm3, %v1638_v39 }
 0x48d   : > { %1814 = vmatprep.mubr.bf16.mxu1 %v8949_v31 }
 0x494   : > { %5303 = vmatmul.mubr.msk.bf16.gmra.mrb[76].mxu1 %vm1656_vm3, %v1639_v37 }
 0x495   : > { %1824 = vmatprep.mubr.bf16.mxu1 %v8949_v31 }
 0x49c   : > { %5304 = vmatmul.mubr.msk.bf16.gmra.mrb[80].mxu1 %vm1656_vm3, %v1648_v40 }
 0x49d   : > { %1834 = vmatprep.mubr.bf16.mxu1 %v8949_v31 }
 0x4a4   : > { %5305 = vmatmul.mubr.msk.bf16.gmra.mrb[84].mxu1 %vm1656_vm3, %v1649_v22 }
 0x4a5   : > { %1844 = vmatprep.mubr.bf16.mxu1 %v8949_v31 }
 0x4ac   : > { %5306 = vmatmul.mubr.msk.bf16.gmra.mrb[88].mxu1 %vm1656_vm3, %v1650_v38 }
 0x4ad   : > { %1854 = vmatprep.mubr.bf16.mxu1 %v8949_v31 }
 0x4b4   : > { %5307 = vmatmul.mubr.msk.bf16.gmra.mrb[92].mxu1 %vm1656_vm3, %v1651_v60 }
 0x4b5   : > { %1864 = vmatprep.mubr.bf16.mxu1 %v8949_v31 }
 0x4bc   : > { %5308 = vmatmul.mubr.msk.bf16.gmra.mrb[96].mxu1 %vm1656_vm3, %v1652_v61 }
 0x4bd   : > { %1874 = vmatprep.mubr.bf16.mxu1 %v8949_v31 }
 0x4c4   : > { %5309 = vmatmul.mubr.msk.bf16.gmra.mrb[100].mxu1 %vm1656_vm3, %v1653_v12 }
 0x4c5   : > { %1884 = vmatprep.mubr.bf16.mxu1 %v8949_v31 }
 0x4cc   : > { %5310 = vmatmul.mubr.msk.bf16.gmra.mrb[104].mxu1 %vm1656_vm3, %v1654_v45 }
 0x4cd   : > { %1894 = vmatprep.mubr.bf16.mxu1 %v8949_v31 }
 0x4d4   : > { %5311 = vmatmul.mubr.msk.bf16.gmra.mrb[108].mxu1 %vm1656_vm3, %v1655_v7 }
 0x502   : > { %v6885_v32 = vpop.f32.mrb[44].mxu1 }
 0x503   : > { %8950 = vst [vmem:[#allocation18_spill] sm:$0xff] %v6885_v32  ;;  %v6887_v11 = vpop.f32.mrb[45].mxu1 }
 0x504   : > { %8951 = vst [vmem:[#allocation19_spill] sm:$0xff] %v6887_v11  ;;  %v1621_v63 = vpop.f32.mrb[46].mxu1 }
 0x505   : > { %v1622_v18 = vpop.f32.mrb[47].mxu1 }
 0x52f   : > { %v6889_v23 = vpop.f32.mrb[48].mxu1 }
 0x530   : > { %v6891_v0 = vpop.f32.mrb[49].mxu1 }
 0x531   : > { %v1905_v28 = vmax.f32 %v6889_v23, %v6891_v0  ;;  %v6895_v10 = vpop.f32.mrb[50].mxu1 }
 0x532   : > { %v6897_v25 = vpop.f32.mrb[51].mxu1 }
 0x533   : > { %1906 = vmax.xlane.f32.xlu1 %v1905_v28  ;;  %v1908_v49 = vmax.f32 %v6895_v10, %v6897_v25 }
 0x535   : > { %1909 = vmax.xlane.f32.xlu0 %v1908_v49 }
 0x537   : > { %v6901_v50 = vpop.f32.mrb[52].mxu1 }
 0x538   : > { %v6903_v21 = vpop.f32.mrb[53].mxu1 }
 0x539   : > { %v1911_v19 = vmax.f32 %v6901_v50, %v6903_v21  ;;  %v6907_v26 = vpop.f32.mrb[54].mxu1 }
 0x53a   : > { %v6909_v5 = vpop.f32.mrb[55].mxu1 }
 0x53b   : > { %v1914_v48 = vmax.f32 %v6907_v26, %v6909_v5  ;;  %1912 = vmax.xlane.f32.xlu1 %v1911_v19 }
 0x53f   : > { %1915 = vmax.xlane.f32.xlu1 %v1914_v48  ;;  %v6913_v29 = vpop.f32.mrb[56].mxu1 }
 0x540   : > { %v6915_v56 = vpop.f32.mrb[57].mxu1 }
 0x541   : > { %v1917_v33 = vmax.f32 %v6913_v29, %v6915_v56  ;;  %v6919_v24 = vpop.f32.mrb[58].mxu1 }
 0x542   : > { %v6921_v35 = vpop.f32.mrb[59].mxu1 }
 0x543   : > { %v1920_v55 = vmax.f32 %v6919_v24, %v6921_v35  ;;  %1918 = vmax.xlane.f32.xlu1 %v1917_v33 }
 0x547   : > { %1921 = vmax.xlane.f32.xlu1 %v1920_v55  ;;  %v6925_v47 = vpop.f32.mrb[60].mxu1 }
 0x548   : > { %v6927_v57 = vpop.f32.mrb[61].mxu1 }
 0x549   : > { %v1923_v53 = vmax.f32 %v6925_v47, %v6927_v57  ;;  %v6931_v20 = vpop.f32.mrb[62].mxu1 }
 0x54a   : > { %v6933_v30 = vpop.f32.mrb[63].mxu1 }
 0x54b   : > { %1924 = vmax.xlane.f32.xlu1 %v1923_v53  ;;  %v1926_v15 = vmax.f32 %v6931_v20, %v6933_v30 }
 0x54d   : > { %1927 = vmax.xlane.f32.xlu0 %v1926_v15 }
 0x54f   : > { %v6937_v3 = vpop.f32.mrb[64].mxu1 }
 0x550   : > { %v6939_v52 = vpop.f32.mrb[65].mxu1 }
 0x551   : > { %v1929_v34 = vmax.f32 %v6937_v3, %v6939_v52  ;;  %v6943_v62 = vpop.f32.mrb[66].mxu1 }
 0x552   : > { %v6945_v43 = vpop.f32.mrb[67].mxu1 }
 0x553   : > { %1930 = vmax.xlane.f32.xlu1 %v1929_v34  ;;  %v1932_v8 = vmax.f32 %v6943_v62, %v6945_v43 }
 0x555   : > { %1933 = vmax.xlane.f32.xlu0 %v1932_v8 }
 0x557   : > { %v6949_v41 = vpop.f32.mrb[68].mxu1 }
 0x558   : > { %v6951_v36 = vpop.f32.mrb[69].mxu1 }
 0x559   : > { %v1935_v27 = vmax.f32 %v6949_v41, %v6951_v36  ;;  %v6955_v58 = vpop.f32.mrb[70].mxu1 }
 0x55a   : > { %v6957_v51 = vpop.f32.mrb[71].mxu1 }
 0x55b   : > { %1936 = vmax.xlane.f32.xlu1 %v1935_v27  ;;  %v1938_v54 = vmax.f32 %v6955_v58, %v6957_v51 }
 0x55d   : > { %1939 = vmax.xlane.f32.xlu0 %v1938_v54 }
 0x55f   : > { %v6961_v59 = vpop.f32.mrb[72].mxu1 }
 0x560   : > { %v6963_v4 = vpop.f32.mrb[73].mxu1 }
 0x561   : > { %v1941_v46 = vmax.f32 %v6961_v59, %v6963_v4  ;;  %v6967_v6 = vpop.f32.mrb[74].mxu1 }
 0x562   : > { %v6969_v42 = vpop.f32.mrb[75].mxu1 }
 0x563   : > { %v1944_v13 = vmax.f32 %v6967_v6, %v6969_v42  ;;  %1942 = vmax.xlane.f32.xlu1 %v1941_v46 }
 0x565   : > { %1945 = vmax.xlane.f32.xlu0 %v1944_v13 }
 0x567   : > { %v6973_v16 = vpop.f32.mrb[76].mxu1 }
 0x568   : > { %v6975_v44 = vpop.f32.mrb[77].mxu1 }
 0x569   : > { %v1947_v2 = vmax.f32 %v6973_v16, %v6975_v44  ;;  %v6979_v39 = vpop.f32.mrb[78].mxu1 }
 0x56a   : > { %v6981_v37 = vpop.f32.mrb[79].mxu1 }
 0x56b   : > { %v1950_v40 = vmax.f32 %v6979_v39, %v6981_v37  ;;  %1948 = vmax.xlane.f32.xlu1 %v1947_v2 }
 0x56d   : > { %1951 = vmax.xlane.f32.xlu0 %v1950_v40 }
 0x56f   : > { %v6985_v22 = vpop.f32.mrb[80].mxu1 }
 0x570   : > { %v6987_v38 = vpop.f32.mrb[81].mxu1 }
 0x571   : > { %v1953_v60 = vmax.f32 %v6985_v22, %v6987_v38  ;;  %v6991_v61 = vpop.f32.mrb[82].mxu1 }
 0x572   : > { %v6993_v12 = vpop.f32.mrb[83].mxu1 }
 0x573   : > { %v1956_v45 = vmax.f32 %v6991_v61, %v6993_v12  ;;  %1954 = vmax.xlane.f32.xlu1 %v1953_v60 }
 0x575   : > { %1957 = vmax.xlane.f32.xlu0 %v1956_v45 }
 0x577   : > { %v6997_v7 = vpop.f32.mrb[84].mxu1 }
 0x578   : > { %v6999_v63 = vpop.f32.mrb[85].mxu1 }
 0x579   : > { %v1959_v18 = vmax.f32 %v6997_v7, %v6999_v63  ;;  %v7003_v28 = vpop.f32.mrb[86].mxu1 }
 0x57a   : > { %v7005_v49 = vpop.f32.mrb[87].mxu1 }
 0x57b   : > { %v1962_v19 = vmax.f32 %v7003_v28, %v7005_v49  ;;  %1960 = vmax.xlane.f32.xlu1 %v1959_v18 }
 0x57d   : > { %1963 = vmax.xlane.f32.xlu0 %v1962_v19 }
 0x57f   : > { %v7009_v48 = vpop.f32.mrb[88].mxu1 }
 0x580   : > { %v7011_v33 = vpop.f32.mrb[89].mxu1 }
 0x581   : > { %v1965_v55 = vmax.f32 %v7009_v48, %v7011_v33  ;;  %v7015_v53 = vpop.f32.mrb[90].mxu1 }
 0x582   : > { %v7017_v15 = vpop.f32.mrb[91].mxu1 }
 0x583   : > { %v1968_v34 = vmax.f32 %v7015_v53, %v7017_v15  ;;  %1966 = vmax.xlane.f32.xlu1 %v1965_v55 }
 0x585   : > { %1969 = vmax.xlane.f32.xlu0 %v1968_v34 }
 0x587   : > { %v7021_v8 = vpop.f32.mrb[92].mxu1 }
 0x588   : > { %v7023_v27 = vpop.f32.mrb[93].mxu1 }
 0x589   : > { %v1971_v54 = vmax.f32 %v7021_v8, %v7023_v27  ;;  %v7027_v46 = vpop.f32.mrb[94].mxu1 }
 0x58a   : > { %v7029_v13 = vpop.f32.mrb[95].mxu1 }
 0x58b   : > { %v1974_v2 = vmax.f32 %v7027_v46, %v7029_v13  ;;  %1972 = vmax.xlane.f32.xlu1 %v1971_v54 }
 0x58d   : > { %1975 = vmax.xlane.f32.xlu0 %v1974_v2 }
 0x58f   : > { %v7033_v40 = vpop.f32.mrb[96].mxu1 }
 0x590   : > { %v7035_v60 = vpop.f32.mrb[97].mxu1 }
 0x591   : > { %8952 = vst [vmem:[#allocation22_spill] sm:$0xff] %v7035_v60  ;;  %v1977_v45 = vmax.f32 %v7033_v40, %v7035_v60  ;;  %v7039_v18 = vpop.f32.mrb[98].mxu1 }
 0x592   : > { %8953 = vst [vmem:[#allocation20_spill] sm:$0xff] %v7039_v18  ;;  %v7041_v19 = vpop.f32.mrb[99].mxu1 }
 0x593   : > { %8954 = vst [vmem:[#allocation21_spill] sm:$0xff] %v7041_v19  ;;  %v1980_v55 = vmax.f32 %v7039_v18, %v7041_v19  ;;  %1978 = vmax.xlane.f32.xlu1 %v1977_v45 }
 0x595   : > { %1981 = vmax.xlane.f32.xlu0 %v1980_v55 }
 0x597   : > { %v7045_v34 = vpop.f32.mrb[100].mxu1 }
 0x598   : > { %8955 = vst [vmem:[#allocation25_spill] sm:$0xff] %v7045_v34  ;;  %v7047_v54 = vpop.f32.mrb[101].mxu1 }
 0x599   : > { %8956 = vst [vmem:[#allocation26_spill] sm:$0xff] %v7047_v54  ;;  %v1983_v2 = vmax.f32 %v7045_v34, %v7047_v54  ;;  %v7051_v11 = vpop.f32.mrb[102].mxu1 }
 0x59a   : > { %8957 = vst [vmem:[#allocation23_spill] sm:$0xff] %v7051_v11  ;;  %v7053_v32 = vpop.f32.mrb[103].mxu1 }
 0x59b   : > { %8958 = vst [vmem:[#allocation24_spill] sm:$0xff] %v7053_v32  ;;  %v1986_v31 = vmax.f32 %v7051_v11, %v7053_v32  ;;  %1984 = vmax.xlane.f32.xlu1 %v1983_v2 }
 0x59d   : > { %1987 = vmax.xlane.f32.xlu0 %v1986_v31 }
 0x59f   : > { %v7057_v17 = vpop.f32.mrb[104].mxu1 }
 0x5a0   : > { %8959 = vst [vmem:[#allocation27_spill] sm:$0xff] %v7057_v17  ;;  %v7059_v45 = vpop.f32.mrb[105].mxu1 }
 0x5a1   : > { %8960 = vst [vmem:[#allocation28_spill] sm:$0xff] %v7059_v45  ;;  %v1989_v55 = vmax.f32 %v7057_v17, %v7059_v45  ;;  %v7063_v9 = vpop.f32.mrb[106].mxu1 }
 0x5a2   : > { %8961 = vst [vmem:[#allocation10_spill] sm:$0xff] %v7063_v9  ;;  %v7065_v14 = vpop.f32.mrb[107].mxu1 }
 0x5a3   : > { %8962 = vst [vmem:[#allocation11_spill] sm:$0xff] %v7065_v14  ;;  %v1992_v1 = vmax.f32 %v7063_v9, %v7065_v14  ;;  %1990 = vmax.xlane.f32.xlu1 %v1989_v55 }
 0x5a5   : > { %1993 = vmax.xlane.f32.xlu0 %v1992_v1 }
 0x5a7   : > { %v7069_v54 = vpop.f32.mrb[108].mxu1 }
 0x5a8   : > { %8963 = vst [vmem:[#allocation7_spill] sm:$0xff] %v7069_v54  ;;  %v7071_v2 = vpop.f32.mrb[109].mxu1 }
 0x5a9   : > { %8964 = vst [vmem:[#allocation8_spill] sm:$0xff] %v7071_v2  ;;  %v1995_v31 = vmax.f32 %v7069_v54, %v7071_v2  ;;  %v7075_v32 = vpop.f32.mrb[110].mxu1 }
 0x5aa   : > { %8965 = vst [vmem:[#allocation9_spill] sm:$0xff] %v7075_v32  ;;  %v7077_v11 = vpop.f32.mrb[111].mxu1 }
 0x5ab   : > { %8966 = vst [vmem:[#allocation6_spill] sm:$0xff] %v7077_v11  ;;  %v1998_v45 = vmax.f32 %v7075_v32, %v7077_v11  ;;  %1996 = vmax.xlane.f32.xlu1 %v1995_v31 }
 0x5ad   : > { %1999 = vmax.xlane.f32.xlu0 %v1998_v45 }
 0x5c0   : > { %v1907_v17 = vpop.xlane.xlu1 %1906 }
 0x5c1   : > { %v2001_v1 = vsub.f32 %v6889_v23, %v1907_v17  ;;  %v2002_v55 = vsub.f32 %v6891_v0, %v1907_v17 }
 0x5c2   : > { %v1910_v14 = vpop.xlane.xlu0 %1909 }
 0x5c3   : > { %v2003_v9 = vsub.f32 %v6895_v10, %v1910_v14  ;;  %v2004_v34 = vsub.f32 %v6897_v25, %v1910_v14 }
 0x5c5   : > { %v2065_v2 = vpack.c.bf16 %v2003_v9, %v2001_v1  ;;  %v2066_v54 = vpack.c.bf16 %v2004_v34, %v2002_v55 }
 0x5c7   : > { %v2098_v19 = vmul.bf16 1069105081, %v2065_v2  ;;  %v2101_v18 = vmul.bf16 1069105081, %v2066_v54 }
 0x5c8   : > { %v1913_v60 = vpop.xlane.xlu1 %1912 }
 0x5c9   : > { %5544 = vpow.bf16 %v2098_v19  ;;  %v2005_v45 = vsub.f32 %v6901_v50, %v1913_v60  ;;  %v2006_v31 = vsub.f32 %v6903_v21, %v1913_v60 }
 0x5ca   : > { %5546 = vpow.bf16 %v2101_v18 }
 0x5cc   : > { %v1916_v11 = vpop.xlane.xlu1 %1915 }
 0x5cd   : > { %v2007_v23 = vsub.f32 %v6907_v26, %v1916_v11  ;;  %v2008_v17 = vsub.f32 %v6909_v5, %v1916_v11 }
 0x5cf   : > { %v2067_v0 = vpack.c.bf16 %v2007_v23, %v2005_v45  ;;  %v2068_v10 = vpack.c.bf16 %v2008_v17, %v2006_v31 }
 0x5d0   : > { %v1919_v32 = vpop.xlane.xlu1 %1918 }
 0x5d1   : > { %v2104_v14 = vmul.bf16 1069105081, %v2067_v0  ;;  %v2107_v9 = vmul.bf16 1069105081, %v2068_v10  ;;  %v2009_v18 = vsub.f32 %v6913_v29, %v1919_v32  ;;  %v2010_v19 = vsub.f32 %v6915_v56, %v1919_v32 }
 0x5d3   : > { %5548 = vpow.bf16 %v2104_v14 }
 0x5d4   : > { %v7089_v25 = vpop.eup %5544  ;;  %5550 = vpow.bf16 %v2107_v9  ;;  %v1922_v50 = vpop.xlane.xlu1 %1921 }
 0x5d5   : > { %v7093_v34 = vpop.eup %5546  ;;  %v2011_v21 = vsub.f32 %v6919_v24, %v1922_v50  ;;  %v2012_v11 = vsub.f32 %v6921_v35, %v1922_v50  ;;  %v2195_v26 = vunpack.c.h.bf16 %v7089_v25  ;;  %v2193_v5 = vunpack.c.l.bf16 %v7089_v25 }
 0x5d6   : > { %v2196_v60 = vunpack.c.h.bf16 %v7093_v34  ;;  %v2194_v54 = vunpack.c.l.bf16 %v7093_v34 }
 0x5d7   : > { %v2069_v2 = vpack.c.bf16 %v2011_v21, %v2009_v18  ;;  %v2070_v1 = vpack.c.bf16 %v2012_v11, %v2010_v19 }
 0x5d8   : > { %v1925_v29 = vpop.xlane.xlu1 %1924  ;;  %v2260_v55 = vadd.f32 %v2196_v60, %v2195_v26  ;;  %v2257_v32 = vadd.f32 %v2194_v54, %v2193_v5 }
 0x5d9   : > { %v2110_v56 = vmul.bf16 1069105081, %v2069_v2  ;;  %v2113_v45 = vmul.bf16 1069105081, %v2070_v1  ;;  %v2013_v31 = vsub.f32 %v6925_v47, %v1925_v29  ;;  %v2014_v35 = vsub.f32 %v6927_v57, %v1925_v29 }
 0x5da   : > { %2261 = vadd.xlane.f32.xlu0 %v2260_v55  ;;  %2258 = vadd.xlane.f32.xlu1 %v2257_v32  ;;  %v1928_v24 = vpop.xlane.xlu0 %1927 }
 0x5db   : > { %5552 = vpow.bf16 %v2110_v56  ;;  %v2015_v23 = vsub.f32 %v6931_v20, %v1928_v24  ;;  %v2016_v17 = vsub.f32 %v6933_v30, %v1928_v24 }
 0x5dc   : > { %5554 = vpow.bf16 %v2113_v45 }
 0x5dd   : > { %v2071_v0 = vpack.c.bf16 %v2015_v23, %v2013_v31  ;;  %v2072_v10 = vpack.c.bf16 %v2016_v17, %v2014_v35 }
 0x5de   : > { %v7105_v14 = vpop.eup %5548 }
 0x5df   : > { %v7107_v9 = vpop.eup %5550  ;;  %v2116_v18 = vmul.bf16 1069105081, %v2071_v0  ;;  %v2119_v19 = vmul.bf16 1069105081, %v2072_v10  ;;  %v2199_v47 = vunpack.c.h.bf16 %v7105_v14  ;;  %v2197_v50 = vunpack.c.l.bf16 %v7105_v14 }
 0x5e0   : > { %v1931_v21 = vpop.xlane.xlu1 %1930  ;;  %v2200_v57 = vunpack.c.h.bf16 %v7107_v9  ;;  %v2198_v20 = vunpack.c.l.bf16 %v7107_v9 }
 0x5e1   : > { %5556 = vpow.bf16 %v2116_v18  ;;  %v2017_v5 = vsub.f32 %v6937_v3, %v1931_v21  ;;  %v2018_v60 = vsub.f32 %v6939_v52, %v1931_v21 }
 0x5e2   : > { %5558 = vpow.bf16 %v2119_v19  ;;  %v1934_v30 = vpop.xlane.xlu0 %1933  ;;  %v2266_v11 = vadd.f32 %v2200_v57, %v2199_v47  ;;  %v2263_v26 = vadd.f32 %v2198_v20, %v2197_v50 }
 0x5e3   : > { %v2019_v54 = vsub.f32 %v6943_v62, %v1934_v30  ;;  %v2020_v2 = vsub.f32 %v6945_v43, %v1934_v30 }
 0x5e4   : > { %2267 = vadd.xlane.f32.xlu0 %v2266_v11  ;;  %2264 = vadd.xlane.f32.xlu1 %v2263_v26 }
 0x5e5   : > { %v2073_v1 = vpack.c.bf16 %v2019_v54, %v2017_v5  ;;  %v2074_v29 = vpack.c.bf16 %v2020_v2, %v2018_v60 }
 0x5e6   : > { %v7117_v55 = vpop.eup %5552 }
 0x5e7   : > { %v7119_v32 = vpop.eup %5554  ;;  %v2122_v56 = vmul.bf16 1069105081, %v2073_v1  ;;  %v2125_v45 = vmul.bf16 1069105081, %v2074_v29  ;;  %v2203_v31 = vunpack.c.h.bf16 %v7117_v55  ;;  %v2201_v3 = vunpack.c.l.bf16 %v7117_v55 }
 0x5e8   : > { %v1937_v24 = vpop.xlane.xlu1 %1936  ;;  %v2204_v52 = vunpack.c.h.bf16 %v7119_v32  ;;  %v2202_v62 = vunpack.c.l.bf16 %v7119_v32 }
 0x5e9   : > { %5560 = vpow.bf16 %v2122_v56  ;;  %v2021_v17 = vsub.f32 %v6949_v41, %v1937_v24  ;;  %v2022_v0 = vsub.f32 %v6951_v36, %v1937_v24 }
 0x5ea   : > { %5562 = vpow.bf16 %v2125_v45  ;;  %v1940_v43 = vpop.xlane.xlu0 %1939  ;;  %v2272_v35 = vadd.f32 %v2204_v52, %v2203_v31  ;;  %v2269_v23 = vadd.f32 %v2202_v62, %v2201_v3 }
 0x5eb   : > { %v2023_v10 = vsub.f32 %v6955_v58, %v1940_v43  ;;  %v2024_v18 = vsub.f32 %v6957_v51, %v1940_v43 }
 0x5ec   : > { %v7129_v19 = vpop.eup %5556  ;;  %2273 = vadd.xlane.f32.xlu0 %v2272_v35  ;;  %2270 = vadd.xlane.f32.xlu1 %v2269_v23 }
 0x5ed   : > { %v7131_v47 = vpop.eup %5558  ;;  %v2075_v50 = vpack.c.bf16 %v2023_v10, %v2021_v17  ;;  %v2076_v21 = vpack.c.bf16 %v2024_v18, %v2022_v0  ;;  %v2207_v57 = vunpack.c.h.bf16 %v7129_v19  ;;  %v2205_v20 = vunpack.c.l.bf16 %v7129_v19 }
 0x5ee   : > { %v2208_v41 = vunpack.c.h.bf16 %v7131_v47  ;;  %v2206_v36 = vunpack.c.l.bf16 %v7131_v47 }
 0x5ef   : > { %v2128_v30 = vmul.bf16 1069105081, %v2075_v50  ;;  %v2131_v58 = vmul.bf16 1069105081, %v2076_v21 }
 0x5f0   : > { %v1943_v11 = vpop.xlane.xlu1 %1942  ;;  %v2278_v51 = vadd.f32 %v2208_v41, %v2207_v57  ;;  %v2275_v26 = vadd.f32 %v2206_v36, %v2205_v20 }
 0x5f1   : > { %5564 = vpow.bf16 %v2128_v30  ;;  %v2025_v60 = vsub.f32 %v6961_v59, %v1943_v11  ;;  %v2026_v54 = vsub.f32 %v6963_v4, %v1943_v11 }
 0x5f2   : > { %5566 = vpow.bf16 %v2131_v58  ;;  %2279 = vadd.xlane.f32.xlu0 %v2278_v51  ;;  %2276 = vadd.xlane.f32.xlu1 %v2275_v26  ;;  %v1946_v5 = vpop.xlane.xlu0 %1945 }
 0x5f3   : > { %v2027_v2 = vsub.f32 %v6967_v6, %v1946_v5  ;;  %v2028_v1 = vsub.f32 %v6969_v42, %v1946_v5 }
 0x5f4   : > { %v7141_v29 = vpop.eup %5560 }
 0x5f5   : > { %v7143_v56 = vpop.eup %5562  ;;  %v2077_v45 = vpack.c.bf16 %v2027_v2, %v2025_v60  ;;  %v2078_v31 = vpack.c.bf16 %v2028_v1, %v2026_v54  ;;  %v2211_v3 = vunpack.c.h.bf16 %v7141_v29  ;;  %v2209_v24 = vunpack.c.l.bf16 %v7141_v29 }
 0x5f6   : > { %v2212_v52 = vunpack.c.h.bf16 %v7143_v56  ;;  %v2210_v59 = vunpack.c.l.bf16 %v7143_v56 }
 0x5f7   : > { %v2134_v62 = vmul.bf16 1069105081, %v2077_v45  ;;  %v2137_v4 = vmul.bf16 1069105081, %v2078_v31 }
 0x5f8   : > { %v1949_v43 = vpop.xlane.xlu1 %1948  ;;  %v2284_v6 = vadd.f32 %v2212_v52, %v2211_v3  ;;  %v2281_v35 = vadd.f32 %v2210_v59, %v2209_v24 }
 0x5f9   : > { %5568 = vpow.bf16 %v2134_v62  ;;  %v2029_v23 = vsub.f32 %v6973_v16, %v1949_v43  ;;  %v2030_v17 = vsub.f32 %v6975_v44, %v1949_v43 }
 0x5fa   : > { %5570 = vpow.bf16 %v2137_v4  ;;  %2285 = vadd.xlane.f32.xlu0 %v2284_v6  ;;  %2282 = vadd.xlane.f32.xlu1 %v2281_v35  ;;  %v1952_v42 = vpop.xlane.xlu0 %1951 }
 0x5fb   : > { %v2031_v0 = vsub.f32 %v6979_v39, %v1952_v42  ;;  %v2032_v10 = vsub.f32 %v6981_v37, %v1952_v42 }
 0x5fc   : > { %v7153_v18 = vpop.eup %5564 }
 0x5fd   : > { %v7155_v50 = vpop.eup %5566  ;;  %v2079_v21 = vpack.c.bf16 %v2031_v0, %v2029_v23  ;;  %v2080_v57 = vpack.c.bf16 %v2032_v10, %v2030_v17  ;;  %v2215_v20 = vunpack.c.h.bf16 %v7153_v18  ;;  %v2213_v41 = vunpack.c.l.bf16 %v7153_v18 }
 0x5fe   : > { %v2216_v36 = vunpack.c.h.bf16 %v7155_v50  ;;  %v2214_v16 = vunpack.c.l.bf16 %v7155_v50 }
 0x5ff   : > { %v2140_v30 = vmul.bf16 1069105081, %v2079_v21  ;;  %v2143_v44 = vmul.bf16 1069105081, %v2080_v57 }
 0x600   : > { %v1955_v58 = vpop.xlane.xlu1 %1954  ;;  %v2290_v39 = vadd.f32 %v2216_v36, %v2215_v20  ;;  %v2287_v11 = vadd.f32 %v2214_v16, %v2213_v41 }
 0x601   : > { %5572 = vpow.bf16 %v2140_v30  ;;  %v2033_v51 = vsub.f32 %v6985_v22, %v1955_v58  ;;  %v2034_v26 = vsub.f32 %v6987_v38, %v1955_v58 }
 0x602   : > { %5574 = vpow.bf16 %v2143_v44  ;;  %2291 = vadd.xlane.f32.xlu0 %v2290_v39  ;;  %2288 = vadd.xlane.f32.xlu1 %v2287_v11  ;;  %v1958_v37 = vpop.xlane.xlu0 %1957 }
 0x603   : > { %v2035_v5 = vsub.f32 %v6991_v61, %v1958_v37  ;;  %v2036_v60 = vsub.f32 %v6993_v12, %v1958_v37 }
 0x604   : > { %v7165_v54 = vpop.eup %5568 }
 0x605   : > { %v7167_v2 = vpop.eup %5570  ;;  %v2081_v1 = vpack.c.bf16 %v2035_v5, %v2033_v51  ;;  %v2082_v45 = vpack.c.bf16 %v2036_v60, %v2034_v26  ;;  %v2219_v31 = vunpack.c.h.bf16 %v7165_v54  ;;  %v2217_v3 = vunpack.c.l.bf16 %v7165_v54 }
 0x606   : > { %v2220_v24 = vunpack.c.h.bf16 %v7167_v2  ;;  %v2218_v22 = vunpack.c.l.bf16 %v7167_v2 }
 0x607   : > { %v2146_v52 = vmul.bf16 1069105081, %v2081_v1  ;;  %v2149_v38 = vmul.bf16 1069105081, %v2082_v45 }
 0x608   : > { %v1961_v59 = vpop.xlane.xlu1 %1960  ;;  %v2296_v61 = vadd.f32 %v2220_v24, %v2219_v31  ;;  %v2293_v62 = vadd.f32 %v2218_v22, %v2217_v3 }
 0x609   : > { %5576 = vpow.bf16 %v2146_v52  ;;  %v2037_v4 = vsub.f32 %v6997_v7, %v1961_v59  ;;  %v2038_v43 = vsub.f32 %v6999_v63, %v1961_v59 }
 0x60a   : > { %5578 = vpow.bf16 %v2149_v38  ;;  %2297 = vadd.xlane.f32.xlu0 %v2296_v61  ;;  %2294 = vadd.xlane.f32.xlu1 %v2293_v62  ;;  %v1964_v12 = vpop.xlane.xlu0 %1963 }
 0x60b   : > { %v2039_v6 = vsub.f32 %v7003_v28, %v1964_v12  ;;  %v2040_v35 = vsub.f32 %v7005_v49, %v1964_v12 }
 0x60c   : > { %v7177_v42 = vpop.eup %5572 }
 0x60d   : > { %v7179_v23 = vpop.eup %5574  ;;  %v2083_v17 = vpack.c.bf16 %v2039_v6, %v2037_v4  ;;  %v2084_v0 = vpack.c.bf16 %v2040_v35, %v2038_v43  ;;  %v2223_v10 = vunpack.c.h.bf16 %v7177_v42  ;;  %v2221_v21 = vunpack.c.l.bf16 %v7177_v42 }
 0x60e   : > { %v2224_v57 = vunpack.c.h.bf16 %v7179_v23  ;;  %v2222_v7 = vunpack.c.l.bf16 %v7179_v23 }
 0x60f   : > { %v2152_v20 = vmul.bf16 1069105081, %v2083_v17  ;;  %v2155_v63 = vmul.bf16 1069105081, %v2084_v0 }
 0x610   : > { %v1967_v41 = vpop.xlane.xlu1 %1966  ;;  %v2302_v28 = vadd.f32 %v2224_v57, %v2223_v10  ;;  %v2299_v36 = vadd.f32 %v2222_v7, %v2221_v21  ;;  %v8967_v10 = vld [vmem:[#allocation22_spill] sm:$0xff]  ;;  %v8968_v57 = vld [vmem:[#allocation20_spill] sm:$0xff] }
 0x611   : > { %5580 = vpow.bf16 %v2152_v20  ;;  %v2041_v16 = vsub.f32 %v7009_v48, %v1967_v41  ;;  %v2042_v30 = vsub.f32 %v7011_v33, %v1967_v41  ;;  %v8969_v20 = vld [vmem:[#allocation21_spill] sm:$0xff] }
 0x612   : > { %5582 = vpow.bf16 %v2155_v63  ;;  %2303 = vadd.xlane.f32.xlu0 %v2302_v28  ;;  %2300 = vadd.xlane.f32.xlu1 %v2299_v36  ;;  %v1970_v49 = vpop.xlane.xlu0 %1969 }
 0x613   : > { %v2043_v44 = vsub.f32 %v7015_v53, %v1970_v49  ;;  %v2044_v58 = vsub.f32 %v7017_v15, %v1970_v49 }
 0x614   : > { %v7189_v39 = vpop.eup %5576 }
 0x615   : > { %v7191_v11 = vpop.eup %5578  ;;  %v2085_v37 = vpack.c.bf16 %v2043_v44, %v2041_v16  ;;  %v2086_v51 = vpack.c.bf16 %v2044_v58, %v2042_v30  ;;  %v2227_v26 = vunpack.c.h.bf16 %v7189_v39  ;;  %v2225_v5 = vunpack.c.l.bf16 %v7189_v39 }
 0x616   : > { %v2228_v60 = vunpack.c.h.bf16 %v7191_v11  ;;  %v2226_v48 = vunpack.c.l.bf16 %v7191_v11 }
 0x617   : > { %v2158_v1 = vmul.bf16 1069105081, %v2085_v37  ;;  %v2161_v33 = vmul.bf16 1069105081, %v2086_v51 }
 0x618   : > { %v1973_v45 = vpop.xlane.xlu1 %1972  ;;  %v2308_v53 = vadd.f32 %v2228_v60, %v2227_v26  ;;  %v2305_v31 = vadd.f32 %v2226_v48, %v2225_v5  ;;  %v8970_v48 = vld [vmem:[#allocation25_spill] sm:$0xff] }
 0x619   : > { %5584 = vpow.bf16 %v2158_v1  ;;  %v2045_v3 = vsub.f32 %v7021_v8, %v1973_v45  ;;  %v2046_v24 = vsub.f32 %v7023_v27, %v1973_v45 }
 0x61a   : > { %5586 = vpow.bf16 %v2161_v33  ;;  %2309 = vadd.xlane.f32.xlu0 %v2308_v53  ;;  %2306 = vadd.xlane.f32.xlu1 %v2305_v31  ;;  %v1976_v15 = vpop.xlane.xlu0 %1975  ;;  %v8971_v33 = vld [vmem:[#allocation26_spill] sm:$0xff]  ;;  %v8972_v53 = vld [vmem:[#allocation23_spill] sm:$0xff] }
 0x61b   : > { %v2047_v22 = vsub.f32 %v7027_v46, %v1976_v15  ;;  %v2048_v52 = vsub.f32 %v7029_v13, %v1976_v15  ;;  %v8973_v15 = vld [vmem:[#allocation24_spill] sm:$0xff] }
 0x61c   : > { %v7201_v38 = vpop.eup %5580 }
 0x61d   : > { %v7203_v59 = vpop.eup %5582  ;;  %v2087_v61 = vpack.c.bf16 %v2047_v22, %v2045_v3  ;;  %v2088_v62 = vpack.c.bf16 %v2048_v52, %v2046_v24  ;;  %v2231_v12 = vunpack.c.h.bf16 %v7201_v38  ;;  %v2229_v4 = vunpack.c.l.bf16 %v7201_v38 }
 0x61e   : > { %v2232_v43 = vunpack.c.h.bf16 %v7203_v59  ;;  %v2230_v8 = vunpack.c.l.bf16 %v7203_v59 }
 0x61f   : > { %v2164_v6 = vmul.bf16 1069105081, %v2087_v61  ;;  %v2167_v27 = vmul.bf16 1069105081, %v2088_v62 }
 0x620   : > { %v1979_v35 = vpop.xlane.xlu1 %1978  ;;  %v2314_v46 = vadd.f32 %v2232_v43, %v2231_v12  ;;  %v2311_v17 = vadd.f32 %v2230_v8, %v2229_v4 }
 0x621   : > { %5588 = vpow.bf16 %v2164_v6  ;;  %v2049_v0 = vsub.f32 %v7033_v40, %v1979_v35  ;;  %v2050_v21 = vsub.f32 %v8967_v10, %v1979_v35  ;;  %v8975_v10 = vld [vmem:[#allocation28_spill] sm:$0xff] }
 0x622   : > { %5590 = vpow.bf16 %v2167_v27  ;;  %2315 = vadd.xlane.f32.xlu0 %v2314_v46  ;;  %2312 = vadd.xlane.f32.xlu1 %v2311_v17  ;;  %v1982_v13 = vpop.xlane.xlu0 %1981 }
 0x623   : > { %v2051_v7 = vsub.f32 %v8968_v57, %v1982_v13  ;;  %v2052_v63 = vsub.f32 %v8969_v20, %v1982_v13  ;;  %v8974_v13 = vld [vmem:[#allocation27_spill] sm:$0xff]  ;;  %v8976_v57 = vld [vmem:[#allocation10_spill] sm:$0xff] }
 0x624   : > { %v7213_v41 = vpop.eup %5584  ;;  %v8977_v20 = vld [vmem:[#allocation11_spill] sm:$0xff] }
 0x625   : > { %v7215_v28 = vpop.eup %5586  ;;  %v2089_v36 = vpack.c.bf16 %v2051_v7, %v2049_v0  ;;  %v2090_v49 = vpack.c.bf16 %v2052_v63, %v2050_v21  ;;  %v2235_v16 = vunpack.c.h.bf16 %v7213_v41  ;;  %v2233_v30 = vunpack.c.l.bf16 %v7213_v41 }
 0x626   : > { %v2236_v44 = vunpack.c.h.bf16 %v7215_v28  ;;  %v2234_v40 = vunpack.c.l.bf16 %v7215_v28 }
 0x627   : > { %v2170_v58 = vmul.bf16 1069105081, %v2089_v36  ;;  %v2173_v37 = vmul.bf16 1069105081, %v2090_v49 }
 0x628   : > { %v1985_v51 = vpop.xlane.xlu1 %1984  ;;  %v2320_v26 = vadd.f32 %v2236_v44, %v2235_v16  ;;  %v2317_v5 = vadd.f32 %v2234_v40, %v2233_v30 }
 0x629   : > { %5592 = vpow.bf16 %v2170_v58  ;;  %v2053_v1 = vsub.f32 %v8970_v48, %v1985_v51  ;;  %v2054_v45 = vsub.f32 %v8971_v33, %v1985_v51  ;;  %v8978_v33 = vld [vmem:[#allocation7_spill] sm:$0xff] }
 0x62a   : > { %5594 = vpow.bf16 %v2173_v37  ;;  %2321 = vadd.xlane.f32.xlu0 %v2320_v26  ;;  %2318 = vadd.xlane.f32.xlu1 %v2317_v5  ;;  %v1988_v60 = vpop.xlane.xlu0 %1987 }
 0x62b   : > { %v2055_v31 = vsub.f32 %v8972_v53, %v1988_v60  ;;  %v2056_v3 = vsub.f32 %v8973_v15, %v1988_v60  ;;  %v8979_v53 = vld [vmem:[#allocation8_spill] sm:$0xff]  ;;  %v8980_v15 = vld [vmem:[#allocation9_spill] sm:$0xff] }
 0x62c   : > { %v7225_v24 = vpop.eup %5588 }
 0x62d   : > { %v7227_v22 = vpop.eup %5590  ;;  %v2091_v52 = vpack.c.bf16 %v2055_v31, %v2053_v1  ;;  %v2092_v61 = vpack.c.bf16 %v2056_v3, %v2054_v45  ;;  %v2239_v62 = vunpack.c.h.bf16 %v7225_v24  ;;  %v2237_v12 = vunpack.c.l.bf16 %v7225_v24 }
 0x62e   : > { %v2240_v4 = vunpack.c.h.bf16 %v7227_v22  ;;  %v2238_v43 = vunpack.c.l.bf16 %v7227_v22 }
 0x62f   : > { %v2176_v8 = vmul.bf16 1069105081, %v2091_v52  ;;  %v2179_v6 = vmul.bf16 1069105081, %v2092_v61  ;;  %v8981_v52 = vld [vmem:[#allocation6_spill] sm:$0xff] }
 0x630   : > { %v1991_v27 = vpop.xlane.xlu1 %1990  ;;  %v2326_v35 = vadd.f32 %v2240_v4, %v2239_v62  ;;  %v2323_v46 = vadd.f32 %v2238_v43, %v2237_v12 }
 0x631   : > { %5596 = vpow.bf16 %v2176_v8  ;;  %v2057_v0 = vsub.f32 %v8974_v13, %v1991_v27  ;;  %v2058_v21 = vsub.f32 %v8975_v10, %v1991_v27 }
 0x632   : > { %5598 = vpow.bf16 %v2179_v6  ;;  %2327 = vadd.xlane.f32.xlu0 %v2326_v35  ;;  %2324 = vadd.xlane.f32.xlu1 %v2323_v46  ;;  %v1994_v17 = vpop.xlane.xlu0 %1993 }
 0x633   : > { %v2059_v7 = vsub.f32 %v8976_v57, %v1994_v17  ;;  %v2060_v63 = vsub.f32 %v8977_v20, %v1994_v17 }
 0x634   : > { %v7237_v36 = vpop.eup %5592 }
 0x635   : > { %v7239_v49 = vpop.eup %5594  ;;  %v2093_v16 = vpack.c.bf16 %v2059_v7, %v2057_v0  ;;  %v2094_v30 = vpack.c.bf16 %v2060_v63, %v2058_v21  ;;  %v2243_v44 = vunpack.c.h.bf16 %v7237_v36  ;;  %v2241_v40 = vunpack.c.l.bf16 %v7237_v36 }
 0x636   : > { %v2244_v58 = vunpack.c.h.bf16 %v7239_v49  ;;  %v2242_v37 = vunpack.c.l.bf16 %v7239_v49 }
 0x637   : > { %v2182_v51 = vmul.bf16 1069105081, %v2093_v16  ;;  %v2185_v26 = vmul.bf16 1069105081, %v2094_v30 }
 0x638   : > { %v1997_v5 = vpop.xlane.xlu1 %1996  ;;  %v2332_v60 = vadd.f32 %v2244_v58, %v2243_v44  ;;  %v2329_v48 = vadd.f32 %v2242_v37, %v2241_v40 }
 0x639   : > { %5600 = vpow.bf16 %v2182_v51  ;;  %v2061_v45 = vsub.f32 %v8978_v33, %v1997_v5  ;;  %v2062_v31 = vsub.f32 %v8979_v53, %v1997_v5 }
 0x63a   : > { %5602 = vpow.bf16 %v2185_v26  ;;  %2333 = vadd.xlane.f32.xlu0 %v2332_v60  ;;  %2330 = vadd.xlane.f32.xlu1 %v2329_v48  ;;  %v2000_v1 = vpop.xlane.xlu0 %1999  ;;  %v448_v48 = vld [vmem:[%s8788_s6] sm:$0xff] }
 0x63b   : > { %v2063_v3 = vsub.f32 %v8980_v15, %v2000_v1  ;;  %v2064_v61 = vsub.f32 %v8981_v52, %v2000_v1 }
 0x63c   : > { %v7249_v62 = vpop.eup %5596 }
 0x63d   : > { %v7251_v12 = vpop.eup %5598  ;;  %v2095_v4 = vpack.c.bf16 %v2063_v3, %v2061_v45  ;;  %v2096_v43 = vpack.c.bf16 %v2064_v61, %v2062_v31  ;;  %v2247_v8 = vunpack.c.h.bf16 %v7249_v62  ;;  %v2245_v6 = vunpack.c.l.bf16 %v7249_v62 }
 0x63e   : > { %v2248_v27 = vunpack.c.h.bf16 %v7251_v12  ;;  %v2246_v35 = vunpack.c.l.bf16 %v7251_v12 }
 0x63f   : > { %v2188_v46 = vmul.bf16 1069105081, %v2095_v4  ;;  %v2191_v17 = vmul.bf16 1069105081, %v2096_v43 }
 0x640   : > { %v2338_v13 = vadd.f32 %v2248_v27, %v2247_v8  ;;  %v2335_v0 = vadd.f32 %v2246_v35, %v2245_v6  ;;  %v8982_v27 = vld [vmem:[#allocation16_spill] sm:$0xff] }
 0x641   : > { %5604 = vpow.bf16 %v2188_v46  ;;  %v2495_v35 = vrot.slane %v8982_v27, 1 }
 0x642   : > { %5606 = vpow.bf16 %v2191_v17  ;;  %2339 = vadd.xlane.f32.xlu0 %v2338_v13  ;;  %2336 = vadd.xlane.f32.xlu1 %v2335_v0 }
 0x644   : > { %v7257_v10 = vpop.eup %5600 }
 0x645   : > { %v7259_v21 = vpop.eup %5602  ;;  %v2251_v57 = vunpack.c.h.bf16 %v7257_v10  ;;  %v2249_v7 = vunpack.c.l.bf16 %v7257_v10 }
 0x646   : > { %v2252_v20 = vunpack.c.h.bf16 %v7259_v21  ;;  %v2250_v63 = vunpack.c.l.bf16 %v7259_v21 }
 0x648   : > { %v2344_v16 = vadd.f32 %v2252_v20, %v2251_v57  ;;  %v2341_v30 = vadd.f32 %v2250_v63, %v2249_v7  ;;  %v8983_v57 = vld [vmem:[#allocation17_spill] sm:$0xff] }
 0x649   : > { %v2496_v7 = vrot.slane %v8983_v57, 1 }
 0x64a   : > { %2345 = vadd.xlane.f32.xlu0 %v2344_v16  ;;  %2342 = vadd.xlane.f32.xlu1 %v2341_v30 }
 0x64c   : > { %v7265_v44 = vpop.eup %5604 }
 0x64d   : > { %v7267_v40 = vpop.eup %5606  ;;  %v2255_v58 = vunpack.c.h.bf16 %v7265_v44  ;;  %v2253_v37 = vunpack.c.l.bf16 %v7265_v44 }
 0x64e   : > { %v2256_v51 = vunpack.c.h.bf16 %v7267_v40  ;;  %v2254_v26 = vunpack.c.l.bf16 %v7267_v40 }
 0x650   : > { %v2350_v5 = vadd.f32 %v2256_v51, %v2255_v58  ;;  %v2347_v60 = vadd.f32 %v2254_v26, %v2253_v37 }
 0x652   : > { %2351 = vadd.xlane.f32.xlu0 %v2350_v5  ;;  %2348 = vadd.xlane.f32.xlu1 %v2347_v60 }
 0x663   : > { %727 = vperm.xlu1 %5413, %v448_v48  }
 0x667   : > { %v2262_v1 = vpop.xlane.xlu0 %2261  ;;  %v2259_v33 = vpop.xlane.xlu1 %2258 }
 0x668   : > { %5608 = vrcp.f32 %v2262_v1 }
 0x669   : > { %5610 = vrcp.f32 %v2259_v33 }
 0x671   : > { %v2268_v45 = vpop.xlane.xlu0 %2267  ;;  %v2265_v53 = vpop.xlane.xlu1 %2264 }
 0x672   : > { %v5609_v31 = vpop.eup %5608  ;;  %5612 = vrcp.f32 %v2268_v45 }
 0x673   : > { %v5611_v15 = vpop.eup %5610  ;;  %5614 = vrcp.f32 %v2265_v53 }
 0x674   : > { %v2385_v3 = vpack.c.bf16 %v5609_v31, %v5611_v15 }
 0x676   : > { %v2402_v52 = vmul.bf16 %v7093_v34, %v2385_v3  ;;  %v2401_v61 = vmul.bf16 %v7089_v25, %v2385_v3 }
 0x678   : > { %2433 = vmatprep.subr.bf16.mxu0 %v2402_v52 }
 0x679   : > { %2434 = vmatpush1.bf16.msra.mxu0 %v2401_v61  ;;  %v2274_v4 = vpop.xlane.xlu0 %2273  ;;  %v2271_v43 = vpop.xlane.xlu1 %2270 }
 0x67a   : > { %5616 = vrcp.f32 %v2274_v4 }
 0x67b   : > { %5618 = vrcp.f32 %v2271_v43 }
 0x67c   : > { %v5613_v8 = vpop.eup %5612 }
 0x67d   : > { %v5615_v6 = vpop.eup %5614 }
 0x67e   : > { %v2386_v46 = vpack.c.bf16 %v5613_v8, %v5615_v6 }
 0x67f   : > { %v2280_v17 = vpop.xlane.xlu0 %2279  ;;  %2499 = vxpose.xlu0.c.b16.start.end [1/1] (short) %v2495_v35, 128  ;;  %v2277_v13 = vpop.xlane.xlu1 %2276 }
 0x680   : > { %5620 = vrcp.f32 %v2280_v17  ;;  %v2404_v0 = vmul.bf16 %v7107_v9, %v2386_v46  ;;  %v2403_v34 = vmul.bf16 %v7105_v14, %v2386_v46 }
 0x681   : > { %5622 = vrcp.f32 %v2277_v13 }
 0x682   : > { %2435 = vmatprep.subr.bf16.mxu0 %v2404_v0 }
 0x683   : > { %2436 = vmatpush1.bf16.msra.mxu0 %v2403_v34 }
 0x684   : > { %v5617_v25 = vpop.eup %5616 }
 0x685   : > { %v5619_v20 = vpop.eup %5618 }
 0x686   : > { %2515 = vxpose.xlu1.c.b16.start.end [1/1] (short) %v2496_v7, 128  ;;  %v2387_v63 = vpack.c.bf16 %v5617_v25, %v5619_v20 }
 0x687   : > { %v2286_v16 = vpop.xlane.xlu0 %2285  ;;  %v2283_v30 = vpop.xlane.xlu1 %2282 }
 0x688   : > { %5624 = vrcp.f32 %v2286_v16  ;;  %v2406_v58 = vmul.bf16 %v7119_v32, %v2387_v63  ;;  %v2405_v37 = vmul.bf16 %v7117_v55, %v2387_v63 }
 0x689   : > { %5626 = vrcp.f32 %v2283_v30 }
 0x68a   : > { %v5621_v9 = vpop.eup %5620  ;;  %2437 = vmatprep.subr.bf16.mxu0 %v2406_v58 }
 0x68b   : > { %v5623_v14 = vpop.eup %5622  ;;  %2438 = vmatpush1.bf16.msra.mxu0 %v2405_v37 }
 0x68c   : > { %v2388_v51 = vpack.c.bf16 %v5621_v9, %v5623_v14 }
 0x68e   : > { %v2408_v26 = vmul.bf16 %v7131_v47, %v2388_v51  ;;  %v2407_v5 = vmul.bf16 %v7129_v19, %v2388_v51 }
 0x68f   : > { %v2292_v60 = vpop.xlane.xlu0 %2291  ;;  %v2289_v48 = vpop.xlane.xlu1 %2288 }
 0x690   : > { %5628 = vrcp.f32 %v2292_v60  ;;  %2439 = vmatprep.subr.bf16.mxu0 %v2408_v26 }
 0x691   : > { %5630 = vrcp.f32 %v2289_v48  ;;  %2440 = vmatpush1.bf16.msra.mxu0 %v2407_v5 }
 0x692   : > { %v5625_v1 = vpop.eup %5624 }
 0x693   : > { %v5627_v32 = vpop.eup %5626 }
 0x694   : > { %v2389_v33 = vpack.c.bf16 %v5625_v1, %v5627_v32 }
 0x696   : > { %v2410_v55 = vmul.bf16 %v7143_v56, %v2389_v33  ;;  %v2409_v45 = vmul.bf16 %v7141_v29, %v2389_v33 }
 0x697   : > { %v2298_v53 = vpop.xlane.xlu0 %2297  ;;  %v2295_v31 = vpop.xlane.xlu1 %2294 }
 0x698   : > { %5632 = vrcp.f32 %v2298_v53  ;;  %2441 = vmatprep.subr.bf16.mxu0 %v2410_v55 }
 0x699   : > { %5634 = vrcp.f32 %v2295_v31  ;;  %2442 = vmatpush1.bf16.msra.mxu0 %v2409_v45 }
 0x69a   : > { %v5629_v19 = vpop.eup %5628 }
 0x69b   : > { %v5631_v47 = vpop.eup %5630 }
 0x69c   : > { %v2390_v15 = vpack.c.bf16 %v5629_v19, %v5631_v47 }
 0x69e   : > { %v2412_v3 = vmul.bf16 %v7155_v50, %v2390_v15  ;;  %v2411_v52 = vmul.bf16 %v7153_v18, %v2390_v15 }
 0x69f   : > { %v2304_v61 = vpop.xlane.xlu0 %2303  ;;  %v2301_v4 = vpop.xlane.xlu1 %2300 }
 0x6a0   : > { %5636 = vrcp.f32 %v2304_v61  ;;  %2443 = vmatprep.subr.bf16.mxu0 %v2412_v3 }
 0x6a1   : > { %5638 = vrcp.f32 %v2301_v4  ;;  %2444 = vmatpush1.bf16.msra.mxu0 %v2411_v52 }
 0x6a2   : > { %v5633_v29 = vpop.eup %5632 }
 0x6a3   : > { %v5635_v56 = vpop.eup %5634 }
 0x6a4   : > { %v2391_v43 = vpack.c.bf16 %v5633_v29, %v5635_v56 }
 0x6a6   : > { %v2414_v8 = vmul.bf16 %v7167_v2, %v2391_v43  ;;  %v2413_v6 = vmul.bf16 %v7165_v54, %v2391_v43 }
 0x6a7   : > { %v2310_v35 = vpop.xlane.xlu0 %2309  ;;  %v2307_v46 = vpop.xlane.xlu1 %2306 }
 0x6a8   : > { %5640 = vrcp.f32 %v2310_v35  ;;  %2445 = vmatprep.subr.bf16.mxu0 %v2414_v8  ;;  %v8984_v8 = vld [vmem:[#allocation13_spill] sm:$0xff] }
 0x6a9   : > { %5642 = vrcp.f32 %v2307_v46  ;;  %2446 = vmatpush1.bf16.msra.mxu0 %v2413_v6 }
 0x6aa   : > { %v5637_v18 = vpop.eup %5636 }
 0x6ab   : > { %v5639_v50 = vpop.eup %5638 }
 0x6ac   : > { %v2392_v17 = vpack.c.bf16 %v5637_v18, %v5639_v50 }
 0x6ae   : > { %v2416_v13 = vmul.bf16 %v7179_v23, %v2392_v17  ;;  %v2415_v0 = vmul.bf16 %v7177_v42, %v2392_v17 }
 0x6af   : > { %v2316_v34 = vpop.xlane.xlu0 %2315  ;;  %v2313_v25 = vpop.xlane.xlu1 %2312 }
 0x6b0   : > { %5644 = vrcp.f32 %v2316_v34  ;;  %2447 = vmatprep.subr.bf16.mxu0 %v2416_v13 }
 0x6b1   : > { %5646 = vrcp.f32 %v2313_v25  ;;  %2448 = vmatpush1.bf16.msra.mxu0 %v2415_v0  ;;  %v8986_v0 = vld [vmem:[#allocation12_spill] sm:$0xff] }
 0x6b2   : > { %v5641_v54 = vpop.eup %5640 }
 0x6b3   : > { %v5643_v2 = vpop.eup %5642 }
 0x6b4   : > { %v2393_v7 = vpack.c.bf16 %v5641_v54, %v5643_v2 }
 0x6b6   : > { %v2418_v20 = vmul.bf16 %v7191_v11, %v2393_v7  ;;  %v2417_v63 = vmul.bf16 %v7189_v39, %v2393_v7 }
 0x6b7   : > { %v2322_v16 = vpop.xlane.xlu0 %2321  ;;  %v2319_v30 = vpop.xlane.xlu1 %2318 }
 0x6b8   : > { %5648 = vrcp.f32 %v2322_v16  ;;  %2449 = vmatprep.subr.bf16.mxu0 %v2418_v20  ;;  %v8990_v16 = vmov 0  }
 0x6b9   : > { %5650 = vrcp.f32 %v2319_v30  ;;  %2450 = vmatpush1.bf16.msra.mxu0 %v2417_v63 }
 0x6ba   : > { %v5645_v42 = vpop.eup %5644 }
 0x6bb   : > { %v5647_v23 = vpop.eup %5646 }
 0x6bc   : > { %v2394_v58 = vpack.c.bf16 %v5645_v42, %v5647_v23 }
 0x6be   : > { %v2420_v37 = vmul.bf16 %v7203_v59, %v2394_v58  ;;  %v2419_v9 = vmul.bf16 %v7201_v38, %v2394_v58 }
 0x6bf   : > { %v2328_v14 = vpop.xlane.xlu0 %2327  ;;  %v2325_v51 = vpop.xlane.xlu1 %2324 }
 0x6c0   : > { %5652 = vrcp.f32 %v2328_v14  ;;  %2451 = vmatprep.subr.bf16.mxu0 %v2420_v37 }
 0x6c1   : > { %5654 = vrcp.f32 %v2325_v51  ;;  %2452 = vmatpush1.bf16.msra.mxu0 %v2419_v9 }
 0x6c2   : > { %v5649_v39 = vpop.eup %5648 }
 0x6c3   : > { %v5651_v11 = vpop.eup %5650 }
 0x6c4   : > { %v2395_v26 = vpack.c.bf16 %v5649_v39, %v5651_v11 }
 0x6c6   : > { %v2422_v5 = vmul.bf16 %v7215_v28, %v2395_v26  ;;  %v2421_v60 = vmul.bf16 %v7213_v41, %v2395_v26 }
 0x6c7   : > { %v2334_v48 = vpop.xlane.xlu0 %2333  ;;  %v2331_v1 = vpop.xlane.xlu1 %2330 }
 0x6c8   : > { %5656 = vrcp.f32 %v2334_v48  ;;  %2453 = vmatprep.subr.bf16.mxu0 %v2422_v5 }
 0x6c9   : > { %5658 = vrcp.f32 %v2331_v1  ;;  %2454 = vmatpush1.bf16.msra.mxu0 %v2421_v60 }
 0x6ca   : > { %v5653_v38 = vpop.eup %5652 }
 0x6cb   : > { %v5655_v59 = vpop.eup %5654 }
 0x6cc   : > { %v2396_v32 = vpack.c.bf16 %v5653_v38, %v5655_v59  ;;  %v8991_v59 = vld [vmem:[#allocation18_spill] sm:$0xff] }
 0x6ce   : > { %v2424_v33 = vmul.bf16 %v7227_v22, %v2396_v32  ;;  %v2423_v55 = vmul.bf16 %v7225_v24, %v2396_v32 }
 0x6cf   : > { %v2340_v45 = vpop.xlane.xlu0 %2339  ;;  %v2337_v53 = vpop.xlane.xlu1 %2336 }
 0x6d0   : > { %5660 = vrcp.f32 %v2340_v45  ;;  %2455 = vmatprep.subr.bf16.mxu0 %v2424_v33 }
 0x6d1   : > { %5662 = vrcp.f32 %v2337_v53  ;;  %2456 = vmatpush1.bf16.msra.mxu0 %v2423_v55  ;;  %v8993_v55 = vld [vmem:[#allocation19_spill] sm:$0xff] }
 0x6d2   : > { %v5657_v41 = vpop.eup %5656 }
 0x6d3   : > { %v5659_v28 = vpop.eup %5658 }
 0x6d4   : > { %v2397_v31 = vpack.c.bf16 %v5657_v41, %v5659_v28 }
 0x6d6   : > { %v2426_v19 = vmul.bf16 %v7239_v49, %v2397_v31  ;;  %v2425_v47 = vmul.bf16 %v7237_v36, %v2397_v31 }
 0x6d7   : > { %v2346_v15 = vpop.xlane.xlu0 %2345  ;;  %v2343_v3 = vpop.xlane.xlu1 %2342 }
 0x6d8   : > { %5664 = vrcp.f32 %v2346_v15  ;;  %2457 = vmatprep.subr.bf16.mxu0 %v2426_v19 }
 0x6d9   : > { %5666 = vrcp.f32 %v2343_v3  ;;  %2458 = vmatpush1.bf16.msra.mxu0 %v2425_v47 }
 0x6da   : > { %v5661_v24 = vpop.eup %5660 }
 0x6db   : > { %v5663_v22 = vpop.eup %5662 }
 0x6dc   : > { %v2398_v52 = vpack.c.bf16 %v5661_v24, %v5663_v22 }
 0x6de   : > { %v2428_v61 = vmul.bf16 %v7251_v12, %v2398_v52  ;;  %v2427_v4 = vmul.bf16 %v7249_v62, %v2398_v52 }
 0x6df   : > { %v2352_v29 = vpop.xlane.xlu0 %2351  ;;  %v2349_v56 = vpop.xlane.xlu1 %2348 }
 0x6e0   : > { %5668 = vrcp.f32 %v2352_v29  ;;  %2459 = vmatprep.subr.bf16.mxu0 %v2428_v61 }
 0x6e1   : > { %5670 = vrcp.f32 %v2349_v56  ;;  %2460 = vmatpush1.bf16.msra.mxu0 %v2427_v4 }
 0x6e2   : > { %v5665_v36 = vpop.eup %5664 }
 0x6e3   : > { %v5667_v49 = vpop.eup %5666  ;;  %v728_v43 = vpop.permute.xlu1 %727 }
 0x6e4   : > { %v770_v6 = vadd.f32 %v8984_v8, %v728_v43  ;;  %v2399_v35 = vpack.c.bf16 %v5665_v36, %v5667_v49  ;;  %v768_v34 = vadd.f32 %v8986_v0, %v728_v43 }
 0x6e6   : > { %v7307_v46 = vpack.c.bf16 %v770_v6, %v770_v6  ;;  %v2430_v18 = vmul.bf16 %v7259_v21, %v2399_v35  ;;  %v2429_v12 = vmul.bf16 %v7257_v10, %v2399_v35  ;;  %v8987_v21 = vld [vmem:[#allocation15_spill] sm:$0xff]  ;;  %v8988_v10 = vld [vmem:[#allocation14_spill] sm:$0xff]  ;;  %v7318_v20 = vpack.c.bf16 %v768_v34, %v768_v34 }
 0x6e7   : > { %v2534_v2 = vrot.slane %v8987_v21, 1  ;;  %v2533_v7 = vrot.slane %v8988_v10, 1 }
 0x6e8   : > { %8985 = vst [vmem:[#allocation22_spill] sm:$0xff] %v7307_v46  ;;  %2461 = vmatprep.subr.bf16.mxu0 %v2430_v18  ;;  %2465 = vmatprep.mubr.bf16.mxu0 %v7307_v46  ;;  %v3313_v62 = vrot.slane %v7307_v46, 1  ;;  %8989 = vst [vmem:[#allocation20_spill] sm:$0xff] %v7318_v20  ;;  %v4205_v1 = vrot.slane %v7307_v46, 2 }
 0x6e9   : > { %2462 = vmatpush1.bf16.msra.mxu0 %v2429_v12  ;;  %v2584_v63 = vsel %vm1705_vm2, %v2533_v7, 0 }
 0x6ea   : > { %v5669_v50 = vpop.eup %5668  ;;  %3354 = vmatprep.mubr.bf16.mxu1 %v3313_v62 }
 0x6eb   : > { %v5671_v17 = vpop.eup %5670 }
 0x6ec   : > { %v2400_v13 = vpack.c.bf16 %v5669_v50, %v5671_v17  ;;  %v2523_v14 = vpop.trf.xlu1 }
 0x6ee   : > { %v2432_v25 = vmul.bf16 %v7267_v40, %v2400_v13  ;;  %v2431_v54 = vmul.bf16 %v7265_v44, %v2400_v13  ;;  %v2507_v40 = vpop.trf.xlu0 }
 0x6f0   : > { %2463 = vmatprep.subr.bf16.mxu0 %v2432_v25  ;;  %v2524_v51 = vpop.trf.xlu1 }
 0x6f1   : > { %2464 = vmatpush1.bf16.msra.mxu0 %v2431_v54 }
 0x6f2   : > { %5312 = vmatprep.subr.msk.bf16.mxu0 %vm1705_vm2, %v2534_v2  ;;  %v2508_v44 = vpop.trf.xlu0 }
 0x6f4   : > { %2466 = vmatmul.mubr.bf16.vlgmr.msra.gmra.mrb[44].mxu0 %v7318_v20  ;;  %v2525_v39 = vpop.trf.xlu1 }
 0x6f5   : > { %2590 = vmatpush1.bf16.msra.mxu0 %v2584_v63  ;;  %2621 = vmatprep.mubr.bf16.mxu0 %v8990_v16 }
 0x6f6   : > { %v2509_v30 = vpop.trf.xlu0 }
 0x6f8   : > { %v2526_v11 = vpop.trf.xlu1 }
 0x6fa   : > { %v2510_v42 = vpop.trf.xlu0 }
 0x6fc   : > { %5313 = vmatmul.mubr.msk.bf16.vlgmr.msra.gmra.mrb[48].mxu0 %vm1656_vm3, %v2507_v40  ;;  %v2527_v26 = vpop.trf.xlu1 }
 0x6fd   : > { %2631 = vmatprep.mubr.bf16.mxu0 %v8990_v16 }
 0x6fe   : > { %v2511_v23 = vpop.trf.xlu0 }
 0x700   : > { %v2528_v5 = vpop.trf.xlu1 }
 0x702   : > { %v2512_v58 = vpop.trf.xlu0 }
 0x704   : > { %5314 = vmatmul.mubr.msk.bf16.gmra.mrb[52].mxu0 %vm1656_vm3, %v2508_v44  ;;  %v2529_v60 = vpop.trf.xlu1 }
 0x705   : > { %2641 = vmatprep.mubr.bf16.mxu0 %v8990_v16 }
 0x706   : > { %v2513_v37 = vpop.trf.xlu0 }
 0x708   : > { %v2530_v48 = vpop.trf.xlu1 }
 0x70a   : > { %v2514_v9 = vpop.trf.xlu0 }
 0x70c   : > { %5315 = vmatmul.mubr.msk.bf16.gmra.mrb[56].mxu0 %vm1656_vm3, %v2509_v30 }
 0x70d   : > { %2651 = vmatprep.mubr.bf16.mxu0 %v8990_v16 }
 0x714   : > { %5316 = vmatmul.mubr.msk.bf16.gmra.mrb[60].mxu0 %vm1656_vm3, %v2510_v42 }
 0x715   : > { %2661 = vmatprep.mubr.bf16.mxu0 %v8990_v16 }
 0x71c   : > { %5317 = vmatmul.mubr.msk.bf16.gmra.mrb[64].mxu0 %vm1656_vm3, %v2511_v23 }
 0x71d   : > { %2671 = vmatprep.mubr.bf16.mxu0 %v8990_v16 }
 0x724   : > { %5318 = vmatmul.mubr.msk.bf16.gmra.mrb[68].mxu0 %vm1656_vm3, %v2512_v58 }
 0x725   : > { %2681 = vmatprep.mubr.bf16.mxu0 %v8990_v16 }
 0x72c   : > { %5319 = vmatmul.mubr.msk.bf16.gmra.mrb[72].mxu0 %vm1656_vm3, %v2513_v37 }
 0x72d   : > { %2691 = vmatprep.mubr.bf16.mxu0 %v8990_v16 }
 0x734   : > { %5320 = vmatmul.mubr.msk.bf16.gmra.mrb[76].mxu0 %vm1656_vm3, %v2514_v9 }
 0x735   : > { %2701 = vmatprep.mubr.bf16.mxu0 %v8990_v16 }
 0x73c   : > { %5321 = vmatmul.mubr.msk.bf16.gmra.mrb[80].mxu0 %vm1656_vm3, %v2523_v14 }
 0x73d   : > { %2711 = vmatprep.mubr.bf16.mxu0 %v8990_v16 }
 0x744   : > { %5322 = vmatmul.mubr.msk.bf16.gmra.mrb[84].mxu0 %vm1656_vm3, %v2524_v51 }
 0x745   : > { %2721 = vmatprep.mubr.bf16.mxu0 %v8990_v16 }
 0x74c   : > { %5323 = vmatmul.mubr.msk.bf16.gmra.mrb[88].mxu0 %vm1656_vm3, %v2525_v39 }
 0x74d   : > { %2731 = vmatprep.mubr.bf16.mxu0 %v8990_v16 }
 0x754   : > { %5324 = vmatmul.mubr.msk.bf16.gmra.mrb[92].mxu0 %vm1656_vm3, %v2526_v11 }
 0x755   : > { %2741 = vmatprep.mubr.bf16.mxu0 %v8990_v16 }
 0x75c   : > { %5325 = vmatmul.mubr.msk.bf16.gmra.mrb[96].mxu0 %vm1656_vm3, %v2527_v26 }
 0x75d   : > { %2751 = vmatprep.mubr.bf16.mxu0 %v8990_v16 }
 0x764   : > { %5326 = vmatmul.mubr.msk.bf16.gmra.mrb[100].mxu0 %vm1656_vm3, %v2528_v5 }
 0x765   : > { %2761 = vmatprep.mubr.bf16.mxu0 %v8990_v16 }
 0x76c   : > { %5327 = vmatmul.mubr.msk.bf16.gmra.mrb[104].mxu0 %vm1656_vm3, %v2529_v60 }
 0x76d   : > { %2771 = vmatprep.mubr.bf16.mxu0 %v8990_v16 }
 0x774   : > { %5328 = vmatmul.mubr.msk.bf16.gmra.mrb[108].mxu0 %vm1656_vm3, %v2530_v48 }
 0x775   : > { %4244 = vmatprep.mubr.bf16.mxu0 %v4205_v1 }
 0x7c7   : > { %v2467_v38 = vpop.f32.mrb[44].mxu0 }
 0x7c8   : > { %v7357_v32 = vadd.f32 %v2467_v38, %v8991_v59  ;;  %v2469_v33 = vpop.f32.mrb[45].mxu0 }
 0x7c9   : > { %v7360_v45 = vadd.f32 %v2469_v33, %v8993_v55  ;;  %v2471_v53 = vpop.f32.mrb[46].mxu0 }
 0x7ca   : > { %8992 = vst [vmem:[#allocation21_spill] sm:$0xff] %v7357_v32  ;;  %v2472_v41 = vpop.f32.mrb[47].mxu0 }
 0x7cb   : > { %8994 = vst [vmem:[#allocation25_spill] sm:$0xff] %v7360_v45 }
 0x7cf   : > { %v7362_v28 = vpop.f32.mrb[48].mxu0 }
 0x7d0   : > { %v7364_v31 = vpop.f32.mrb[49].mxu0 }
 0x7d1   : > { %v2782_v19 = vmax.f32 %v7362_v28, %v7364_v31  ;;  %v7368_v47 = vpop.f32.mrb[50].mxu0 }
 0x7d2   : > { %v7370_v15 = vpop.f32.mrb[51].mxu0 }
 0x7d3   : > { %v2785_v3 = vmax.f32 %v7368_v47, %v7370_v15  ;;  %2783 = vmax.xlane.f32.xlu0 %v2782_v19 }
 0x7d5   : > { %2786 = vmax.xlane.f32.xlu1 %v2785_v3 }
 0x7d7   : > { %v7374_v24 = vpop.f32.mrb[52].mxu0 }
 0x7d8   : > { %v7376_v22 = vpop.f32.mrb[53].mxu0 }
 0x7d9   : > { %v2788_v52 = vmax.f32 %v7374_v24, %v7376_v22  ;;  %v7380_v61 = vpop.f32.mrb[54].mxu0 }
 0x7da   : > { %v7382_v4 = vpop.f32.mrb[55].mxu0 }
 0x7db   : > { %v2791_v29 = vmax.f32 %v7380_v61, %v7382_v4  ;;  %2789 = vmax.xlane.f32.xlu0 %v2788_v52 }
 0x7df   : > { %2792 = vmax.xlane.f32.xlu0 %v2791_v29  ;;  %v7386_v56 = vpop.f32.mrb[56].mxu0 }
 0x7e0   : > { %v7388_v36 = vpop.f32.mrb[57].mxu0 }
 0x7e1   : > { %v2794_v49 = vmax.f32 %v7386_v56, %v7388_v36  ;;  %v7392_v43 = vpop.f32.mrb[58].mxu0 }
 0x7e2   : > { %v7394_v8 = vpop.f32.mrb[59].mxu0 }
 0x7e3   : > { %v2797_v6 = vmax.f32 %v7392_v43, %v7394_v8  ;;  %2795 = vmax.xlane.f32.xlu1 %v2794_v49 }
 0x7e5   : > { %2798 = vmax.xlane.f32.xlu0 %v2797_v6 }
 0x7e7   : > { %v7398_v35 = vpop.f32.mrb[60].mxu0 }
 0x7e8   : > { %v7400_v18 = vpop.f32.mrb[61].mxu0 }
 0x7e9   : > { %v2800_v12 = vmax.f32 %v7398_v35, %v7400_v18  ;;  %v7404_v62 = vpop.f32.mrb[62].mxu0 }
 0x7ea   : > { %v7406_v50 = vpop.f32.mrb[63].mxu0 }
 0x7eb   : > { %v2803_v17 = vmax.f32 %v7404_v62, %v7406_v50  ;;  %2801 = vmax.xlane.f32.xlu1 %v2800_v12 }
 0x7ed   : > { %2804 = vmax.xlane.f32.xlu0 %v2803_v17 }
 0x7ef   : > { %v7410_v13 = vpop.f32.mrb[64].mxu0 }
 0x7f0   : > { %v7412_v0 = vpop.f32.mrb[65].mxu0 }
 0x7f1   : > { %v2806_v34 = vmax.f32 %v7410_v13, %v7412_v0  ;;  %v7416_v25 = vpop.f32.mrb[66].mxu0 }
 0x7f2   : > { %v7418_v54 = vpop.f32.mrb[67].mxu0 }
 0x7f3   : > { %v2809_v2 = vmax.f32 %v7416_v25, %v7418_v54  ;;  %2807 = vmax.xlane.f32.xlu1 %v2806_v34 }
 0x7f5   : > { %2810 = vmax.xlane.f32.xlu0 %v2809_v2 }
 0x7f7   : > { %v7422_v7 = vpop.f32.mrb[68].mxu0 }
 0x7f8   : > { %v7424_v63 = vpop.f32.mrb[69].mxu0 }
 0x7f9   : > { %v2812_v40 = vmax.f32 %v7422_v7, %v7424_v63  ;;  %v7428_v44 = vpop.f32.mrb[70].mxu0 }
 0x7fa   : > { %v7430_v30 = vpop.f32.mrb[71].mxu0 }
 0x7fb   : > { %v2815_v42 = vmax.f32 %v7428_v44, %v7430_v30  ;;  %2813 = vmax.xlane.f32.xlu1 %v2812_v40 }
 0x7fd   : > { %2816 = vmax.xlane.f32.xlu0 %v2815_v42 }
 0x7ff   : > { %v7434_v23 = vpop.f32.mrb[72].mxu0 }
 0x800   : > { %v7436_v58 = vpop.f32.mrb[73].mxu0 }
 0x801   : > { %v2818_v37 = vmax.f32 %v7434_v23, %v7436_v58  ;;  %v7440_v9 = vpop.f32.mrb[74].mxu0 }
 0x802   : > { %v7442_v14 = vpop.f32.mrb[75].mxu0 }
 0x803   : > { %v2821_v51 = vmax.f32 %v7440_v9, %v7442_v14  ;;  %2819 = vmax.xlane.f32.xlu1 %v2818_v37 }
 0x805   : > { %2822 = vmax.xlane.f32.xlu0 %v2821_v51 }
 0x807   : > { %v7446_v39 = vpop.f32.mrb[76].mxu0 }
 0x808   : > { %v7448_v11 = vpop.f32.mrb[77].mxu0 }
 0x809   : > { %v2824_v26 = vmax.f32 %v7446_v39, %v7448_v11  ;;  %v7452_v5 = vpop.f32.mrb[78].mxu0 }
 0x80a   : > { %v7454_v60 = vpop.f32.mrb[79].mxu0 }
 0x80b   : > { %v2827_v48 = vmax.f32 %v7452_v5, %v7454_v60  ;;  %2825 = vmax.xlane.f32.xlu1 %v2824_v26 }
 0x80d   : > { %2828 = vmax.xlane.f32.xlu0 %v2827_v48 }
 0x80f   : > { %v7458_v1 = vpop.f32.mrb[80].mxu0 }
 0x810   : > { %v7460_v38 = vpop.f32.mrb[81].mxu0 }
 0x811   : > { %v2830_v33 = vmax.f32 %v7458_v1, %v7460_v38  ;;  %v7464_v53 = vpop.f32.mrb[82].mxu0 }
 0x812   : > { %v7466_v41 = vpop.f32.mrb[83].mxu0 }
 0x813   : > { %v2833_v19 = vmax.f32 %v7464_v53, %v7466_v41  ;;  %2831 = vmax.xlane.f32.xlu1 %v2830_v33 }
 0x815   : > { %2834 = vmax.xlane.f32.xlu0 %v2833_v19 }
 0x817   : > { %v7470_v3 = vpop.f32.mrb[84].mxu0 }
 0x818   : > { %v7472_v52 = vpop.f32.mrb[85].mxu0 }
 0x819   : > { %v2836_v29 = vmax.f32 %v7470_v3, %v7472_v52  ;;  %v7476_v49 = vpop.f32.mrb[86].mxu0 }
 0x81a   : > { %v7478_v6 = vpop.f32.mrb[87].mxu0 }
 0x81b   : > { %v2839_v12 = vmax.f32 %v7476_v49, %v7478_v6  ;;  %2837 = vmax.xlane.f32.xlu1 %v2836_v29 }
 0x81d   : > { %2840 = vmax.xlane.f32.xlu0 %v2839_v12 }
 0x81f   : > { %v7482_v17 = vpop.f32.mrb[88].mxu0 }
 0x820   : > { %v7484_v34 = vpop.f32.mrb[89].mxu0 }
 0x821   : > { %v2842_v2 = vmax.f32 %v7482_v17, %v7484_v34  ;;  %v7488_v40 = vpop.f32.mrb[90].mxu0 }
 0x822   : > { %v7490_v42 = vpop.f32.mrb[91].mxu0 }
 0x823   : > { %v2845_v37 = vmax.f32 %v7488_v40, %v7490_v42  ;;  %2843 = vmax.xlane.f32.xlu1 %v2842_v2 }
 0x825   : > { %2846 = vmax.xlane.f32.xlu0 %v2845_v37 }
 0x827   : > { %v7494_v51 = vpop.f32.mrb[92].mxu0 }
 0x828   : > { %v7496_v26 = vpop.f32.mrb[93].mxu0 }
 0x829   : > { %v2848_v48 = vmax.f32 %v7494_v51, %v7496_v26  ;;  %v7500_v33 = vpop.f32.mrb[94].mxu0 }
 0x82a   : > { %v7502_v19 = vpop.f32.mrb[95].mxu0 }
 0x82b   : > { %v2851_v29 = vmax.f32 %v7500_v33, %v7502_v19  ;;  %2849 = vmax.xlane.f32.xlu1 %v2848_v48 }
 0x82d   : > { %2852 = vmax.xlane.f32.xlu0 %v2851_v29 }
 0x82f   : > { %v7506_v12 = vpop.f32.mrb[96].mxu0 }
 0x830   : > { %v7508_v2 = vpop.f32.mrb[97].mxu0 }
 0x831   : > { %8995 = vst [vmem:[#allocation26_spill] sm:$0xff] %v7508_v2  ;;  %v2854_v37 = vmax.f32 %v7506_v12, %v7508_v2  ;;  %v7512_v55 = vpop.f32.mrb[98].mxu0 }
 0x832   : > { %8996 = vst [vmem:[#allocation23_spill] sm:$0xff] %v7512_v55  ;;  %v7514_v59 = vpop.f32.mrb[99].mxu0 }
 0x833   : > { %8997 = vst [vmem:[#allocation24_spill] sm:$0xff] %v7514_v59  ;;  %v2857_v45 = vmax.f32 %v7512_v55, %v7514_v59  ;;  %2855 = vmax.xlane.f32.xlu1 %v2854_v37 }
 0x835   : > { %2858 = vmax.xlane.f32.xlu0 %v2857_v45 }
 0x837   : > { %v7518_v32 = vpop.f32.mrb[100].mxu0 }
 0x838   : > { %8998 = vst [vmem:[#allocation27_spill] sm:$0xff] %v7518_v32  ;;  %v7520_v48 = vpop.f32.mrb[101].mxu0 }
 0x839   : > { %8999 = vst [vmem:[#allocation28_spill] sm:$0xff] %v7520_v48  ;;  %v2860_v29 = vmax.f32 %v7518_v32, %v7520_v48  ;;  %v7524_v46 = vpop.f32.mrb[102].mxu0 }
 0x83a   : > { %9000 = vst [vmem:[#allocation10_spill] sm:$0xff] %v7524_v46  ;;  %v7526_v16 = vpop.f32.mrb[103].mxu0 }
 0x83b   : > { %9001 = vst [vmem:[#allocation11_spill] sm:$0xff] %v7526_v16  ;;  %v2863_v20 = vmax.f32 %v7524_v46, %v7526_v16  ;;  %2861 = vmax.xlane.f32.xlu1 %v2860_v29 }
 0x83d   : > { %2864 = vmax.xlane.f32.xlu0 %v2863_v20 }
 0x83f   : > { %v7530_v10 = vpop.f32.mrb[104].mxu0 }
 0x840   : > { %9002 = vst [vmem:[#allocation7_spill] sm:$0xff] %v7530_v10  ;;  %v7532_v37 = vpop.f32.mrb[105].mxu0 }
 0x841   : > { %9003 = vst [vmem:[#allocation8_spill] sm:$0xff] %v7532_v37  ;;  %v2866_v45 = vmax.f32 %v7530_v10, %v7532_v37  ;;  %v7536_v21 = vpop.f32.mrb[106].mxu0 }
 0x842   : > { %9004 = vst [vmem:[#allocation9_spill] sm:$0xff] %v7536_v21  ;;  %v7538_v27 = vpop.f32.mrb[107].mxu0 }
 0x843   : > { %9005 = vst [vmem:[#allocation6_spill] sm:$0xff] %v7538_v27  ;;  %v2869_v57 = vmax.f32 %v7536_v21, %v7538_v27  ;;  %2867 = vmax.xlane.f32.xlu1 %v2866_v45 }
 0x845   : > { %2870 = vmax.xlane.f32.xlu0 %v2869_v57 }
 0x847   : > { %v7542_v48 = vpop.f32.mrb[108].mxu0 }
 0x848   : > { %9006 = vst [vmem:[#allocation13_spill] sm:$0xff] %v7542_v48  ;;  %v7544_v29 = vpop.f32.mrb[109].mxu0 }
 0x849   : > { %9007 = vst [vmem:[#allocation12_spill] sm:$0xff] %v7544_v29  ;;  %v2872_v20 = vmax.f32 %v7542_v48, %v7544_v29  ;;  %v7548_v16 = vpop.f32.mrb[110].mxu0 }
 0x84a   : > { %9008 = vst [vmem:[#allocation29_spill] sm:$0xff] %v7548_v16  ;;  %v7550_v46 = vpop.f32.mrb[111].mxu0 }
 0x84b   : > { %9009 = vst [vmem:[#allocation30_spill] sm:$0xff] %v7550_v46  ;;  %v2875_v37 = vmax.f32 %v7548_v16, %v7550_v46  ;;  %2873 = vmax.xlane.f32.xlu1 %v2872_v20 }
 0x84d   : > { %2876 = vmax.xlane.f32.xlu0 %v2875_v37 }
 0x860   : > { %v2784_v10 = vpop.xlane.xlu0 %2783 }
 0x861   : > { %v2878_v57 = vsub.f32 %v7362_v28, %v2784_v10  ;;  %v2879_v45 = vsub.f32 %v7364_v31, %v2784_v10 }
 0x862   : > { %v2787_v27 = vpop.xlane.xlu1 %2786 }
 0x863   : > { %v2880_v21 = vsub.f32 %v7368_v47, %v2787_v27  ;;  %v2881_v32 = vsub.f32 %v7370_v15, %v2787_v27 }
 0x865   : > { %v2942_v29 = vpack.c.bf16 %v2880_v21, %v2878_v57  ;;  %v2943_v48 = vpack.c.bf16 %v2881_v32, %v2879_v45 }
 0x867   : > { %v2975_v59 = vmul.bf16 1069105081, %v2942_v29  ;;  %v2978_v55 = vmul.bf16 1069105081, %v2943_v48 }
 0x868   : > { %v2790_v2 = vpop.xlane.xlu0 %2789 }
 0x869   : > { %5672 = vpow.bf16 %v2975_v59  ;;  %v2882_v37 = vsub.f32 %v7374_v24, %v2790_v2  ;;  %v2883_v20 = vsub.f32 %v7376_v22, %v2790_v2 }
 0x86a   : > { %5674 = vpow.bf16 %v2978_v55 }
 0x86c   : > { %v2793_v46 = vpop.xlane.xlu0 %2792 }
 0x86d   : > { %v2884_v28 = vsub.f32 %v7380_v61, %v2793_v46  ;;  %v2885_v10 = vsub.f32 %v7382_v4, %v2793_v46 }
 0x86f   : > { %v2944_v31 = vpack.c.bf16 %v2884_v28, %v2882_v37  ;;  %v2945_v47 = vpack.c.bf16 %v2885_v10, %v2883_v20 }
 0x870   : > { %v2796_v16 = vpop.xlane.xlu1 %2795 }
 0x871   : > { %v2981_v27 = vmul.bf16 1069105081, %v2944_v31  ;;  %v2984_v21 = vmul.bf16 1069105081, %v2945_v47  ;;  %v2886_v32 = vsub.f32 %v7386_v56, %v2796_v16  ;;  %v2887_v59 = vsub.f32 %v7388_v36, %v2796_v16 }
 0x872   : > { %v2799_v15 = vpop.xlane.xlu0 %2798 }
 0x873   : > { %5676 = vpow.bf16 %v2981_v27  ;;  %v2888_v55 = vsub.f32 %v7392_v43, %v2799_v15  ;;  %v2889_v24 = vsub.f32 %v7394_v8, %v2799_v15 }
 0x874   : > { %v7566_v22 = vpop.eup %5672  ;;  %5678 = vpow.bf16 %v2984_v21 }
 0x875   : > { %v7568_v61 = vpop.eup %5674  ;;  %v2946_v46 = vpack.c.bf16 %v2888_v55, %v2886_v32  ;;  %v2947_v4 = vpack.c.bf16 %v2889_v24, %v2887_v59  ;;  %v3072_v2 = vunpack.c.h.bf16 %v7566_v22  ;;  %v3070_v48 = vunpack.c.l.bf16 %v7566_v22 }
 0x876   : > { %v3073_v56 = vunpack.c.h.bf16 %v7568_v61  ;;  %v3071_v29 = vunpack.c.l.bf16 %v7568_v61 }
 0x877   : > { %v2987_v16 = vmul.bf16 1069105081, %v2946_v46  ;;  %v2990_v36 = vmul.bf16 1069105081, %v2947_v4 }
 0x878   : > { %v2802_v43 = vpop.xlane.xlu1 %2801  ;;  %v3137_v57 = vadd.f32 %v3073_v56, %v3072_v2  ;;  %v3134_v8 = vadd.f32 %v3071_v29, %v3070_v48 }
 0x879   : > { %5680 = vpow.bf16 %v2987_v16  ;;  %v2890_v37 = vsub.f32 %v7398_v35, %v2802_v43  ;;  %v2891_v20 = vsub.f32 %v7400_v18, %v2802_v43 }
 0x87a   : > { %5682 = vpow.bf16 %v2990_v36  ;;  %3138 = vadd.xlane.f32.xlu0 %v3137_v57  ;;  %3135 = vadd.xlane.f32.xlu1 %v3134_v8  ;;  %v2805_v45 = vpop.xlane.xlu0 %2804 }
 0x87b   : > { %v2892_v28 = vsub.f32 %v7404_v62, %v2805_v45  ;;  %v2893_v10 = vsub.f32 %v7406_v50, %v2805_v45 }
 0x87d   : > { %v2948_v31 = vpack.c.bf16 %v2892_v28, %v2890_v37  ;;  %v2949_v47 = vpack.c.bf16 %v2893_v10, %v2891_v20 }
 0x87e   : > { %v7578_v27 = vpop.eup %5676 }
 0x87f   : > { %v7580_v21 = vpop.eup %5678  ;;  %v2993_v32 = vmul.bf16 1069105081, %v2948_v31  ;;  %v2996_v15 = vmul.bf16 1069105081, %v2949_v47  ;;  %v3076_v59 = vunpack.c.h.bf16 %v7578_v27  ;;  %v3074_v55 = vunpack.c.l.bf16 %v7578_v27 }
 0x880   : > { %v2808_v24 = vpop.xlane.xlu1 %2807  ;;  %v3077_v35 = vunpack.c.h.bf16 %v7580_v21  ;;  %v3075_v18 = vunpack.c.l.bf16 %v7580_v21 }
 0x881   : > { %5684 = vpow.bf16 %v2993_v32  ;;  %v2894_v4 = vsub.f32 %v7410_v13, %v2808_v24  ;;  %v2895_v2 = vsub.f32 %v7412_v0, %v2808_v24 }
 0x882   : > { %5686 = vpow.bf16 %v2996_v15  ;;  %v2811_v62 = vpop.xlane.xlu0 %2810  ;;  %v3143_v50 = vadd.f32 %v3077_v35, %v3076_v59  ;;  %v3140_v46 = vadd.f32 %v3075_v18, %v3074_v55 }
 0x883   : > { %v2896_v48 = vsub.f32 %v7416_v25, %v2811_v62  ;;  %v2897_v56 = vsub.f32 %v7418_v54, %v2811_v62 }
 0x884   : > { %v7590_v29 = vpop.eup %5680  ;;  %3144 = vadd.xlane.f32.xlu0 %v3143_v50  ;;  %3141 = vadd.xlane.f32.xlu1 %v3140_v46 }
 0x885   : > { %v7592_v16 = vpop.eup %5682  ;;  %v2950_v36 = vpack.c.bf16 %v2896_v48, %v2894_v4  ;;  %v2951_v43 = vpack.c.bf16 %v2897_v56, %v2895_v2  ;;  %v3080_v57 = vunpack.c.h.bf16 %v7590_v29  ;;  %v3078_v8 = vunpack.c.l.bf16 %v7590_v29 }
 0x886   : > { %v3081_v13 = vunpack.c.h.bf16 %v7592_v16  ;;  %v3079_v0 = vunpack.c.l.bf16 %v7592_v16 }
 0x887   : > { %v2999_v45 = vmul.bf16 1069105081, %v2950_v36  ;;  %v3002_v25 = vmul.bf16 1069105081, %v2951_v43 }
 0x888   : > { %v2814_v37 = vpop.xlane.xlu1 %2813  ;;  %v3149_v54 = vadd.f32 %v3081_v13, %v3080_v57  ;;  %v3146_v20 = vadd.f32 %v3079_v0, %v3078_v8 }
 0x889   : > { %5688 = vpow.bf16 %v2999_v45  ;;  %v2898_v10 = vsub.f32 %v7422_v7, %v2814_v37  ;;  %v2899_v31 = vsub.f32 %v7424_v63, %v2814_v37 }
 0x88a   : > { %5690 = vpow.bf16 %v3002_v25  ;;  %3150 = vadd.xlane.f32.xlu0 %v3149_v54  ;;  %3147 = vadd.xlane.f32.xlu1 %v3146_v20  ;;  %v2817_v28 = vpop.xlane.xlu0 %2816 }
 0x88b   : > { %v2900_v47 = vsub.f32 %v7428_v44, %v2817_v28  ;;  %v2901_v32 = vsub.f32 %v7430_v30, %v2817_v28 }
 0x88c   : > { %v7602_v15 = vpop.eup %5684 }
 0x88d   : > { %v7604_v59 = vpop.eup %5686  ;;  %v2952_v55 = vpack.c.bf16 %v2900_v47, %v2898_v10  ;;  %v2953_v24 = vpack.c.bf16 %v2901_v32, %v2899_v31  ;;  %v3084_v35 = vunpack.c.h.bf16 %v7602_v15  ;;  %v3082_v18 = vunpack.c.l.bf16 %v7602_v15 }
 0x88e   : > { %v3085_v62 = vunpack.c.h.bf16 %v7604_v59  ;;  %v3083_v7 = vunpack.c.l.bf16 %v7604_v59 }
 0x88f   : > { %v3005_v50 = vmul.bf16 1069105081, %v2952_v55  ;;  %v3008_v63 = vmul.bf16 1069105081, %v2953_v24 }
 0x890   : > { %v2820_v46 = vpop.xlane.xlu1 %2819  ;;  %v3155_v44 = vadd.f32 %v3085_v62, %v3084_v35  ;;  %v3152_v4 = vadd.f32 %v3083_v7, %v3082_v18 }
 0x891   : > { %5692 = vpow.bf16 %v3005_v50  ;;  %v2902_v2 = vsub.f32 %v7434_v23, %v2820_v46  ;;  %v2903_v48 = vsub.f32 %v7436_v58, %v2820_v46 }
 0x892   : > { %5694 = vpow.bf16 %v3008_v63  ;;  %3156 = vadd.xlane.f32.xlu0 %v3155_v44  ;;  %3153 = vadd.xlane.f32.xlu1 %v3152_v4  ;;  %v2823_v30 = vpop.xlane.xlu0 %2822 }
 0x893   : > { %v2904_v56 = vsub.f32 %v7440_v9, %v2823_v30  ;;  %v2905_v36 = vsub.f32 %v7442_v14, %v2823_v30 }
 0x894   : > { %v7614_v43 = vpop.eup %5688 }
 0x895   : > { %v7616_v57 = vpop.eup %5690  ;;  %v2954_v8 = vpack.c.bf16 %v2904_v56, %v2902_v2  ;;  %v2955_v13 = vpack.c.bf16 %v2905_v36, %v2903_v48  ;;  %v3088_v0 = vunpack.c.h.bf16 %v7614_v43  ;;  %v3086_v45 = vunpack.c.l.bf16 %v7614_v43 }
 0x896   : > { %v3089_v25 = vunpack.c.h.bf16 %v7616_v57  ;;  %v3087_v23 = vunpack.c.l.bf16 %v7616_v57 }
 0x897   : > { %v3011_v37 = vmul.bf16 1069105081, %v2954_v8  ;;  %v3014_v58 = vmul.bf16 1069105081, %v2955_v13 }
 0x898   : > { %v2826_v54 = vpop.xlane.xlu1 %2825  ;;  %v3161_v9 = vadd.f32 %v3089_v25, %v3088_v0  ;;  %v3158_v20 = vadd.f32 %v3087_v23, %v3086_v45 }
 0x899   : > { %5696 = vpow.bf16 %v3011_v37  ;;  %v2906_v28 = vsub.f32 %v7446_v39, %v2826_v54  ;;  %v2907_v10 = vsub.f32 %v7448_v11, %v2826_v54 }
 0x89a   : > { %5698 = vpow.bf16 %v3014_v58  ;;  %3162 = vadd.xlane.f32.xlu0 %v3161_v9  ;;  %3159 = vadd.xlane.f32.xlu1 %v3158_v20  ;;  %v2829_v14 = vpop.xlane.xlu0 %2828 }
 0x89b   : > { %v2908_v31 = vsub.f32 %v7452_v5, %v2829_v14  ;;  %v2909_v47 = vsub.f32 %v7454_v60, %v2829_v14 }
 0x89c   : > { %v7626_v32 = vpop.eup %5692 }
 0x89d   : > { %v7628_v55 = vpop.eup %5694  ;;  %v2956_v24 = vpack.c.bf16 %v2908_v31, %v2906_v28  ;;  %v2957_v35 = vpack.c.bf16 %v2909_v47, %v2907_v10  ;;  %v3092_v18 = vunpack.c.h.bf16 %v7626_v32  ;;  %v3090_v62 = vunpack.c.l.bf16 %v7626_v32 }
 0x89e   : > { %v3093_v7 = vunpack.c.h.bf16 %v7628_v55  ;;  %v3091_v39 = vunpack.c.l.bf16 %v7628_v55 }
 0x89f   : > { %v3017_v50 = vmul.bf16 1069105081, %v2956_v24  ;;  %v3020_v11 = vmul.bf16 1069105081, %v2957_v35 }
 0x8a0   : > { %v2832_v63 = vpop.xlane.xlu1 %2831  ;;  %v3167_v5 = vadd.f32 %v3093_v7, %v3092_v18  ;;  %v3164_v46 = vadd.f32 %v3091_v39, %v3090_v62 }
 0x8a1   : > { %5700 = vpow.bf16 %v3017_v50  ;;  %v2910_v44 = vsub.f32 %v7458_v1, %v2832_v63  ;;  %v2911_v4 = vsub.f32 %v7460_v38, %v2832_v63 }
 0x8a2   : > { %5702 = vpow.bf16 %v3020_v11  ;;  %3168 = vadd.xlane.f32.xlu0 %v3167_v5  ;;  %3165 = vadd.xlane.f32.xlu1 %v3164_v46  ;;  %v2835_v60 = vpop.xlane.xlu0 %2834 }
 0x8a3   : > { %v2912_v30 = vsub.f32 %v7464_v53, %v2835_v60  ;;  %v2913_v2 = vsub.f32 %v7466_v41, %v2835_v60 }
 0x8a4   : > { %v7638_v48 = vpop.eup %5696 }
 0x8a5   : > { %v7640_v56 = vpop.eup %5698  ;;  %v2958_v36 = vpack.c.bf16 %v2912_v30, %v2910_v44  ;;  %v2959_v8 = vpack.c.bf16 %v2913_v2, %v2911_v4  ;;  %v3096_v13 = vunpack.c.h.bf16 %v7638_v48  ;;  %v3094_v0 = vunpack.c.l.bf16 %v7638_v48 }
 0x8a6   : > { %v3097_v45 = vunpack.c.h.bf16 %v7640_v56  ;;  %v3095_v1 = vunpack.c.l.bf16 %v7640_v56 }
 0x8a7   : > { %v3023_v25 = vmul.bf16 1069105081, %v2958_v36  ;;  %v3026_v38 = vmul.bf16 1069105081, %v2959_v8 }
 0x8a8   : > { %v2838_v23 = vpop.xlane.xlu1 %2837  ;;  %v3173_v53 = vadd.f32 %v3097_v45, %v3096_v13  ;;  %v3170_v37 = vadd.f32 %v3095_v1, %v3094_v0 }
 0x8a9   : > { %5704 = vpow.bf16 %v3023_v25  ;;  %v2914_v58 = vsub.f32 %v7470_v3, %v2838_v23  ;;  %v2915_v54 = vsub.f32 %v7472_v52, %v2838_v23 }
 0x8aa   : > { %5706 = vpow.bf16 %v3026_v38  ;;  %3174 = vadd.xlane.f32.xlu0 %v3173_v53  ;;  %3171 = vadd.xlane.f32.xlu1 %v3170_v37  ;;  %v2841_v41 = vpop.xlane.xlu0 %2840 }
 0x8ab   : > { %v2916_v9 = vsub.f32 %v7476_v49, %v2841_v41  ;;  %v2917_v20 = vsub.f32 %v7478_v6, %v2841_v41 }
 0x8ac   : > { %v7650_v14 = vpop.eup %5700 }
 0x8ad   : > { %v7652_v28 = vpop.eup %5702  ;;  %v2960_v10 = vpack.c.bf16 %v2916_v9, %v2914_v58  ;;  %v2961_v31 = vpack.c.bf16 %v2917_v20, %v2915_v54  ;;  %v3100_v47 = vunpack.c.h.bf16 %v7650_v14  ;;  %v3098_v24 = vunpack.c.l.bf16 %v7650_v14 }
 0x8ae   : > { %v3101_v35 = vunpack.c.h.bf16 %v7652_v28  ;;  %v3099_v3 = vunpack.c.l.bf16 %v7652_v28 }
 0x8af   : > { %v3029_v18 = vmul.bf16 1069105081, %v2960_v10  ;;  %v3032_v52 = vmul.bf16 1069105081, %v2961_v31 }
 0x8b0   : > { %v2844_v62 = vpop.xlane.xlu1 %2843  ;;  %v3179_v49 = vadd.f32 %v3101_v35, %v3100_v47  ;;  %v3176_v7 = vadd.f32 %v3099_v3, %v3098_v24  ;;  %v9010_v47 = vld [vmem:[#allocation26_spill] sm:$0xff]  ;;  %v9011_v35 = vld [vmem:[#allocation23_spill] sm:$0xff] }
 0x8b1   : > { %5708 = vpow.bf16 %v3029_v18  ;;  %v2918_v39 = vsub.f32 %v7482_v17, %v2844_v62  ;;  %v2919_v50 = vsub.f32 %v7484_v34, %v2844_v62  ;;  %v9012_v18 = vld [vmem:[#allocation24_spill] sm:$0xff] }
 0x8b2   : > { %5710 = vpow.bf16 %v3032_v52  ;;  %3180 = vadd.xlane.f32.xlu0 %v3179_v49  ;;  %3177 = vadd.xlane.f32.xlu1 %v3176_v7  ;;  %v2847_v6 = vpop.xlane.xlu0 %2846 }
 0x8b3   : > { %v2920_v11 = vsub.f32 %v7488_v40, %v2847_v6  ;;  %v2921_v63 = vsub.f32 %v7490_v42, %v2847_v6 }
 0x8b4   : > { %v7662_v5 = vpop.eup %5704 }
 0x8b5   : > { %v7664_v46 = vpop.eup %5706  ;;  %v2962_v60 = vpack.c.bf16 %v2920_v11, %v2918_v39  ;;  %v2963_v44 = vpack.c.bf16 %v2921_v63, %v2919_v50  ;;  %v3104_v4 = vunpack.c.h.bf16 %v7662_v5  ;;  %v3102_v30 = vunpack.c.l.bf16 %v7662_v5 }
 0x8b6   : > { %v3105_v2 = vunpack.c.h.bf16 %v7664_v46  ;;  %v3103_v17 = vunpack.c.l.bf16 %v7664_v46 }
 0x8b7   : > { %v3035_v36 = vmul.bf16 1069105081, %v2962_v60  ;;  %v3038_v34 = vmul.bf16 1069105081, %v2963_v44 }
 0x8b8   : > { %v2850_v8 = vpop.xlane.xlu1 %2849  ;;  %v3185_v40 = vadd.f32 %v3105_v2, %v3104_v4  ;;  %v3182_v13 = vadd.f32 %v3103_v17, %v3102_v30  ;;  %v9013_v17 = vld [vmem:[#allocation27_spill] sm:$0xff] }
 0x8b9   : > { %5712 = vpow.bf16 %v3035_v36  ;;  %v2922_v0 = vsub.f32 %v7494_v51, %v2850_v8  ;;  %v2923_v45 = vsub.f32 %v7496_v26, %v2850_v8 }
 0x8ba   : > { %5714 = vpow.bf16 %v3038_v34  ;;  %3186 = vadd.xlane.f32.xlu0 %v3185_v40  ;;  %3183 = vadd.xlane.f32.xlu1 %v3182_v13  ;;  %v2853_v42 = vpop.xlane.xlu0 %2852  ;;  %v9014_v34 = vld [vmem:[#allocation28_spill] sm:$0xff]  ;;  %v9015_v40 = vld [vmem:[#allocation10_spill] sm:$0xff] }
 0x8bb   : > { %v2924_v1 = vsub.f32 %v7500_v33, %v2853_v42  ;;  %v2925_v25 = vsub.f32 %v7502_v19, %v2853_v42  ;;  %v9016_v42 = vld [vmem:[#allocation11_spill] sm:$0xff] }
 0x8bc   : > { %v7674_v38 = vpop.eup %5708 }
 0x8bd   : > { %v7676_v23 = vpop.eup %5710  ;;  %v2964_v53 = vpack.c.bf16 %v2924_v1, %v2922_v0  ;;  %v2965_v37 = vpack.c.bf16 %v2925_v25, %v2923_v45  ;;  %v3108_v41 = vunpack.c.h.bf16 %v7674_v38  ;;  %v3106_v58 = vunpack.c.l.bf16 %v7674_v38 }
 0x8be   : > { %v3109_v54 = vunpack.c.h.bf16 %v7676_v23  ;;  %v3107_v51 = vunpack.c.l.bf16 %v7676_v23 }
 0x8bf   : > { %v3041_v9 = vmul.bf16 1069105081, %v2964_v53  ;;  %v3044_v26 = vmul.bf16 1069105081, %v2965_v37 }
 0x8c0   : > { %v2856_v20 = vpop.xlane.xlu1 %2855  ;;  %v3191_v33 = vadd.f32 %v3109_v54, %v3108_v41  ;;  %v3188_v10 = vadd.f32 %v3107_v51, %v3106_v58 }
 0x8c1   : > { %5716 = vpow.bf16 %v3041_v9  ;;  %v2926_v31 = vsub.f32 %v7506_v12, %v2856_v20  ;;  %v2927_v24 = vsub.f32 %v9010_v47, %v2856_v20  ;;  %v9018_v47 = vld [vmem:[#allocation8_spill] sm:$0xff] }
 0x8c2   : > { %5718 = vpow.bf16 %v3044_v26  ;;  %3192 = vadd.xlane.f32.xlu0 %v3191_v33  ;;  %3189 = vadd.xlane.f32.xlu1 %v3188_v10  ;;  %v2859_v19 = vpop.xlane.xlu0 %2858 }
 0x8c3   : > { %v2928_v3 = vsub.f32 %v9011_v35, %v2859_v19  ;;  %v2929_v52 = vsub.f32 %v9012_v18, %v2859_v19  ;;  %v9017_v19 = vld [vmem:[#allocation7_spill] sm:$0xff]  ;;  %v9019_v35 = vld [vmem:[#allocation9_spill] sm:$0xff]  ;;  %v9020_v18 = vld [vmem:[#allocation6_spill] sm:$0xff] }
 0x8c4   : > { %v7686_v62 = vpop.eup %5712 }
 0x8c5   : > { %v7688_v49 = vpop.eup %5714  ;;  %v2966_v7 = vpack.c.bf16 %v2928_v3, %v2926_v31  ;;  %v2967_v6 = vpack.c.bf16 %v2929_v52, %v2927_v24  ;;  %v3112_v39 = vunpack.c.h.bf16 %v7686_v62  ;;  %v3110_v50 = vunpack.c.l.bf16 %v7686_v62 }
 0x8c6   : > { %v3113_v11 = vunpack.c.h.bf16 %v7688_v49  ;;  %v3111_v12 = vunpack.c.l.bf16 %v7688_v49 }
 0x8c7   : > { %v3047_v63 = vmul.bf16 1069105081, %v2966_v7  ;;  %v3050_v60 = vmul.bf16 1069105081, %v2967_v6 }
 0x8c8   : > { %v2862_v44 = vpop.xlane.xlu1 %2861  ;;  %v3197_v4 = vadd.f32 %v3113_v11, %v3112_v39  ;;  %v3194_v30 = vadd.f32 %v3111_v12, %v3110_v50 }
 0x8c9   : > { %5720 = vpow.bf16 %v3047_v63  ;;  %v2930_v36 = vsub.f32 %v9013_v17, %v2862_v44  ;;  %v2931_v8 = vsub.f32 %v9014_v34, %v2862_v44  ;;  %v9021_v34 = vld [vmem:[#allocation13_spill] sm:$0xff] }
 0x8ca   : > { %5722 = vpow.bf16 %v3050_v60  ;;  %3198 = vadd.xlane.f32.xlu0 %v3197_v4  ;;  %3195 = vadd.xlane.f32.xlu1 %v3194_v30  ;;  %v2865_v2 = vpop.xlane.xlu0 %2864 }
 0x8cb   : > { %v2932_v13 = vsub.f32 %v9015_v40, %v2865_v2  ;;  %v2933_v0 = vsub.f32 %v9016_v42, %v2865_v2  ;;  %v9022_v40 = vld [vmem:[#allocation12_spill] sm:$0xff]  ;;  %v9023_v42 = vld [vmem:[#allocation29_spill] sm:$0xff] }
 0x8cc   : > { %v7698_v45 = vpop.eup %5716 }
 0x8cd   : > { %v7700_v1 = vpop.eup %5718  ;;  %v2968_v25 = vpack.c.bf16 %v2932_v13, %v2930_v36  ;;  %v2969_v53 = vpack.c.bf16 %v2933_v0, %v2931_v8  ;;  %v3116_v37 = vunpack.c.h.bf16 %v7698_v45  ;;  %v3114_v41 = vunpack.c.l.bf16 %v7698_v45 }
 0x8ce   : > { %v3117_v58 = vunpack.c.h.bf16 %v7700_v1  ;;  %v3115_v54 = vunpack.c.l.bf16 %v7700_v1 }
 0x8cf   : > { %v3053_v51 = vmul.bf16 1069105081, %v2968_v25  ;;  %v3056_v9 = vmul.bf16 1069105081, %v2969_v53  ;;  %v9024_v25 = vld [vmem:[#allocation30_spill] sm:$0xff] }
 0x8d0   : > { %v2868_v26 = vpop.xlane.xlu1 %2867  ;;  %v3203_v20 = vadd.f32 %v3117_v58, %v3116_v37  ;;  %v3200_v33 = vadd.f32 %v3115_v54, %v3114_v41 }
 0x8d1   : > { %5724 = vpow.bf16 %v3053_v51  ;;  %v2934_v31 = vsub.f32 %v9017_v19, %v2868_v26  ;;  %v2935_v24 = vsub.f32 %v9018_v47, %v2868_v26 }
 0x8d2   : > { %5726 = vpow.bf16 %v3056_v9  ;;  %3204 = vadd.xlane.f32.xlu0 %v3203_v20  ;;  %3201 = vadd.xlane.f32.xlu1 %v3200_v33  ;;  %v2871_v10 = vpop.xlane.xlu0 %2870 }
 0x8d3   : > { %v2936_v3 = vsub.f32 %v9019_v35, %v2871_v10  ;;  %v2937_v52 = vsub.f32 %v9020_v18, %v2871_v10 }
 0x8d4   : > { %v7710_v7 = vpop.eup %5720 }
 0x8d5   : > { %v7712_v6 = vpop.eup %5722  ;;  %v2970_v39 = vpack.c.bf16 %v2936_v3, %v2934_v31  ;;  %v2971_v50 = vpack.c.bf16 %v2937_v52, %v2935_v24  ;;  %v3120_v11 = vunpack.c.h.bf16 %v7710_v7  ;;  %v3118_v12 = vunpack.c.l.bf16 %v7710_v7 }
 0x8d6   : > { %v3121_v63 = vunpack.c.h.bf16 %v7712_v6  ;;  %v3119_v60 = vunpack.c.l.bf16 %v7712_v6 }
 0x8d7   : > { %v3059_v44 = vmul.bf16 1069105081, %v2970_v39  ;;  %v3062_v4 = vmul.bf16 1069105081, %v2971_v50 }
 0x8d8   : > { %v2874_v30 = vpop.xlane.xlu1 %2873  ;;  %v3209_v2 = vadd.f32 %v3121_v63, %v3120_v11  ;;  %v3206_v17 = vadd.f32 %v3119_v60, %v3118_v12 }
 0x8d9   : > { %5728 = vpow.bf16 %v3059_v44  ;;  %v2938_v8 = vsub.f32 %v9021_v34, %v2874_v30  ;;  %v2939_v13 = vsub.f32 %v9022_v40, %v2874_v30 }
 0x8da   : > { %5730 = vpow.bf16 %v3062_v4  ;;  %3210 = vadd.xlane.f32.xlu0 %v3209_v2  ;;  %3207 = vadd.xlane.f32.xlu1 %v3206_v17  ;;  %v2877_v36 = vpop.xlane.xlu0 %2876 }
 0x8db   : > { %v2940_v0 = vsub.f32 %v9023_v42, %v2877_v36  ;;  %v2941_v53 = vsub.f32 %v9024_v25, %v2877_v36 }
 0x8dc   : > { %v7722_v37 = vpop.eup %5724 }
 0x8dd   : > { %v7724_v41 = vpop.eup %5726  ;;  %v2972_v58 = vpack.c.bf16 %v2940_v0, %v2938_v8  ;;  %v2973_v54 = vpack.c.bf16 %v2941_v53, %v2939_v13  ;;  %v3124_v51 = vunpack.c.h.bf16 %v7722_v37  ;;  %v3122_v9 = vunpack.c.l.bf16 %v7722_v37 }
 0x8de   : > { %v3125_v26 = vunpack.c.h.bf16 %v7724_v41  ;;  %v3123_v20 = vunpack.c.l.bf16 %v7724_v41 }
 0x8df   : > { %v3065_v33 = vmul.bf16 1069105081, %v2972_v58  ;;  %v3068_v10 = vmul.bf16 1069105081, %v2973_v54 }
 0x8e0   : > { %v3215_v19 = vadd.f32 %v3125_v26, %v3124_v51  ;;  %v3212_v31 = vadd.f32 %v3123_v20, %v3122_v9  ;;  %v9025_v9 = vld [vmem:[#allocation17_spill] sm:$0xff]  ;;  %v9026_v20 = vld [vmem:[#allocation16_spill] sm:$0xff] }
 0x8e1   : > { %5732 = vpow.bf16 %v3065_v33  ;;  %v3392_v26 = vrot.slane %v9025_v9, 2  ;;  %v3391_v33 = vrot.slane %v9026_v20, 2 }
 0x8e2   : > { %5734 = vpow.bf16 %v3068_v10  ;;  %3216 = vadd.xlane.f32.xlu0 %v3215_v19  ;;  %3213 = vadd.xlane.f32.xlu1 %v3212_v31 }
 0x8e4   : > { %v7730_v47 = vpop.eup %5728 }
 0x8e5   : > { %v7732_v24 = vpop.eup %5730  ;;  %v3128_v35 = vunpack.c.h.bf16 %v7730_v47  ;;  %v3126_v3 = vunpack.c.l.bf16 %v7730_v47 }
 0x8e6   : > { %v3129_v18 = vunpack.c.h.bf16 %v7732_v24  ;;  %v3127_v52 = vunpack.c.l.bf16 %v7732_v24 }
 0x8e8   : > { %v3221_v39 = vadd.f32 %v3129_v18, %v3128_v35  ;;  %v3218_v50 = vadd.f32 %v3127_v52, %v3126_v3 }
 0x8ea   : > { %3222 = vadd.xlane.f32.xlu0 %v3221_v39  ;;  %3219 = vadd.xlane.f32.xlu1 %v3218_v50 }
 0x8ec   : > { %v7738_v11 = vpop.eup %5732 }
 0x8ed   : > { %v7740_v12 = vpop.eup %5734  ;;  %v3132_v63 = vunpack.c.h.bf16 %v7738_v11  ;;  %v3130_v60 = vunpack.c.l.bf16 %v7738_v11 }
 0x8ee   : > { %v3133_v44 = vunpack.c.h.bf16 %v7740_v12  ;;  %v3131_v4 = vunpack.c.l.bf16 %v7740_v12 }
 0x8f0   : > { %v3227_v30 = vadd.f32 %v3133_v44, %v3132_v63  ;;  %v3224_v2 = vadd.f32 %v3131_v4, %v3130_v60 }
 0x8f2   : > { %3228 = vadd.xlane.f32.xlu0 %v3227_v30  ;;  %3225 = vadd.xlane.f32.xlu1 %v3224_v2 }
 0x907   : > { %v3139_v17 = vpop.xlane.xlu0 %3138  ;;  %v3136_v36 = vpop.xlane.xlu1 %3135 }
 0x908   : > { %5736 = vrcp.f32 %v3139_v17 }
 0x909   : > { %5738 = vrcp.f32 %v3136_v36 }
 0x911   : > { %v3145_v34 = vpop.xlane.xlu0 %3144  ;;  %v3142_v8 = vpop.xlane.xlu1 %3141 }
 0x912   : > { %v5737_v40 = vpop.eup %5736  ;;  %5740 = vrcp.f32 %v3145_v34 }
 0x913   : > { %v5739_v13 = vpop.eup %5738  ;;  %5742 = vrcp.f32 %v3142_v8 }
 0x914   : > { %v3262_v42 = vpack.c.bf16 %v5737_v40, %v5739_v13 }
 0x916   : > { %v3279_v0 = vmul.bf16 %v7568_v61, %v3262_v42  ;;  %v3278_v25 = vmul.bf16 %v7566_v22, %v3262_v42 }
 0x917   : > { %v3151_v53 = vpop.xlane.xlu0 %3150  ;;  %v3148_v58 = vpop.xlane.xlu1 %3147 }
 0x918   : > { %5744 = vrcp.f32 %v3151_v53  ;;  %3322 = vmatprep.subr.bf16.mxu1 %v3279_v0 }
 0x919   : > { %5746 = vrcp.f32 %v3148_v58  ;;  %3323 = vmatpush1.bf16.msra.mxu1 %v3278_v25 }
 0x91c   : > { %v5741_v54 = vpop.eup %5740 }
 0x91d   : > { %v5743_v51 = vpop.eup %5742 }
 0x91e   : > { %v3263_v10 = vpack.c.bf16 %v5741_v54, %v5743_v51 }
 0x91f   : > { %v3157_v19 = vpop.xlane.xlu0 %3156  ;;  %3411 = vxpose.xlu0.c.b16.start.end [1/1] (short) %v3392_v26, 128  ;;  %3395 = vxpose.xlu1.c.b16.start.end [1/1] (short) %v3391_v33, 128  ;;  %v3154_v31 = vpop.xlane.xlu1 %3153 }
 0x920   : > { %5748 = vrcp.f32 %v3157_v19  ;;  %v3281_v22 = vmul.bf16 %v7580_v21, %v3263_v10  ;;  %v3280_v61 = vmul.bf16 %v7578_v27, %v3263_v10 }
 0x921   : > { %5750 = vrcp.f32 %v3154_v31 }
 0x922   : > { %v5745_v35 = vpop.eup %5744  ;;  %3324 = vmatprep.subr.bf16.mxu1 %v3281_v22 }
 0x923   : > { %v5747_v3 = vpop.eup %5746  ;;  %3325 = vmatpush1.bf16.msra.mxu1 %v3280_v61 }
 0x924   : > { %v3264_v18 = vpack.c.bf16 %v5745_v35, %v5747_v3 }
 0x926   : > { %v3283_v52 = vmul.bf16 %v7592_v16, %v3264_v18  ;;  %v3282_v39 = vmul.bf16 %v7590_v29, %v3264_v18 }
 0x927   : > { %v3163_v50 = vpop.xlane.xlu0 %3162  ;;  %v3160_v63 = vpop.xlane.xlu1 %3159 }
 0x928   : > { %5752 = vrcp.f32 %v3163_v50  ;;  %3326 = vmatprep.subr.bf16.mxu1 %v3283_v52 }
 0x929   : > { %5754 = vrcp.f32 %v3160_v63  ;;  %3327 = vmatpush1.bf16.msra.mxu1 %v3282_v39 }
 0x92a   : > { %v5749_v60 = vpop.eup %5748 }
 0x92b   : > { %v5751_v21 = vpop.eup %5750 }
 0x92c   : > { %v3265_v44 = vpack.c.bf16 %v5749_v60, %v5751_v21 }
 0x92e   : > { %v3285_v27 = vmul.bf16 %v7604_v59, %v3265_v44  ;;  %v3284_v4 = vmul.bf16 %v7602_v15, %v3265_v44 }
 0x92f   : > { %v3169_v30 = vpop.xlane.xlu0 %3168  ;;  %v3166_v2 = vpop.xlane.xlu1 %3165 }
 0x930   : > { %5756 = vrcp.f32 %v3169_v30  ;;  %3328 = vmatprep.subr.bf16.mxu1 %v3285_v27 }
 0x931   : > { %5758 = vrcp.f32 %v3166_v2  ;;  %3329 = vmatpush1.bf16.msra.mxu1 %v3284_v4 }
 0x932   : > { %v5753_v29 = vpop.eup %5752 }
 0x933   : > { %v5755_v16 = vpop.eup %5754 }
 0x934   : > { %v3266_v17 = vpack.c.bf16 %v5753_v29, %v5755_v16 }
 0x936   : > { %v3287_v36 = vmul.bf16 %v7616_v57, %v3266_v17  ;;  %v3286_v34 = vmul.bf16 %v7614_v43, %v3266_v17 }
 0x937   : > { %v3175_v8 = vpop.xlane.xlu0 %3174  ;;  %v3172_v40 = vpop.xlane.xlu1 %3171 }
 0x938   : > { %5760 = vrcp.f32 %v3175_v8  ;;  %3330 = vmatprep.subr.bf16.mxu1 %v3287_v36 }
 0x939   : > { %5762 = vrcp.f32 %v3172_v40  ;;  %3331 = vmatpush1.bf16.msra.mxu1 %v3286_v34 }
 0x93a   : > { %v5757_v15 = vpop.eup %5756 }
 0x93b   : > { %v5759_v59 = vpop.eup %5758 }
 0x93c   : > { %v3267_v13 = vpack.c.bf16 %v5757_v15, %v5759_v59 }
 0x93e   : > { %v3289_v42 = vmul.bf16 %v7628_v55, %v3267_v13  ;;  %v3288_v0 = vmul.bf16 %v7626_v32, %v3267_v13 }
 0x93f   : > { %v3181_v25 = vpop.xlane.xlu0 %3180  ;;  %v3178_v53 = vpop.xlane.xlu1 %3177 }
 0x940   : > { %5764 = vrcp.f32 %v3181_v25  ;;  %3332 = vmatprep.subr.bf16.mxu1 %v3289_v42 }
 0x941   : > { %5766 = vrcp.f32 %v3178_v53  ;;  %3333 = vmatpush1.bf16.msra.mxu1 %v3288_v0 }
 0x942   : > { %v5761_v43 = vpop.eup %5760 }
 0x943   : > { %v5763_v57 = vpop.eup %5762 }
 0x944   : > { %v3268_v58 = vpack.c.bf16 %v5761_v43, %v5763_v57 }
 0x946   : > { %v3291_v54 = vmul.bf16 %v7640_v56, %v3268_v58  ;;  %v3290_v51 = vmul.bf16 %v7638_v48, %v3268_v58 }
 0x947   : > { %v3187_v26 = vpop.xlane.xlu0 %3186  ;;  %v3184_v33 = vpop.xlane.xlu1 %3183 }
 0x948   : > { %5768 = vrcp.f32 %v3187_v26  ;;  %3334 = vmatprep.subr.bf16.mxu1 %v3291_v54 }
 0x949   : > { %5770 = vrcp.f32 %v3184_v33  ;;  %3335 = vmatpush1.bf16.msra.mxu1 %v3290_v51 }
 0x94a   : > { %v5765_v32 = vpop.eup %5764 }
 0x94b   : > { %v5767_v55 = vpop.eup %5766 }
 0x94c   : > { %v3269_v10 = vpack.c.bf16 %v5765_v32, %v5767_v55  ;;  %v9027_v55 = vld [vmem:[#allocation15_spill] sm:$0xff] }
 0x94e   : > { %v3293_v19 = vmul.bf16 %v7652_v28, %v3269_v10  ;;  %v3292_v31 = vmul.bf16 %v7650_v14, %v3269_v10  ;;  %v3428_v10 = vrot.slane %v9027_v55, 2 }
 0x94f   : > { %v3193_v22 = vpop.xlane.xlu0 %3192  ;;  %v3190_v61 = vpop.xlane.xlu1 %3189 }
 0x950   : > { %5772 = vrcp.f32 %v3193_v22  ;;  %3336 = vmatprep.subr.bf16.mxu1 %v3293_v19  ;;  %v9028_v19 = vld [vmem:[#allocation14_spill] sm:$0xff] }
 0x951   : > { %5774 = vrcp.f32 %v3190_v61  ;;  %3337 = vmatpush1.bf16.msra.mxu1 %v3292_v31  ;;  %v3427_v31 = vrot.slane %v9028_v19, 2  ;;  %v9030_v61 = vmov 0  }
 0x952   : > { %v5769_v48 = vpop.eup %5768 }
 0x953   : > { %v5771_v56 = vpop.eup %5770 }
 0x954   : > { %v3270_v35 = vpack.c.bf16 %v5769_v48, %v5771_v56 }
 0x956   : > { %v3295_v3 = vmul.bf16 %v7664_v46, %v3270_v35  ;;  %v3294_v18 = vmul.bf16 %v7662_v5, %v3270_v35 }
 0x957   : > { %v3199_v52 = vpop.xlane.xlu0 %3198  ;;  %v3196_v39 = vpop.xlane.xlu1 %3195 }
 0x958   : > { %5776 = vrcp.f32 %v3199_v52  ;;  %3338 = vmatprep.subr.bf16.mxu1 %v3295_v3 }
 0x959   : > { %5778 = vrcp.f32 %v3196_v39  ;;  %3339 = vmatpush1.bf16.msra.mxu1 %v3294_v18 }
 0x95a   : > { %v5773_v14 = vpop.eup %5772 }
 0x95b   : > { %v5775_v28 = vpop.eup %5774 }
 0x95c   : > { %v3271_v50 = vpack.c.bf16 %v5773_v14, %v5775_v28 }
 0x95e   : > { %v3297_v63 = vmul.bf16 %v7676_v23, %v3271_v50  ;;  %v3296_v60 = vmul.bf16 %v7674_v38, %v3271_v50 }
 0x95f   : > { %v3205_v21 = vpop.xlane.xlu0 %3204  ;;  %v3202_v44 = vpop.xlane.xlu1 %3201 }
 0x960   : > { %5780 = vrcp.f32 %v3205_v21  ;;  %3340 = vmatprep.subr.bf16.mxu1 %v3297_v63 }
 0x961   : > { %5782 = vrcp.f32 %v3202_v44  ;;  %3341 = vmatpush1.bf16.msra.mxu1 %v3296_v60 }
 0x962   : > { %v5777_v5 = vpop.eup %5776 }
 0x963   : > { %v5779_v46 = vpop.eup %5778 }
 0x964   : > { %v3272_v27 = vpack.c.bf16 %v5777_v5, %v5779_v46  ;;  %v9031_v5 = vld [vmem:[#allocation22_spill] sm:$0xff] }
 0x965   : > { %v5095_v46 = vrot.slane %v9031_v5, 3 }
 0x966   : > { %v3299_v4 = vmul.bf16 %v7688_v49, %v3272_v27  ;;  %v3298_v30 = vmul.bf16 %v7686_v62, %v3272_v27  ;;  %v6056_v27 = vld [vmem:[%s6255_s17] sm:$0xff]  ;;  %s431_s17 = sand.u32 1, %s6111_s26  }
 0x967   : > { %v3211_v2 = vpop.xlane.xlu0 %3210  ;;  %v3208_v29 = vpop.xlane.xlu1 %3207  ;;  %s5261_s24 = sshll.u32 %s431_s17, 3  ;;  %s5184_s23 = scalar_lea.sflag [#allocation3], %s431_s17 }
 0x968   : > { %5784 = vrcp.f32 %v3211_v2  ;;  %3342 = vmatprep.subr.bf16.mxu1 %v3299_v4  ;;  %v7819_v4 = vunpack.c.l.bf16 %v6056_v27  ;;  %v9034_v2 = vld [vmem:[#allocation21_spill] sm:$0xff]  ;;  %s433_s15 = scalar_lea.vmem [#allocation2], %s5261_s24  ;;  %s6122_s24 = smov [#allocation2]  }
 0x969   : > { %5786 = vrcp.f32 %v3208_v29  ;;  %3343 = vmatpush1.bf16.msra.mxu1 %v3298_v30  ;;  %v7821_v30 = vunpack.c.h.bf16 %v6056_v27  ;;  %s5198_s16 = sshll.u32 %s433_s15, 4  ;;  %s6061_s0 = sshll.u32 %s6122_s24, 4  ;;  %s8742_s16 = int_to_ptr.vmem [resolvable:$true] %s5198_s16  ;;  %s6062_s0 = int_to_ptr.vmem [resolvable:$false] %s6061_s0 }
 0x96a   : > { %v5781_v38 = vpop.eup %5780  ;;  %9032 = vst [vmem:[#allocation26_spill] sm:$0xff] %v7819_v4  ;;  %v2476_v29 = vmul.f32 %v7819_v4, %v9034_v2  ;;  %s6057_s29 = scalar_lea.vmem %s8742_s16, 128  ;;  %s6063_s1 = scalar_lea.vmem %s6062_s0, 256 }
 0x96b   : > { %v5783_v23 = vpop.eup %5782  ;;  %9033 = vst [vmem:[#allocation23_spill] sm:$0xff] %v7821_v30  ;;  %p6058_p11 = scmp.ne.s32.totalorder %s8742_s16, %s6057_s29  ;;  %p6064_p0 = scmp.lt.s32.totalorder %s8742_s16, %s6062_s0 }
 0x96c   : > { %v3273_v16 = vpack.c.bf16 %v5781_v38, %v5783_v23  ;;  %v9035_v38 = vld [vmem:[#allocation25_spill] sm:$0xff]  ;;  %p6065_p1 = scmp.lt.s32.totalorder %s6063_s1, %s6057_s29 }
 0x96d   : > { %v2477_v23 = vmul.f32 %v7821_v30, %v9035_v38  ;;  %p6059_p12 = pnand %p6058_p11, %p6231_p5 }
 0x96e   : > { %v3301_v17 = vmul.bf16 %v7700_v1, %v3273_v16  ;;  %v3300_v36 = vmul.bf16 %v7698_v45, %v3273_v16  ;;  %v2479_v16 = vsel %vm2478_vm4, %v2476_v29, 0.0  ;;  %p6066_p2 = por %p6065_p1, %p6064_p0 }
 0x96f   : > { %v3217_v34 = vpop.xlane.xlu0 %3216  ;;  %v3214_v8 = vpop.xlane.xlu1 %3213  ;;  %p6060_p13 = pneg %p6059_p12 }
 0x970   : > { %5788 = vrcp.f32 %v3217_v34  ;;  %3344 = vmatprep.subr.bf16.mxu1 %v3301_v17  ;;  %v2486_v17 = vsel %vm2478_vm4, %v2477_v23, 0.0 }
 0x971   : > { %5790 = vrcp.f32 %v3214_v8  ;;  %3345 = vmatpush1.bf16.msra.mxu1 %v3300_v36  ;;  %v9036_v36 = vld [vmem:[#allocation18_spill] sm:$0xff]  ;;  %v2480_v8 = vrot.slane %v2479_v16, 4  ;;  %p6067_p3 = pnand %p6066_p2, %p6060_p13 }
 0x972   : > { %v5785_v62 = vpop.eup %5784  ;;  %v3318_v34 = vrot.slane %v9036_v36, 2 }
 0x973   : > { %v5787_v49 = vpop.eup %5786 }
 0x974   : > { %v3274_v40 = vpack.c.bf16 %v5785_v62, %v5787_v49  ;;  %v9037_v49 = vld [vmem:[#allocation19_spill] sm:$0xff] }
 0x976   : > { %v3303_v15 = vmul.bf16 %v7712_v6, %v3274_v40  ;;  %v3302_v59 = vmul.bf16 %v7710_v7, %v3274_v40  ;;  %v3319_v40 = vrot.slane %v9037_v49, 2 }
 0x977   : > { %v3223_v13 = vpop.xlane.xlu0 %3222  ;;  %v3220_v42 = vpop.xlane.xlu1 %3219 }
 0x978   : > { %5792 = vrcp.f32 %v3223_v13  ;;  %3346 = vmatprep.subr.bf16.mxu1 %v3303_v15  ;;  %v2487_v15 = vrot.slane %v2486_v17, 4 }
 0x979   : > { %5794 = vrcp.f32 %v3220_v42  ;;  %3347 = vmatpush1.bf16.msra.mxu1 %v3302_v59 }
 0x97a   : > { %v5789_v45 = vpop.eup %5788 }
 0x97b   : > { %v5791_v1 = vpop.eup %5790 }
 0x97c   : > { %v3275_v0 = vpack.c.bf16 %v5789_v45, %v5791_v1 }
 0x97e   : > { %v3305_v25 = vmul.bf16 %v7724_v41, %v3275_v0  ;;  %v3304_v53 = vmul.bf16 %v7722_v37, %v3275_v0 }
 0x97f   : > { %v3229_v43 = vpop.xlane.xlu0 %3228  ;;  %v3226_v57 = vpop.xlane.xlu1 %3225 }
 0x980   : > { %5796 = vrcp.f32 %v3229_v43  ;;  %3348 = vmatprep.subr.bf16.mxu1 %v3305_v25  ;;  %v2481_v25 = vadd.f32 %v2480_v8, %v2479_v16  ;;  %v2488_v43 = vadd.f32 %v2487_v15, %v2486_v17 }
 0x981   : > { %5798 = vrcp.f32 %v3226_v57  ;;  %3349 = vmatpush1.bf16.msra.mxu1 %v3304_v53 }
 0x982   : > { %v5793_v7 = vpop.eup %5792 }
 0x983   : > { %v5795_v6 = vpop.eup %5794 }
 0x984   : > { %v3276_v58 = vpack.c.bf16 %v5793_v7, %v5795_v6 }
 0x985   : > { %v3403_v48 = vpop.trf.xlu1  ;;  %v3419_v39 = vpop.trf.xlu0 }
 0x986   : > { %v3307_v54 = vmul.bf16 %v7732_v24, %v3276_v58  ;;  %v3306_v51 = vmul.bf16 %v7730_v47, %v3276_v58  ;;  %v9029_v24 = vld [vmem:[#allocation20_spill] sm:$0xff]  ;;  %v3478_v47 = vsel %vm1705_vm2, %v3427_v31, 0  ;;  %v2482_v58 = vrot.slane %v2481_v25, 2 }
 0x987   : > { %v3312_v22 = vrot.slane %v9029_v24, 1 }
 0x988   : > { %3350 = vmatprep.subr.bf16.mxu1 %v3307_v54 }
 0x989   : > { %3351 = vmatpush1.bf16.msra.mxu1 %v3306_v51  ;;  %v3420_v14 = vpop.trf.xlu0 }
 0x98a   : > { %v5797_v26 = vpop.eup %5796 }
 0x98b   : > { %v5799_v33 = vpop.eup %5798 }
 0x98c   : > { %v3277_v41 = vpack.c.bf16 %v5797_v26, %v5799_v33  ;;  %v2489_v26 = vrot.slane %v2488_v43, 2 }
 0x98d   : > { %v3421_v28 = vpop.trf.xlu0 }
 0x98e   : > { %v3309_v37 = vmul.bf16 %v7740_v12, %v3277_v41  ;;  %v3308_v32 = vmul.bf16 %v7738_v11, %v3277_v41  ;;  %v3404_v11 = vpop.trf.xlu1 }
 0x990   : > { %3352 = vmatprep.subr.bf16.mxu1 %v3309_v37 }
 0x991   : > { %3353 = vmatpush1.bf16.msra.mxu1 %v3308_v32  ;;  %v3422_v50 = vpop.trf.xlu0 }
 0x992   : > { %5329 = vmatprep.subr.msk.bf16.mxu1 %vm1705_vm2, %v3428_v10  ;;  %v3405_v12 = vpop.trf.xlu1 }
 0x994   : > { %3355 = vmatmul.mubr.bf16.vlgmr.msra.gmra.mrb[112].mxu1 %v3312_v22 }
 0x995   : > { %3484 = vmatpush1.bf16.msra.mxu1 %v3478_v47  ;;  %3515 = vmatprep.mubr.bf16.mxu1 %v9030_v61  ;;  %v3423_v63 = vpop.trf.xlu0 }
 0x996   : > { %v3406_v56 = vpop.trf.xlu1 }
 0x999   : > { %v3424_v60 = vpop.trf.xlu0 }
 0x99a   : > { %v3407_v35 = vpop.trf.xlu1 }
 0x99c   : > { %5330 = vmatmul.mubr.msk.bf16.vlgmr.msra.gmra.mrb[116].mxu1 %vm1656_vm3, %v3403_v48  ;;  %v2483_v48 = vadd.f32 %v2482_v58, %v2481_v25 }
 0x99d   : > { %3525 = vmatprep.mubr.bf16.mxu1 %v9030_v61  ;;  %v3425_v21 = vpop.trf.xlu0 }
 0x99e   : > { %v3408_v3 = vpop.trf.xlu1 }
 0x9a1   : > { %v3426_v44 = vpop.trf.xlu0 }
 0x9a2   : > { %v3409_v18 = vpop.trf.xlu1 }
 0x9a4   : > { %5331 = vmatmul.mubr.msk.bf16.gmra.mrb[120].mxu1 %vm1656_vm3, %v3404_v11 }
 0x9a5   : > { %3535 = vmatprep.mubr.bf16.mxu1 %v9030_v61 }
 0x9a6   : > { %v3410_v52 = vpop.trf.xlu1 }
 0x9ac   : > { %5332 = vmatmul.mubr.msk.bf16.gmra.mrb[124].mxu1 %vm1656_vm3, %v3405_v12 }
 0x9ad   : > { %3545 = vmatprep.mubr.bf16.mxu1 %v9030_v61 }
 0x9b4   : > { %5333 = vmatmul.mubr.msk.bf16.gmra.mrb[128].mxu1 %vm1656_vm3, %v3406_v56  ;;  %v2490_v56 = vadd.f32 %v2489_v26, %v2488_v43 }
 0x9b5   : > { %3555 = vmatprep.mubr.bf16.mxu1 %v9030_v61 }
 0x9bc   : > { %5334 = vmatmul.mubr.msk.bf16.gmra.mrb[132].mxu1 %vm1656_vm3, %v3407_v35 }
 0x9bd   : > { %3565 = vmatprep.mubr.bf16.mxu1 %v9030_v61 }
 0x9c4   : > { %5335 = vmatmul.mubr.msk.bf16.gmra.mrb[136].mxu1 %vm1656_vm3, %v3408_v3 }
 0x9c5   : > { %3575 = vmatprep.mubr.bf16.mxu1 %v9030_v61 }
 0x9cc   : > { %5336 = vmatmul.mubr.msk.bf16.gmra.mrb[140].mxu1 %vm1656_vm3, %v3409_v18 }
 0x9cd   : > { %3585 = vmatprep.mubr.bf16.mxu1 %v9030_v61 }
 0x9d4   : > { %5337 = vmatmul.mubr.msk.bf16.gmra.mrb[144].mxu1 %vm1656_vm3, %v3410_v52  ;;  %v2484_v52 = vrot.slane %v2483_v48, 1 }
 0x9d5   : > { %3595 = vmatprep.mubr.bf16.mxu1 %v9030_v61 }
 0x9d6   : > { %v2485_v27 = vadd.f32 %v2484_v52, %v2483_v48 }
 0x9dc   : > { %5338 = vmatmul.mubr.msk.bf16.gmra.mrb[148].mxu1 %vm1656_vm3, %v3419_v39 }
 0x9dd   : > { %3605 = vmatprep.mubr.bf16.mxu1 %v9030_v61 }
 0x9e4   : > { %5339 = vmatmul.mubr.msk.bf16.gmra.mrb[152].mxu1 %vm1656_vm3, %v3420_v14 }
 0x9e5   : > { %3615 = vmatprep.mubr.bf16.mxu1 %v9030_v61 }
 0x9ec   : > { %5340 = vmatmul.mubr.msk.bf16.gmra.mrb[156].mxu1 %vm1656_vm3, %v3421_v28  ;;  %v2491_v28 = vrot.slane %v2490_v56, 1 }
 0x9ed   : > { %3625 = vmatprep.mubr.bf16.mxu1 %v9030_v61 }
 0x9ee   : > { %v2492_v38 = vadd.f32 %v2491_v28, %v2490_v56 }
 0x9f4   : > { %5341 = vmatmul.mubr.msk.bf16.gmra.mrb[160].mxu1 %vm1656_vm3, %v3422_v50 }
 0x9f5   : > { %3635 = vmatprep.mubr.bf16.mxu1 %v9030_v61 }
 0x9fc   : > { %5342 = vmatmul.mubr.msk.bf16.gmra.mrb[164].mxu1 %vm1656_vm3, %v3423_v63 }
 0x9fd   : > { %3645 = vmatprep.mubr.bf16.mxu1 %v9030_v61 }
 0xa04   : > { %5343 = vmatmul.mubr.msk.bf16.gmra.mrb[168].mxu1 %vm1656_vm3, %v3424_v60 }
 0xa05   : > { %3655 = vmatprep.mubr.bf16.mxu1 %v9030_v61 }
 0xa0c   : > { %5344 = vmatmul.mubr.msk.bf16.gmra.mrb[172].mxu1 %vm1656_vm3, %v3425_v21 }
 0xa0d   : > { %3665 = vmatprep.mubr.bf16.mxu1 %v9030_v61 }
 0xa14   : > { %5345 = vmatmul.mubr.msk.bf16.gmra.mrb[176].mxu1 %vm1656_vm3, %v3426_v44 }
 0xa15   : > { %5134 = vmatprep.mubr.bf16.mxu1 %v5095_v46 }
 0xa67   : > { %v3356_v62 = vpop.f32.mrb[112].mxu1 }
 0xa68   : > { %v3357_v59 = vadd.f32 %v3356_v62, %v3318_v34  ;;  %v3358_v13 = vpop.f32.mrb[113].mxu1 }
 0xa69   : > { %v3359_v42 = vadd.f32 %v3358_v13, %v3319_v40  ;;  %v3360_v45 = vpop.f32.mrb[114].mxu1 }
 0xa6a   : > { %v3365_v1 = vrot.slane %v3357_v59, 6  ;;  %v3361_v0 = vpop.f32.mrb[115].mxu1 }
 0xa6b   : > { %v3366_v53 = vrot.slane %v3359_v42, 6 }
 0xa6c   : > { %v3369_v57 = vmul.f32 %v3365_v1, %v7819_v4 }
 0xa6d   : > { %v3370_v7 = vmul.f32 %v3366_v53, %v7821_v30 }
 0xa6e   : > { %v3373_v6 = vrot.slane %v3369_v57, 2 }
 0xa6f   : > { %v3374_v54 = vrot.slane %v3370_v7, 2  ;;  %v7833_v51 = vpop.f32.mrb[116].mxu1 }
 0xa70   : > { %v3377_v33 = vsel %vm2478_vm4, %v3373_v6, 0.0  ;;  %v7836_v41 = vpop.f32.mrb[117].mxu1 }
 0xa71   : > { %v3378_v37 = vrot.slane %v3377_v33, 4  ;;  %v3384_v32 = vsel %vm2478_vm4, %v3374_v54, 0.0  ;;  %v3676_v10 = vmax.f32 %v7833_v51, %v7836_v41  ;;  %v7841_v31 = vpop.f32.mrb[118].mxu1 }
 0xa72   : > { %v3385_v22 = vrot.slane %v3384_v32, 4  ;;  %v7843_v47 = vpop.f32.mrb[119].mxu1 }
 0xa73   : > { %v3379_v11 = vadd.f32 %v3378_v37, %v3377_v33  ;;  %v3679_v12 = vmax.f32 %v7841_v31, %v7843_v47  ;;  %3677 = vmax.xlane.f32.xlu1 %v3676_v10 }
 0xa74   : > { %v3386_v35 = vadd.f32 %v3385_v22, %v3384_v32 }
 0xa75   : > { %v3380_v3 = vrot.slane %v3379_v11, 2  ;;  %3680 = vmax.xlane.f32.xlu0 %v3679_v12 }
 0xa76   : > { %v3387_v18 = vrot.slane %v3386_v35, 2 }
 0xa77   : > { %v3381_v39 = vadd.f32 %v3380_v3, %v3379_v11  ;;  %v7847_v14 = vpop.f32.mrb[120].mxu1 }
 0xa78   : > { %v3388_v50 = vadd.f32 %v3387_v18, %v3386_v35  ;;  %v7849_v63 = vpop.f32.mrb[121].mxu1 }
 0xa79   : > { %v3382_v60 = vrot.slane %v3381_v39, 1  ;;  %v3682_v21 = vmax.f32 %v7847_v14, %v7849_v63  ;;  %v7853_v44 = vpop.f32.mrb[122].mxu1 }
 0xa7a   : > { %v3389_v5 = vrot.slane %v3388_v50, 1  ;;  %v7855_v46 = vpop.f32.mrb[123].mxu1 }
 0xa7b   : > { %v3383_v2 = vadd.f32 %v3382_v60, %v3381_v39  ;;  %v3685_v29 = vmax.f32 %v7853_v44, %v7855_v46  ;;  %3683 = vmax.xlane.f32.xlu1 %v3682_v21 }
 0xa7c   : > { %v3390_v23 = vadd.f32 %v3389_v5, %v3388_v50 }
 0xa7d   : > { %3686 = vmax.xlane.f32.xlu0 %v3685_v29  ;;  %v7860_v16 = vsel %vm1705_vm2, %v2485_v27, %v3383_v2 }
 0xa7e   : > { %9038 = vst [vmem:[#allocation24_spill] sm:$0xff] %v7860_v16  ;;  %v7863_v17 = vsel %vm1705_vm2, %v2492_v38, %v3390_v23 }
 0xa7f   : > { %9039 = vst [vmem:[#allocation27_spill] sm:$0xff] %v7863_v17  ;;  %v7865_v34 = vpop.f32.mrb[124].mxu1 }
 0xa80   : > { %v7867_v8 = vpop.f32.mrb[125].mxu1 }
 0xa81   : > { %v3688_v62 = vmax.f32 %v7865_v34, %v7867_v8  ;;  %v7871_v40 = vpop.f32.mrb[126].mxu1 }
 0xa82   : > { %v7873_v15 = vpop.f32.mrb[127].mxu1 }
 0xa83   : > { %v3691_v59 = vmax.f32 %v7871_v40, %v7873_v15  ;;  %3689 = vmax.xlane.f32.xlu1 %v3688_v62 }
 0xa85   : > { %3692 = vmax.xlane.f32.xlu0 %v3691_v59 }
 0xa87   : > { %v7877_v13 = vpop.f32.mrb[128].mxu1 }
 0xa88   : > { %v7879_v42 = vpop.f32.mrb[129].mxu1 }
 0xa89   : > { %v3694_v45 = vmax.f32 %v7877_v13, %v7879_v42  ;;  %v7883_v1 = vpop.f32.mrb[130].mxu1 }
 0xa8a   : > { %v7885_v0 = vpop.f32.mrb[131].mxu1 }
 0xa8b   : > { %v3697_v25 = vmax.f32 %v7883_v1, %v7885_v0  ;;  %3695 = vmax.xlane.f32.xlu1 %v3694_v45 }
 0xa8d   : > { %3698 = vmax.xlane.f32.xlu0 %v3697_v25 }
 0xa8f   : > { %v7889_v53 = vpop.f32.mrb[132].mxu1 }
 0xa90   : > { %v7891_v43 = vpop.f32.mrb[133].mxu1 }
 0xa91   : > { %v3700_v57 = vmax.f32 %v7889_v53, %v7891_v43  ;;  %v7895_v7 = vpop.f32.mrb[134].mxu1 }
 0xa92   : > { %v7897_v6 = vpop.f32.mrb[135].mxu1 }
 0xa93   : > { %v3703_v58 = vmax.f32 %v7895_v7, %v7897_v6  ;;  %3701 = vmax.xlane.f32.xlu1 %v3700_v57 }
 0xa95   : > { %3704 = vmax.xlane.f32.xlu0 %v3703_v58 }
 0xa97   : > { %v7901_v54 = vpop.f32.mrb[136].mxu1 }
 0xa98   : > { %v7903_v26 = vpop.f32.mrb[137].mxu1 }
 0xa99   : > { %v3706_v33 = vmax.f32 %v7901_v54, %v7903_v26  ;;  %v7907_v37 = vpop.f32.mrb[138].mxu1 }
 0xa9a   : > { %v7909_v32 = vpop.f32.mrb[139].mxu1 }
 0xa9b   : > { %v3709_v10 = vmax.f32 %v7907_v37, %v7909_v32  ;;  %3707 = vmax.xlane.f32.xlu1 %v3706_v33 }
 0xa9d   : > { %3710 = vmax.xlane.f32.xlu0 %v3709_v10 }
 0xa9f   : > { %v7913_v22 = vpop.f32.mrb[140].mxu1 }
 0xaa0   : > { %v7915_v48 = vpop.f32.mrb[141].mxu1 }
 0xaa1   : > { %v3712_v11 = vmax.f32 %v7913_v22, %v7915_v48  ;;  %v7919_v12 = vpop.f32.mrb[142].mxu1 }
 0xaa2   : > { %v7921_v56 = vpop.f32.mrb[143].mxu1 }
 0xaa3   : > { %v3715_v35 = vmax.f32 %v7919_v12, %v7921_v56  ;;  %3713 = vmax.xlane.f32.xlu1 %v3712_v11 }
 0xaa5   : > { %3716 = vmax.xlane.f32.xlu0 %v3715_v35 }
 0xaa7   : > { %v7925_v3 = vpop.f32.mrb[144].mxu1 }
 0xaa8   : > { %v7927_v18 = vpop.f32.mrb[145].mxu1 }
 0xaa9   : > { %v3718_v52 = vmax.f32 %v7925_v3, %v7927_v18  ;;  %v7931_v39 = vpop.f32.mrb[146].mxu1 }
 0xaaa   : > { %v7933_v28 = vpop.f32.mrb[147].mxu1 }
 0xaab   : > { %v3721_v50 = vmax.f32 %v7931_v39, %v7933_v28  ;;  %3719 = vmax.xlane.f32.xlu1 %v3718_v52 }
 0xaad   : > { %3722 = vmax.xlane.f32.xlu0 %v3721_v50 }
 0xaaf   : > { %v7937_v60 = vpop.f32.mrb[148].mxu1 }
 0xab0   : > { %v7939_v21 = vpop.f32.mrb[149].mxu1 }
 0xab1   : > { %v3724_v5 = vmax.f32 %v7937_v60, %v7939_v21  ;;  %v7943_v27 = vpop.f32.mrb[150].mxu1 }
 0xab2   : > { %v7945_v2 = vpop.f32.mrb[151].mxu1 }
 0xab3   : > { %v3727_v29 = vmax.f32 %v7943_v27, %v7945_v2  ;;  %3725 = vmax.xlane.f32.xlu1 %v3724_v5 }
 0xab5   : > { %3728 = vmax.xlane.f32.xlu0 %v3727_v29 }
 0xab7   : > { %v7949_v38 = vpop.f32.mrb[152].mxu1 }
 0xab8   : > { %v7951_v23 = vpop.f32.mrb[153].mxu1 }
 0xab9   : > { %v3730_v62 = vmax.f32 %v7949_v38, %v7951_v23  ;;  %v7955_v59 = vpop.f32.mrb[154].mxu1 }
 0xaba   : > { %v7957_v45 = vpop.f32.mrb[155].mxu1 }
 0xabb   : > { %v3733_v25 = vmax.f32 %v7955_v59, %v7957_v45  ;;  %3731 = vmax.xlane.f32.xlu1 %v3730_v62 }
 0xabd   : > { %3734 = vmax.xlane.f32.xlu0 %v3733_v25 }
 0xabf   : > { %v7961_v57 = vpop.f32.mrb[156].mxu1 }
 0xac0   : > { %v7963_v58 = vpop.f32.mrb[157].mxu1 }
 0xac1   : > { %v3736_v33 = vmax.f32 %v7961_v57, %v7963_v58  ;;  %v7967_v10 = vpop.f32.mrb[158].mxu1 }
 0xac2   : > { %v7969_v11 = vpop.f32.mrb[159].mxu1 }
 0xac3   : > { %v3739_v35 = vmax.f32 %v7967_v10, %v7969_v11  ;;  %3737 = vmax.xlane.f32.xlu1 %v3736_v33 }
 0xac5   : > { %3740 = vmax.xlane.f32.xlu0 %v3739_v35 }
 0xac7   : > { %v7973_v52 = vpop.f32.mrb[160].mxu1 }
 0xac8   : > { %v7975_v50 = vpop.f32.mrb[161].mxu1 }
 0xac9   : > { %v3742_v5 = vmax.f32 %v7973_v52, %v7975_v50  ;;  %v7979_v29 = vpop.f32.mrb[162].mxu1 }
 0xaca   : > { %v7981_v62 = vpop.f32.mrb[163].mxu1 }
 0xacb   : > { %v3745_v25 = vmax.f32 %v7979_v29, %v7981_v62  ;;  %3743 = vmax.xlane.f32.xlu1 %v3742_v5 }
 0xacd   : > { %3746 = vmax.xlane.f32.xlu0 %v3745_v25 }
 0xacf   : > { %v7985_v17 = vpop.f32.mrb[164].mxu1 }
 0xad0   : > { %v7987_v33 = vpop.f32.mrb[165].mxu1 }
 0xad1   : > { %9040 = vst [vmem:[#allocation28_spill] sm:$0xff] %v7987_v33  ;;  %v3748_v35 = vmax.f32 %v7985_v17, %v7987_v33  ;;  %v7991_v16 = vpop.f32.mrb[166].mxu1 }
 0xad2   : > { %9041 = vst [vmem:[#allocation10_spill] sm:$0xff] %v7991_v16  ;;  %v7993_v30 = vpop.f32.mrb[167].mxu1 }
 0xad3   : > { %9042 = vst [vmem:[#allocation11_spill] sm:$0xff] %v7993_v30  ;;  %v3751_v4 = vmax.f32 %v7991_v16, %v7993_v30  ;;  %3749 = vmax.xlane.f32.xlu1 %v3748_v35 }
 0xad5   : > { %3752 = vmax.xlane.f32.xlu0 %v3751_v4 }
 0xad7   : > { %v7997_v49 = vpop.f32.mrb[168].mxu1 }
 0xad8   : > { %9043 = vst [vmem:[#allocation7_spill] sm:$0xff] %v7997_v49  ;;  %v7999_v5 = vpop.f32.mrb[169].mxu1 }
 0xad9   : > { %9044 = vst [vmem:[#allocation8_spill] sm:$0xff] %v7999_v5  ;;  %v3754_v25 = vmax.f32 %v7997_v49, %v7999_v5  ;;  %v8003_v36 = vpop.f32.mrb[170].mxu1 }
 0xada   : > { %9045 = vst [vmem:[#allocation9_spill] sm:$0xff] %v8003_v36  ;;  %v8005_v61 = vpop.f32.mrb[171].mxu1 }
 0xadb   : > { %9046 = vst [vmem:[#allocation6_spill] sm:$0xff] %v8005_v61  ;;  %v3757_v24 = vmax.f32 %v8003_v36, %v8005_v61  ;;  %3755 = vmax.xlane.f32.xlu1 %v3754_v25 }
 0xadd   : > { %3758 = vmax.xlane.f32.xlu0 %v3757_v24 }
 0xadf   : > { %v8009_v19 = vpop.f32.mrb[172].mxu1 }
 0xae0   : > { %9047 = vst [vmem:[#allocation13_spill] sm:$0xff] %v8009_v19  ;;  %v8011_v35 = vpop.f32.mrb[173].mxu1 }
 0xae1   : > { %9048 = vst [vmem:[#allocation12_spill] sm:$0xff] %v8011_v35  ;;  %v3760_v4 = vmax.f32 %v8009_v19, %v8011_v35  ;;  %v8015_v55 = vpop.f32.mrb[174].mxu1 }
 0xae2   : > { %9049 = vst [vmem:[#allocation29_spill] sm:$0xff] %v8015_v55  ;;  %v8017_v20 = vpop.f32.mrb[175].mxu1 }
 0xae3   : > { %9050 = vst [vmem:[#allocation30_spill] sm:$0xff] %v8017_v20  ;;  %v3763_v9 = vmax.f32 %v8015_v55, %v8017_v20  ;;  %3761 = vmax.xlane.f32.xlu1 %v3760_v4 }
 0xae5   : > { %3764 = vmax.xlane.f32.xlu0 %v3763_v9 }
 0xae7   : > { %v8021_v5 = vpop.f32.mrb[176].mxu1 }
 0xae8   : > { %9051 = vst [vmem:[#allocation22_spill] sm:$0xff] %v8021_v5  ;;  %v8023_v25 = vpop.f32.mrb[177].mxu1 }
 0xae9   : > { %9052 = vst [vmem:[#allocation21_spill] sm:$0xff] %v8023_v25  ;;  %v3766_v24 = vmax.f32 %v8021_v5, %v8023_v25  ;;  %v8027_v61 = vpop.f32.mrb[178].mxu1 }
 0xaea   : > { %9053 = vst [vmem:[#allocation25_spill] sm:$0xff] %v8027_v61  ;;  %v8029_v36 = vpop.f32.mrb[179].mxu1 }
 0xaeb   : > { %9054 = vst [vmem:[#allocation31_spill] sm:$0xff] %v8029_v36  ;;  %v3769_v35 = vmax.f32 %v8027_v61, %v8029_v36  ;;  %3767 = vmax.xlane.f32.xlu1 %v3766_v24 }
 0xaed   : > { %3770 = vmax.xlane.f32.xlu0 %v3769_v35 }
 0xb00   : > { %v3678_v19 = vpop.xlane.xlu1 %3677 }
 0xb01   : > { %v3772_v9 = vsub.f32 %v7833_v51, %v3678_v19  ;;  %v3773_v4 = vsub.f32 %v7836_v41, %v3678_v19 }
 0xb02   : > { %v3681_v20 = vpop.xlane.xlu0 %3680 }
 0xb03   : > { %v3774_v55 = vsub.f32 %v7841_v31, %v3681_v20  ;;  %v3775_v49 = vsub.f32 %v7843_v47, %v3681_v20 }
 0xb05   : > { %v3836_v25 = vpack.c.bf16 %v3774_v55, %v3772_v9  ;;  %v3837_v5 = vpack.c.bf16 %v3775_v49, %v3773_v4 }
 0xb07   : > { %v3869_v30 = vmul.bf16 1069105081, %v3836_v25  ;;  %v3872_v16 = vmul.bf16 1069105081, %v3837_v5 }
 0xb08   : > { %v3684_v33 = vpop.xlane.xlu1 %3683 }
 0xb09   : > { %5800 = vpow.bf16 %v3869_v30  ;;  %v3776_v35 = vsub.f32 %v7847_v14, %v3684_v33  ;;  %v3777_v24 = vsub.f32 %v7849_v63, %v3684_v33 }
 0xb0a   : > { %5802 = vpow.bf16 %v3872_v16  ;;  %v3687_v36 = vpop.xlane.xlu0 %3686 }
 0xb0b   : > { %v3778_v51 = vsub.f32 %v7853_v44, %v3687_v36  ;;  %v3779_v19 = vsub.f32 %v7855_v46, %v3687_v36 }
 0xb0d   : > { %v3838_v41 = vpack.c.bf16 %v3778_v51, %v3776_v35  ;;  %v3839_v31 = vpack.c.bf16 %v3779_v19, %v3777_v24 }
 0xb0f   : > { %v3875_v61 = vmul.bf16 1069105081, %v3838_v41  ;;  %v3878_v20 = vmul.bf16 1069105081, %v3839_v31 }
 0xb10   : > { %v3690_v55 = vpop.xlane.xlu1 %3689 }
 0xb11   : > { %5804 = vpow.bf16 %v3875_v61  ;;  %v3780_v30 = vsub.f32 %v7865_v34, %v3690_v55  ;;  %v3781_v47 = vsub.f32 %v7867_v8, %v3690_v55 }
 0xb12   : > { %5806 = vpow.bf16 %v3878_v20  ;;  %v3693_v49 = vpop.xlane.xlu0 %3692 }
 0xb13   : > { %v3782_v14 = vsub.f32 %v7871_v40, %v3693_v49  ;;  %v3783_v63 = vsub.f32 %v7873_v15, %v3693_v49 }
 0xb14   : > { %v8045_v16 = vpop.eup %5800 }
 0xb15   : > { %v8047_v44 = vpop.eup %5802  ;;  %v3840_v36 = vpack.c.bf16 %v3782_v14, %v3780_v30  ;;  %v3841_v46 = vpack.c.bf16 %v3783_v63, %v3781_v47  ;;  %v3966_v33 = vunpack.c.h.bf16 %v8045_v16  ;;  %v3964_v61 = vunpack.c.l.bf16 %v8045_v16 }
 0xb16   : > { %v3967_v5 = vunpack.c.h.bf16 %v8047_v44  ;;  %v3965_v34 = vunpack.c.l.bf16 %v8047_v44 }
 0xb17   : > { %v3881_v25 = vmul.bf16 1069105081, %v3840_v36  ;;  %v3884_v8 = vmul.bf16 1069105081, %v3841_v46 }
 0xb18   : > { %v3696_v9 = vpop.xlane.xlu1 %3695  ;;  %v4031_v40 = vadd.f32 %v3967_v5, %v3966_v33  ;;  %v4028_v4 = vadd.f32 %v3965_v34, %v3964_v61 }
 0xb19   : > { %5808 = vpow.bf16 %v3881_v25  ;;  %v3784_v35 = vsub.f32 %v7877_v13, %v3696_v9  ;;  %v3785_v24 = vsub.f32 %v7879_v42, %v3696_v9 }
 0xb1a   : > { %5810 = vpow.bf16 %v3884_v8  ;;  %4032 = vadd.xlane.f32.xlu0 %v4031_v40  ;;  %4029 = vadd.xlane.f32.xlu1 %v4028_v4  ;;  %v3699_v15 = vpop.xlane.xlu0 %3698 }
 0xb1b   : > { %v3786_v51 = vsub.f32 %v7883_v1, %v3699_v15  ;;  %v3787_v19 = vsub.f32 %v7885_v0, %v3699_v15 }
 0xb1c   : > { %v8057_v41 = vpop.eup %5804 }
 0xb1d   : > { %v8059_v31 = vpop.eup %5806  ;;  %v3842_v20 = vpack.c.bf16 %v3786_v51, %v3784_v35  ;;  %v3843_v55 = vpack.c.bf16 %v3787_v19, %v3785_v24  ;;  %v3970_v49 = vunpack.c.h.bf16 %v8057_v41  ;;  %v3968_v30 = vunpack.c.l.bf16 %v8057_v41 }
 0xb1e   : > { %v3971_v47 = vunpack.c.h.bf16 %v8059_v31  ;;  %v3969_v13 = vunpack.c.l.bf16 %v8059_v31 }
 0xb1f   : > { %v3887_v14 = vmul.bf16 1069105081, %v3842_v20  ;;  %v3890_v42 = vmul.bf16 1069105081, %v3843_v55 }
 0xb20   : > { %v3702_v63 = vpop.xlane.xlu1 %3701  ;;  %v4037_v1 = vadd.f32 %v3971_v47, %v3970_v49  ;;  %v4034_v36 = vadd.f32 %v3969_v13, %v3968_v30 }
 0xb21   : > { %5812 = vpow.bf16 %v3887_v14  ;;  %v3788_v46 = vsub.f32 %v7889_v53, %v3702_v63  ;;  %v3789_v33 = vsub.f32 %v7891_v43, %v3702_v63 }
 0xb22   : > { %5814 = vpow.bf16 %v3890_v42  ;;  %4038 = vadd.xlane.f32.xlu0 %v4037_v1  ;;  %4035 = vadd.xlane.f32.xlu1 %v4034_v36  ;;  %v3705_v0 = vpop.xlane.xlu0 %3704 }
 0xb23   : > { %v3790_v61 = vsub.f32 %v7895_v7, %v3705_v0  ;;  %v3791_v5 = vsub.f32 %v7897_v6, %v3705_v0 }
 0xb24   : > { %v8069_v34 = vpop.eup %5808 }
 0xb25   : > { %v8071_v25 = vpop.eup %5810  ;;  %v3844_v8 = vpack.c.bf16 %v3790_v61, %v3788_v46  ;;  %v3845_v9 = vpack.c.bf16 %v3791_v5, %v3789_v33  ;;  %v3974_v40 = vunpack.c.h.bf16 %v8069_v34  ;;  %v3972_v4 = vunpack.c.l.bf16 %v8069_v34 }
 0xb26   : > { %v3975_v15 = vunpack.c.h.bf16 %v8071_v25  ;;  %v3973_v53 = vunpack.c.l.bf16 %v8071_v25 }
 0xb27   : > { %v3893_v35 = vmul.bf16 1069105081, %v3844_v8  ;;  %v3896_v43 = vmul.bf16 1069105081, %v3845_v9 }
 0xb28   : > { %v3708_v24 = vpop.xlane.xlu1 %3707  ;;  %v4043_v7 = vadd.f32 %v3975_v15, %v3974_v40  ;;  %v4040_v51 = vadd.f32 %v3973_v53, %v3972_v4 }
 0xb29   : > { %5816 = vpow.bf16 %v3893_v35  ;;  %v3792_v19 = vsub.f32 %v7901_v54, %v3708_v24  ;;  %v3793_v20 = vsub.f32 %v7903_v26, %v3708_v24 }
 0xb2a   : > { %5818 = vpow.bf16 %v3896_v43  ;;  %4044 = vadd.xlane.f32.xlu0 %v4043_v7  ;;  %4041 = vadd.xlane.f32.xlu1 %v4040_v51  ;;  %v3711_v6 = vpop.xlane.xlu0 %3710 }
 0xb2b   : > { %v3794_v55 = vsub.f32 %v7907_v37, %v3711_v6  ;;  %v3795_v49 = vsub.f32 %v7909_v32, %v3711_v6 }
 0xb2c   : > { %v8081_v30 = vpop.eup %5812 }
 0xb2d   : > { %v8083_v47 = vpop.eup %5814  ;;  %v3846_v13 = vpack.c.bf16 %v3794_v55, %v3792_v19  ;;  %v3847_v14 = vpack.c.bf16 %v3795_v49, %v3793_v20  ;;  %v3978_v42 = vunpack.c.h.bf16 %v8081_v30  ;;  %v3976_v63 = vunpack.c.l.bf16 %v8081_v30 }
 0xb2e   : > { %v3979_v1 = vunpack.c.h.bf16 %v8083_v47  ;;  %v3977_v54 = vunpack.c.l.bf16 %v8083_v47 }
 0xb2f   : > { %v3899_v36 = vmul.bf16 1069105081, %v3846_v13  ;;  %v3902_v26 = vmul.bf16 1069105081, %v3847_v14 }
 0xb30   : > { %v3714_v0 = vpop.xlane.xlu1 %3713  ;;  %v4049_v37 = vadd.f32 %v3979_v1, %v3978_v42  ;;  %v4046_v46 = vadd.f32 %v3977_v54, %v3976_v63 }
 0xb31   : > { %5820 = vpow.bf16 %v3899_v36  ;;  %v3796_v33 = vsub.f32 %v7913_v22, %v3714_v0  ;;  %v3797_v61 = vsub.f32 %v7915_v48, %v3714_v0 }
 0xb32   : > { %5822 = vpow.bf16 %v3902_v26  ;;  %4050 = vadd.xlane.f32.xlu0 %v4049_v37  ;;  %4047 = vadd.xlane.f32.xlu1 %v4046_v46  ;;  %v3717_v32 = vpop.xlane.xlu0 %3716 }
 0xb33   : > { %v3798_v5 = vsub.f32 %v7919_v12, %v3717_v32  ;;  %v3799_v8 = vsub.f32 %v7921_v56, %v3717_v32 }
 0xb34   : > { %v8093_v9 = vpop.eup %5816 }
 0xb35   : > { %v8095_v40 = vpop.eup %5818  ;;  %v3848_v4 = vpack.c.bf16 %v3798_v5, %v3796_v33  ;;  %v3849_v15 = vpack.c.bf16 %v3799_v8, %v3797_v61  ;;  %v3982_v53 = vunpack.c.h.bf16 %v8093_v9  ;;  %v3980_v35 = vunpack.c.l.bf16 %v8093_v9 }
 0xb36   : > { %v3983_v43 = vunpack.c.h.bf16 %v8095_v40  ;;  %v3981_v22 = vunpack.c.l.bf16 %v8095_v40 }
 0xb37   : > { %v3905_v24 = vmul.bf16 1069105081, %v3848_v4  ;;  %v3908_v48 = vmul.bf16 1069105081, %v3849_v15 }
 0xb38   : > { %v3720_v7 = vpop.xlane.xlu1 %3719  ;;  %v4055_v12 = vadd.f32 %v3983_v43, %v3982_v53  ;;  %v4052_v51 = vadd.f32 %v3981_v22, %v3980_v35 }
 0xb39   : > { %5824 = vpow.bf16 %v3905_v24  ;;  %v3800_v6 = vsub.f32 %v7925_v3, %v3720_v7  ;;  %v3801_v19 = vsub.f32 %v7927_v18, %v3720_v7 }
 0xb3a   : > { %5826 = vpow.bf16 %v3908_v48  ;;  %4056 = vadd.xlane.f32.xlu0 %v4055_v12  ;;  %4053 = vadd.xlane.f32.xlu1 %v4052_v51  ;;  %v3723_v56 = vpop.xlane.xlu0 %3722 }
 0xb3b   : > { %v3802_v20 = vsub.f32 %v7931_v39, %v3723_v56  ;;  %v3803_v55 = vsub.f32 %v7933_v28, %v3723_v56 }
 0xb3c   : > { %v8105_v49 = vpop.eup %5820 }
 0xb3d   : > { %v8107_v13 = vpop.eup %5822  ;;  %v3850_v14 = vpack.c.bf16 %v3802_v20, %v3800_v6  ;;  %v3851_v42 = vpack.c.bf16 %v3803_v55, %v3801_v19  ;;  %v3986_v63 = vunpack.c.h.bf16 %v8105_v49  ;;  %v3984_v1 = vunpack.c.l.bf16 %v8105_v49 }
 0xb3e   : > { %v3987_v54 = vunpack.c.h.bf16 %v8107_v13  ;;  %v3985_v3 = vunpack.c.l.bf16 %v8107_v13 }
 0xb3f   : > { %v3911_v36 = vmul.bf16 1069105081, %v3850_v14  ;;  %v3914_v18 = vmul.bf16 1069105081, %v3851_v42 }
 0xb40   : > { %v3726_v26 = vpop.xlane.xlu1 %3725  ;;  %v4061_v39 = vadd.f32 %v3987_v54, %v3986_v63  ;;  %v4058_v0 = vadd.f32 %v3985_v3, %v3984_v1 }
 0xb41   : > { %5828 = vpow.bf16 %v3911_v36  ;;  %v3804_v37 = vsub.f32 %v7937_v60, %v3726_v26  ;;  %v3805_v46 = vsub.f32 %v7939_v21, %v3726_v26 }
 0xb42   : > { %5830 = vpow.bf16 %v3914_v18  ;;  %4062 = vadd.xlane.f32.xlu0 %v4061_v39  ;;  %4059 = vadd.xlane.f32.xlu1 %v4058_v0  ;;  %v3729_v28 = vpop.xlane.xlu0 %3728 }
 0xb43   : > { %v3806_v32 = vsub.f32 %v7943_v27, %v3729_v28  ;;  %v3807_v33 = vsub.f32 %v7945_v2, %v3729_v28 }
 0xb44   : > { %v8117_v61 = vpop.eup %5824 }
 0xb45   : > { %v8119_v5 = vpop.eup %5826  ;;  %v3852_v8 = vpack.c.bf16 %v3806_v32, %v3804_v37  ;;  %v3853_v4 = vpack.c.bf16 %v3807_v33, %v3805_v46  ;;  %v3990_v15 = vunpack.c.h.bf16 %v8117_v61  ;;  %v3988_v53 = vunpack.c.l.bf16 %v8117_v61 }
 0xb46   : > { %v3991_v35 = vunpack.c.h.bf16 %v8119_v5  ;;  %v3989_v60 = vunpack.c.l.bf16 %v8119_v5 }
 0xb47   : > { %v3917_v43 = vmul.bf16 1069105081, %v3852_v8  ;;  %v3920_v21 = vmul.bf16 1069105081, %v3853_v4 }
 0xb48   : > { %v3732_v22 = vpop.xlane.xlu1 %3731  ;;  %v4067_v27 = vadd.f32 %v3991_v35, %v3990_v15  ;;  %v4064_v24 = vadd.f32 %v3989_v60, %v3988_v53 }
 0xb49   : > { %5832 = vpow.bf16 %v3917_v43  ;;  %v3808_v48 = vsub.f32 %v7949_v38, %v3732_v22  ;;  %v3809_v7 = vsub.f32 %v7951_v23, %v3732_v22 }
 0xb4a   : > { %5834 = vpow.bf16 %v3920_v21  ;;  %4068 = vadd.xlane.f32.xlu0 %v4067_v27  ;;  %4065 = vadd.xlane.f32.xlu1 %v4064_v24  ;;  %v3735_v2 = vpop.xlane.xlu0 %3734 }
 0xb4b   : > { %v3810_v12 = vsub.f32 %v7955_v59, %v3735_v2  ;;  %v3811_v51 = vsub.f32 %v7957_v45, %v3735_v2 }
 0xb4c   : > { %v8129_v56 = vpop.eup %5828 }
 0xb4d   : > { %v8131_v6 = vpop.eup %5830  ;;  %v3854_v19 = vpack.c.bf16 %v3810_v12, %v3808_v48  ;;  %v3855_v20 = vpack.c.bf16 %v3811_v51, %v3809_v7  ;;  %v3994_v55 = vunpack.c.h.bf16 %v8129_v56  ;;  %v3992_v14 = vunpack.c.l.bf16 %v8129_v56 }
 0xb4e   : > { %v3995_v42 = vunpack.c.h.bf16 %v8131_v6  ;;  %v3993_v38 = vunpack.c.l.bf16 %v8131_v6 }
 0xb4f   : > { %v3923_v63 = vmul.bf16 1069105081, %v3854_v19  ;;  %v3926_v23 = vmul.bf16 1069105081, %v3855_v20 }
 0xb50   : > { %v3738_v1 = vpop.xlane.xlu1 %3737  ;;  %v4073_v59 = vadd.f32 %v3995_v42, %v3994_v55  ;;  %v4070_v54 = vadd.f32 %v3993_v38, %v3992_v14  ;;  %v9055_v55 = vld [vmem:[#allocation28_spill] sm:$0xff]  ;;  %v9056_v42 = vld [vmem:[#allocation10_spill] sm:$0xff] }
 0xb51   : > { %5836 = vpow.bf16 %v3923_v63  ;;  %v3812_v3 = vsub.f32 %v7961_v57, %v3738_v1  ;;  %v3813_v36 = vsub.f32 %v7963_v58, %v3738_v1  ;;  %v9057_v63 = vld [vmem:[#allocation11_spill] sm:$0xff] }
 0xb52   : > { %5838 = vpow.bf16 %v3926_v23  ;;  %4074 = vadd.xlane.f32.xlu0 %v4073_v59  ;;  %4071 = vadd.xlane.f32.xlu1 %v4070_v54  ;;  %v3741_v45 = vpop.xlane.xlu0 %3740 }
 0xb53   : > { %v3814_v18 = vsub.f32 %v7967_v10, %v3741_v45  ;;  %v3815_v26 = vsub.f32 %v7969_v11, %v3741_v45 }
 0xb54   : > { %v8141_v39 = vpop.eup %5832 }
 0xb55   : > { %v8143_v0 = vpop.eup %5834  ;;  %v3856_v28 = vpack.c.bf16 %v3814_v18, %v3812_v3  ;;  %v3857_v37 = vpack.c.bf16 %v3815_v26, %v3813_v36  ;;  %v3998_v46 = vunpack.c.h.bf16 %v8141_v39  ;;  %v3996_v32 = vunpack.c.l.bf16 %v8141_v39 }
 0xb56   : > { %v3999_v33 = vunpack.c.h.bf16 %v8143_v0  ;;  %v3997_v57 = vunpack.c.l.bf16 %v8143_v0 }
 0xb57   : > { %v3929_v8 = vmul.bf16 1069105081, %v3856_v28  ;;  %v3932_v58 = vmul.bf16 1069105081, %v3857_v37 }
 0xb58   : > { %v3744_v4 = vpop.xlane.xlu1 %3743  ;;  %v4079_v10 = vadd.f32 %v3999_v33, %v3998_v46  ;;  %v4076_v15 = vadd.f32 %v3997_v57, %v3996_v32  ;;  %v9058_v57 = vld [vmem:[#allocation7_spill] sm:$0xff] }
 0xb59   : > { %5840 = vpow.bf16 %v3929_v8  ;;  %v3816_v53 = vsub.f32 %v7973_v52, %v3744_v4  ;;  %v3817_v35 = vsub.f32 %v7975_v50, %v3744_v4 }
 0xb5a   : > { %5842 = vpow.bf16 %v3932_v58  ;;  %4080 = vadd.xlane.f32.xlu0 %v4079_v10  ;;  %4077 = vadd.xlane.f32.xlu1 %v4076_v15  ;;  %v3747_v11 = vpop.xlane.xlu0 %3746  ;;  %v9059_v58 = vld [vmem:[#allocation8_spill] sm:$0xff]  ;;  %v9060_v10 = vld [vmem:[#allocation9_spill] sm:$0xff] }
 0xb5b   : > { %v3818_v60 = vsub.f32 %v7979_v29, %v3747_v11  ;;  %v3819_v43 = vsub.f32 %v7981_v62, %v3747_v11  ;;  %v9061_v11 = vld [vmem:[#allocation6_spill] sm:$0xff] }
 0xb5c   : > { %v8153_v21 = vpop.eup %5836 }
 0xb5d   : > { %v8155_v22 = vpop.eup %5838  ;;  %v3858_v27 = vpack.c.bf16 %v3818_v60, %v3816_v53  ;;  %v3859_v24 = vpack.c.bf16 %v3819_v43, %v3817_v35  ;;  %v4002_v2 = vunpack.c.h.bf16 %v8153_v21  ;;  %v4000_v48 = vunpack.c.l.bf16 %v8153_v21 }
 0xb5e   : > { %v4003_v7 = vunpack.c.h.bf16 %v8155_v22  ;;  %v4001_v52 = vunpack.c.l.bf16 %v8155_v22 }
 0xb5f   : > { %v3935_v12 = vmul.bf16 1069105081, %v3858_v27  ;;  %v3938_v50 = vmul.bf16 1069105081, %v3859_v24 }
 0xb60   : > { %v3750_v51 = vpop.xlane.xlu1 %3749  ;;  %v4085_v29 = vadd.f32 %v4003_v7, %v4002_v2  ;;  %v4082_v19 = vadd.f32 %v4001_v52, %v4000_v48 }
 0xb61   : > { %5844 = vpow.bf16 %v3935_v12  ;;  %v3820_v20 = vsub.f32 %v7985_v17, %v3750_v51  ;;  %v3821_v14 = vsub.f32 %v9055_v55, %v3750_v51  ;;  %v9063_v55 = vld [vmem:[#allocation12_spill] sm:$0xff] }
 0xb62   : > { %5846 = vpow.bf16 %v3938_v50  ;;  %4086 = vadd.xlane.f32.xlu0 %v4085_v29  ;;  %4083 = vadd.xlane.f32.xlu1 %v4082_v19  ;;  %v3753_v62 = vpop.xlane.xlu0 %3752 }
 0xb63   : > { %v3822_v38 = vsub.f32 %v9056_v42, %v3753_v62  ;;  %v3823_v23 = vsub.f32 %v9057_v63, %v3753_v62  ;;  %v9062_v62 = vld [vmem:[#allocation13_spill] sm:$0xff]  ;;  %v9065_v63 = vld [vmem:[#allocation30_spill] sm:$0xff] }
 0xb64   : > { %v8165_v1 = vpop.eup %5840  ;;  %v9064_v42 = vld [vmem:[#allocation29_spill] sm:$0xff] }
 0xb65   : > { %v8167_v59 = vpop.eup %5842  ;;  %v3860_v54 = vpack.c.bf16 %v3822_v38, %v3820_v20  ;;  %v3861_v45 = vpack.c.bf16 %v3823_v23, %v3821_v14  ;;  %v4006_v3 = vunpack.c.h.bf16 %v8165_v1  ;;  %v4004_v36 = vunpack.c.l.bf16 %v8165_v1 }
 0xb66   : > { %v4007_v18 = vunpack.c.h.bf16 %v8167_v59  ;;  %v4005_v17 = vunpack.c.l.bf16 %v8167_v59 }
 0xb67   : > { %v3941_v26 = vmul.bf16 1069105081, %v3860_v54  ;;  %v3944_v28 = vmul.bf16 1069105081, %v3861_v45 }
 0xb68   : > { %v3756_v37 = vpop.xlane.xlu1 %3755  ;;  %v4091_v46 = vadd.f32 %v4007_v18, %v4006_v3  ;;  %v4088_v32 = vadd.f32 %v4005_v17, %v4004_v36 }
 0xb69   : > { %5848 = vpow.bf16 %v3941_v26  ;;  %v3824_v8 = vsub.f32 %v9058_v57, %v3756_v37  ;;  %v3825_v4 = vsub.f32 %v9059_v58, %v3756_v37  ;;  %v9066_v58 = vld [vmem:[#allocation22_spill] sm:$0xff] }
 0xb6a   : > { %5850 = vpow.bf16 %v3944_v28  ;;  %4092 = vadd.xlane.f32.xlu0 %v4091_v46  ;;  %4089 = vadd.xlane.f32.xlu1 %v4088_v32  ;;  %v3759_v33 = vpop.xlane.xlu0 %3758 }
 0xb6b   : > { %v3826_v15 = vsub.f32 %v9060_v10, %v3759_v33  ;;  %v3827_v53 = vsub.f32 %v9061_v11, %v3759_v33  ;;  %v9067_v10 = vld [vmem:[#allocation21_spill] sm:$0xff] }
 0xb6c   : > { %v8177_v35 = vpop.eup %5844  ;;  %v9068_v11 = vld [vmem:[#allocation25_spill] sm:$0xff] }
 0xb6d   : > { %v8179_v60 = vpop.eup %5846  ;;  %v3862_v43 = vpack.c.bf16 %v3826_v15, %v3824_v8  ;;  %v3863_v27 = vpack.c.bf16 %v3827_v53, %v3825_v4  ;;  %v4010_v24 = vunpack.c.h.bf16 %v8177_v35  ;;  %v4008_v2 = vunpack.c.l.bf16 %v8177_v35 }
 0xb6e   : > { %v4011_v48 = vunpack.c.h.bf16 %v8179_v60  ;;  %v4009_v7 = vunpack.c.l.bf16 %v8179_v60 }
 0xb6f   : > { %v3947_v52 = vmul.bf16 1069105081, %v3862_v43  ;;  %v3950_v12 = vmul.bf16 1069105081, %v3863_v27  ;;  %v9069_v43 = vld [vmem:[#allocation31_spill] sm:$0xff] }
 0xb70   : > { %v3762_v50 = vpop.xlane.xlu1 %3761  ;;  %v4097_v51 = vadd.f32 %v4011_v48, %v4010_v24  ;;  %v4094_v29 = vadd.f32 %v4009_v7, %v4008_v2 }
 0xb71   : > { %5852 = vpow.bf16 %v3947_v52  ;;  %v3828_v20 = vsub.f32 %v9062_v62, %v3762_v50  ;;  %v3829_v14 = vsub.f32 %v9063_v55, %v3762_v50 }
 0xb72   : > { %5854 = vpow.bf16 %v3950_v12  ;;  %4098 = vadd.xlane.f32.xlu0 %v4097_v51  ;;  %4095 = vadd.xlane.f32.xlu1 %v4094_v29  ;;  %v3765_v19 = vpop.xlane.xlu0 %3764 }
 0xb73   : > { %v3830_v38 = vsub.f32 %v9064_v42, %v3765_v19  ;;  %v3831_v23 = vsub.f32 %v9065_v63, %v3765_v19 }
 0xb74   : > { %v8189_v54 = vpop.eup %5848 }
 0xb75   : > { %v8191_v45 = vpop.eup %5850  ;;  %v3864_v3 = vpack.c.bf16 %v3830_v38, %v3828_v20  ;;  %v3865_v36 = vpack.c.bf16 %v3831_v23, %v3829_v14  ;;  %v4014_v18 = vunpack.c.h.bf16 %v8189_v54  ;;  %v4012_v17 = vunpack.c.l.bf16 %v8189_v54 }
 0xb76   : > { %v4015_v26 = vunpack.c.h.bf16 %v8191_v45  ;;  %v4013_v28 = vunpack.c.l.bf16 %v8191_v45 }
 0xb77   : > { %v3953_v37 = vmul.bf16 1069105081, %v3864_v3  ;;  %v3956_v46 = vmul.bf16 1069105081, %v3865_v36 }
 0xb78   : > { %v3768_v32 = vpop.xlane.xlu1 %3767  ;;  %v4103_v33 = vadd.f32 %v4015_v26, %v4014_v18  ;;  %v4100_v57 = vadd.f32 %v4013_v28, %v4012_v17 }
 0xb79   : > { %5856 = vpow.bf16 %v3953_v37  ;;  %v3832_v4 = vsub.f32 %v9066_v58, %v3768_v32  ;;  %v3833_v15 = vsub.f32 %v9067_v10, %v3768_v32 }
 0xb7a   : > { %5858 = vpow.bf16 %v3956_v46  ;;  %4104 = vadd.xlane.f32.xlu0 %v4103_v33  ;;  %4101 = vadd.xlane.f32.xlu1 %v4100_v57  ;;  %v3771_v8 = vpop.xlane.xlu0 %3770 }
 0xb7b   : > { %v3834_v53 = vsub.f32 %v9068_v11, %v3771_v8  ;;  %v3835_v27 = vsub.f32 %v9069_v43, %v3771_v8 }
 0xb7c   : > { %v8201_v24 = vpop.eup %5852 }
 0xb7d   : > { %v8203_v2 = vpop.eup %5854  ;;  %v3866_v48 = vpack.c.bf16 %v3834_v53, %v3832_v4  ;;  %v3867_v7 = vpack.c.bf16 %v3835_v27, %v3833_v15  ;;  %v4018_v52 = vunpack.c.h.bf16 %v8201_v24  ;;  %v4016_v12 = vunpack.c.l.bf16 %v8201_v24 }
 0xb7e   : > { %v4019_v50 = vunpack.c.h.bf16 %v8203_v2  ;;  %v4017_v51 = vunpack.c.l.bf16 %v8203_v2 }
 0xb7f   : > { %v3959_v29 = vmul.bf16 1069105081, %v3866_v48  ;;  %v3962_v19 = vmul.bf16 1069105081, %v3867_v7 }
 0xb80   : > { %v4109_v62 = vadd.f32 %v4019_v50, %v4018_v52  ;;  %v4106_v20 = vadd.f32 %v4017_v51, %v4016_v12  ;;  %v9070_v50 = vld [vmem:[#allocation17_spill] sm:$0xff] }
 0xb81   : > { %5860 = vpow.bf16 %v3959_v29  ;;  %v4282_v51 = vrot.slane %v9070_v50, 3  ;;  %v9071_v29 = vld [vmem:[#allocation16_spill] sm:$0xff] }
 0xb82   : > { %5862 = vpow.bf16 %v3962_v19  ;;  %4110 = vadd.xlane.f32.xlu0 %v4109_v62  ;;  %4107 = vadd.xlane.f32.xlu1 %v4106_v20  ;;  %v4281_v19 = vrot.slane %v9071_v29, 3 }
 0xb84   : > { %v8209_v55 = vpop.eup %5856 }
 0xb85   : > { %v8211_v14 = vpop.eup %5858  ;;  %v4022_v42 = vunpack.c.h.bf16 %v8209_v55  ;;  %v4020_v38 = vunpack.c.l.bf16 %v8209_v55 }
 0xb86   : > { %v4023_v63 = vunpack.c.h.bf16 %v8211_v14  ;;  %v4021_v23 = vunpack.c.l.bf16 %v8211_v14 }
 0xb88   : > { %v4115_v3 = vadd.f32 %v4023_v63, %v4022_v42  ;;  %v4112_v36 = vadd.f32 %v4021_v23, %v4020_v38 }
 0xb8a   : > { %4116 = vadd.xlane.f32.xlu0 %v4115_v3  ;;  %4113 = vadd.xlane.f32.xlu1 %v4112_v36 }
 0xb8c   : > { %v8217_v18 = vpop.eup %5860 }
 0xb8d   : > { %v8219_v17 = vpop.eup %5862  ;;  %v4026_v26 = vunpack.c.h.bf16 %v8217_v18  ;;  %v4024_v28 = vunpack.c.l.bf16 %v8217_v18 }
 0xb8e   : > { %v4027_v37 = vunpack.c.h.bf16 %v8219_v17  ;;  %v4025_v46 = vunpack.c.l.bf16 %v8219_v17 }
 0xb90   : > { %v4121_v32 = vadd.f32 %v4027_v37, %v4026_v26  ;;  %v4118_v33 = vadd.f32 %v4025_v46, %v4024_v28 }
 0xb92   : > { %4122 = vadd.xlane.f32.xlu0 %v4121_v32  ;;  %4119 = vadd.xlane.f32.xlu1 %v4118_v33 }
 0xba7   : > { %v4033_v57 = vpop.xlane.xlu0 %4032  ;;  %v4030_v8 = vpop.xlane.xlu1 %4029 }
 0xba8   : > { %5864 = vrcp.f32 %v4033_v57 }
 0xba9   : > { %5866 = vrcp.f32 %v4030_v8 }
 0xbaf   : > { %v4039_v58 = vpop.xlane.xlu0 %4038  ;;  %v4036_v4 = vpop.xlane.xlu1 %4035 }
 0xbb0   : > { %5868 = vrcp.f32 %v4039_v58 }
 0xbb1   : > { %5870 = vrcp.f32 %v4036_v4 }
 0xbb2   : > { %v5865_v10 = vpop.eup %5864 }
 0xbb3   : > { %v5867_v15 = vpop.eup %5866 }
 0xbb4   : > { %v4156_v11 = vpack.c.bf16 %v5865_v10, %v5867_v15 }
 0xbb6   : > { %v4173_v53 = vmul.bf16 %v8047_v44, %v4156_v11  ;;  %v4172_v43 = vmul.bf16 %v8045_v16, %v4156_v11 }
 0xbb7   : > { %v4045_v27 = vpop.xlane.xlu0 %4044  ;;  %v4042_v48 = vpop.xlane.xlu1 %4041 }
 0xbb8   : > { %5872 = vrcp.f32 %v4045_v27  ;;  %4212 = vmatprep.subr.bf16.mxu0 %v4173_v53 }
 0xbb9   : > { %5874 = vrcp.f32 %v4042_v48  ;;  %4213 = vmatpush1.bf16.msra.mxu0 %v4172_v43 }
 0xbba   : > { %v5869_v7 = vpop.eup %5868 }
 0xbbb   : > { %v5871_v52 = vpop.eup %5870 }
 0xbbc   : > { %v4157_v12 = vpack.c.bf16 %v5869_v7, %v5871_v52 }
 0xbbe   : > { %v4175_v62 = vmul.bf16 %v8059_v31, %v4157_v12  ;;  %v4174_v20 = vmul.bf16 %v8057_v41, %v4157_v12 }
 0xbbf   : > { %v4051_v44 = vpop.xlane.xlu0 %4050  ;;  %4301 = vxpose.xlu0.c.b16.start.end [1/1] (short) %v4282_v51, 128  ;;  %4285 = vxpose.xlu1.c.b16.start.end [1/1] (short) %v4281_v19, 128  ;;  %v4048_v16 = vpop.xlane.xlu1 %4047 }
 0xbc0   : > { %5876 = vrcp.f32 %v4051_v44  ;;  %4214 = vmatprep.subr.bf16.mxu0 %v4175_v62 }
 0xbc1   : > { %5878 = vrcp.f32 %v4048_v16  ;;  %4215 = vmatpush1.bf16.msra.mxu0 %v4174_v20 }
 0xbc2   : > { %v5873_v42 = vpop.eup %5872 }
 0xbc3   : > { %v5875_v38 = vpop.eup %5874 }
 0xbc4   : > { %v4158_v63 = vpack.c.bf16 %v5873_v42, %v5875_v38 }
 0xbc6   : > { %v4177_v23 = vmul.bf16 %v8071_v25, %v4158_v63  ;;  %v4176_v3 = vmul.bf16 %v8069_v34, %v4158_v63 }
 0xbc7   : > { %v4057_v36 = vpop.xlane.xlu0 %4056  ;;  %v4054_v26 = vpop.xlane.xlu1 %4053 }
 0xbc8   : > { %5880 = vrcp.f32 %v4057_v36  ;;  %4216 = vmatprep.subr.bf16.mxu0 %v4177_v23 }
 0xbc9   : > { %5882 = vrcp.f32 %v4054_v26  ;;  %4217 = vmatpush1.bf16.msra.mxu0 %v4176_v3 }
 0xbca   : > { %v5877_v41 = vpop.eup %5876 }
 0xbcb   : > { %v5879_v31 = vpop.eup %5878 }
 0xbcc   : > { %v4159_v28 = vpack.c.bf16 %v5877_v41, %v5879_v31 }
 0xbce   : > { %v4179_v37 = vmul.bf16 %v8083_v47, %v4159_v28  ;;  %v4178_v46 = vmul.bf16 %v8081_v30, %v4159_v28 }
 0xbcf   : > { %v4063_v32 = vpop.xlane.xlu0 %4062  ;;  %v4060_v33 = vpop.xlane.xlu1 %4059 }
 0xbd0   : > { %5884 = vrcp.f32 %v4063_v32  ;;  %4218 = vmatprep.subr.bf16.mxu0 %v4179_v37 }
 0xbd1   : > { %5886 = vrcp.f32 %v4060_v33  ;;  %4219 = vmatpush1.bf16.msra.mxu0 %v4178_v46 }
 0xbd2   : > { %v5881_v34 = vpop.eup %5880 }
 0xbd3   : > { %v5883_v25 = vpop.eup %5882 }
 0xbd4   : > { %v4160_v57 = vpack.c.bf16 %v5881_v34, %v5883_v25 }
 0xbd6   : > { %v4181_v8 = vmul.bf16 %v8095_v40, %v4160_v57  ;;  %v4180_v58 = vmul.bf16 %v8093_v9, %v4160_v57 }
 0xbd7   : > { %v4069_v4 = vpop.xlane.xlu0 %4068  ;;  %v4066_v10 = vpop.xlane.xlu1 %4065 }
 0xbd8   : > { %5888 = vrcp.f32 %v4069_v4  ;;  %4220 = vmatprep.subr.bf16.mxu0 %v4181_v8 }
 0xbd9   : > { %5890 = vrcp.f32 %v4066_v10  ;;  %4221 = vmatpush1.bf16.msra.mxu0 %v4180_v58 }
 0xbda   : > { %v5885_v30 = vpop.eup %5884 }
 0xbdb   : > { %v5887_v47 = vpop.eup %5886 }
 0xbdc   : > { %v4161_v15 = vpack.c.bf16 %v5885_v30, %v5887_v47 }
 0xbde   : > { %v4183_v11 = vmul.bf16 %v8107_v13, %v4161_v15  ;;  %v4182_v53 = vmul.bf16 %v8105_v49, %v4161_v15 }
 0xbdf   : > { %v4075_v43 = vpop.xlane.xlu0 %4074  ;;  %v4072_v27 = vpop.xlane.xlu1 %4071 }
 0xbe0   : > { %5892 = vrcp.f32 %v4075_v43  ;;  %4222 = vmatprep.subr.bf16.mxu0 %v4183_v11 }
 0xbe1   : > { %5894 = vrcp.f32 %v4072_v27  ;;  %4223 = vmatpush1.bf16.msra.mxu0 %v4182_v53 }
 0xbe2   : > { %v5889_v9 = vpop.eup %5888 }
 0xbe3   : > { %v5891_v40 = vpop.eup %5890 }
 0xbe4   : > { %v4162_v48 = vpack.c.bf16 %v5889_v9, %v5891_v40 }
 0xbe6   : > { %v4185_v7 = vmul.bf16 %v8119_v5, %v4162_v48  ;;  %v4184_v52 = vmul.bf16 %v8117_v61, %v4162_v48 }
 0xbe7   : > { %v4081_v12 = vpop.xlane.xlu0 %4080  ;;  %v4078_v50 = vpop.xlane.xlu1 %4077 }
 0xbe8   : > { %5896 = vrcp.f32 %v4081_v12  ;;  %4224 = vmatprep.subr.bf16.mxu0 %v4185_v7 }
 0xbe9   : > { %5898 = vrcp.f32 %v4078_v50  ;;  %4225 = vmatpush1.bf16.msra.mxu0 %v4184_v52  ;;  %v9072_v50 = vld [vmem:[#allocation15_spill] sm:$0xff] }
 0xbea   : > { %v5893_v49 = vpop.eup %5892 }
 0xbeb   : > { %v5895_v13 = vpop.eup %5894 }
 0xbec   : > { %v4163_v51 = vpack.c.bf16 %v5893_v49, %v5895_v13  ;;  %v4318_v49 = vrot.slane %v9072_v50, 3  ;;  %v9073_v13 = vld [vmem:[#allocation14_spill] sm:$0xff] }
 0xbee   : > { %v4187_v29 = vmul.bf16 %v8131_v6, %v4163_v51  ;;  %v4186_v19 = vmul.bf16 %v8129_v56, %v4163_v51  ;;  %v4317_v51 = vrot.slane %v9073_v13, 3 }
 0xbef   : > { %v4087_v62 = vpop.xlane.xlu0 %4086  ;;  %v4084_v20 = vpop.xlane.xlu1 %4083 }
 0xbf0   : > { %5900 = vrcp.f32 %v4087_v62  ;;  %4226 = vmatprep.subr.bf16.mxu0 %v4187_v29 }
 0xbf1   : > { %5902 = vrcp.f32 %v4084_v20  ;;  %4227 = vmatpush1.bf16.msra.mxu0 %v4186_v19  ;;  %v9075_v19 = vmov 0  }
 0xbf2   : > { %v5897_v61 = vpop.eup %5896 }
 0xbf3   : > { %v5899_v5 = vpop.eup %5898 }
 0xbf4   : > { %v4164_v44 = vpack.c.bf16 %v5897_v61, %v5899_v5 }
 0xbf6   : > { %v4189_v16 = vmul.bf16 %v8143_v0, %v4164_v44  ;;  %v4188_v42 = vmul.bf16 %v8141_v39, %v4164_v44 }
 0xbf7   : > { %v4093_v38 = vpop.xlane.xlu0 %4092  ;;  %v4090_v63 = vpop.xlane.xlu1 %4089 }
 0xbf8   : > { %5904 = vrcp.f32 %v4093_v38  ;;  %4228 = vmatprep.subr.bf16.mxu0 %v4189_v16 }
 0xbf9   : > { %5906 = vrcp.f32 %v4090_v63  ;;  %4229 = vmatpush1.bf16.msra.mxu0 %v4188_v42 }
 0xbfa   : > { %v5901_v56 = vpop.eup %5900 }
 0xbfb   : > { %v5903_v6 = vpop.eup %5902 }
 0xbfc   : > { %v4165_v23 = vpack.c.bf16 %v5901_v56, %v5903_v6 }
 0xbfe   : > { %v4191_v3 = vmul.bf16 %v8155_v22, %v4165_v23  ;;  %v4190_v36 = vmul.bf16 %v8153_v21, %v4165_v23 }
 0xbff   : > { %v4099_v26 = vpop.xlane.xlu0 %4098  ;;  %v4096_v41 = vpop.xlane.xlu1 %4095 }
 0xc00   : > { %5908 = vrcp.f32 %v4099_v26  ;;  %4230 = vmatprep.subr.bf16.mxu0 %v4191_v3  ;;  %v9076_v26 = vld [vmem:[#allocation18_spill] sm:$0xff] }
 0xc01   : > { %5910 = vrcp.f32 %v4096_v41  ;;  %4231 = vmatpush1.bf16.msra.mxu0 %v4190_v36  ;;  %v4208_v41 = vrot.slane %v9076_v26, 4 }
 0xc02   : > { %v5905_v39 = vpop.eup %5904 }
 0xc03   : > { %v5907_v0 = vpop.eup %5906 }
 0xc04   : > { %v4166_v31 = vpack.c.bf16 %v5905_v39, %v5907_v0  ;;  %v9077_v0 = vld [vmem:[#allocation19_spill] sm:$0xff] }
 0xc06   : > { %v4193_v28 = vmul.bf16 %v8167_v59, %v4166_v31  ;;  %v4192_v37 = vmul.bf16 %v8165_v1, %v4166_v31  ;;  %v4209_v31 = vrot.slane %v9077_v0, 4 }
 0xc07   : > { %v4105_v46 = vpop.xlane.xlu0 %4104  ;;  %v4102_v32 = vpop.xlane.xlu1 %4101 }
 0xc08   : > { %5912 = vrcp.f32 %v4105_v46  ;;  %4232 = vmatprep.subr.bf16.mxu0 %v4193_v28 }
 0xc09   : > { %5914 = vrcp.f32 %v4102_v32  ;;  %4233 = vmatpush1.bf16.msra.mxu0 %v4192_v37 }
 0xc0a   : > { %v5909_v21 = vpop.eup %5908 }
 0xc0b   : > { %v5911_v22 = vpop.eup %5910 }
 0xc0c   : > { %v4167_v33 = vpack.c.bf16 %v5909_v21, %v5911_v22 }
 0xc0e   : > { %v4195_v34 = vmul.bf16 %v8179_v60, %v4167_v33  ;;  %v4194_v25 = vmul.bf16 %v8177_v35, %v4167_v33 }
 0xc0f   : > { %v4111_v57 = vpop.xlane.xlu0 %4110  ;;  %v4108_v8 = vpop.xlane.xlu1 %4107 }
 0xc10   : > { %5916 = vrcp.f32 %v4111_v57  ;;  %4234 = vmatprep.subr.bf16.mxu0 %v4195_v34  ;;  %v9078_v34 = vld [vmem:[#allocation26_spill] sm:$0xff]  ;;  %v9079_v57 = vld [vmem:[#allocation23_spill] sm:$0xff] }
 0xc11   : > { %5918 = vrcp.f32 %v4108_v8  ;;  %4235 = vmatpush1.bf16.msra.mxu0 %v4194_v25 }
 0xc12   : > { %v5913_v1 = vpop.eup %5912 }
 0xc13   : > { %v5915_v59 = vpop.eup %5914 }
 0xc14   : > { %v4168_v58 = vpack.c.bf16 %v5913_v1, %v5915_v59 }
 0xc16   : > { %v4197_v4 = vmul.bf16 %v8191_v45, %v4168_v58  ;;  %v4196_v10 = vmul.bf16 %v8189_v54, %v4168_v58 }
 0xc17   : > { %v4117_v30 = vpop.xlane.xlu0 %4116  ;;  %v4114_v47 = vpop.xlane.xlu1 %4113 }
 0xc18   : > { %5920 = vrcp.f32 %v4117_v30  ;;  %4236 = vmatprep.subr.bf16.mxu0 %v4197_v4 }
 0xc19   : > { %5922 = vrcp.f32 %v4114_v47  ;;  %4237 = vmatpush1.bf16.msra.mxu0 %v4196_v10 }
 0xc1a   : > { %v5917_v35 = vpop.eup %5916 }
 0xc1b   : > { %v5919_v60 = vpop.eup %5918 }
 0xc1c   : > { %v4169_v15 = vpack.c.bf16 %v5917_v35, %v5919_v60 }
 0xc1e   : > { %v4199_v11 = vmul.bf16 %v8203_v2, %v4169_v15  ;;  %v4198_v53 = vmul.bf16 %v8201_v24, %v4169_v15 }
 0xc1f   : > { %v4123_v43 = vpop.xlane.xlu0 %4122  ;;  %v4120_v27 = vpop.xlane.xlu1 %4119 }
 0xc20   : > { %5924 = vrcp.f32 %v4123_v43  ;;  %4238 = vmatprep.subr.bf16.mxu0 %v4199_v11 }
 0xc21   : > { %5926 = vrcp.f32 %v4120_v27  ;;  %4239 = vmatpush1.bf16.msra.mxu0 %v4198_v53 }
 0xc22   : > { %v5921_v54 = vpop.eup %5920 }
 0xc23   : > { %v5923_v45 = vpop.eup %5922 }
 0xc24   : > { %v4170_v9 = vpack.c.bf16 %v5921_v54, %v5923_v45 }
 0xc25   : > { %v4293_v62 = vpop.trf.xlu1  ;;  %v4309_v42 = vpop.trf.xlu0 }
 0xc26   : > { %v4201_v40 = vmul.bf16 %v8211_v14, %v4170_v9  ;;  %v4200_v48 = vmul.bf16 %v8209_v55, %v4170_v9  ;;  %v9074_v14 = vld [vmem:[#allocation20_spill] sm:$0xff]  ;;  %v4368_v55 = vsel %vm1705_vm2, %v4317_v51, 0 }
 0xc27   : > { %v4204_v29 = vrot.slane %v9074_v14, 2 }
 0xc28   : > { %4240 = vmatprep.subr.bf16.mxu0 %v4201_v40 }
 0xc29   : > { %4241 = vmatpush1.bf16.msra.mxu0 %v4200_v48  ;;  %v4310_v38 = vpop.trf.xlu0 }
 0xc2a   : > { %v5925_v7 = vpop.eup %5924 }
 0xc2b   : > { %v5927_v52 = vpop.eup %5926 }
 0xc2c   : > { %v4171_v2 = vpack.c.bf16 %v5925_v7, %v5927_v52 }
 0xc2d   : > { %v4311_v63 = vpop.trf.xlu0 }
 0xc2e   : > { %v4203_v24 = vmul.bf16 %v8219_v17, %v4171_v2  ;;  %v4202_v12 = vmul.bf16 %v8217_v18, %v4171_v2  ;;  %v4294_v18 = vpop.trf.xlu1 }
 0xc30   : > { %4242 = vmatprep.subr.bf16.mxu0 %v4203_v24 }
 0xc31   : > { %4243 = vmatpush1.bf16.msra.mxu0 %v4202_v12  ;;  %v4312_v56 = vpop.trf.xlu0 }
 0xc32   : > { %5346 = vmatprep.subr.msk.bf16.mxu0 %vm1705_vm2, %v4318_v49  ;;  %v4295_v17 = vpop.trf.xlu1 }
 0xc34   : > { %4245 = vmatmul.mubr.bf16.vlgmr.msra.gmra.mrb[112].mxu0 %v4204_v29  ;;  %v9080_v29 = vld [vmem:[#allocation24_spill] sm:$0xff] }
 0xc35   : > { %4374 = vmatpush1.bf16.msra.mxu0 %v4368_v55  ;;  %4405 = vmatprep.mubr.bf16.mxu0 %v9075_v19  ;;  %v4313_v6 = vpop.trf.xlu0 }
 0xc36   : > { %v4296_v20 = vpop.trf.xlu1 }
 0xc39   : > { %v4314_v23 = vpop.trf.xlu0 }
 0xc3a   : > { %v4297_v61 = vpop.trf.xlu1 }
 0xc3c   : > { %5347 = vmatmul.mubr.msk.bf16.vlgmr.msra.gmra.mrb[116].mxu0 %vm1656_vm3, %v4293_v62 }
 0xc3d   : > { %4415 = vmatprep.mubr.bf16.mxu0 %v9075_v19  ;;  %v4315_v3 = vpop.trf.xlu0 }
 0xc3e   : > { %v4298_v5 = vpop.trf.xlu1 }
 0xc41   : > { %v4316_v36 = vpop.trf.xlu0 }
 0xc42   : > { %v4299_v44 = vpop.trf.xlu1 }
 0xc44   : > { %5348 = vmatmul.mubr.msk.bf16.gmra.mrb[120].mxu0 %vm1656_vm3, %v4294_v18 }
 0xc45   : > { %4425 = vmatprep.mubr.bf16.mxu0 %v9075_v19 }
 0xc46   : > { %v4300_v16 = vpop.trf.xlu1 }
 0xc4c   : > { %5349 = vmatmul.mubr.msk.bf16.gmra.mrb[124].mxu0 %vm1656_vm3, %v4295_v17 }
 0xc4d   : > { %4435 = vmatprep.mubr.bf16.mxu0 %v9075_v19 }
 0xc54   : > { %5350 = vmatmul.mubr.msk.bf16.gmra.mrb[128].mxu0 %vm1656_vm3, %v4296_v20 }
 0xc55   : > { %4445 = vmatprep.mubr.bf16.mxu0 %v9075_v19 }
 0xc5c   : > { %5351 = vmatmul.mubr.msk.bf16.gmra.mrb[132].mxu0 %vm1656_vm3, %v4297_v61 }
 0xc5d   : > { %4455 = vmatprep.mubr.bf16.mxu0 %v9075_v19 }
 0xc64   : > { %5352 = vmatmul.mubr.msk.bf16.gmra.mrb[136].mxu0 %vm1656_vm3, %v4298_v5 }
 0xc65   : > { %4465 = vmatprep.mubr.bf16.mxu0 %v9075_v19 }
 0xc6c   : > { %5353 = vmatmul.mubr.msk.bf16.gmra.mrb[140].mxu0 %vm1656_vm3, %v4299_v44 }
 0xc6d   : > { %4475 = vmatprep.mubr.bf16.mxu0 %v9075_v19 }
 0xc74   : > { %5354 = vmatmul.mubr.msk.bf16.gmra.mrb[144].mxu0 %vm1656_vm3, %v4300_v16 }
 0xc75   : > { %4485 = vmatprep.mubr.bf16.mxu0 %v9075_v19 }
 0xc7c   : > { %5355 = vmatmul.mubr.msk.bf16.gmra.mrb[148].mxu0 %vm1656_vm3, %v4309_v42 }
 0xc7d   : > { %4495 = vmatprep.mubr.bf16.mxu0 %v9075_v19 }
 0xc84   : > { %5356 = vmatmul.mubr.msk.bf16.gmra.mrb[152].mxu0 %vm1656_vm3, %v4310_v38 }
 0xc85   : > { %4505 = vmatprep.mubr.bf16.mxu0 %v9075_v19 }
 0xc8c   : > { %5357 = vmatmul.mubr.msk.bf16.gmra.mrb[156].mxu0 %vm1656_vm3, %v4311_v63 }
 0xc8d   : > { %4515 = vmatprep.mubr.bf16.mxu0 %v9075_v19 }
 0xc94   : > { %5358 = vmatmul.mubr.msk.bf16.gmra.mrb[160].mxu0 %vm1656_vm3, %v4312_v56 }
 0xc95   : > { %4525 = vmatprep.mubr.bf16.mxu0 %v9075_v19 }
 0xc9c   : > { %5359 = vmatmul.mubr.msk.bf16.gmra.mrb[164].mxu0 %vm1656_vm3, %v4313_v6 }
 0xc9d   : > { %4535 = vmatprep.mubr.bf16.mxu0 %v9075_v19 }
 0xca4   : > { %5360 = vmatmul.mubr.msk.bf16.gmra.mrb[168].mxu0 %vm1656_vm3, %v4314_v23 }
 0xca5   : > { %4545 = vmatprep.mubr.bf16.mxu0 %v9075_v19 }
 0xcac   : > { %5361 = vmatmul.mubr.msk.bf16.gmra.mrb[172].mxu0 %vm1656_vm3, %v4315_v3 }
 0xcad   : > { %4555 = vmatprep.mubr.bf16.mxu0 %v9075_v19  ;;  %v9082_v19 = vld [vmem:[#allocation27_spill] sm:$0xff] }
 0xcb4   : > { %5362 = vmatmul.mubr.msk.bf16.gmra.mrb[176].mxu0 %vm1656_vm3, %v4316_v36 }
 0xd07   : > { %v4246_v39 = vpop.f32.mrb[112].mxu0 }
 0xd08   : > { %v4247_v28 = vadd.f32 %v4246_v39, %v4208_v41  ;;  %v4248_v37 = vpop.f32.mrb[113].mxu0 }
 0xd09   : > { %v4249_v46 = vadd.f32 %v4248_v37, %v4209_v31  ;;  %v4250_v32 = vpop.f32.mrb[114].mxu0 }
 0xd0a   : > { %v4255_v21 = vrot.slane %v4247_v28, 4  ;;  %v4251_v22 = vpop.f32.mrb[115].mxu0 }
 0xd0b   : > { %v4256_v33 = vrot.slane %v4249_v46, 4 }
 0xd0c   : > { %v4259_v25 = vmul.f32 %v4255_v21, %v9078_v34 }
 0xd0d   : > { %v4260_v8 = vmul.f32 %v4256_v33, %v9079_v57 }
 0xd0e   : > { %v4263_v1 = vrot.slane %v4259_v25, 4 }
 0xd0f   : > { %v4264_v59 = vrot.slane %v4260_v8, 4  ;;  %v8300_v58 = vpop.f32.mrb[116].mxu0 }
 0xd10   : > { %v4267_v4 = vsel %vm2478_vm4, %v4263_v1, 0.0  ;;  %v8303_v10 = vpop.f32.mrb[117].mxu0 }
 0xd11   : > { %v4268_v30 = vrot.slane %v4267_v4, 4  ;;  %v4274_v47 = vsel %vm2478_vm4, %v4264_v59, 0.0  ;;  %v4566_v35 = vmax.f32 %v8300_v58, %v8303_v10  ;;  %v8308_v60 = vpop.f32.mrb[118].mxu0 }
 0xd12   : > { %v4275_v15 = vrot.slane %v4274_v47, 4  ;;  %v8310_v11 = vpop.f32.mrb[119].mxu0 }
 0xd13   : > { %v4269_v53 = vadd.f32 %v4268_v30, %v4267_v4  ;;  %v4569_v43 = vmax.f32 %v8308_v60, %v8310_v11  ;;  %4567 = vmax.xlane.f32.xlu1 %v4566_v35 }
 0xd14   : > { %v4276_v27 = vadd.f32 %v4275_v15, %v4274_v47 }
 0xd15   : > { %v4270_v54 = vrot.slane %v4269_v53, 2  ;;  %4570 = vmax.xlane.f32.xlu0 %v4569_v43 }
 0xd16   : > { %v4277_v45 = vrot.slane %v4276_v27, 2 }
 0xd17   : > { %v4271_v9 = vadd.f32 %v4270_v54, %v4269_v53  ;;  %v8314_v40 = vpop.f32.mrb[120].mxu0 }
 0xd18   : > { %v4278_v48 = vadd.f32 %v4277_v45, %v4276_v27  ;;  %v8316_v7 = vpop.f32.mrb[121].mxu0 }
 0xd19   : > { %v4272_v52 = vrot.slane %v4271_v9, 1  ;;  %v4572_v2 = vmax.f32 %v8314_v40, %v8316_v7  ;;  %v8320_v24 = vpop.f32.mrb[122].mxu0 }
 0xd1a   : > { %v4279_v12 = vrot.slane %v4278_v48, 1  ;;  %v8322_v50 = vpop.f32.mrb[123].mxu0 }
 0xd1b   : > { %v4273_v49 = vadd.f32 %v4272_v52, %v4271_v9  ;;  %v4575_v13 = vmax.f32 %v8320_v24, %v8322_v50  ;;  %4573 = vmax.xlane.f32.xlu1 %v4572_v2 }
 0xd1c   : > { %v4280_v51 = vadd.f32 %v4279_v12, %v4278_v48 }
 0xd1d   : > { %4576 = vmax.xlane.f32.xlu0 %v4575_v13  ;;  %v8328_v55 = vsel %vm2478_vm4, %v9080_v29, %v4273_v49 }
 0xd1e   : > { %9081 = vst [vmem:[#allocation28_spill] sm:$0xff] %v8328_v55  ;;  %v8332_v62 = vsel %vm2478_vm4, %v9082_v19, %v4280_v51 }
 0xd1f   : > { %9083 = vst [vmem:[#allocation10_spill] sm:$0xff] %v8332_v62  ;;  %v8334_v18 = vpop.f32.mrb[124].mxu0 }
 0xd20   : > { %v8336_v17 = vpop.f32.mrb[125].mxu0 }
 0xd21   : > { %v4578_v20 = vmax.f32 %v8334_v18, %v8336_v17  ;;  %v8340_v61 = vpop.f32.mrb[126].mxu0 }
 0xd22   : > { %v8342_v5 = vpop.f32.mrb[127].mxu0 }
 0xd23   : > { %v4581_v44 = vmax.f32 %v8340_v61, %v8342_v5  ;;  %4579 = vmax.xlane.f32.xlu1 %v4578_v20 }
 0xd25   : > { %4582 = vmax.xlane.f32.xlu0 %v4581_v44 }
 0xd27   : > { %v8346_v16 = vpop.f32.mrb[128].mxu0 }
 0xd28   : > { %v8348_v42 = vpop.f32.mrb[129].mxu0 }
 0xd29   : > { %v4584_v38 = vmax.f32 %v8346_v16, %v8348_v42  ;;  %v8352_v63 = vpop.f32.mrb[130].mxu0 }
 0xd2a   : > { %v8354_v56 = vpop.f32.mrb[131].mxu0 }
 0xd2b   : > { %v4587_v6 = vmax.f32 %v8352_v63, %v8354_v56  ;;  %4585 = vmax.xlane.f32.xlu1 %v4584_v38 }
 0xd2d   : > { %4588 = vmax.xlane.f32.xlu0 %v4587_v6 }
 0xd2f   : > { %v8358_v23 = vpop.f32.mrb[132].mxu0 }
 0xd30   : > { %v8360_v3 = vpop.f32.mrb[133].mxu0 }
 0xd31   : > { %v4590_v36 = vmax.f32 %v8358_v23, %v8360_v3  ;;  %v8364_v41 = vpop.f32.mrb[134].mxu0 }
 0xd32   : > { %v8366_v39 = vpop.f32.mrb[135].mxu0 }
 0xd33   : > { %v4593_v31 = vmax.f32 %v8364_v41, %v8366_v39  ;;  %4591 = vmax.xlane.f32.xlu1 %v4590_v36 }
 0xd35   : > { %4594 = vmax.xlane.f32.xlu0 %v4593_v31 }
 0xd37   : > { %v8370_v28 = vpop.f32.mrb[136].mxu0 }
 0xd38   : > { %v8372_v37 = vpop.f32.mrb[137].mxu0 }
 0xd39   : > { %v4596_v46 = vmax.f32 %v8370_v28, %v8372_v37  ;;  %v8376_v32 = vpop.f32.mrb[138].mxu0 }
 0xd3a   : > { %v8378_v21 = vpop.f32.mrb[139].mxu0 }
 0xd3b   : > { %v4599_v22 = vmax.f32 %v8376_v32, %v8378_v21  ;;  %4597 = vmax.xlane.f32.xlu1 %v4596_v46 }
 0xd3d   : > { %4600 = vmax.xlane.f32.xlu0 %v4599_v22 }
 0xd3f   : > { %v8382_v33 = vpop.f32.mrb[140].mxu0 }
 0xd40   : > { %v8384_v25 = vpop.f32.mrb[141].mxu0 }
 0xd41   : > { %v4602_v8 = vmax.f32 %v8382_v33, %v8384_v25  ;;  %v8388_v1 = vpop.f32.mrb[142].mxu0 }
 0xd42   : > { %v8390_v59 = vpop.f32.mrb[143].mxu0 }
 0xd43   : > { %v4605_v4 = vmax.f32 %v8388_v1, %v8390_v59  ;;  %4603 = vmax.xlane.f32.xlu1 %v4602_v8 }
 0xd45   : > { %4606 = vmax.xlane.f32.xlu0 %v4605_v4 }
 0xd47   : > { %v8394_v30 = vpop.f32.mrb[144].mxu0 }
 0xd48   : > { %v8396_v47 = vpop.f32.mrb[145].mxu0 }
 0xd49   : > { %v4608_v35 = vmax.f32 %v8394_v30, %v8396_v47  ;;  %v8400_v15 = vpop.f32.mrb[146].mxu0 }
 0xd4a   : > { %v8402_v53 = vpop.f32.mrb[147].mxu0 }
 0xd4b   : > { %v4611_v43 = vmax.f32 %v8400_v15, %v8402_v53  ;;  %4609 = vmax.xlane.f32.xlu1 %v4608_v35 }
 0xd4d   : > { %4612 = vmax.xlane.f32.xlu0 %v4611_v43 }
 0xd4f   : > { %v8406_v27 = vpop.f32.mrb[148].mxu0 }
 0xd50   : > { %v8408_v54 = vpop.f32.mrb[149].mxu0 }
 0xd51   : > { %v4614_v45 = vmax.f32 %v8406_v27, %v8408_v54  ;;  %v8412_v9 = vpop.f32.mrb[150].mxu0 }
 0xd52   : > { %v8414_v48 = vpop.f32.mrb[151].mxu0 }
 0xd53   : > { %v4617_v52 = vmax.f32 %v8412_v9, %v8414_v48  ;;  %4615 = vmax.xlane.f32.xlu1 %v4614_v45 }
 0xd55   : > { %4618 = vmax.xlane.f32.xlu0 %v4617_v52 }
 0xd57   : > { %v8418_v2 = vpop.f32.mrb[152].mxu0 }
 0xd58   : > { %v8420_v12 = vpop.f32.mrb[153].mxu0 }
 0xd59   : > { %v4620_v49 = vmax.f32 %v8418_v2, %v8420_v12  ;;  %v8424_v13 = vpop.f32.mrb[154].mxu0 }
 0xd5a   : > { %v8426_v51 = vpop.f32.mrb[155].mxu0 }
 0xd5b   : > { %v4623_v29 = vmax.f32 %v8424_v13, %v8426_v51  ;;  %4621 = vmax.xlane.f32.xlu1 %v4620_v49 }
 0xd5d   : > { %4624 = vmax.xlane.f32.xlu0 %v4623_v29 }
 0xd5f   : > { %v8430_v19 = vpop.f32.mrb[156].mxu0 }
 0xd60   : > { %v8432_v20 = vpop.f32.mrb[157].mxu0 }
 0xd61   : > { %v4626_v44 = vmax.f32 %v8430_v19, %v8432_v20  ;;  %v8436_v38 = vpop.f32.mrb[158].mxu0 }
 0xd62   : > { %v8438_v6 = vpop.f32.mrb[159].mxu0 }
 0xd63   : > { %v4629_v36 = vmax.f32 %v8436_v38, %v8438_v6  ;;  %4627 = vmax.xlane.f32.xlu1 %v4626_v44 }
 0xd65   : > { %4630 = vmax.xlane.f32.xlu0 %v4629_v36 }
 0xd67   : > { %v8442_v31 = vpop.f32.mrb[160].mxu0 }
 0xd68   : > { %v8444_v46 = vpop.f32.mrb[161].mxu0 }
 0xd69   : > { %v4632_v22 = vmax.f32 %v8442_v31, %v8444_v46  ;;  %v8448_v8 = vpop.f32.mrb[162].mxu0 }
 0xd6a   : > { %v8450_v4 = vpop.f32.mrb[163].mxu0 }
 0xd6b   : > { %v4635_v35 = vmax.f32 %v8448_v8, %v8450_v4  ;;  %4633 = vmax.xlane.f32.xlu1 %v4632_v22 }
 0xd6d   : > { %4636 = vmax.xlane.f32.xlu0 %v4635_v35 }
 0xd6f   : > { %v8454_v43 = vpop.f32.mrb[164].mxu0 }
 0xd70   : > { %v8456_v45 = vpop.f32.mrb[165].mxu0 }
 0xd71   : > { %9084 = vst [vmem:[#allocation11_spill] sm:$0xff] %v8456_v45  ;;  %v4638_v52 = vmax.f32 %v8454_v43, %v8456_v45  ;;  %v8460_v49 = vpop.f32.mrb[166].mxu0 }
 0xd72   : > { %9085 = vst [vmem:[#allocation7_spill] sm:$0xff] %v8460_v49  ;;  %v8462_v29 = vpop.f32.mrb[167].mxu0 }
 0xd73   : > { %9086 = vst [vmem:[#allocation8_spill] sm:$0xff] %v8462_v29  ;;  %v4641_v44 = vmax.f32 %v8460_v49, %v8462_v29  ;;  %4639 = vmax.xlane.f32.xlu1 %v4638_v52 }
 0xd75   : > { %4642 = vmax.xlane.f32.xlu0 %v4641_v44 }
 0xd77   : > { %v8466_v36 = vpop.f32.mrb[168].mxu0 }
 0xd78   : > { %9087 = vst [vmem:[#allocation9_spill] sm:$0xff] %v8466_v36  ;;  %v8468_v22 = vpop.f32.mrb[169].mxu0 }
 0xd79   : > { %9088 = vst [vmem:[#allocation6_spill] sm:$0xff] %v8468_v22  ;;  %v4644_v35 = vmax.f32 %v8466_v36, %v8468_v22  ;;  %v8472_v62 = vpop.f32.mrb[170].mxu0 }
 0xd7a   : > { %9089 = vst [vmem:[#allocation13_spill] sm:$0xff] %v8472_v62  ;;  %v8474_v55 = vpop.f32.mrb[171].mxu0 }
 0xd7b   : > { %9090 = vst [vmem:[#allocation12_spill] sm:$0xff] %v8474_v55  ;;  %v4647_v57 = vmax.f32 %v8472_v62, %v8474_v55  ;;  %4645 = vmax.xlane.f32.xlu1 %v4644_v35 }
 0xd7d   : > { %4648 = vmax.xlane.f32.xlu0 %v4647_v57 }
 0xd7f   : > { %v8478_v34 = vpop.f32.mrb[172].mxu0 }
 0xd80   : > { %9091 = vst [vmem:[#allocation29_spill] sm:$0xff] %v8478_v34  ;;  %v8480_v52 = vpop.f32.mrb[173].mxu0 }
 0xd81   : > { %9092 = vst [vmem:[#allocation30_spill] sm:$0xff] %v8480_v52  ;;  %v4650_v44 = vmax.f32 %v8478_v34, %v8480_v52  ;;  %v8484_v0 = vpop.f32.mrb[174].mxu0 }
 0xd82   : > { %9093 = vst [vmem:[#allocation22_spill] sm:$0xff] %v8484_v0  ;;  %v8486_v26 = vpop.f32.mrb[175].mxu0 }
 0xd83   : > { %9094 = vst [vmem:[#allocation21_spill] sm:$0xff] %v8486_v26  ;;  %v4653_v14 = vmax.f32 %v8484_v0, %v8486_v26  ;;  %4651 = vmax.xlane.f32.xlu1 %v4650_v44 }
 0xd85   : > { %4654 = vmax.xlane.f32.xlu0 %v4653_v14 }
 0xd87   : > { %v8490_v22 = vpop.f32.mrb[176].mxu0 }
 0xd88   : > { %9095 = vst [vmem:[#allocation25_spill] sm:$0xff] %v8490_v22  ;;  %v8492_v35 = vpop.f32.mrb[177].mxu0 }
 0xd89   : > { %9096 = vst [vmem:[#allocation31_spill] sm:$0xff] %v8492_v35  ;;  %v4656_v57 = vmax.f32 %v8490_v22, %v8492_v35  ;;  %v8496_v55 = vpop.f32.mrb[178].mxu0 }
 0xd8a   : > { %9097 = vst [vmem:[#allocation17_spill] sm:$0xff] %v8496_v55  ;;  %v8498_v62 = vpop.f32.mrb[179].mxu0 }
 0xd8b   : > { %9098 = vst [vmem:[#allocation16_spill] sm:$0xff] %v8498_v62  ;;  %v4659_v52 = vmax.f32 %v8496_v55, %v8498_v62  ;;  %4657 = vmax.xlane.f32.xlu1 %v4656_v57 }
 0xd8d   : > { %4660 = vmax.xlane.f32.xlu0 %v4659_v52 }
 0xda0   : > { %v4568_v34 = vpop.xlane.xlu1 %4567 }
 0xda1   : > { %v4662_v14 = vsub.f32 %v8300_v58, %v4568_v34  ;;  %v4663_v44 = vsub.f32 %v8303_v10, %v4568_v34 }
 0xda2   : > { %v4571_v26 = vpop.xlane.xlu0 %4570 }
 0xda3   : > { %v4664_v0 = vsub.f32 %v8308_v60, %v4571_v26  ;;  %v4665_v36 = vsub.f32 %v8310_v11, %v4571_v26 }
 0xda5   : > { %v4726_v35 = vpack.c.bf16 %v4664_v0, %v4662_v14  ;;  %v4727_v22 = vpack.c.bf16 %v4665_v36, %v4663_v44 }
 0xda7   : > { %v4759_v29 = vmul.bf16 1069105081, %v4726_v35  ;;  %v4762_v49 = vmul.bf16 1069105081, %v4727_v22 }
 0xda8   : > { %v4574_v45 = vpop.xlane.xlu1 %4573 }
 0xda9   : > { %5928 = vpow.bf16 %v4759_v29  ;;  %v4666_v52 = vsub.f32 %v8314_v40, %v4574_v45  ;;  %v4667_v57 = vsub.f32 %v8316_v7, %v4574_v45 }
 0xdaa   : > { %5930 = vpow.bf16 %v4762_v49  ;;  %v4577_v62 = vpop.xlane.xlu0 %4576 }
 0xdab   : > { %v4668_v58 = vsub.f32 %v8320_v24, %v4577_v62  ;;  %v4669_v34 = vsub.f32 %v8322_v50, %v4577_v62 }
 0xdad   : > { %v4728_v10 = vpack.c.bf16 %v4668_v58, %v4666_v52  ;;  %v4729_v60 = vpack.c.bf16 %v4669_v34, %v4667_v57 }
 0xdaf   : > { %v4765_v55 = vmul.bf16 1069105081, %v4728_v10  ;;  %v4768_v26 = vmul.bf16 1069105081, %v4729_v60 }
 0xdb0   : > { %v4580_v0 = vpop.xlane.xlu1 %4579 }
 0xdb1   : > { %5932 = vpow.bf16 %v4765_v55  ;;  %v4670_v29 = vsub.f32 %v8334_v18, %v4580_v0  ;;  %v4671_v49 = vsub.f32 %v8336_v17, %v4580_v0 }
 0xdb2   : > { %5934 = vpow.bf16 %v4768_v26  ;;  %v4583_v11 = vpop.xlane.xlu0 %4582 }
 0xdb3   : > { %v4672_v40 = vsub.f32 %v8340_v61, %v4583_v11  ;;  %v4673_v7 = vsub.f32 %v8342_v5, %v4583_v11 }
 0xdb4   : > { %v8514_v45 = vpop.eup %5928 }
 0xdb5   : > { %v8516_v24 = vpop.eup %5930  ;;  %v4730_v50 = vpack.c.bf16 %v4672_v40, %v4670_v29  ;;  %v4731_v62 = vpack.c.bf16 %v4673_v7, %v4671_v49  ;;  %v4856_v36 = vunpack.c.h.bf16 %v8514_v45  ;;  %v4854_v55 = vunpack.c.l.bf16 %v8514_v45 }
 0xdb6   : > { %v4857_v22 = vunpack.c.h.bf16 %v8516_v24  ;;  %v4855_v18 = vunpack.c.l.bf16 %v8516_v24 }
 0xdb7   : > { %v4771_v35 = vmul.bf16 1069105081, %v4730_v50  ;;  %v4774_v17 = vmul.bf16 1069105081, %v4731_v62 }
 0xdb8   : > { %v4586_v14 = vpop.xlane.xlu1 %4585  ;;  %v4921_v61 = vadd.f32 %v4857_v22, %v4856_v36  ;;  %v4918_v44 = vadd.f32 %v4855_v18, %v4854_v55 }
 0xdb9   : > { %5936 = vpow.bf16 %v4771_v35  ;;  %v4674_v52 = vsub.f32 %v8346_v16, %v4586_v14  ;;  %v4675_v57 = vsub.f32 %v8348_v42, %v4586_v14 }
 0xdba   : > { %5938 = vpow.bf16 %v4774_v17  ;;  %4922 = vadd.xlane.f32.xlu0 %v4921_v61  ;;  %4919 = vadd.xlane.f32.xlu1 %v4918_v44  ;;  %v4589_v5 = vpop.xlane.xlu0 %4588 }
 0xdbb   : > { %v4676_v58 = vsub.f32 %v8352_v63, %v4589_v5  ;;  %v4677_v34 = vsub.f32 %v8354_v56, %v4589_v5 }
 0xdbc   : > { %v8526_v10 = vpop.eup %5932 }
 0xdbd   : > { %v8528_v60 = vpop.eup %5934  ;;  %v4732_v26 = vpack.c.bf16 %v4676_v58, %v4674_v52  ;;  %v4733_v0 = vpack.c.bf16 %v4677_v34, %v4675_v57  ;;  %v4860_v11 = vunpack.c.h.bf16 %v8526_v10  ;;  %v4858_v29 = vunpack.c.l.bf16 %v8526_v10 }
 0xdbe   : > { %v4861_v49 = vunpack.c.h.bf16 %v8528_v60  ;;  %v4859_v16 = vunpack.c.l.bf16 %v8528_v60 }
 0xdbf   : > { %v4777_v40 = vmul.bf16 1069105081, %v4732_v26  ;;  %v4780_v42 = vmul.bf16 1069105081, %v4733_v0 }
 0xdc0   : > { %v4592_v7 = vpop.xlane.xlu1 %4591  ;;  %v4927_v63 = vadd.f32 %v4861_v49, %v4860_v11  ;;  %v4924_v50 = vadd.f32 %v4859_v16, %v4858_v29 }
 0xdc1   : > { %5940 = vpow.bf16 %v4777_v40  ;;  %v4678_v62 = vsub.f32 %v8358_v23, %v4592_v7  ;;  %v4679_v36 = vsub.f32 %v8360_v3, %v4592_v7 }
 0xdc2   : > { %5942 = vpow.bf16 %v4780_v42  ;;  %4928 = vadd.xlane.f32.xlu0 %v4927_v63  ;;  %4925 = vadd.xlane.f32.xlu1 %v4924_v50  ;;  %v4595_v56 = vpop.xlane.xlu0 %4594 }
 0xdc3   : > { %v4680_v55 = vsub.f32 %v8364_v41, %v4595_v56  ;;  %v4681_v22 = vsub.f32 %v8366_v39, %v4595_v56 }
 0xdc4   : > { %v8538_v18 = vpop.eup %5936 }
 0xdc5   : > { %v8540_v35 = vpop.eup %5938  ;;  %v4734_v17 = vpack.c.bf16 %v4680_v55, %v4678_v62  ;;  %v4735_v14 = vpack.c.bf16 %v4681_v22, %v4679_v36  ;;  %v4864_v61 = vunpack.c.h.bf16 %v8538_v18  ;;  %v4862_v44 = vunpack.c.l.bf16 %v8538_v18 }
 0xdc6   : > { %v4865_v5 = vunpack.c.h.bf16 %v8540_v35  ;;  %v4863_v23 = vunpack.c.l.bf16 %v8540_v35 }
 0xdc7   : > { %v4783_v52 = vmul.bf16 1069105081, %v4734_v17  ;;  %v4786_v3 = vmul.bf16 1069105081, %v4735_v14 }
 0xdc8   : > { %v4598_v57 = vpop.xlane.xlu1 %4597  ;;  %v4933_v41 = vadd.f32 %v4865_v5, %v4864_v61  ;;  %v4930_v58 = vadd.f32 %v4863_v23, %v4862_v44 }
 0xdc9   : > { %5944 = vpow.bf16 %v4783_v52  ;;  %v4682_v34 = vsub.f32 %v8370_v28, %v4598_v57  ;;  %v4683_v26 = vsub.f32 %v8372_v37, %v4598_v57 }
 0xdca   : > { %5946 = vpow.bf16 %v4786_v3  ;;  %4934 = vadd.xlane.f32.xlu0 %v4933_v41  ;;  %4931 = vadd.xlane.f32.xlu1 %v4930_v58  ;;  %v4601_v39 = vpop.xlane.xlu0 %4600 }
 0xdcb   : > { %v4684_v0 = vsub.f32 %v8376_v32, %v4601_v39  ;;  %v4685_v11 = vsub.f32 %v8378_v21, %v4601_v39 }
 0xdcc   : > { %v8550_v29 = vpop.eup %5940 }
 0xdcd   : > { %v8552_v49 = vpop.eup %5942  ;;  %v4736_v16 = vpack.c.bf16 %v4684_v0, %v4682_v34  ;;  %v4737_v40 = vpack.c.bf16 %v4685_v11, %v4683_v26  ;;  %v4868_v42 = vunpack.c.h.bf16 %v8550_v29  ;;  %v4866_v7 = vunpack.c.l.bf16 %v8550_v29 }
 0xdce   : > { %v4869_v63 = vunpack.c.h.bf16 %v8552_v49  ;;  %v4867_v28 = vunpack.c.l.bf16 %v8552_v49 }
 0xdcf   : > { %v4789_v50 = vmul.bf16 1069105081, %v4736_v16  ;;  %v4792_v37 = vmul.bf16 1069105081, %v4737_v40 }
 0xdd0   : > { %v4604_v56 = vpop.xlane.xlu1 %4603  ;;  %v4939_v32 = vadd.f32 %v4869_v63, %v4868_v42  ;;  %v4936_v62 = vadd.f32 %v4867_v28, %v4866_v7 }
 0xdd1   : > { %5948 = vpow.bf16 %v4789_v50  ;;  %v4686_v36 = vsub.f32 %v8382_v33, %v4604_v56  ;;  %v4687_v55 = vsub.f32 %v8384_v25, %v4604_v56 }
 0xdd2   : > { %5950 = vpow.bf16 %v4792_v37  ;;  %4940 = vadd.xlane.f32.xlu0 %v4939_v32  ;;  %4937 = vadd.xlane.f32.xlu1 %v4936_v62  ;;  %v4607_v21 = vpop.xlane.xlu0 %4606 }
 0xdd3   : > { %v4688_v22 = vsub.f32 %v8388_v1, %v4607_v21  ;;  %v4689_v17 = vsub.f32 %v8390_v59, %v4607_v21 }
 0xdd4   : > { %v8562_v14 = vpop.eup %5944 }
 0xdd5   : > { %v8564_v61 = vpop.eup %5946  ;;  %v4738_v44 = vpack.c.bf16 %v4688_v22, %v4686_v36  ;;  %v4739_v5 = vpack.c.bf16 %v4689_v17, %v4687_v55  ;;  %v4872_v23 = vunpack.c.h.bf16 %v8562_v14  ;;  %v4870_v52 = vunpack.c.l.bf16 %v8562_v14 }
 0xdd6   : > { %v4873_v3 = vunpack.c.h.bf16 %v8564_v61  ;;  %v4871_v33 = vunpack.c.l.bf16 %v8564_v61 }
 0xdd7   : > { %v4795_v57 = vmul.bf16 1069105081, %v4738_v44  ;;  %v4798_v25 = vmul.bf16 1069105081, %v4739_v5 }
 0xdd8   : > { %v4610_v41 = vpop.xlane.xlu1 %4609  ;;  %v4945_v1 = vadd.f32 %v4873_v3, %v4872_v23  ;;  %v4942_v58 = vadd.f32 %v4871_v33, %v4870_v52 }
 0xdd9   : > { %5952 = vpow.bf16 %v4795_v57  ;;  %v4690_v39 = vsub.f32 %v8394_v30, %v4610_v41  ;;  %v4691_v34 = vsub.f32 %v8396_v47, %v4610_v41 }
 0xdda   : > { %5954 = vpow.bf16 %v4798_v25  ;;  %4946 = vadd.xlane.f32.xlu0 %v4945_v1  ;;  %4943 = vadd.xlane.f32.xlu1 %v4942_v58  ;;  %v4613_v59 = vpop.xlane.xlu0 %4612 }
 0xddb   : > { %v4692_v26 = vsub.f32 %v8400_v15, %v4613_v59  ;;  %v4693_v0 = vsub.f32 %v8402_v53, %v4613_v59 }
 0xddc   : > { %v8574_v11 = vpop.eup %5948 }
 0xddd   : > { %v8576_v16 = vpop.eup %5950  ;;  %v4740_v40 = vpack.c.bf16 %v4692_v26, %v4690_v39  ;;  %v4741_v42 = vpack.c.bf16 %v4693_v0, %v4691_v34  ;;  %v4876_v7 = vunpack.c.h.bf16 %v8574_v11  ;;  %v4874_v63 = vunpack.c.l.bf16 %v8574_v11 }
 0xdde   : > { %v4877_v28 = vunpack.c.h.bf16 %v8576_v16  ;;  %v4875_v30 = vunpack.c.l.bf16 %v8576_v16 }
 0xddf   : > { %v4801_v50 = vmul.bf16 1069105081, %v4740_v40  ;;  %v4804_v47 = vmul.bf16 1069105081, %v4741_v42 }
 0xde0   : > { %v4616_v37 = vpop.xlane.xlu1 %4615  ;;  %v4951_v15 = vadd.f32 %v4877_v28, %v4876_v7  ;;  %v4948_v56 = vadd.f32 %v4875_v30, %v4874_v63 }
 0xde1   : > { %5956 = vpow.bf16 %v4801_v50  ;;  %v4694_v32 = vsub.f32 %v8406_v27, %v4616_v37  ;;  %v4695_v62 = vsub.f32 %v8408_v54, %v4616_v37 }
 0xde2   : > { %5958 = vpow.bf16 %v4804_v47  ;;  %4952 = vadd.xlane.f32.xlu0 %v4951_v15  ;;  %4949 = vadd.xlane.f32.xlu1 %v4948_v56  ;;  %v4619_v53 = vpop.xlane.xlu0 %4618 }
 0xde3   : > { %v4696_v21 = vsub.f32 %v8412_v9, %v4619_v53  ;;  %v4697_v36 = vsub.f32 %v8414_v48, %v4619_v53 }
 0xde4   : > { %v8586_v55 = vpop.eup %5952 }
 0xde5   : > { %v8588_v22 = vpop.eup %5954  ;;  %v4742_v17 = vpack.c.bf16 %v4696_v21, %v4694_v32  ;;  %v4743_v44 = vpack.c.bf16 %v4697_v36, %v4695_v62  ;;  %v4880_v5 = vunpack.c.h.bf16 %v8586_v55  ;;  %v4878_v23 = vunpack.c.l.bf16 %v8586_v55 }
 0xde6   : > { %v4881_v52 = vunpack.c.h.bf16 %v8588_v22  ;;  %v4879_v27 = vunpack.c.l.bf16 %v8588_v22 }
 0xde7   : > { %v4807_v3 = vmul.bf16 1069105081, %v4742_v17  ;;  %v4810_v54 = vmul.bf16 1069105081, %v4743_v44 }
 0xde8   : > { %v4622_v33 = vpop.xlane.xlu1 %4621  ;;  %v4957_v9 = vadd.f32 %v4881_v52, %v4880_v5  ;;  %v4954_v57 = vadd.f32 %v4879_v27, %v4878_v23 }
 0xde9   : > { %5960 = vpow.bf16 %v4807_v3  ;;  %v4698_v25 = vsub.f32 %v8418_v2, %v4622_v33  ;;  %v4699_v41 = vsub.f32 %v8420_v12, %v4622_v33 }
 0xdea   : > { %5962 = vpow.bf16 %v4810_v54  ;;  %4958 = vadd.xlane.f32.xlu0 %v4957_v9  ;;  %4955 = vadd.xlane.f32.xlu1 %v4954_v57  ;;  %v4625_v48 = vpop.xlane.xlu0 %4624 }
 0xdeb   : > { %v4700_v1 = vsub.f32 %v8424_v13, %v4625_v48  ;;  %v4701_v58 = vsub.f32 %v8426_v51, %v4625_v48 }
 0xdec   : > { %v8598_v59 = vpop.eup %5956 }
 0xded   : > { %v8600_v39 = vpop.eup %5958  ;;  %v4744_v34 = vpack.c.bf16 %v4700_v1, %v4698_v25  ;;  %v4745_v26 = vpack.c.bf16 %v4701_v58, %v4699_v41  ;;  %v4884_v0 = vunpack.c.h.bf16 %v8598_v59  ;;  %v4882_v40 = vunpack.c.l.bf16 %v8598_v59 }
 0xdee   : > { %v4885_v42 = vunpack.c.h.bf16 %v8600_v39  ;;  %v4883_v2 = vunpack.c.l.bf16 %v8600_v39 }
 0xdef   : > { %v4813_v7 = vmul.bf16 1069105081, %v4744_v34  ;;  %v4816_v12 = vmul.bf16 1069105081, %v4745_v26 }
 0xdf0   : > { %v4628_v63 = vpop.xlane.xlu1 %4627  ;;  %v4963_v13 = vadd.f32 %v4885_v42, %v4884_v0  ;;  %v4960_v28 = vadd.f32 %v4883_v2, %v4882_v40  ;;  %v9099_v0 = vld [vmem:[#allocation11_spill] sm:$0xff] }
 0xdf1   : > { %5964 = vpow.bf16 %v4813_v7  ;;  %v4702_v30 = vsub.f32 %v8430_v19, %v4628_v63  ;;  %v4703_v50 = vsub.f32 %v8432_v20, %v4628_v63  ;;  %v9100_v42 = vld [vmem:[#allocation7_spill] sm:$0xff]  ;;  %v9101_v7 = vld [vmem:[#allocation8_spill] sm:$0xff] }
 0xdf2   : > { %5966 = vpow.bf16 %v4816_v12  ;;  %4964 = vadd.xlane.f32.xlu0 %v4963_v13  ;;  %4961 = vadd.xlane.f32.xlu1 %v4960_v28  ;;  %v4631_v51 = vpop.xlane.xlu0 %4630 }
 0xdf3   : > { %v4704_v47 = vsub.f32 %v8436_v38, %v4631_v51  ;;  %v4705_v37 = vsub.f32 %v8438_v6, %v4631_v51 }
 0xdf4   : > { %v8610_v15 = vpop.eup %5960 }
 0xdf5   : > { %v8612_v56 = vpop.eup %5962  ;;  %v4746_v53 = vpack.c.bf16 %v4704_v47, %v4702_v30  ;;  %v4747_v32 = vpack.c.bf16 %v4705_v37, %v4703_v50  ;;  %v4888_v62 = vunpack.c.h.bf16 %v8610_v15  ;;  %v4886_v21 = vunpack.c.l.bf16 %v8610_v15 }
 0xdf6   : > { %v4889_v36 = vunpack.c.h.bf16 %v8612_v56  ;;  %v4887_v19 = vunpack.c.l.bf16 %v8612_v56 }
 0xdf7   : > { %v4819_v17 = vmul.bf16 1069105081, %v4746_v53  ;;  %v4822_v20 = vmul.bf16 1069105081, %v4747_v32 }
 0xdf8   : > { %v4634_v44 = vpop.xlane.xlu1 %4633  ;;  %v4969_v38 = vadd.f32 %v4889_v36, %v4888_v62  ;;  %v4966_v5 = vadd.f32 %v4887_v19, %v4886_v21  ;;  %v9102_v19 = vld [vmem:[#allocation9_spill] sm:$0xff] }
 0xdf9   : > { %5968 = vpow.bf16 %v4819_v17  ;;  %v4706_v23 = vsub.f32 %v8442_v31, %v4634_v44  ;;  %v4707_v52 = vsub.f32 %v8444_v46, %v4634_v44 }
 0xdfa   : > { %5970 = vpow.bf16 %v4822_v20  ;;  %4970 = vadd.xlane.f32.xlu0 %v4969_v38  ;;  %4967 = vadd.xlane.f32.xlu1 %v4966_v5  ;;  %v4637_v6 = vpop.xlane.xlu0 %4636  ;;  %v9103_v20 = vld [vmem:[#allocation6_spill] sm:$0xff]  ;;  %v9104_v38 = vld [vmem:[#allocation13_spill] sm:$0xff] }
 0xdfb   : > { %v4708_v27 = vsub.f32 %v8448_v8, %v4637_v6  ;;  %v4709_v3 = vsub.f32 %v8450_v4, %v4637_v6  ;;  %v9105_v6 = vld [vmem:[#allocation12_spill] sm:$0xff] }
 0xdfc   : > { %v8622_v54 = vpop.eup %5964 }
 0xdfd   : > { %v8624_v33 = vpop.eup %5966  ;;  %v4748_v9 = vpack.c.bf16 %v4708_v27, %v4706_v23  ;;  %v4749_v57 = vpack.c.bf16 %v4709_v3, %v4707_v52  ;;  %v4892_v48 = vunpack.c.h.bf16 %v8622_v54  ;;  %v4890_v25 = vunpack.c.l.bf16 %v8622_v54 }
 0xdfe   : > { %v4893_v41 = vunpack.c.h.bf16 %v8624_v33  ;;  %v4891_v31 = vunpack.c.l.bf16 %v8624_v33 }
 0xdff   : > { %v4825_v1 = vmul.bf16 1069105081, %v4748_v9  ;;  %v4828_v46 = vmul.bf16 1069105081, %v4749_v57 }
 0xe00   : > { %v4640_v58 = vpop.xlane.xlu1 %4639  ;;  %v4975_v8 = vadd.f32 %v4893_v41, %v4892_v48  ;;  %v4972_v34 = vadd.f32 %v4891_v31, %v4890_v25 }
 0xe01   : > { %5972 = vpow.bf16 %v4825_v1  ;;  %v4710_v26 = vsub.f32 %v8454_v43, %v4640_v58  ;;  %v4711_v40 = vsub.f32 %v9099_v0, %v4640_v58  ;;  %v9107_v0 = vld [vmem:[#allocation30_spill] sm:$0xff] }
 0xe02   : > { %5974 = vpow.bf16 %v4828_v46  ;;  %4976 = vadd.xlane.f32.xlu0 %v4975_v8  ;;  %4973 = vadd.xlane.f32.xlu1 %v4972_v34  ;;  %v4643_v4 = vpop.xlane.xlu0 %4642 }
 0xe03   : > { %v4712_v2 = vsub.f32 %v9100_v42, %v4643_v4  ;;  %v4713_v12 = vsub.f32 %v9101_v7, %v4643_v4  ;;  %v9106_v4 = vld [vmem:[#allocation29_spill] sm:$0xff]  ;;  %v9108_v42 = vld [vmem:[#allocation22_spill] sm:$0xff] }
 0xe04   : > { %v8634_v63 = vpop.eup %5968  ;;  %v9109_v7 = vld [vmem:[#allocation21_spill] sm:$0xff] }
 0xe05   : > { %v8636_v13 = vpop.eup %5970  ;;  %v4750_v28 = vpack.c.bf16 %v4712_v2, %v4710_v26  ;;  %v4751_v51 = vpack.c.bf16 %v4713_v12, %v4711_v40  ;;  %v4896_v30 = vunpack.c.h.bf16 %v8634_v63  ;;  %v4894_v50 = vunpack.c.l.bf16 %v8634_v63 }
 0xe06   : > { %v4897_v47 = vunpack.c.h.bf16 %v8636_v13  ;;  %v4895_v43 = vunpack.c.l.bf16 %v8636_v13 }
 0xe07   : > { %v4831_v37 = vmul.bf16 1069105081, %v4750_v28  ;;  %v4834_v53 = vmul.bf16 1069105081, %v4751_v51 }
 0xe08   : > { %v4646_v32 = vpop.xlane.xlu1 %4645  ;;  %v4981_v62 = vadd.f32 %v4897_v47, %v4896_v30  ;;  %v4978_v21 = vadd.f32 %v4895_v43, %v4894_v50 }
 0xe09   : > { %5976 = vpow.bf16 %v4831_v37  ;;  %v4714_v17 = vsub.f32 %v9102_v19, %v4646_v32  ;;  %v4715_v44 = vsub.f32 %v9103_v20, %v4646_v32  ;;  %v9110_v20 = vld [vmem:[#allocation25_spill] sm:$0xff] }
 0xe0a   : > { %5978 = vpow.bf16 %v4834_v53  ;;  %4982 = vadd.xlane.f32.xlu0 %v4981_v62  ;;  %4979 = vadd.xlane.f32.xlu1 %v4978_v21  ;;  %v4649_v36 = vpop.xlane.xlu0 %4648 }
 0xe0b   : > { %v4716_v5 = vsub.f32 %v9104_v38, %v4649_v36  ;;  %v4717_v23 = vsub.f32 %v9105_v6, %v4649_v36  ;;  %v9111_v38 = vld [vmem:[#allocation31_spill] sm:$0xff]  ;;  %v9112_v6 = vld [vmem:[#allocation17_spill] sm:$0xff] }
 0xe0c   : > { %v8646_v52 = vpop.eup %5972 }
 0xe0d   : > { %v8648_v27 = vpop.eup %5974  ;;  %v4752_v3 = vpack.c.bf16 %v4716_v5, %v4714_v17  ;;  %v4753_v9 = vpack.c.bf16 %v4717_v23, %v4715_v44  ;;  %v4900_v57 = vunpack.c.h.bf16 %v8646_v52  ;;  %v4898_v48 = vunpack.c.l.bf16 %v8646_v52 }
 0xe0e   : > { %v4901_v25 = vunpack.c.h.bf16 %v8648_v27  ;;  %v4899_v41 = vunpack.c.l.bf16 %v8648_v27 }
 0xe0f   : > { %v4837_v31 = vmul.bf16 1069105081, %v4752_v3  ;;  %v4840_v1 = vmul.bf16 1069105081, %v4753_v9  ;;  %v9113_v3 = vld [vmem:[#allocation16_spill] sm:$0xff] }
 0xe10   : > { %v4652_v46 = vpop.xlane.xlu1 %4651  ;;  %v4987_v58 = vadd.f32 %v4901_v25, %v4900_v57  ;;  %v4984_v8 = vadd.f32 %v4899_v41, %v4898_v48 }
 0xe11   : > { %5980 = vpow.bf16 %v4837_v31  ;;  %v4718_v26 = vsub.f32 %v9106_v4, %v4652_v46  ;;  %v4719_v40 = vsub.f32 %v9107_v0, %v4652_v46 }
 0xe12   : > { %5982 = vpow.bf16 %v4840_v1  ;;  %4988 = vadd.xlane.f32.xlu0 %v4987_v58  ;;  %4985 = vadd.xlane.f32.xlu1 %v4984_v8  ;;  %v4655_v34 = vpop.xlane.xlu0 %4654 }
 0xe13   : > { %v4720_v2 = vsub.f32 %v9108_v42, %v4655_v34  ;;  %v4721_v12 = vsub.f32 %v9109_v7, %v4655_v34 }
 0xe14   : > { %v8658_v28 = vpop.eup %5976 }
 0xe15   : > { %v8660_v51 = vpop.eup %5978  ;;  %v4754_v30 = vpack.c.bf16 %v4720_v2, %v4718_v26  ;;  %v4755_v50 = vpack.c.bf16 %v4721_v12, %v4719_v40  ;;  %v4904_v47 = vunpack.c.h.bf16 %v8658_v28  ;;  %v4902_v43 = vunpack.c.l.bf16 %v8658_v28 }
 0xe16   : > { %v4905_v37 = vunpack.c.h.bf16 %v8660_v51  ;;  %v4903_v53 = vunpack.c.l.bf16 %v8660_v51 }
 0xe17   : > { %v4843_v32 = vmul.bf16 1069105081, %v4754_v30  ;;  %v4846_v62 = vmul.bf16 1069105081, %v4755_v50 }
 0xe18   : > { %v4658_v21 = vpop.xlane.xlu1 %4657  ;;  %v4993_v36 = vadd.f32 %v4905_v37, %v4904_v47  ;;  %v4990_v19 = vadd.f32 %v4903_v53, %v4902_v43 }
 0xe19   : > { %5984 = vpow.bf16 %v4843_v32  ;;  %v4722_v44 = vsub.f32 %v9110_v20, %v4658_v21  ;;  %v4723_v5 = vsub.f32 %v9111_v38, %v4658_v21 }
 0xe1a   : > { %5986 = vpow.bf16 %v4846_v62  ;;  %4994 = vadd.xlane.f32.xlu0 %v4993_v36  ;;  %4991 = vadd.xlane.f32.xlu1 %v4990_v19  ;;  %v4661_v17 = vpop.xlane.xlu0 %4660 }
 0xe1b   : > { %v4724_v23 = vsub.f32 %v9112_v6, %v4661_v17  ;;  %v4725_v9 = vsub.f32 %v9113_v3, %v4661_v17 }
 0xe1c   : > { %v8670_v57 = vpop.eup %5980 }
 0xe1d   : > { %v8672_v48 = vpop.eup %5982  ;;  %v4756_v25 = vpack.c.bf16 %v4724_v23, %v4722_v44  ;;  %v4757_v41 = vpack.c.bf16 %v4725_v9, %v4723_v5  ;;  %v4908_v31 = vunpack.c.h.bf16 %v8670_v57  ;;  %v4906_v1 = vunpack.c.l.bf16 %v8670_v57 }
 0xe1e   : > { %v4909_v46 = vunpack.c.h.bf16 %v8672_v48  ;;  %v4907_v58 = vunpack.c.l.bf16 %v8672_v48 }
 0xe1f   : > { %v4849_v8 = vmul.bf16 1069105081, %v4756_v25  ;;  %v4852_v34 = vmul.bf16 1069105081, %v4757_v41 }
 0xe20   : > { %v4999_v4 = vadd.f32 %v4909_v46, %v4908_v31  ;;  %v4996_v26 = vadd.f32 %v4907_v58, %v4906_v1 }
 0xe21   : > { %5988 = vpow.bf16 %v4849_v8 }
 0xe22   : > { %5990 = vpow.bf16 %v4852_v34  ;;  %5000 = vadd.xlane.f32.xlu0 %v4999_v4  ;;  %4997 = vadd.xlane.f32.xlu1 %v4996_v26 }
 0xe24   : > { %v8678_v0 = vpop.eup %5984 }
 0xe25   : > { %v8680_v40 = vpop.eup %5986  ;;  %v4912_v42 = vunpack.c.h.bf16 %v8678_v0  ;;  %v4910_v2 = vunpack.c.l.bf16 %v8678_v0 }
 0xe26   : > { %v4913_v7 = vunpack.c.h.bf16 %v8680_v40  ;;  %v4911_v12 = vunpack.c.l.bf16 %v8680_v40 }
 0xe28   : > { %v5005_v30 = vadd.f32 %v4913_v7, %v4912_v42  ;;  %v5002_v50 = vadd.f32 %v4911_v12, %v4910_v2 }
 0xe2a   : > { %5006 = vadd.xlane.f32.xlu0 %v5005_v30  ;;  %5003 = vadd.xlane.f32.xlu1 %v5002_v50 }
 0xe2c   : > { %v8686_v47 = vpop.eup %5988 }
 0xe2d   : > { %v8688_v43 = vpop.eup %5990  ;;  %v4916_v37 = vunpack.c.h.bf16 %v8686_v47  ;;  %v4914_v53 = vunpack.c.l.bf16 %v8686_v47 }
 0xe2e   : > { %v4917_v32 = vunpack.c.h.bf16 %v8688_v43  ;;  %v4915_v62 = vunpack.c.l.bf16 %v8688_v43 }
 0xe30   : > { %v5011_v21 = vadd.f32 %v4917_v32, %v4916_v37  ;;  %v5008_v36 = vadd.f32 %v4915_v62, %v4914_v53 }
 0xe32   : > { %5012 = vadd.xlane.f32.xlu0 %v5011_v21  ;;  %5009 = vadd.xlane.f32.xlu1 %v5008_v36 }
 0xe47   : > { %v4923_v19 = vpop.xlane.xlu0 %4922  ;;  %v4920_v17 = vpop.xlane.xlu1 %4919 }
 0xe48   : > { %5992 = vrcp.f32 %v4923_v19 }
 0xe49   : > { %5994 = vrcp.f32 %v4920_v17 }
 0xe4f   : > { %v4929_v20 = vpop.xlane.xlu0 %4928  ;;  %v4926_v44 = vpop.xlane.xlu1 %4925 }
 0xe50   : > { %5996 = vrcp.f32 %v4929_v20 }
 0xe51   : > { %5998 = vrcp.f32 %v4926_v44 }
 0xe52   : > { %v5993_v38 = vpop.eup %5992 }
 0xe53   : > { %v5995_v5 = vpop.eup %5994 }
 0xe54   : > { %v5046_v6 = vpack.c.bf16 %v5993_v38, %v5995_v5 }
 0xe56   : > { %v5063_v23 = vmul.bf16 %v8516_v24, %v5046_v6  ;;  %v5062_v3 = vmul.bf16 %v8514_v45, %v5046_v6 }
 0xe57   : > { %v4935_v9 = vpop.xlane.xlu0 %4934  ;;  %v4932_v25 = vpop.xlane.xlu1 %4931 }
 0xe58   : > { %6000 = vrcp.f32 %v4935_v9  ;;  %5102 = vmatprep.subr.bf16.mxu1 %v5063_v23 }
 0xe59   : > { %6002 = vrcp.f32 %v4932_v25  ;;  %5103 = vmatpush1.bf16.msra.mxu1 %v5062_v3 }
 0xe5a   : > { %v5997_v41 = vpop.eup %5996 }
 0xe5b   : > { %v5999_v31 = vpop.eup %5998 }
 0xe5c   : > { %v5047_v1 = vpack.c.bf16 %v5997_v41, %v5999_v31 }
 0xe5e   : > { %v5065_v46 = vmul.bf16 %v8528_v60, %v5047_v1  ;;  %v5064_v58 = vmul.bf16 %v8526_v10, %v5047_v1 }
 0xe5f   : > { %v4941_v8 = vpop.xlane.xlu0 %4940  ;;  %v4938_v34 = vpop.xlane.xlu1 %4937 }
 0xe60   : > { %6004 = vrcp.f32 %v4941_v8  ;;  %5104 = vmatprep.subr.bf16.mxu1 %v5065_v46 }
 0xe61   : > { %6006 = vrcp.f32 %v4938_v34  ;;  %5105 = vmatpush1.bf16.msra.mxu1 %v5064_v58 }
 0xe62   : > { %v6001_v45 = vpop.eup %6000 }
 0xe63   : > { %v6003_v24 = vpop.eup %6002 }
 0xe64   : > { %v5048_v4 = vpack.c.bf16 %v6001_v45, %v6003_v24 }
 0xe66   : > { %v5067_v26 = vmul.bf16 %v8540_v35, %v5048_v4  ;;  %v5066_v42 = vmul.bf16 %v8538_v18, %v5048_v4 }
 0xe67   : > { %v4947_v2 = vpop.xlane.xlu0 %4946  ;;  %v4944_v7 = vpop.xlane.xlu1 %4943 }
 0xe68   : > { %6008 = vrcp.f32 %v4947_v2  ;;  %5106 = vmatprep.subr.bf16.mxu1 %v5067_v26 }
 0xe69   : > { %6010 = vrcp.f32 %v4944_v7  ;;  %5107 = vmatpush1.bf16.msra.mxu1 %v5066_v42 }
 0xe6a   : > { %v6005_v10 = vpop.eup %6004 }
 0xe6b   : > { %v6007_v60 = vpop.eup %6006 }
 0xe6c   : > { %v5049_v12 = vpack.c.bf16 %v6005_v10, %v6007_v60 }
 0xe6e   : > { %v5069_v30 = vmul.bf16 %v8552_v49, %v5049_v12  ;;  %v5068_v50 = vmul.bf16 %v8550_v29, %v5049_v12 }
 0xe6f   : > { %v4953_v37 = vpop.xlane.xlu0 %4952  ;;  %v4950_v53 = vpop.xlane.xlu1 %4949 }
 0xe70   : > { %6012 = vrcp.f32 %v4953_v37  ;;  %5108 = vmatprep.subr.bf16.mxu1 %v5069_v30 }
 0xe71   : > { %6014 = vrcp.f32 %v4950_v53  ;;  %5109 = vmatpush1.bf16.msra.mxu1 %v5068_v50 }
 0xe72   : > { %v6009_v18 = vpop.eup %6008 }
 0xe73   : > { %v6011_v35 = vpop.eup %6010 }
 0xe74   : > { %v5050_v32 = vpack.c.bf16 %v6009_v18, %v6011_v35 }
 0xe76   : > { %v5071_v62 = vmul.bf16 %v8564_v61, %v5050_v32  ;;  %v5070_v21 = vmul.bf16 %v8562_v14, %v5050_v32 }
 0xe77   : > { %v4959_v36 = vpop.xlane.xlu0 %4958  ;;  %v4956_v19 = vpop.xlane.xlu1 %4955 }
 0xe78   : > { %6016 = vrcp.f32 %v4959_v36  ;;  %5110 = vmatprep.subr.bf16.mxu1 %v5071_v62 }
 0xe79   : > { %6018 = vrcp.f32 %v4956_v19  ;;  %5111 = vmatpush1.bf16.msra.mxu1 %v5070_v21 }
 0xe7a   : > { %v6013_v29 = vpop.eup %6012 }
 0xe7b   : > { %v6015_v49 = vpop.eup %6014 }
 0xe7c   : > { %v5051_v17 = vpack.c.bf16 %v6013_v29, %v6015_v49 }
 0xe7e   : > { %v5073_v20 = vmul.bf16 %v8576_v16, %v5051_v17  ;;  %v5072_v44 = vmul.bf16 %v8574_v11, %v5051_v17 }
 0xe7f   : > { %v4965_v38 = vpop.xlane.xlu0 %4964  ;;  %v4962_v5 = vpop.xlane.xlu1 %4961 }
 0xe80   : > { %6020 = vrcp.f32 %v4965_v38  ;;  %5112 = vmatprep.subr.bf16.mxu1 %v5073_v20 }
 0xe81   : > { %6022 = vrcp.f32 %v4962_v5  ;;  %5113 = vmatpush1.bf16.msra.mxu1 %v5072_v44 }
 0xe82   : > { %v6017_v14 = vpop.eup %6016 }
 0xe83   : > { %v6019_v61 = vpop.eup %6018 }
 0xe84   : > { %v5052_v6 = vpack.c.bf16 %v6017_v14, %v6019_v61 }
 0xe86   : > { %v5075_v23 = vmul.bf16 %v8588_v22, %v5052_v6  ;;  %v5074_v3 = vmul.bf16 %v8586_v55, %v5052_v6 }
 0xe87   : > { %v4971_v9 = vpop.xlane.xlu0 %4970  ;;  %v4968_v25 = vpop.xlane.xlu1 %4967 }
 0xe88   : > { %6024 = vrcp.f32 %v4971_v9  ;;  %5114 = vmatprep.subr.bf16.mxu1 %v5075_v23 }
 0xe89   : > { %6026 = vrcp.f32 %v4968_v25  ;;  %5115 = vmatpush1.bf16.msra.mxu1 %v5074_v3  ;;  %v9114_v25 = vld [vmem:[#allocation20_spill] sm:$0xff] }
 0xe8a   : > { %v6021_v11 = vpop.eup %6020 }
 0xe8b   : > { %v6023_v16 = vpop.eup %6022 }
 0xe8c   : > { %v5053_v41 = vpack.c.bf16 %v6021_v11, %v6023_v16  ;;  %v5094_v11 = vrot.slane %v9114_v25, 3  ;;  %v9115_v16 = vld [vmem:[#allocation18_spill] sm:$0xff] }
 0xe8e   : > { %v5077_v31 = vmul.bf16 %v8600_v39, %v5053_v41  ;;  %v5076_v1 = vmul.bf16 %v8598_v59, %v5053_v41  ;;  %v5098_v41 = vrot.slane %v9115_v16, 6 }
 0xe8f   : > { %v4977_v46 = vpop.xlane.xlu0 %4976  ;;  %v4974_v58 = vpop.xlane.xlu1 %4973 }
 0xe90   : > { %6028 = vrcp.f32 %v4977_v46  ;;  %5116 = vmatprep.subr.bf16.mxu1 %v5077_v31 }
 0xe91   : > { %6030 = vrcp.f32 %v4974_v58  ;;  %5117 = vmatpush1.bf16.msra.mxu1 %v5076_v1 }
 0xe92   : > { %v6025_v55 = vpop.eup %6024 }
 0xe93   : > { %v6027_v22 = vpop.eup %6026 }
 0xe94   : > { %v5054_v8 = vpack.c.bf16 %v6025_v55, %v6027_v22 }
 0xe96   : > { %v5079_v34 = vmul.bf16 %v8612_v56, %v5054_v8  ;;  %v5078_v45 = vmul.bf16 %v8610_v15, %v5054_v8 }
 0xe97   : > { %v4983_v24 = vpop.xlane.xlu0 %4982  ;;  %v4980_v4 = vpop.xlane.xlu1 %4979 }
 0xe98   : > { %6032 = vrcp.f32 %v4983_v24  ;;  %5118 = vmatprep.subr.bf16.mxu1 %v5079_v34  ;;  %v9117_v34 = vld [vmem:[#allocation26_spill] sm:$0xff] }
 0xe99   : > { %6034 = vrcp.f32 %v4980_v4  ;;  %5119 = vmatpush1.bf16.msra.mxu1 %v5078_v45  ;;  %v9118_v45 = vld [vmem:[#allocation23_spill] sm:$0xff] }
 0xe9a   : > { %v6029_v59 = vpop.eup %6028 }
 0xe9b   : > { %v6031_v39 = vpop.eup %6030 }
 0xe9c   : > { %v5055_v26 = vpack.c.bf16 %v6029_v59, %v6031_v39 }
 0xe9e   : > { %v5081_v42 = vmul.bf16 %v8624_v33, %v5055_v26  ;;  %v5080_v2 = vmul.bf16 %v8622_v54, %v5055_v26 }
 0xe9f   : > { %v4989_v7 = vpop.xlane.xlu0 %4988  ;;  %v4986_v10 = vpop.xlane.xlu1 %4985 }
 0xea0   : > { %6036 = vrcp.f32 %v4989_v7  ;;  %5120 = vmatprep.subr.bf16.mxu1 %v5081_v42 }
 0xea1   : > { %6038 = vrcp.f32 %v4986_v10  ;;  %5121 = vmatpush1.bf16.msra.mxu1 %v5080_v2 }
 0xea2   : > { %v6033_v15 = vpop.eup %6032 }
 0xea3   : > { %v6035_v56 = vpop.eup %6034 }
 0xea4   : > { %v5056_v60 = vpack.c.bf16 %v6033_v15, %v6035_v56 }
 0xea6   : > { %v5083_v12 = vmul.bf16 %v8636_v13, %v5056_v60  ;;  %v5082_v30 = vmul.bf16 %v8634_v63, %v5056_v60 }
 0xea7   : > { %v4995_v50 = vpop.xlane.xlu0 %4994  ;;  %v4992_v37 = vpop.xlane.xlu1 %4991 }
 0xea8   : > { %6040 = vrcp.f32 %v4995_v50  ;;  %5122 = vmatprep.subr.bf16.mxu1 %v5083_v12 }
 0xea9   : > { %6042 = vrcp.f32 %v4992_v37  ;;  %5123 = vmatpush1.bf16.msra.mxu1 %v5082_v30 }
 0xeaa   : > { %v6037_v54 = vpop.eup %6036 }
 0xeab   : > { %v6039_v33 = vpop.eup %6038 }
 0xeac   : > { %v5057_v53 = vpack.c.bf16 %v6037_v54, %v6039_v33  ;;  %v9119_v33 = vld [vmem:[#allocation28_spill] sm:$0xff] }
 0xeae   : > { %v5085_v18 = vmul.bf16 %v8648_v27, %v5057_v53  ;;  %v5084_v35 = vmul.bf16 %v8646_v52, %v5057_v53 }
 0xeaf   : > { %v5001_v32 = vpop.xlane.xlu0 %5000  ;;  %v4998_v62 = vpop.xlane.xlu1 %4997 }
 0xeb0   : > { %6044 = vrcp.f32 %v5001_v32  ;;  %5124 = vmatprep.subr.bf16.mxu1 %v5085_v18  ;;  %v9120_v18 = vld [vmem:[#allocation10_spill] sm:$0xff] }
 0xeb1   : > { %6046 = vrcp.f32 %v4998_v62  ;;  %5125 = vmatpush1.bf16.msra.mxu1 %v5084_v35 }
 0xeb2   : > { %v6041_v63 = vpop.eup %6040 }
 0xeb3   : > { %v6043_v13 = vpop.eup %6042 }
 0xeb4   : > { %v5058_v21 = vpack.c.bf16 %v6041_v63, %v6043_v13 }
 0xeb6   : > { %v5087_v36 = vmul.bf16 %v8660_v51, %v5058_v21  ;;  %v5086_v19 = vmul.bf16 %v8658_v28, %v5058_v21 }
 0xeb7   : > { %v5007_v29 = vpop.xlane.xlu0 %5006  ;;  %v5004_v49 = vpop.xlane.xlu1 %5003 }
 0xeb8   : > { %6048 = vrcp.f32 %v5007_v29  ;;  %5126 = vmatprep.subr.bf16.mxu1 %v5087_v36 }
 0xeb9   : > { %6050 = vrcp.f32 %v5004_v49  ;;  %5127 = vmatpush1.bf16.msra.mxu1 %v5086_v19 }
 0xeba   : > { %v6045_v52 = vpop.eup %6044 }
 0xebb   : > { %v6047_v27 = vpop.eup %6046 }
 0xebc   : > { %v5059_v17 = vpack.c.bf16 %v6045_v52, %v6047_v27 }
 0xebe   : > { %v5089_v20 = vmul.bf16 %v8672_v48, %v5059_v17  ;;  %v5088_v44 = vmul.bf16 %v8670_v57, %v5059_v17 }
 0xebf   : > { %v5013_v38 = vpop.xlane.xlu0 %5012  ;;  %v5010_v5 = vpop.xlane.xlu1 %5009 }
 0xec0   : > { %6052 = vrcp.f32 %v5013_v38  ;;  %5128 = vmatprep.subr.bf16.mxu1 %v5089_v20 }
 0xec1   : > { %6054 = vrcp.f32 %v5010_v5  ;;  %5129 = vmatpush1.bf16.msra.mxu1 %v5088_v44 }
 0xec2   : > { %v6049_v28 = vpop.eup %6048 }
 0xec3   : > { %v6051_v51 = vpop.eup %6050 }
 0xec4   : > { %v5060_v14 = vpack.c.bf16 %v6049_v28, %v6051_v51 }
 0xec6   : > { %v5091_v61 = vmul.bf16 %v8680_v40, %v5060_v14  ;;  %v5090_v6 = vmul.bf16 %v8678_v0, %v5060_v14  ;;  %v9116_v40 = vld [vmem:[#allocation19_spill] sm:$0xff] }
 0xec7   : > { %v5099_v1 = vrot.slane %v9116_v40, 6 }
 0xec8   : > { %5130 = vmatprep.subr.bf16.mxu1 %v5091_v61 }
 0xec9   : > { %5131 = vmatpush1.bf16.msra.mxu1 %v5090_v6 }
 0xeca   : > { %v6053_v23 = vpop.eup %6052 }
 0xecb   : > { %v6055_v3 = vpop.eup %6054 }
 0xecc   : > { %v5061_v48 = vpack.c.bf16 %v6053_v23, %v6055_v3 }
 0xece   : > { %v5093_v57 = vmul.bf16 %v8688_v43, %v5061_v48  ;;  %v5092_v9 = vmul.bf16 %v8686_v47, %v5061_v48 }
 0xed0   : > { %5132 = vmatprep.subr.bf16.mxu1 %v5093_v57 }
 0xed1   : > { %5133 = vmatpush1.bf16.msra.mxu1 %v5092_v9 }
 0xed4   : > { %5135 = vmatmul.mubr.bf16.vlgmr.msra.gmra.mrb[180].mxu1 %v5094_v11 }
 0xfa7   : > { %v5136_v31 = vpop.f32.mrb[180].mxu1 }
 0xfa8   : > { %v5137_v0 = vadd.f32 %v5136_v31, %v5098_v41  ;;  %v5138_v46 = vpop.f32.mrb[181].mxu1 }
 0xfa9   : > { %v5139_v58 = vadd.f32 %v5138_v46, %v5099_v1  ;;  %v5140_v55 = vpop.f32.mrb[182].mxu1 }
 0xfaa   : > { %v5145_v22 = vrot.slane %v5137_v0, 2  ;;  %v5141_v8 = vpop.f32.mrb[183].mxu1 }
 0xfab   : > { %v5146_v43 = vrot.slane %v5139_v58, 2 }
 0xfac   : > { %v5149_v47 = vmul.f32 %v5145_v22, %v9117_v34 }
 0xfad   : > { %v5150_v24 = vmul.f32 %v5146_v43, %v9118_v45 }
 0xfae   : > { %v5153_v4 = vrot.slane %v5149_v47, 6 }
 0xfaf   : > { %v5154_v59 = vrot.slane %v5150_v24, 6 }
 0xfb0   : > { %v5157_v39 = vsel %vm2478_vm4, %v5153_v4, 0.0 }
 0xfb1   : > { %v5158_v26 = vrot.slane %v5157_v39, 4  ;;  %v5164_v42 = vsel %vm2478_vm4, %v5154_v59, 0.0 }
 0xfb2   : > { %v5165_v2 = vrot.slane %v5164_v42, 4 }
 0xfb3   : > { %v5159_v7 = vadd.f32 %v5158_v26, %v5157_v39 }
 0xfb4   : > { %v5166_v10 = vadd.f32 %v5165_v2, %v5164_v42 }
 0xfb5   : > { %v5160_v15 = vrot.slane %v5159_v7, 2 }
 0xfb6   : > { %v5167_v56 = vrot.slane %v5166_v10, 2 }
 0xfb7   : > { %v5161_v60 = vadd.f32 %v5160_v15, %v5159_v7 }
 0xfb8   : > { %v5168_v12 = vadd.f32 %v5167_v56, %v5166_v10 }
 0xfb9   : > { %v5162_v30 = vrot.slane %v5161_v60, 1 }
 0xfba   : > { %v5169_v50 = vrot.slane %v5168_v12, 1 }
 0xfbb   : > { %v5163_v37 = vadd.f32 %v5162_v30, %v5161_v60 }
 0xfbc   : > { %v5170_v54 = vadd.f32 %v5169_v50, %v5168_v12 }
 0xfbd   : > { %v5176_v53 = vsel %vm5175_vm5, %v9119_v33, %v5163_v37 }
 0xfbe   : > { %v5177_v35 = vsel %vm5175_vm5, %v9120_v18, %v5170_v54 }
 0xfbf   : > { %v5180_v32 = vcombine.low %v5176_v53, %v5177_v35 }
 0xfc1   : > { %5182 = vst [vmem:[%s433_s15] sm:$0xff] %v5180_v32 }
 0xfc2   : > { %6070 = shalt.err (!%p6067_p3)
}
 0xfc3   : > { %s6071_s17 = scalar_lea.hbm %s8740_s22, 128  ;;  %s6075_s20 = scalar_lea.hbm %s8795_s13, 256 }
 0xfc4   : > { %p6072_p4 = scmp.ne.s32.totalorder %s8740_s22, %s6071_s17  ;;  %p6076_p9 = scmp.lt.u32.totalorder %s8740_s22, %s8795_s13 }
 0xfc5   : > { %p6077_p10 = scmp.lt.u32.totalorder %s6075_s20, %s6071_s17  ;;  %p6079_p12 = scmp.lt.u32.totalorder %s6071_s17, %s8740_s22 }
 0xfc6   : > { %p6073_p7 = pnand %p6072_p4, %p6231_p5 }
 0xfc7   : > { %p6078_p11 = por %p6077_p10, %p6076_p9 }
 0xfc8   : > { %p6074_p8 = pneg %p6073_p7 }
 0xfc9   : > { %p6080_p13 = por %p6079_p12, %p6078_p11 }
 0xfcb   : > { %p6081_p0 = pnand %p6080_p13, %p6074_p8 }
 0xfcd   : > { %6084 = shalt.err (!%p6081_p0)
}
 0xfce   : > { %5372 = dma.vmem_to_hbm [thread:$0]  (%p6231_p5), %s8742_s16, 128, %s8740_s22, %s5184_s23  }
 0xfcf PF: > { %p5378_p1 = scmp.ge.s32.totalorder %s6119_s28, 2  ;;  %s5210_s1 = sand.u32 1, %s6107_s25  }
 0xfd0   : > { %s5211_s29 = scalar_lea.sflag [#allocation3], %s5210_s1 }
 0xfd1   : > { %p5375_p2 = pnand %p5378_p1, %p6235_p6 }
 0xfd3   : > { %6102 = dma.done.wait (!%p5375_p2), %s5211_s29, 128  }
 0xfd4   : > { %6104 = vsyncadd (!%p5375_p2), %s5211_s29, 4294967168  ;;  %s9121_s24 = sld [smem:[#allocation5_spill]]  ;;  %p23_p3 = scmp.ge.s32.totalorder %s6218_s14, 4  }
 0xfd5   : > { %s9122_s25 = smov %s6111_s26  ;;  %s9123_s26 = smov %s6115_s27 }
 0xfd6   : > { %s9125_s28 = smov %s6218_s14  ;;  %25 = sbr.rel (!%p23_p3) target bundleno = 6 (0x6), region = 107 }
 0xfda   : > { %s9124_s27 = smov %s9121_s24 }
 0xfdd   :  { %5216 = vsyncpa [#allocation3], 1 }
 0xfde   :  { %5218 = vsyncpa [#allocation3 + $0x1], 1 }

</bundles_post_ra>
